<compile_context>
chip_gen: v7x
topology: tpu7x:2x2x1
jax: 0.10.0
libtpu: 0.0.40
codegen_flags: <defaults>
</compile_context>

<pallas_src>
import functools

import jax
import jax.numpy as jnp
from jax import lax
from jax.experimental import pallas as pl
from jax.experimental.pallas import tpu as pltpu

_VMEM_LIMIT = 32 * 1024 * 1024  # explicit scoped-VMEM limit (safe on v5e/v6e/v7x)


def _round_up(x, m):
    return (x + m - 1) // m * m


def _apply_act(y, act):
    if act == "relu":
        return jnp.maximum(y, 0.0)
    if act == "tanh":
        return jnp.tanh(y)
    return y


# ----------------------------------------------------------------------------
# Kernel 1: tiled GEMM (+bias +activation)  -- used for the 1x1 convolutions.
# ----------------------------------------------------------------------------
def _gemm_kernel(x_ref, w_ref, b_ref, o_ref, acc_ref, *, act):
    k = pl.program_id(2)

    @pl.when(k == 0)
    def _init():
        acc_ref[...] = jnp.zeros_like(acc_ref)

    acc_ref[...] += jnp.dot(x_ref[...], w_ref[...],
                            preferred_element_type=jnp.float32)

    @pl.when(k == pl.num_programs(2) - 1)
    def _finalize():
        y = acc_ref[...] + b_ref[...]
        o_ref[...] = _apply_act(y, act).astype(o_ref.dtype)


def matmul_bias_act(x2d, w2d_bf16, bias, act=None, *, tm=256, tn=128, tk=512):
    """(M,K) @ (K,C) + bias with fused activation.  Returns (M,C) float32."""
    M, K = x2d.shape
    Kw, C = w2d_bf16.shape
    assert K == Kw
    tm = min(tm, _round_up(M, 128))
    tn = min(tn, _round_up(C, 128))   # lane-dense output tiles (Cout padded to 128)
    tk = min(tk, _round_up(K, 128))   # keep MXU contraction depth >= 128
    Mp, Kp, Cp = _round_up(M, tm), _round_up(K, tk), _round_up(C, tn)

    xb = x2d.astype(jnp.bfloat16)
    if (Mp, Kp) != (M, K):
        xb = jnp.zeros((Mp, Kp), jnp.bfloat16).at[:M, :K].set(xb)
    wb = w2d_bf16
    if (Kp, Cp) != (K, C):
        wb = jnp.zeros((Kp, Cp), jnp.bfloat16).at[:K, :C].set(wb)
    bb = jnp.zeros((1, Cp), jnp.float32).at[0, :C].set(bias.astype(jnp.float32))

    out = pl.pallas_call(
        functools.partial(_gemm_kernel, act=act),
        out_shape=jax.ShapeDtypeStruct((Mp, Cp), jnp.float32),
        grid_spec=pltpu.PrefetchScalarGridSpec(
            num_scalar_prefetch=0,
            grid=(Mp // tm, Cp // tn, Kp // tk),
            in_specs=[
                pl.BlockSpec((tm, tk), lambda i, j, k: (i, k)),
                pl.BlockSpec((tk, tn), lambda i, j, k: (k, j)),
                pl.BlockSpec((1, tn), lambda i, j, k: (0, j)),
            ],
            out_specs=pl.BlockSpec((tm, tn), lambda i, j, k: (i, j)),
            scratch_shapes=[pltpu.VMEM((tm, tn), jnp.float32)],
        ),
        compiler_params=pltpu.CompilerParams(
            dimension_semantics=("parallel", "parallel", "arbitrary"),
            vmem_limit_bytes=_VMEM_LIMIT,
        ),
    )(xb, wb, bb)
    return out[:M, :C]


def conv1x1_nhwc(x, w_packed, bias, act=None):
    N, H, W, Cin = x.shape
    Cout = w_packed.shape[1]
    y = matmul_bias_act(x.reshape(N * H * W, Cin), w_packed, bias, act=act)
    return y.reshape(N, H, W, Cout)


# ----------------------------------------------------------------------------
# Kernel 2: KxK conv (stride 1) -- one output row per grid step.  The KH
# row-shifted BlockSpecs stream the padded NHWC input directly; im2col patches
# are built in VMEM only (no 9x/49x HBM expansion).
# ----------------------------------------------------------------------------
def _row_conv_kernel(*refs, KH, KW, Wo, act):
    row_refs = refs[:KH]
    w_ref, b_ref, o_ref = refs[KH], refs[KH + 1], refs[KH + 2]
    parts = []
    for kh in range(KH):
        row = row_refs[kh][...]                 # (Wpad, Cin) bf16
        for kw in range(KW):
            parts.append(row[kw:kw + Wo, :])    # (Wo, Cin)
    patches = jnp.concatenate(parts, axis=-1)   # (Wo, KH*KW*Cin)  in VMEM
    y = jnp.dot(patches, w_ref[...], preferred_element_type=jnp.float32)
    y = y + b_ref[...]
    o_ref[...] = _apply_act(y, act).astype(o_ref.dtype)


def _shifted_row_map(off):
    def index_map(n, h):
        return (n, h + off, 0, 0)
    return index_map


def conv2d_kxk_nhwc(x, w_packed, bias, kh, kw, pad, act=None):
    """KxK conv, stride 1, zero padding.  x (N,H,W,Cin) f32; w_packed (kh*kw*Cin, Cout) bf16."""
    N, H, W, Cin = x.shape
    K, Cout = w_packed.shape
    assert K == kh * kw * Cin
    xpad = jnp.pad(x, ((0, 0), (pad, pad), (pad, pad), (0, 0))).astype(jnp.bfloat16)
    Hpad, Wpad = H + 2 * pad, W + 2 * pad
    Ho, Wo = Hpad - kh + 1, Wpad - kw + 1
    b2d = bias.reshape(1, Cout).astype(jnp.float32)

    in_specs = [pl.BlockSpec((None, None, Wpad, Cin), _shifted_row_map(i))
                for i in range(kh)]
    in_specs += [
        pl.BlockSpec((K, Cout), lambda n, h: (0, 0)),
        pl.BlockSpec((1, Cout), lambda n, h: (0, 0)),
    ]

    return pl.pallas_call(
        functools.partial(_row_conv_kernel, KH=kh, KW=kw, Wo=Wo, act=act),
        out_shape=jax.ShapeDtypeStruct((N, Ho, Wo, Cout), jnp.float32),
        grid_spec=pltpu.PrefetchScalarGridSpec(
            num_scalar_prefetch=0,
            grid=(N, Ho),
            in_specs=in_specs,
            out_specs=pl.BlockSpec((None, None, Wo, Cout), lambda n, h: (n, h, 0, 0)),
        ),
        compiler_params=pltpu.CompilerParams(
            dimension_semantics=("parallel", "parallel"),
            vmem_limit_bytes=_VMEM_LIMIT,
        ),
    )(*([xpad] * kh), w_packed, b2d)


# ----------------------------------------------------------------------------
# Kernel 3: per-sample LayerNorm (MUNIT-style) with fused ReLU / residual add.
# ----------------------------------------------------------------------------
def _ln_kernel(*refs, eps, relu, nelem, has_res):
    if has_res:
        x_ref, g_ref, b_ref, r_ref, o_ref = refs
    else:
        x_ref, g_ref, b_ref, o_ref = refs
    x = x_ref[...].astype(jnp.float32)            # (H, W, C)
    mean = jnp.sum(x) / nelem
    d = x - mean
    var = jnp.sum(d * d) / (nelem - 1)            # unbiased std, matches torch .std()
    y = d / (jnp.sqrt(var) + eps)
    y = y * g_ref[...] + b_ref[...]
    if has_res:
        y = y + r_ref[...]
    if relu:
        y = jnp.maximum(y, 0.0)
    o_ref[...] = y.astype(o_ref.dtype)


def layernorm_pallas(x, gamma, beta, *, eps=1e-5, relu=False, residual=None):
    N, H, W, C = x.shape
    g = gamma.reshape(1, 1, C).astype(jnp.float32)
    b = beta.reshape(1, 1, C).astype(jnp.float32)
    has_res = residual is not None

    full = pl.BlockSpec((None, H, W, C), lambda n: (n, 0, 0, 0))
    vec = pl.BlockSpec((1, 1, C), lambda n: (0, 0, 0))
    in_specs = [full, vec, vec]
    args = [x, g, b]
    if has_res:
        in_specs.append(full)
        args.append(residual)

    return pl.pallas_call(
        functools.partial(_ln_kernel, eps=eps, relu=relu,
                          nelem=H * W * C, has_res=has_res),
        out_shape=jax.ShapeDtypeStruct((N, H, W, C), jnp.float32),
        grid_spec=pltpu.PrefetchScalarGridSpec(
            num_scalar_prefetch=0,
            grid=(N,),
            in_specs=in_specs,
            out_specs=full,
        ),
        compiler_params=pltpu.CompilerParams(
            dimension_semantics=("parallel",),
            vmem_limit_bytes=_VMEM_LIMIT,
        ),
    )(*args)


# ----------------------------------------------------------------------------
# Plain-JAX glue: bilinear x2 upsample (align_corners=False) and center crop.
# ----------------------------------------------------------------------------
def upsample2x_bilinear(x):
    # TODO(synk): upsample / crop left as plain-JAX glue (pure memory reshuffle).
    def up_axis(v, axis):
        L = v.shape[axis]
        head = lax.slice_in_dim(v, 0, 1, axis=axis)
        tail = lax.slice_in_dim(v, L - 1, L, axis=axis)
        prev = jnp.concatenate([head, lax.slice_in_dim(v, 0, L - 1, axis=axis)], axis=axis)
        nxt = jnp.concatenate([lax.slice_in_dim(v, 1, L, axis=axis), tail], axis=axis)
        even = 0.25 * prev + 0.75 * v
        odd = 0.75 * v + 0.25 * nxt
        y = jnp.stack([even, odd], axis=axis + 1)
        new_shape = list(v.shape)
        new_shape[axis] = 2 * L
        return y.reshape(new_shape)
    return up_axis(up_axis(x, 1), 2)


def center_crop_nchw(x, t_shape):
    _, _, h, w = t_shape
    oh = (x.shape[2] - h) // 2
    ow = (x.shape[3] - w) // 2
    return x[:, :, oh:oh + h, ow:ow + w]


# ----------------------------------------------------------------------------
# Parameters (packed bf16 weights precomputed here, not per forward).
# ----------------------------------------------------------------------------
def _conv_init(key, cin, cout, k):
    kw_key, kb_key = jax.random.split(key)
    w = 0.05 * jax.random.normal(kw_key, (cout, cin, k, k), jnp.float32)
    b = 0.01 * jax.random.normal(kb_key, (cout,), jnp.float32)
    wp = jnp.transpose(w, (2, 3, 1, 0)).reshape(k * k * cin, cout).astype(jnp.bfloat16)
    return {"w": w, "b": b, "wp": wp}


def _ln_init(key, c):
    return {"g": jax.random.uniform(key, (c,), jnp.float32, 0.2, 1.0),
            "b": jnp.zeros((c,), jnp.float32)}


def init_decoder_params(key, dim=256, m_dim=64, num_blocks=3):
    params = {"resblocks": []}
    for _ in range(num_blocks):
        key, k1, k2, k3, k4, k5, k6 = jax.random.split(key, 7)
        params["resblocks"].append({
            "c1": _conv_init(k1, dim, m_dim, 1), "ln1": _ln_init(k2, m_dim),
            "c2": _conv_init(k3, m_dim, m_dim, 3), "ln2": _ln_init(k4, m_dim),
            "c3": _conv_init(k5, m_dim, dim, 1), "ln3": _ln_init(k6, dim),
        })
    key, k1, k2, k3, k4, k5 = jax.random.split(key, 6)
    params["cu1"] = _conv_init(k1, dim, 128, 3)
    params["lnu1"] = _ln_init(k2, 128)
    params["cu2"] = _conv_init(k3, 128, 64, 3)
    params["lnu2"] = _ln_init(k4, 64)
    params["cout"] = _conv_init(k5, 64, 3, 7)
    return params


# ----------------------------------------------------------------------------
# Decoder forward (Pallas path).
# ----------------------------------------------------------------------------
def decoder_forward(h_nchw, t_shape, params):
    x = jnp.transpose(h_nchw, (0, 2, 3, 1)).astype(jnp.float32)   # NCHW -> NHWC
    # TODO(synk): ResBlocks/LayerNorm internals are not given in the spec; assumed a
    # ResNet-style bottleneck (1x1->3x3->1x1, m_dim=64) with MUNIT-style LayerNorm.
    for blk in params["resblocks"]:
        r = x
        y = conv1x1_nhwc(x, blk["c1"]["wp"], blk["c1"]["b"])
        y = layernorm_pallas(y, blk["ln1"]["g"], blk["ln1"]["b"], relu=True)
        y = conv2d_kxk_nhwc(y, blk["c2"]["wp"], blk["c2"]["b"], 3, 3, 1)
        y = layernorm_pallas(y, blk["ln2"]["g"], blk["ln2"]["b"], relu=True)
        y = conv1x1_nhwc(y, blk["c3"]["wp"], blk["c3"]["b"])
        x = layernorm_pallas(y, blk["ln3"]["g"], blk["ln3"]["b"], residual=r)
    x = upsample2x_bilinear(x)
    x = conv2d_kxk_nhwc(x, params["cu1"]["wp"], params["cu1"]["b"], 3, 3, 1)
    x = layernorm_pallas(x, params["lnu1"]["g"], params["lnu1"]["b"], relu=True)
    x = upsample2x_bilinear(x)
    x = conv2d_kxk_nhwc(x, params["cu2"]["wp"], params["cu2"]["b"], 3, 3, 1)
    x = layernorm_pallas(x, params["lnu2"]["g"], params["lnu2"]["b"], relu=True)
    x = conv2d_kxk_nhwc(x, params["cout"]["wp"], params["cout"]["b"], 7, 7, 3, act="tanh")
    x = jnp.transpose(x, (0, 3, 1, 2))                             # NHWC -> NCHW
    return center_crop_nchw(x, t_shape)


# ----------------------------------------------------------------------------
# Pure-JAX reference (XLA convs, same bf16-input / f32-accumulate contract).
# ----------------------------------------------------------------------------
def _conv_ref(x, w_oihw, b, pad, act=None):
    w = jnp.transpose(w_oihw, (2, 3, 1, 0)).astype(jnp.bfloat16)   # OIHW -> HWIO
    y = lax.conv_general_dilated(
        x.astype(jnp.bfloat16), w, window_strides=(1, 1),
        padding=((pad, pad), (pad, pad)),
        dimension_numbers=("NHWC", "HWIO", "NHWC"),
        preferred_element_type=jnp.float32)
    return _apply_act(y + b.reshape(1, 1, 1, -1), act)


def _ln_ref(x, g, b, eps=1e-5, relu=False, residual=None):
    n = x.shape[0]
    xf = x.reshape(n, -1)
    mean = jnp.mean(xf, axis=1).reshape(n, 1, 1, 1)
    var = jnp.sum((xf - jnp.mean(xf, axis=1, keepdims=True)) ** 2, axis=1) / (xf.shape[1] - 1)
    std = jnp.sqrt(var).reshape(n, 1, 1, 1)
    y = (x - mean) / (std + eps)
    y = y * g.reshape(1, 1, 1, -1) + b.reshape(1, 1, 1, -1)
    if residual is not None:
        y = y + residual
    if relu:
        y = jnp.maximum(y, 0.0)
    return y


def decoder_forward_ref(h_nchw, t_shape, params):
    x = jnp.transpose(h_nchw, (0, 2, 3, 1)).astype(jnp.float32)
    for blk in params["resblocks"]:
        r = x
        y = _conv_ref(x, blk["c1"]["w"], blk["c1"]["b"], 0)
        y = _ln_ref(y, blk["ln1"]["g"], blk["ln1"]["b"], relu=True)
        y = _conv_ref(y, blk["c2"]["w"], blk["c2"]["b"], 1)
        y = _ln_ref(y, blk["ln2"]["g"], blk["ln2"]["b"], relu=True)
        y = _conv_ref(y, blk["c3"]["w"], blk["c3"]["b"], 0)
        x = _ln_ref(y, blk["ln3"]["g"], blk["ln3"]["b"], residual=r)
    x = upsample2x_bilinear(x)
    x = _conv_ref(x, params["cu1"]["w"], params["cu1"]["b"], 1)
    x = _ln_ref(x, params["lnu1"]["g"], params["lnu1"]["b"], relu=True)
    x = upsample2x_bilinear(x)
    x = _conv_ref(x, params["cu2"]["w"], params["cu2"]["b"], 1)
    x = _ln_ref(x, params["lnu2"]["g"], params["lnu2"]["b"], relu=True)
    x = _conv_ref(x, params["cout"]["w"], params["cout"]["b"], 3, act="tanh")
    x = jnp.transpose(x, (0, 3, 1, 2))
    return center_crop_nchw(x, t_shape)


if __name__ == "__main__":
    # h: (N, 256, 8, 8) latent -> decoder output (N, 3, 32, 32), center-cropped to t_shape.
    batch, channels, spatial = 2, 256, 8
    key = jax.random.PRNGKey(0)
    key, kx = jax.random.split(key)
    h = jax.random.normal(kx, (batch, channels, spatial, spatial), jnp.float32)
    params = init_decoder_params(key, dim=channels, m_dim=64, num_blocks=3)
    t_shape = (batch, 3, 4 * spatial - 2, 4 * spatial - 2)   # (2, 3, 30, 30) -> exercises crop

    fwd = jax.jit(lambda inp: decoder_forward(inp, t_shape, params))
    ref_fwd = jax.jit(lambda inp: decoder_forward_ref(inp, t_shape, params))

    out = jax.block_until_ready(fwd(h))
    ref = jax.block_until_ready(ref_fwd(h))

    assert out.shape == (batch, 3, t_shape[2], t_shape[3]), out.shape
    max_err = float(jnp.max(jnp.abs(out - ref)))
    assert max_err < 2e-2, f"max abs err {max_err}"
    print("KERNEL_OK")
</pallas_src>

<mosaic_0001>
module attributes {stable_mosaic.version = 11 : i64} {
  func.func @_gemm_kernel(%arg0: i32, %arg1: i32, %arg2: i32, %arg3: memref<128x128xbf16, #tpu.memory_space<vmem>>, %arg4: memref<128x128xbf16, #tpu.memory_space<vmem>>, %arg5: memref<1x128xf32, #tpu.memory_space<vmem>>, %arg6: memref<128x128xf32, #tpu.memory_space<vmem>>, %arg7: memref<128x128xf32, #tpu.memory_space<vmem>>) attributes {dimension_semantics = [#tpu.dimension_semantics<parallel>, #tpu.dimension_semantics<parallel>, #tpu.dimension_semantics<arbitrary>], iteration_bounds = array<i64: 1, 2, 1>, scalar_prefetch = 0 : i64, scratch_operands = 1 : i64, tpu.core_type = #tpu.core_type<tc>, window_params = [{transform_indices = @transform_0, window_bounds = array<i64: 128, 128>}, {transform_indices = @transform_1, window_bounds = array<i64: 128, 128>}, {transform_indices = @transform_2, window_bounds = array<i64: 1, 128>}, {transform_indices = @transform_3, window_bounds = array<i64: 128, 128>}]} {
    %c0_i32 = arith.constant 0 : i32
    %0 = arith.cmpi eq, %arg2, %c0_i32 : i32
    %1 = arith.extui %0 : i1 to i32
    %c0_i32_0 = arith.constant 0 : i32
    %2 = arith.cmpi ne, %1, %c0_i32_0 : i32
    scf.if %2 {
      %cst_10 = arith.constant 0.000000e+00 : f32
      %12 = vector.broadcast %cst_10 : f32 to vector<128x128xf32>
      %c0_11 = arith.constant 0 : index
      %c0_12 = arith.constant 0 : index
      %13 = vector.load %arg7[%c0_11, %c0_12] : memref<128x128xf32, #tpu.memory_space<vmem>>, vector<128x128xf32>
      tpu.vector_store %arg7[%c0_11, %c0_12], %12 {strides = array<i32>} : memref<128x128xf32, #tpu.memory_space<vmem>>, vector<128x128xf32>,
    } else {
    }
    %c0 = arith.constant 0 : index
    %c0_1 = arith.constant 0 : index
    %3 = vector.load %arg7[%c0, %c0_1] : memref<128x128xf32, #tpu.memory_space<vmem>>, vector<128x128xf32>
    %c0_2 = arith.constant 0 : index
    %c0_3 = arith.constant 0 : index
    %4 = vector.load %arg3[%c0_2, %c0_3] : memref<128x128xbf16, #tpu.memory_space<vmem>>, vector<128x128xbf16>
    %c0_4 = arith.constant 0 : index
    %c0_5 = arith.constant 0 : index
    %5 = vector.load %arg4[%c0_4, %c0_5] : memref<128x128xbf16, #tpu.memory_space<vmem>>, vector<128x128xbf16>
    %cst = arith.constant dense<0.000000e+00> : vector<128x128xf32>
    %6 = tpu.matmul %4, %5, %cst {dimension_numbers = #tpu.dot_dimension_numbers<[1], [0], [0], [1], [0, 0, 1, 1], [], []>} : vector<128x128xbf16>, vector<128x128xbf16>, vector<128x128xf32> -> vector<128x128xf32>
    %7 = arith.addf %3, %6 : vector<128x128xf32>
    %c0_6 = arith.constant 0 : index
    %c0_7 = arith.constant 0 : index
    %8 = vector.load %arg7[%c0_6, %c0_7] : memref<128x128xf32, #tpu.memory_space<vmem>>, vector<128x128xf32>
    tpu.vector_store %arg7[%c0_6, %c0_7], %7 {strides = array<i32>} : memref<128x128xf32, #tpu.memory_space<vmem>>, vector<128x128xf32>,
    %c0_i32_8 = arith.constant 0 : i32
    %9 = arith.cmpi eq, %arg2, %c0_i32_8 : i32
    %10 = arith.extui %9 : i1 to i32
    %c0_i32_9 = arith.constant 0 : i32
    %11 = arith.cmpi ne, %10, %c0_i32_9 : i32
    scf.if %11 {
      %c0_10 = arith.constant 0 : index
      %c0_11 = arith.constant 0 : index
      %12 = vector.load %arg7[%c0_10, %c0_11] : memref<128x128xf32, #tpu.memory_space<vmem>>, vector<128x128xf32>
      %c0_12 = arith.constant 0 : index
      %c0_13 = arith.constant 0 : index
      %13 = vector.load %arg5[%c0_12, %c0_13] : memref<1x128xf32, #tpu.memory_space<vmem>>, vector<1x128xf32>
      %14 = vector.broadcast %13 : vector<1x128xf32> to vector<128x128xf32>
      %15 = arith.addf %12, %14 : vector<128x128xf32>
      %c0_14 = arith.constant 0 : index
      %c0_15 = arith.constant 0 : index
      %16 = vector.load %arg6[%c0_14, %c0_15] : memref<128x128xf32, #tpu.memory_space<vmem>>, vector<128x128xf32>
      tpu.vector_store %arg6[%c0_14, %c0_15], %15 {strides = array<i32>} : memref<128x128xf32, #tpu.memory_space<vmem>>, vector<128x128xf32>,
    } else {
    }
    return
  }
  func.func @transform_0(%arg0: i32, %arg1: i32, %arg2: i32) -> (i32, i32) {
    %c0_i32 = arith.constant 0 : i32
    return %arg0, %arg2 : i32, i32
  }
  func.func @transform_1(%arg0: i32, %arg1: i32, %arg2: i32) -> (i32, i32) {
    %c0_i32 = arith.constant 0 : i32
    return %arg2, %arg1 : i32, i32
  }
  func.func @transform_2(%arg0: i32, %arg1: i32, %arg2: i32) -> (i32, i32) {
    %c0_i32 = arith.constant 0 : i32
    %c0_i32_0 = arith.constant 0 : i32
    return %c0_i32, %arg1 : i32, i32
  }
  func.func @transform_3(%arg0: i32, %arg1: i32, %arg2: i32) -> (i32, i32) {
    %c0_i32 = arith.constant 0 : i32
    return %arg0, %arg1 : i32, i32
  }
}

module attributes {stable_mosaic.version = 11 : i64} {
  func.func @_ln_kernel(%arg0: i32, %arg1: memref<1x8x8x64xf32, #tpu.memory_space<vmem>>, %arg2: memref<1x1x64xf32, #tpu.memory_space<vmem>>, %arg3: memref<1x1x64xf32, #tpu.memory_space<vmem>>, %arg4: memref<1x8x8x64xf32, #tpu.memory_space<vmem>>) attributes {dimension_semantics = [#tpu.dimension_semantics<parallel>], iteration_bounds = array<i64: 2>, scalar_prefetch = 0 : i64, scratch_operands = 0 : i64, tpu.core_type = #tpu.core_type<tc>, window_params = [{transform_indices = @transform_0, window_bounds = array<i64: 1, 8, 8, 64>}, {pipeline_mode = #tpu.pipeline_mode<synchronous>, transform_indices = @transform_1, window_bounds = array<i64: 1, 1, 64>}, {pipeline_mode = #tpu.pipeline_mode<synchronous>, transform_indices = @transform_2, window_bounds = array<i64: 1, 1, 64>}, {transform_indices = @transform_3, window_bounds = array<i64: 1, 8, 8, 64>}]} {
    %c0 = arith.constant 0 : index
    %c0_0 = arith.constant 0 : index
    %c0_1 = arith.constant 0 : index
    %c0_2 = arith.constant 0 : index
    %0 = vector.load %arg1[%c0, %c0_0, %c0_1, %c0_2] : memref<1x8x8x64xf32, #tpu.memory_space<vmem>>, vector<1x8x8x64xf32>
    %1 = vector.shape_cast %0 : vector<1x8x8x64xf32> to vector<8x8x64xf32>
    %2 = vector.shape_cast %1 : vector<8x8x64xf32> to vector<1x8x8x64xf32>
    %cst = arith.constant dense<0.000000e+00> : vector<1xf32>
    %3 = vector.multi_reduction <add>, %2, %cst [1, 2, 3] : vector<1x8x8x64xf32> to vector<1xf32>
    %4 = vector.shape_cast %3 : vector<1xf32> to vector<1x1x1x1xf32>
    %5 = vector.extract %4[0, 0, 0, 0] : f32 from vector<1x1x1x1xf32>
    %cst_3 = arith.constant 4.096000e+03 : f32
    %6 = arith.divf %5, %cst_3 : f32
    %7 = vector.broadcast %6 : f32 to vector<8x8x64xf32>
    %8 = arith.subf %1, %7 : vector<8x8x64xf32>
    %9 = arith.mulf %8, %8 : vector<8x8x64xf32>
    %10 = vector.shape_cast %9 : vector<8x8x64xf32> to vector<1x8x8x64xf32>
    %cst_4 = arith.constant dense<0.000000e+00> : vector<1xf32>
    %11 = vector.multi_reduction <add>, %10, %cst_4 [1, 2, 3] : vector<1x8x8x64xf32> to vector<1xf32>
    %12 = vector.shape_cast %11 : vector<1xf32> to vector<1x1x1x1xf32>
    %13 = vector.extract %12[0, 0, 0, 0] : f32 from vector<1x1x1x1xf32>
    %cst_5 = arith.constant 4.095000e+03 : f32
    %14 = arith.divf %13, %cst_5 : f32
    %15 = math.sqrt %14 : f32
    %cst_6 = arith.constant 9.99999974E-6 : f32
    %16 = arith.addf %15, %cst_6 : f32
    %17 = vector.broadcast %16 : f32 to vector<8x8x64xf32>
    %18 = arith.divf %8, %17 : vector<8x8x64xf32>
    %c0_7 = arith.constant 0 : index
    %c0_8 = arith.constant 0 : index
    %c0_9 = arith.constant 0 : index
    %19 = vector.load %arg2[%c0_7, %c0_8, %c0_9] : memref<1x1x64xf32, #tpu.memory_space<vmem>>, vector<1x1x64xf32>
    %20 = vector.broadcast %19 : vector<1x1x64xf32> to vector<8x8x64xf32>
    %21 = arith.mulf %18, %20 : vector<8x8x64xf32>
    %c0_10 = arith.constant 0 : index
    %c0_11 = arith.constant 0 : index
    %c0_12 = arith.constant 0 : index
    %22 = vector.load %arg3[%c0_10, %c0_11, %c0_12] : memref<1x1x64xf32, #tpu.memory_space<vmem>>, vector<1x1x64xf32>
    %23 = vector.broadcast %22 : vector<1x1x64xf32> to vector<8x8x64xf32>
    %24 = arith.addf %21, %23 : vector<8x8x64xf32>
    %cst_13 = arith.constant 0.000000e+00 : f32
    %25 = vector.broadcast %cst_13 : f32 to vector<8x8x64xf32>
    %26 = arith.maximumf %24, %25 : vector<8x8x64xf32>
    %c0_14 = arith.constant 0 : index
    %c0_15 = arith.constant 0 : index
    %c0_16 = arith.constant 0 : index
    %c0_17 = arith.constant 0 : index
    %27 = vector.load %arg4[%c0_14, %c0_15, %c0_16, %c0_17] : memref<1x8x8x64xf32, #tpu.memory_space<vmem>>, vector<1x8x8x64xf32>
    %28 = vector.shape_cast %27 : vector<1x8x8x64xf32> to vector<8x8x64xf32>
    %29 = vector.shape_cast %26 : vector<8x8x64xf32> to vector<1x8x8x64xf32>
    tpu.vector_store %arg4[%c0_14, %c0_15, %c0_16, %c0_17], %29 {strides = array<i32>} : memref<1x8x8x64xf32, #tpu.memory_space<vmem>>, vector<1x8x8x64xf32>,
    return
  }
  func.func @transform_0(%arg0: i32) -> (i32, i32, i32, i32) {
    %c0_i32 = arith.constant 0 : i32
    %c0_i32_0 = arith.constant 0 : i32
    %c0_i32_1 = arith.constant 0 : i32
    %c0_i32_2 = arith.constant 0 : i32
    return %arg0, %c0_i32, %c0_i32_0, %c0_i32_1 : i32, i32, i32, i32
  }
  func.func @transform_1(%arg0: i32) -> (i32, i32, i32) {
    %c0_i32 = arith.constant 0 : i32
    %c0_i32_0 = arith.constant 0 : i32
    %c0_i32_1 = arith.constant 0 : i32
    %c0_i32_2 = arith.constant 0 : i32
    return %c0_i32, %c0_i32_0, %c0_i32_1 : i32, i32, i32
  }
  func.func @transform_2(%arg0: i32) -> (i32, i32, i32) {
    %c0_i32 = arith.constant 0 : i32
    %c0_i32_0 = arith.constant 0 : i32
    %c0_i32_1 = arith.constant 0 : i32
    %c0_i32_2 = arith.constant 0 : i32
    return %c0_i32, %c0_i32_0, %c0_i32_1 : i32, i32, i32
  }
  func.func @transform_3(%arg0: i32) -> (i32, i32, i32, i32) {
    %c0_i32 = arith.constant 0 : i32
    %c0_i32_0 = arith.constant 0 : i32
    %c0_i32_1 = arith.constant 0 : i32
    %c0_i32_2 = arith.constant 0 : i32
    return %arg0, %c0_i32, %c0_i32_0, %c0_i32_1 : i32, i32, i32, i32
  }
}

module attributes {stable_mosaic.version = 11 : i64} {
  func.func @_row_conv_kernel(%arg0: i32, %arg1: i32, %arg2: memref<1x1x10x64xbf16, #tpu.memory_space<vmem>>, %arg3: memref<1x1x10x64xbf16, #tpu.memory_space<vmem>>, %arg4: memref<1x1x10x64xbf16, #tpu.memory_space<vmem>>, %arg5: memref<576x64xbf16, #tpu.memory_space<vmem>>, %arg6: memref<1x64xf32, #tpu.memory_space<vmem>>, %arg7: memref<1x1x8x64xf32, #tpu.memory_space<vmem>>) attributes {dimension_semantics = [#tpu.dimension_semantics<parallel>, #tpu.dimension_semantics<parallel>], iteration_bounds = array<i64: 2, 8>, scalar_prefetch = 0 : i64, scratch_operands = 0 : i64, tpu.core_type = #tpu.core_type<tc>, window_params = [{transform_indices = @transform_0, window_bounds = array<i64: 1, 1, 10, 64>}, {transform_indices = @transform_1, window_bounds = array<i64: 1, 1, 10, 64>}, {transform_indices = @transform_2, window_bounds = array<i64: 1, 1, 10, 64>}, {pipeline_mode = #tpu.pipeline_mode<synchronous>, transform_indices = @transform_3, window_bounds = array<i64: 576, 64>}, {pipeline_mode = #tpu.pipeline_mode<synchronous>, transform_indices = @transform_4, window_bounds = array<i64: 1, 64>}, {transform_indices = @transform_5, window_bounds = array<i64: 1, 1, 8, 64>}]} {
    %c0 = arith.constant 0 : index
    %c0_0 = arith.constant 0 : index
    %c0_1 = arith.constant 0 : index
    %c0_2 = arith.constant 0 : index
    %0 = vector.load %arg2[%c0, %c0_0, %c0_1, %c0_2] : memref<1x1x10x64xbf16, #tpu.memory_space<vmem>>, vector<1x1x10x64xbf16>
    %1 = vector.shape_cast %0 : vector<1x1x10x64xbf16> to vector<10x64xbf16>
    %2 = vector.extract_strided_slice %1 {offsets = [0, 0], sizes = [8, 64], strides = [1, 1]} : vector<10x64xbf16> to vector<8x64xbf16>
    %3 = vector.extract_strided_slice %1 {offsets = [1, 0], sizes = [8, 64], strides = [1, 1]} : vector<10x64xbf16> to vector<8x64xbf16>
    %4 = vector.extract_strided_slice %1 {offsets = [2, 0], sizes = [8, 64], strides = [1, 1]} : vector<10x64xbf16> to vector<8x64xbf16>
    %c0_3 = arith.constant 0 : index
    %c0_4 = arith.constant 0 : index
    %c0_5 = arith.constant 0 : index
    %c0_6 = arith.constant 0 : index
    %5 = vector.load %arg3[%c0_3, %c0_4, %c0_5, %c0_6] : memref<1x1x10x64xbf16, #tpu.memory_space<vmem>>, vector<1x1x10x64xbf16>
    %6 = vector.shape_cast %5 : vector<1x1x10x64xbf16> to vector<10x64xbf16>
    %7 = vector.extract_strided_slice %6 {offsets = [0, 0], sizes = [8, 64], strides = [1, 1]} : vector<10x64xbf16> to vector<8x64xbf16>
    %8 = vector.extract_strided_slice %6 {offsets = [1, 0], sizes = [8, 64], strides = [1, 1]} : vector<10x64xbf16> to vector<8x64xbf16>
    %9 = vector.extract_strided_slice %6 {offsets = [2, 0], sizes = [8, 64], strides = [1, 1]} : vector<10x64xbf16> to vector<8x64xbf16>
    %c0_7 = arith.constant 0 : index
    %c0_8 = arith.constant 0 : index
    %c0_9 = arith.constant 0 : index
    %c0_10 = arith.constant 0 : index
    %10 = vector.load %arg4[%c0_7, %c0_8, %c0_9, %c0_10] : memref<1x1x10x64xbf16, #tpu.memory_space<vmem>>, vector<1x1x10x64xbf16>
    %11 = vector.shape_cast %10 : vector<1x1x10x64xbf16> to vector<10x64xbf16>
    %12 = vector.extract_strided_slice %11 {offsets = [0, 0], sizes = [8, 64], strides = [1, 1]} : vector<10x64xbf16> to vector<8x64xbf16>
    %13 = vector.extract_strided_slice %11 {offsets = [1, 0], sizes = [8, 64], strides = [1, 1]} : vector<10x64xbf16> to vector<8x64xbf16>
    %14 = vector.extract_strided_slice %11 {offsets = [2, 0], sizes = [8, 64], strides = [1, 1]} : vector<10x64xbf16> to vector<8x64xbf16>
    %15 = tpu.concatenate %2, %3, %4, %7, %8, %9, %12, %13, %14 in 1 : vector<8x64xbf16>, vector<8x64xbf16>, vector<8x64xbf16>, vector<8x64xbf16>, vector<8x64xbf16>, vector<8x64xbf16>, vector<8x64xbf16>, vector<8x64xbf16>, vector<8x64xbf16> -> vector<8x576xbf16>
    %c0_11 = arith.constant 0 : index
    %c0_12 = arith.constant 0 : index
    %16 = vector.load %arg5[%c0_11, %c0_12] : memref<576x64xbf16, #tpu.memory_space<vmem>>, vector<576x64xbf16>
    %cst = arith.constant dense<0.000000e+00> : vector<8x64xf32>
    %17 = tpu.matmul %15, %16, %cst {dimension_numbers = #tpu.dot_dimension_numbers<[1], [0], [0], [1], [0, 0, 1, 1], [], []>} : vector<8x576xbf16>, vector<576x64xbf16>, vector<8x64xf32> -> vector<8x64xf32>
    %c0_13 = arith.constant 0 : index
    %c0_14 = arith.constant 0 : index
    %18 = vector.load %arg6[%c0_13, %c0_14] : memref<1x64xf32, #tpu.memory_space<vmem>>, vector<1x64xf32>
    %19 = vector.broadcast %18 : vector<1x64xf32> to vector<8x64xf32>
    %20 = arith.addf %17, %19 : vector<8x64xf32>
    %c0_15 = arith.constant 0 : index
    %c0_16 = arith.constant 0 : index
    %c0_17 = arith.constant 0 : index
    %c0_18 = arith.constant 0 : index
    %21 = vector.load %arg7[%c0_15, %c0_16, %c0_17, %c0_18] : memref<1x1x8x64xf32, #tpu.memory_space<vmem>>, vector<1x1x8x64xf32>
    %22 = vector.shape_cast %21 : vector<1x1x8x64xf32> to vector<8x64xf32>
    %23 = vector.shape_cast %20 : vector<8x64xf32> to vector<1x1x8x64xf32>
    tpu.vector_store %arg7[%c0_15, %c0_16, %c0_17, %c0_18], %23 {strides = array<i32>} : memref<1x1x8x64xf32, #tpu.memory_space<vmem>>, vector<1x1x8x64xf32>,
    return
  }
  func.func @transform_0(%arg0: i32, %arg1: i32) -> (i32, i32, i32, i32) {
    %c0_i32 = arith.constant 0 : i32
    %0 = arith.addi %arg1, %c0_i32 : i32
    %c0_i32_0 = arith.constant 0 : i32
    %c0_i32_1 = arith.constant 0 : i32
    %c0_i32_2 = arith.constant 0 : i32
    return %arg0, %0, %c0_i32_0, %c0_i32_1 : i32, i32, i32, i32
  }
  func.func @transform_1(%arg0: i32, %arg1: i32) -> (i32, i32, i32, i32) {
    %c1_i32 = arith.constant 1 : i32
    %0 = arith.addi %arg1, %c1_i32 : i32
    %c0_i32 = arith.constant 0 : i32
    %c0_i32_0 = arith.constant 0 : i32
    %c0_i32_1 = arith.constant 0 : i32
    return %arg0, %0, %c0_i32, %c0_i32_0 : i32, i32, i32, i32
  }
  func.func @transform_2(%arg0: i32, %arg1: i32) -> (i32, i32, i32, i32) {
    %c2_i32 = arith.constant 2 : i32
    %0 = arith.addi %arg1, %c2_i32 : i32
    %c0_i32 = arith.constant 0 : i32
    %c0_i32_0 = arith.constant 0 : i32
    %c0_i32_1 = arith.constant 0 : i32
    return %arg0, %0, %c0_i32, %c0_i32_0 : i32, i32, i32, i32
  }
  func.func @transform_3(%arg0: i32, %arg1: i32) -> (i32, i32) {
    %c0_i32 = arith.constant 0 : i32
    %c0_i32_0 = arith.constant 0 : i32
    %c0_i32_1 = arith.constant 0 : i32
    return %c0_i32, %c0_i32_0 : i32, i32
  }
  func.func @transform_4(%arg0: i32, %arg1: i32) -> (i32, i32) {
    %c0_i32 = arith.constant 0 : i32
    %c0_i32_0 = arith.constant 0 : i32
    %c0_i32_1 = arith.constant 0 : i32
    return %c0_i32, %c0_i32_0 : i32, i32
  }
  func.func @transform_5(%arg0: i32, %arg1: i32) -> (i32, i32, i32, i32) {
    %c0_i32 = arith.constant 0 : i32
    %c0_i32_0 = arith.constant 0 : i32
    %c0_i32_1 = arith.constant 0 : i32
    return %arg0, %arg1, %c0_i32, %c0_i32_0 : i32, i32, i32, i32
  }
}

module attributes {stable_mosaic.version = 11 : i64} {
  func.func @_gemm_kernel(%arg0: i32, %arg1: i32, %arg2: i32, %arg3: memref<128x256xbf16, #tpu.memory_space<vmem>>, %arg4: memref<256x128xbf16, #tpu.memory_space<vmem>>, %arg5: memref<1x128xf32, #tpu.memory_space<vmem>>, %arg6: memref<128x128xf32, #tpu.memory_space<vmem>>, %arg7: memref<128x128xf32, #tpu.memory_space<vmem>>) attributes {dimension_semantics = [#tpu.dimension_semantics<parallel>, #tpu.dimension_semantics<parallel>, #tpu.dimension_semantics<arbitrary>], iteration_bounds = array<i64: 1, 1, 1>, scalar_prefetch = 0 : i64, scratch_operands = 1 : i64, tpu.core_type = #tpu.core_type<tc>, window_params = [{transform_indices = @transform_0, window_bounds = array<i64: 128, 256>}, {transform_indices = @transform_1, window_bounds = array<i64: 256, 128>}, {transform_indices = @transform_2, window_bounds = array<i64: 1, 128>}, {transform_indices = @transform_3, window_bounds = array<i64: 128, 128>}]} {
    %c0_i32 = arith.constant 0 : i32
    %0 = arith.cmpi eq, %arg2, %c0_i32 : i32
    %1 = arith.extui %0 : i1 to i32
    %c0_i32_0 = arith.constant 0 : i32
    %2 = arith.cmpi ne, %1, %c0_i32_0 : i32
    scf.if %2 {
      %cst_10 = arith.constant 0.000000e+00 : f32
      %12 = vector.broadcast %cst_10 : f32 to vector<128x128xf32>
      %c0_11 = arith.constant 0 : index
      %c0_12 = arith.constant 0 : index
      %13 = vector.load %arg7[%c0_11, %c0_12] : memref<128x128xf32, #tpu.memory_space<vmem>>, vector<128x128xf32>
      tpu.vector_store %arg7[%c0_11, %c0_12], %12 {strides = array<i32>} : memref<128x128xf32, #tpu.memory_space<vmem>>, vector<128x128xf32>,
    } else {
    }
    %c0 = arith.constant 0 : index
    %c0_1 = arith.constant 0 : index
    %3 = vector.load %arg7[%c0, %c0_1] : memref<128x128xf32, #tpu.memory_space<vmem>>, vector<128x128xf32>
    %c0_2 = arith.constant 0 : index
    %c0_3 = arith.constant 0 : index
    %4 = vector.load %arg3[%c0_2, %c0_3] : memref<128x256xbf16, #tpu.memory_space<vmem>>, vector<128x256xbf16>
    %c0_4 = arith.constant 0 : index
    %c0_5 = arith.constant 0 : index
    %5 = vector.load %arg4[%c0_4, %c0_5] : memref<256x128xbf16, #tpu.memory_space<vmem>>, vector<256x128xbf16>
    %cst = arith.constant dense<0.000000e+00> : vector<128x128xf32>
    %6 = tpu.matmul %4, %5, %cst {dimension_numbers = #tpu.dot_dimension_numbers<[1], [0], [0], [1], [0, 0, 1, 1], [], []>} : vector<128x256xbf16>, vector<256x128xbf16>, vector<128x128xf32> -> vector<128x128xf32>
    %7 = arith.addf %3, %6 : vector<128x128xf32>
    %c0_6 = arith.constant 0 : index
    %c0_7 = arith.constant 0 : index
    %8 = vector.load %arg7[%c0_6, %c0_7] : memref<128x128xf32, #tpu.memory_space<vmem>>, vector<128x128xf32>
    tpu.vector_store %arg7[%c0_6, %c0_7], %7 {strides = array<i32>} : memref<128x128xf32, #tpu.memory_space<vmem>>, vector<128x128xf32>,
    %c0_i32_8 = arith.constant 0 : i32
    %9 = arith.cmpi eq, %arg2, %c0_i32_8 : i32
    %10 = arith.extui %9 : i1 to i32
    %c0_i32_9 = arith.constant 0 : i32
    %11 = arith.cmpi ne, %10, %c0_i32_9 : i32
    scf.if %11 {
      %c0_10 = arith.constant 0 : index
      %c0_11 = arith.constant 0 : index
      %12 = vector.load %arg7[%c0_10, %c0_11] : memref<128x128xf32, #tpu.memory_space<vmem>>, vector<128x128xf32>
      %c0_12 = arith.constant 0 : index
      %c0_13 = arith.constant 0 : index
      %13 = vector.load %arg5[%c0_12, %c0_13] : memref<1x128xf32, #tpu.memory_space<vmem>>, vector<1x128xf32>
      %14 = vector.broadcast %13 : vector<1x128xf32> to vector<128x128xf32>
      %15 = arith.addf %12, %14 : vector<128x128xf32>
      %c0_14 = arith.constant 0 : index
      %c0_15 = arith.constant 0 : index
      %16 = vector.load %arg6[%c0_14, %c0_15] : memref<128x128xf32, #tpu.memory_space<vmem>>, vector<128x128xf32>
      tpu.vector_store %arg6[%c0_14, %c0_15], %15 {strides = array<i32>} : memref<128x128xf32, #tpu.memory_space<vmem>>, vector<128x128xf32>,
    } else {
    }
    return
  }
  func.func @transform_0(%arg0: i32, %arg1: i32, %arg2: i32) -> (i32, i32) {
    %c0_i32 = arith.constant 0 : i32
    return %arg0, %arg2 : i32, i32
  }
  func.func @transform_1(%arg0: i32, %arg1: i32, %arg2: i32) -> (i32, i32) {
    %c0_i32 = arith.constant 0 : i32
    return %arg2, %arg1 : i32, i32
  }
  func.func @transform_2(%arg0: i32, %arg1: i32, %arg2: i32) -> (i32, i32) {
    %c0_i32 = arith.constant 0 : i32
    %c0_i32_0 = arith.constant 0 : i32
    return %c0_i32, %arg1 : i32, i32
  }
  func.func @transform_3(%arg0: i32, %arg1: i32, %arg2: i32) -> (i32, i32) {
    %c0_i32 = arith.constant 0 : i32
    return %arg0, %arg1 : i32, i32
  }
}

module attributes {stable_mosaic.version = 11 : i64} {
  func.func @_ln_kernel(%arg0: i32, %arg1: memref<1x8x8x256xf32, #tpu.memory_space<vmem>>, %arg2: memref<1x1x256xf32, #tpu.memory_space<vmem>>, %arg3: memref<1x1x256xf32, #tpu.memory_space<vmem>>, %arg4: memref<1x8x8x256xf32, #tpu.memory_space<vmem>>, %arg5: memref<1x8x8x256xf32, #tpu.memory_space<vmem>>) attributes {dimension_semantics = [#tpu.dimension_semantics<parallel>], iteration_bounds = array<i64: 2>, scalar_prefetch = 0 : i64, scratch_operands = 0 : i64, tpu.core_type = #tpu.core_type<tc>, window_params = [{transform_indices = @transform_0, window_bounds = array<i64: 1, 8, 8, 256>}, {pipeline_mode = #tpu.pipeline_mode<synchronous>, transform_indices = @transform_1, window_bounds = array<i64: 1, 1, 256>}, {pipeline_mode = #tpu.pipeline_mode<synchronous>, transform_indices = @transform_2, window_bounds = array<i64: 1, 1, 256>}, {transform_indices = @transform_3, window_bounds = array<i64: 1, 8, 8, 256>}, {transform_indices = @transform_4, window_bounds = array<i64: 1, 8, 8, 256>}]} {
    %c0 = arith.constant 0 : index
    %c0_0 = arith.constant 0 : index
    %c0_1 = arith.constant 0 : index
    %c0_2 = arith.constant 0 : index
    %0 = vector.load %arg1[%c0, %c0_0, %c0_1, %c0_2] : memref<1x8x8x256xf32, #tpu.memory_space<vmem>>, vector<1x8x8x256xf32>
    %1 = vector.shape_cast %0 : vector<1x8x8x256xf32> to vector<8x8x256xf32>
    %2 = vector.shape_cast %1 : vector<8x8x256xf32> to vector<1x8x8x256xf32>
    %cst = arith.constant dense<0.000000e+00> : vector<1xf32>
    %3 = vector.multi_reduction <add>, %2, %cst [1, 2, 3] : vector<1x8x8x256xf32> to vector<1xf32>
    %4 = vector.shape_cast %3 : vector<1xf32> to vector<1x1x1x1xf32>
    %5 = vector.extract %4[0, 0, 0, 0] : f32 from vector<1x1x1x1xf32>
    %cst_3 = arith.constant 1.638400e+04 : f32
    %6 = arith.divf %5, %cst_3 : f32
    %7 = vector.broadcast %6 : f32 to vector<8x8x256xf32>
    %8 = arith.subf %1, %7 : vector<8x8x256xf32>
    %9 = arith.mulf %8, %8 : vector<8x8x256xf32>
    %10 = vector.shape_cast %9 : vector<8x8x256xf32> to vector<1x8x8x256xf32>
    %cst_4 = arith.constant dense<0.000000e+00> : vector<1xf32>
    %11 = vector.multi_reduction <add>, %10, %cst_4 [1, 2, 3] : vector<1x8x8x256xf32> to vector<1xf32>
    %12 = vector.shape_cast %11 : vector<1xf32> to vector<1x1x1x1xf32>
    %13 = vector.extract %12[0, 0, 0, 0] : f32 from vector<1x1x1x1xf32>
    %cst_5 = arith.constant 1.638300e+04 : f32
    %14 = arith.divf %13, %cst_5 : f32
    %15 = math.sqrt %14 : f32
    %cst_6 = arith.constant 9.99999974E-6 : f32
    %16 = arith.addf %15, %cst_6 : f32
    %17 = vector.broadcast %16 : f32 to vector<8x8x256xf32>
    %18 = arith.divf %8, %17 : vector<8x8x256xf32>
    %c0_7 = arith.constant 0 : index
    %c0_8 = arith.constant 0 : index
    %c0_9 = arith.constant 0 : index
    %19 = vector.load %arg2[%c0_7, %c0_8, %c0_9] : memref<1x1x256xf32, #tpu.memory_space<vmem>>, vector<1x1x256xf32>
    %20 = vector.broadcast %19 : vector<1x1x256xf32> to vector<8x8x256xf32>
    %21 = arith.mulf %18, %20 : vector<8x8x256xf32>
    %c0_10 = arith.constant 0 : index
    %c0_11 = arith.constant 0 : index
    %c0_12 = arith.constant 0 : index
    %22 = vector.load %arg3[%c0_10, %c0_11, %c0_12] : memref<1x1x256xf32, #tpu.memory_space<vmem>>, vector<1x1x256xf32>
    %23 = vector.broadcast %22 : vector<1x1x256xf32> to vector<8x8x256xf32>
    %24 = arith.addf %21, %23 : vector<8x8x256xf32>
    %c0_13 = arith.constant 0 : index
    %c0_14 = arith.constant 0 : index
    %c0_15 = arith.constant 0 : index
    %c0_16 = arith.constant 0 : index
    %25 = vector.load %arg4[%c0_13, %c0_14, %c0_15, %c0_16] : memref<1x8x8x256xf32, #tpu.memory_space<vmem>>, vector<1x8x8x256xf32>
    %26 = vector.shape_cast %25 : vector<1x8x8x256xf32> to vector<8x8x256xf32>
    %27 = arith.addf %24, %26 : vector<8x8x256xf32>
    %c0_17 = arith.constant 0 : index
    %c0_18 = arith.constant 0 : index
    %c0_19 = arith.constant 0 : index
    %c0_20 = arith.constant 0 : index
    %28 = vector.load %arg5[%c0_17, %c0_18, %c0_19, %c0_20] : memref<1x8x8x256xf32, #tpu.memory_space<vmem>>, vector<1x8x8x256xf32>
    %29 = vector.shape_cast %28 : vector<1x8x8x256xf32> to vector<8x8x256xf32>
    %30 = vector.shape_cast %27 : vector<8x8x256xf32> to vector<1x8x8x256xf32>
    tpu.vector_store %arg5[%c0_17, %c0_18, %c0_19, %c0_20], %30 {strides = array<i32>} : memref<1x8x8x256xf32, #tpu.memory_space<vmem>>, vector<1x8x8x256xf32>,
    return
  }
  func.func @transform_0(%arg0: i32) -> (i32, i32, i32, i32) {
    %c0_i32 = arith.constant 0 : i32
    %c0_i32_0 = arith.constant 0 : i32
    %c0_i32_1 = arith.constant 0 : i32
    %c0_i32_2 = arith.constant 0 : i32
    return %arg0, %c0_i32, %c0_i32_0, %c0_i32_1 : i32, i32, i32, i32
  }
  func.func @transform_1(%arg0: i32) -> (i32, i32, i32) {
    %c0_i32 = arith.constant 0 : i32
    %c0_i32_0 = arith.constant 0 : i32
    %c0_i32_1 = arith.constant 0 : i32
    %c0_i32_2 = arith.constant 0 : i32
    return %c0_i32, %c0_i32_0, %c0_i32_1 : i32, i32, i32
  }
  func.func @transform_2(%arg0: i32) -> (i32, i32, i32) {
    %c0_i32 = arith.constant 0 : i32
    %c0_i32_0 = arith.constant 0 : i32
    %c0_i32_1 = arith.constant 0 : i32
    %c0_i32_2 = arith.constant 0 : i32
    return %c0_i32, %c0_i32_0, %c0_i32_1 : i32, i32, i32
  }
  func.func @transform_3(%arg0: i32) -> (i32, i32, i32, i32) {
    %c0_i32 = arith.constant 0 : i32
    %c0_i32_0 = arith.constant 0 : i32
    %c0_i32_1 = arith.constant 0 : i32
    %c0_i32_2 = arith.constant 0 : i32
    return %arg0, %c0_i32, %c0_i32_0, %c0_i32_1 : i32, i32, i32, i32
  }
  func.func @transform_4(%arg0: i32) -> (i32, i32, i32, i32) {
    %c0_i32 = arith.constant 0 : i32
    %c0_i32_0 = arith.constant 0 : i32
    %c0_i32_1 = arith.constant 0 : i32
    %c0_i32_2 = arith.constant 0 : i32
    return %arg0, %c0_i32, %c0_i32_0, %c0_i32_1 : i32, i32, i32, i32
  }
}

module attributes {stable_mosaic.version = 11 : i64} {
  func.func @_row_conv_kernel(%arg0: i32, %arg1: i32, %arg2: memref<1x1x18x256xbf16, #tpu.memory_space<vmem>>, %arg3: memref<1x1x18x256xbf16, #tpu.memory_space<vmem>>, %arg4: memref<1x1x18x256xbf16, #tpu.memory_space<vmem>>, %arg5: memref<2304x128xbf16, #tpu.memory_space<vmem>>, %arg6: memref<1x128xf32, #tpu.memory_space<vmem>>, %arg7: memref<1x1x16x128xf32, #tpu.memory_space<vmem>>) attributes {dimension_semantics = [#tpu.dimension_semantics<parallel>, #tpu.dimension_semantics<parallel>], iteration_bounds = array<i64: 2, 16>, scalar_prefetch = 0 : i64, scratch_operands = 0 : i64, tpu.core_type = #tpu.core_type<tc>, window_params = [{transform_indices = @transform_0, window_bounds = array<i64: 1, 1, 18, 256>}, {transform_indices = @transform_1, window_bounds = array<i64: 1, 1, 18, 256>}, {transform_indices = @transform_2, window_bounds = array<i64: 1, 1, 18, 256>}, {pipeline_mode = #tpu.pipeline_mode<synchronous>, transform_indices = @transform_3, window_bounds = array<i64: 2304, 128>}, {pipeline_mode = #tpu.pipeline_mode<synchronous>, transform_indices = @transform_4, window_bounds = array<i64: 1, 128>}, {transform_indices = @transform_5, window_bounds = array<i64: 1, 1, 16, 128>}]} {
    %c0 = arith.constant 0 : index
    %c0_0 = arith.constant 0 : index
    %c0_1 = arith.constant 0 : index
    %c0_2 = arith.constant 0 : index
    %0 = vector.load %arg2[%c0, %c0_0, %c0_1, %c0_2] : memref<1x1x18x256xbf16, #tpu.memory_space<vmem>>, vector<1x1x18x256xbf16>
    %1 = vector.shape_cast %0 : vector<1x1x18x256xbf16> to vector<18x256xbf16>
    %2 = vector.extract_strided_slice %1 {offsets = [0, 0], sizes = [16, 256], strides = [1, 1]} : vector<18x256xbf16> to vector<16x256xbf16>
    %3 = vector.extract_strided_slice %1 {offsets = [1, 0], sizes = [16, 256], strides = [1, 1]} : vector<18x256xbf16> to vector<16x256xbf16>
    %4 = vector.extract_strided_slice %1 {offsets = [2, 0], sizes = [16, 256], strides = [1, 1]} : vector<18x256xbf16> to vector<16x256xbf16>
    %c0_3 = arith.constant 0 : index
    %c0_4 = arith.constant 0 : index
    %c0_5 = arith.constant 0 : index
    %c0_6 = arith.constant 0 : index
    %5 = vector.load %arg3[%c0_3, %c0_4, %c0_5, %c0_6] : memref<1x1x18x256xbf16, #tpu.memory_space<vmem>>, vector<1x1x18x256xbf16>
    %6 = vector.shape_cast %5 : vector<1x1x18x256xbf16> to vector<18x256xbf16>
    %7 = vector.extract_strided_slice %6 {offsets = [0, 0], sizes = [16, 256], strides = [1, 1]} : vector<18x256xbf16> to vector<16x256xbf16>
    %8 = vector.extract_strided_slice %6 {offsets = [1, 0], sizes = [16, 256], strides = [1, 1]} : vector<18x256xbf16> to vector<16x256xbf16>
    %9 = vector.extract_strided_slice %6 {offsets = [2, 0], sizes = [16, 256], strides = [1, 1]} : vector<18x256xbf16> to vector<16x256xbf16>
    %c0_7 = arith.constant 0 : index
    %c0_8 = arith.constant 0 : index
    %c0_9 = arith.constant 0 : index
    %c0_10 = arith.constant 0 : index
    %10 = vector.load %arg4[%c0_7, %c0_8, %c0_9, %c0_10] : memref<1x1x18x256xbf16, #tpu.memory_space<vmem>>, vector<1x1x18x256xbf16>
    %11 = vector.shape_cast %10 : vector<1x1x18x256xbf16> to vector<18x256xbf16>
    %12 = vector.extract_strided_slice %11 {offsets = [0, 0], sizes = [16, 256], strides = [1, 1]} : vector<18x256xbf16> to vector<16x256xbf16>
    %13 = vector.extract_strided_slice %11 {offsets = [1, 0], sizes = [16, 256], strides = [1, 1]} : vector<18x256xbf16> to vector<16x256xbf16>
    %14 = vector.extract_strided_slice %11 {offsets = [2, 0], sizes = [16, 256], strides = [1, 1]} : vector<18x256xbf16> to vector<16x256xbf16>
    %15 = tpu.concatenate %2, %3, %4, %7, %8, %9, %12, %13, %14 in 1 : vector<16x256xbf16>, vector<16x256xbf16>, vector<16x256xbf16>, vector<16x256xbf16>, vector<16x256xbf16>, vector<16x256xbf16>, vector<16x256xbf16>, vector<16x256xbf16>, vector<16x256xbf16> -> vector<16x2304xbf16>
    %c0_11 = arith.constant 0 : index
    %c0_12 = arith.constant 0 : index
    %16 = vector.load %arg5[%c0_11, %c0_12] : memref<2304x128xbf16, #tpu.memory_space<vmem>>, vector<2304x128xbf16>
    %cst = arith.constant dense<0.000000e+00> : vector<16x128xf32>
    %17 = tpu.matmul %15, %16, %cst {dimension_numbers = #tpu.dot_dimension_numbers<[1], [0], [0], [1], [0, 0, 1, 1], [], []>} : vector<16x2304xbf16>, vector<2304x128xbf16>, vector<16x128xf32> -> vector<16x128xf32>
    %c0_13 = arith.constant 0 : index
    %c0_14 = arith.constant 0 : index
    %18 = vector.load %arg6[%c0_13, %c0_14] : memref<1x128xf32, #tpu.memory_space<vmem>>, vector<1x128xf32>
    %19 = vector.broadcast %18 : vector<1x128xf32> to vector<16x128xf32>
    %20 = arith.addf %17, %19 : vector<16x128xf32>
    %c0_15 = arith.constant 0 : index
    %c0_16 = arith.constant 0 : index
    %c0_17 = arith.constant 0 : index
    %c0_18 = arith.constant 0 : index
    %21 = vector.load %arg7[%c0_15, %c0_16, %c0_17, %c0_18] : memref<1x1x16x128xf32, #tpu.memory_space<vmem>>, vector<1x1x16x128xf32>
    %22 = vector.shape_cast %21 : vector<1x1x16x128xf32> to vector<16x128xf32>
    %23 = vector.shape_cast %20 : vector<16x128xf32> to vector<1x1x16x128xf32>
    tpu.vector_store %arg7[%c0_15, %c0_16, %c0_17, %c0_18], %23 {strides = array<i32>} : memref<1x1x16x128xf32, #tpu.memory_space<vmem>>, vector<1x1x16x128xf32>,
    return
  }
  func.func @transform_0(%arg0: i32, %arg1: i32) -> (i32, i32, i32, i32) {
    %c0_i32 = arith.constant 0 : i32
    %0 = arith.addi %arg1, %c0_i32 : i32
    %c0_i32_0 = arith.constant 0 : i32
    %c0_i32_1 = arith.constant 0 : i32
    %c0_i32_2 = arith.constant 0 : i32
    return %arg0, %0, %c0_i32_0, %c0_i32_1 : i32, i32, i32, i32
  }
  func.func @transform_1(%arg0: i32, %arg1: i32) -> (i32, i32, i32, i32) {
    %c1_i32 = arith.constant 1 : i32
    %0 = arith.addi %arg1, %c1_i32 : i32
    %c0_i32 = arith.constant 0 : i32
    %c0_i32_0 = arith.constant 0 : i32
    %c0_i32_1 = arith.constant 0 : i32
    return %arg0, %0, %c0_i32, %c0_i32_0 : i32, i32, i32, i32
  }
  func.func @transform_2(%arg0: i32, %arg1: i32) -> (i32, i32, i32, i32) {
    %c2_i32 = arith.constant 2 : i32
    %0 = arith.addi %arg1, %c2_i32 : i32
    %c0_i32 = arith.constant 0 : i32
    %c0_i32_0 = arith.constant 0 : i32
    %c0_i32_1 = arith.constant 0 : i32
    return %arg0, %0, %c0_i32, %c0_i32_0 : i32, i32, i32, i32
  }
  func.func @transform_3(%arg0: i32, %arg1: i32) -> (i32, i32) {
    %c0_i32 = arith.constant 0 : i32
    %c0_i32_0 = arith.constant 0 : i32
    %c0_i32_1 = arith.constant 0 : i32
    return %c0_i32, %c0_i32_0 : i32, i32
  }
  func.func @transform_4(%arg0: i32, %arg1: i32) -> (i32, i32) {
    %c0_i32 = arith.constant 0 : i32
    %c0_i32_0 = arith.constant 0 : i32
    %c0_i32_1 = arith.constant 0 : i32
    return %c0_i32, %c0_i32_0 : i32, i32
  }
  func.func @transform_5(%arg0: i32, %arg1: i32) -> (i32, i32, i32, i32) {
    %c0_i32 = arith.constant 0 : i32
    %c0_i32_0 = arith.constant 0 : i32
    %c0_i32_1 = arith.constant 0 : i32
    return %arg0, %arg1, %c0_i32, %c0_i32_0 : i32, i32, i32, i32
  }
}

module attributes {stable_mosaic.version = 11 : i64} {
  func.func @_ln_kernel(%arg0: i32, %arg1: memref<1x16x16x128xf32, #tpu.memory_space<vmem>>, %arg2: memref<1x1x128xf32, #tpu.memory_space<vmem>>, %arg3: memref<1x1x128xf32, #tpu.memory_space<vmem>>, %arg4: memref<1x16x16x128xf32, #tpu.memory_space<vmem>>) attributes {dimension_semantics = [#tpu.dimension_semantics<parallel>], iteration_bounds = array<i64: 2>, scalar_prefetch = 0 : i64, scratch_operands = 0 : i64, tpu.core_type = #tpu.core_type<tc>, window_params = [{transform_indices = @transform_0, window_bounds = array<i64: 1, 16, 16, 128>}, {pipeline_mode = #tpu.pipeline_mode<synchronous>, transform_indices = @transform_1, window_bounds = array<i64: 1, 1, 128>}, {pipeline_mode = #tpu.pipeline_mode<synchronous>, transform_indices = @transform_2, window_bounds = array<i64: 1, 1, 128>}, {transform_indices = @transform_3, window_bounds = array<i64: 1, 16, 16, 128>}]} {
    %c0 = arith.constant 0 : index
    %c0_0 = arith.constant 0 : index
    %c0_1 = arith.constant 0 : index
    %c0_2 = arith.constant 0 : index
    %0 = vector.load %arg1[%c0, %c0_0, %c0_1, %c0_2] : memref<1x16x16x128xf32, #tpu.memory_space<vmem>>, vector<1x16x16x128xf32>
    %1 = vector.shape_cast %0 : vector<1x16x16x128xf32> to vector<16x16x128xf32>
    %2 = vector.shape_cast %1 : vector<16x16x128xf32> to vector<1x16x16x128xf32>
    %cst = arith.constant dense<0.000000e+00> : vector<1xf32>
    %3 = vector.multi_reduction <add>, %2, %cst [1, 2, 3] : vector<1x16x16x128xf32> to vector<1xf32>
    %4 = vector.shape_cast %3 : vector<1xf32> to vector<1x1x1x1xf32>
    %5 = vector.extract %4[0, 0, 0, 0] : f32 from vector<1x1x1x1xf32>
    %cst_3 = arith.constant 3.276800e+04 : f32
    %6 = arith.divf %5, %cst_3 : f32
    %7 = vector.broadcast %6 : f32 to vector<16x16x128xf32>
    %8 = arith.subf %1, %7 : vector<16x16x128xf32>
    %9 = arith.mulf %8, %8 : vector<16x16x128xf32>
    %10 = vector.shape_cast %9 : vector<16x16x128xf32> to vector<1x16x16x128xf32>
    %cst_4 = arith.constant dense<0.000000e+00> : vector<1xf32>
    %11 = vector.multi_reduction <add>, %10, %cst_4 [1, 2, 3] : vector<1x16x16x128xf32> to vector<1xf32>
    %12 = vector.shape_cast %11 : vector<1xf32> to vector<1x1x1x1xf32>
    %13 = vector.extract %12[0, 0, 0, 0] : f32 from vector<1x1x1x1xf32>
    %cst_5 = arith.constant 3.276700e+04 : f32
    %14 = arith.divf %13, %cst_5 : f32
    %15 = math.sqrt %14 : f32
    %cst_6 = arith.constant 9.99999974E-6 : f32
    %16 = arith.addf %15, %cst_6 : f32
    %17 = vector.broadcast %16 : f32 to vector<16x16x128xf32>
    %18 = arith.divf %8, %17 : vector<16x16x128xf32>
    %c0_7 = arith.constant 0 : index
    %c0_8 = arith.constant 0 : index
    %c0_9 = arith.constant 0 : index
    %19 = vector.load %arg2[%c0_7, %c0_8, %c0_9] : memref<1x1x128xf32, #tpu.memory_space<vmem>>, vector<1x1x128xf32>
    %20 = vector.broadcast %19 : vector<1x1x128xf32> to vector<16x16x128xf32>
    %21 = arith.mulf %18, %20 : vector<16x16x128xf32>
    %c0_10 = arith.constant 0 : index
    %c0_11 = arith.constant 0 : index
    %c0_12 = arith.constant 0 : index
    %22 = vector.load %arg3[%c0_10, %c0_11, %c0_12] : memref<1x1x128xf32, #tpu.memory_space<vmem>>, vector<1x1x128xf32>
    %23 = vector.broadcast %22 : vector<1x1x128xf32> to vector<16x16x128xf32>
    %24 = arith.addf %21, %23 : vector<16x16x128xf32>
    %cst_13 = arith.constant 0.000000e+00 : f32
    %25 = vector.broadcast %cst_13 : f32 to vector<16x16x128xf32>
    %26 = arith.maximumf %24, %25 : vector<16x16x128xf32>
    %c0_14 = arith.constant 0 : index
    %c0_15 = arith.constant 0 : index
    %c0_16 = arith.constant 0 : index
    %c0_17 = arith.constant 0 : index
    %27 = vector.load %arg4[%c0_14, %c0_15, %c0_16, %c0_17] : memref<1x16x16x128xf32, #tpu.memory_space<vmem>>, vector<1x16x16x128xf32>
    %28 = vector.shape_cast %27 : vector<1x16x16x128xf32> to vector<16x16x128xf32>
    %29 = vector.shape_cast %26 : vector<16x16x128xf32> to vector<1x16x16x128xf32>
    tpu.vector_store %arg4[%c0_14, %c0_15, %c0_16, %c0_17], %29 {strides = array<i32>} : memref<1x16x16x128xf32, #tpu.memory_space<vmem>>, vector<1x16x16x128xf32>,
    return
  }
  func.func @transform_0(%arg0: i32) -> (i32, i32, i32, i32) {
    %c0_i32 = arith.constant 0 : i32
    %c0_i32_0 = arith.constant 0 : i32
    %c0_i32_1 = arith.constant 0 : i32
    %c0_i32_2 = arith.constant 0 : i32
    return %arg0, %c0_i32, %c0_i32_0, %c0_i32_1 : i32, i32, i32, i32
  }
  func.func @transform_1(%arg0: i32) -> (i32, i32, i32) {
    %c0_i32 = arith.constant 0 : i32
    %c0_i32_0 = arith.constant 0 : i32
    %c0_i32_1 = arith.constant 0 : i32
    %c0_i32_2 = arith.constant 0 : i32
    return %c0_i32, %c0_i32_0, %c0_i32_1 : i32, i32, i32
  }
  func.func @transform_2(%arg0: i32) -> (i32, i32, i32) {
    %c0_i32 = arith.constant 0 : i32
    %c0_i32_0 = arith.constant 0 : i32
    %c0_i32_1 = arith.constant 0 : i32
    %c0_i32_2 = arith.constant 0 : i32
    return %c0_i32, %c0_i32_0, %c0_i32_1 : i32, i32, i32
  }
  func.func @transform_3(%arg0: i32) -> (i32, i32, i32, i32) {
    %c0_i32 = arith.constant 0 : i32
    %c0_i32_0 = arith.constant 0 : i32
    %c0_i32_1 = arith.constant 0 : i32
    %c0_i32_2 = arith.constant 0 : i32
    return %arg0, %c0_i32, %c0_i32_0, %c0_i32_1 : i32, i32, i32, i32
  }
}

module attributes {stable_mosaic.version = 11 : i64} {
  func.func @_row_conv_kernel(%arg0: i32, %arg1: i32, %arg2: memref<1x1x34x128xbf16, #tpu.memory_space<vmem>>, %arg3: memref<1x1x34x128xbf16, #tpu.memory_space<vmem>>, %arg4: memref<1x1x34x128xbf16, #tpu.memory_space<vmem>>, %arg5: memref<1152x64xbf16, #tpu.memory_space<vmem>>, %arg6: memref<1x64xf32, #tpu.memory_space<vmem>>, %arg7: memref<1x1x32x64xf32, #tpu.memory_space<vmem>>) attributes {dimension_semantics = [#tpu.dimension_semantics<parallel>, #tpu.dimension_semantics<parallel>], iteration_bounds = array<i64: 2, 32>, scalar_prefetch = 0 : i64, scratch_operands = 0 : i64, tpu.core_type = #tpu.core_type<tc>, window_params = [{transform_indices = @transform_0, window_bounds = array<i64: 1, 1, 34, 128>}, {transform_indices = @transform_1, window_bounds = array<i64: 1, 1, 34, 128>}, {transform_indices = @transform_2, window_bounds = array<i64: 1, 1, 34, 128>}, {pipeline_mode = #tpu.pipeline_mode<synchronous>, transform_indices = @transform_3, window_bounds = array<i64: 1152, 64>}, {pipeline_mode = #tpu.pipeline_mode<synchronous>, transform_indices = @transform_4, window_bounds = array<i64: 1, 64>}, {transform_indices = @transform_5, window_bounds = array<i64: 1, 1, 32, 64>}]} {
    %c0 = arith.constant 0 : index
    %c0_0 = arith.constant 0 : index
    %c0_1 = arith.constant 0 : index
    %c0_2 = arith.constant 0 : index
    %0 = vector.load %arg2[%c0, %c0_0, %c0_1, %c0_2] : memref<1x1x34x128xbf16, #tpu.memory_space<vmem>>, vector<1x1x34x128xbf16>
    %1 = vector.shape_cast %0 : vector<1x1x34x128xbf16> to vector<34x128xbf16>
    %2 = vector.extract_strided_slice %1 {offsets = [0, 0], sizes = [32, 128], strides = [1, 1]} : vector<34x128xbf16> to vector<32x128xbf16>
    %3 = vector.extract_strided_slice %1 {offsets = [1, 0], sizes = [32, 128], strides = [1, 1]} : vector<34x128xbf16> to vector<32x128xbf16>
    %4 = vector.extract_strided_slice %1 {offsets = [2, 0], sizes = [32, 128], strides = [1, 1]} : vector<34x128xbf16> to vector<32x128xbf16>
    %c0_3 = arith.constant 0 : index
    %c0_4 = arith.constant 0 : index
    %c0_5 = arith.constant 0 : index
    %c0_6 = arith.constant 0 : index
    %5 = vector.load %arg3[%c0_3, %c0_4, %c0_5, %c0_6] : memref<1x1x34x128xbf16, #tpu.memory_space<vmem>>, vector<1x1x34x128xbf16>
    %6 = vector.shape_cast %5 : vector<1x1x34x128xbf16> to vector<34x128xbf16>
    %7 = vector.extract_strided_slice %6 {offsets = [0, 0], sizes = [32, 128], strides = [1, 1]} : vector<34x128xbf16> to vector<32x128xbf16>
    %8 = vector.extract_strided_slice %6 {offsets = [1, 0], sizes = [32, 128], strides = [1, 1]} : vector<34x128xbf16> to vector<32x128xbf16>
    %9 = vector.extract_strided_slice %6 {offsets = [2, 0], sizes = [32, 128], strides = [1, 1]} : vector<34x128xbf16> to vector<32x128xbf16>
    %c0_7 = arith.constant 0 : index
    %c0_8 = arith.constant 0 : index
    %c0_9 = arith.constant 0 : index
    %c0_10 = arith.constant 0 : index
    %10 = vector.load %arg4[%c0_7, %c0_8, %c0_9, %c0_10] : memref<1x1x34x128xbf16, #tpu.memory_space<vmem>>, vector<1x1x34x128xbf16>
    %11 = vector.shape_cast %10 : vector<1x1x34x128xbf16> to vector<34x128xbf16>
    %12 = vector.extract_strided_slice %11 {offsets = [0, 0], sizes = [32, 128], strides = [1, 1]} : vector<34x128xbf16> to vector<32x128xbf16>
    %13 = vector.extract_strided_slice %11 {offsets = [1, 0], sizes = [32, 128], strides = [1, 1]} : vector<34x128xbf16> to vector<32x128xbf16>
    %14 = vector.extract_strided_slice %11 {offsets = [2, 0], sizes = [32, 128], strides = [1, 1]} : vector<34x128xbf16> to vector<32x128xbf16>
    %15 = tpu.concatenate %2, %3, %4, %7, %8, %9, %12, %13, %14 in 1 : vector<32x128xbf16>, vector<32x128xbf16>, vector<32x128xbf16>, vector<32x128xbf16>, vector<32x128xbf16>, vector<32x128xbf16>, vector<32x128xbf16>, vector<32x128xbf16>, vector<32x128xbf16> -> vector<32x1152xbf16>
    %c0_11 = arith.constant 0 : index
    %c0_12 = arith.constant 0 : index
    %16 = vector.load %arg5[%c0_11, %c0_12] : memref<1152x64xbf16, #tpu.memory_space<vmem>>, vector<1152x64xbf16>
    %cst = arith.constant dense<0.000000e+00> : vector<32x64xf32>
    %17 = tpu.matmul %15, %16, %cst {dimension_numbers = #tpu.dot_dimension_numbers<[1], [0], [0], [1], [0, 0, 1, 1], [], []>} : vector<32x1152xbf16>, vector<1152x64xbf16>, vector<32x64xf32> -> vector<32x64xf32>
    %c0_13 = arith.constant 0 : index
    %c0_14 = arith.constant 0 : index
    %18 = vector.load %arg6[%c0_13, %c0_14] : memref<1x64xf32, #tpu.memory_space<vmem>>, vector<1x64xf32>
    %19 = vector.broadcast %18 : vector<1x64xf32> to vector<32x64xf32>
    %20 = arith.addf %17, %19 : vector<32x64xf32>
    %c0_15 = arith.constant 0 : index
    %c0_16 = arith.constant 0 : index
    %c0_17 = arith.constant 0 : index
    %c0_18 = arith.constant 0 : index
    %21 = vector.load %arg7[%c0_15, %c0_16, %c0_17, %c0_18] : memref<1x1x32x64xf32, #tpu.memory_space<vmem>>, vector<1x1x32x64xf32>
    %22 = vector.shape_cast %21 : vector<1x1x32x64xf32> to vector<32x64xf32>
    %23 = vector.shape_cast %20 : vector<32x64xf32> to vector<1x1x32x64xf32>
    tpu.vector_store %arg7[%c0_15, %c0_16, %c0_17, %c0_18], %23 {strides = array<i32>} : memref<1x1x32x64xf32, #tpu.memory_space<vmem>>, vector<1x1x32x64xf32>,
    return
  }
  func.func @transform_0(%arg0: i32, %arg1: i32) -> (i32, i32, i32, i32) {
    %c0_i32 = arith.constant 0 : i32
    %0 = arith.addi %arg1, %c0_i32 : i32
    %c0_i32_0 = arith.constant 0 : i32
    %c0_i32_1 = arith.constant 0 : i32
    %c0_i32_2 = arith.constant 0 : i32
    return %arg0, %0, %c0_i32_0, %c0_i32_1 : i32, i32, i32, i32
  }
  func.func @transform_1(%arg0: i32, %arg1: i32) -> (i32, i32, i32, i32) {
    %c1_i32 = arith.constant 1 : i32
    %0 = arith.addi %arg1, %c1_i32 : i32
    %c0_i32 = arith.constant 0 : i32
    %c0_i32_0 = arith.constant 0 : i32
    %c0_i32_1 = arith.constant 0 : i32
    return %arg0, %0, %c0_i32, %c0_i32_0 : i32, i32, i32, i32
  }
  func.func @transform_2(%arg0: i32, %arg1: i32) -> (i32, i32, i32, i32) {
    %c2_i32 = arith.constant 2 : i32
    %0 = arith.addi %arg1, %c2_i32 : i32
    %c0_i32 = arith.constant 0 : i32
    %c0_i32_0 = arith.constant 0 : i32
    %c0_i32_1 = arith.constant 0 : i32
    return %arg0, %0, %c0_i32, %c0_i32_0 : i32, i32, i32, i32
  }
  func.func @transform_3(%arg0: i32, %arg1: i32) -> (i32, i32) {
    %c0_i32 = arith.constant 0 : i32
    %c0_i32_0 = arith.constant 0 : i32
    %c0_i32_1 = arith.constant 0 : i32
    return %c0_i32, %c0_i32_0 : i32, i32
  }
  func.func @transform_4(%arg0: i32, %arg1: i32) -> (i32, i32) {
    %c0_i32 = arith.constant 0 : i32
    %c0_i32_0 = arith.constant 0 : i32
    %c0_i32_1 = arith.constant 0 : i32
    return %c0_i32, %c0_i32_0 : i32, i32
  }
  func.func @transform_5(%arg0: i32, %arg1: i32) -> (i32, i32, i32, i32) {
    %c0_i32 = arith.constant 0 : i32
    %c0_i32_0 = arith.constant 0 : i32
    %c0_i32_1 = arith.constant 0 : i32
    return %arg0, %arg1, %c0_i32, %c0_i32_0 : i32, i32, i32, i32
  }
}

module attributes {stable_mosaic.version = 11 : i64} {
  func.func @_ln_kernel(%arg0: i32, %arg1: memref<1x32x32x64xf32, #tpu.memory_space<vmem>>, %arg2: memref<1x1x64xf32, #tpu.memory_space<vmem>>, %arg3: memref<1x1x64xf32, #tpu.memory_space<vmem>>, %arg4: memref<1x32x32x64xf32, #tpu.memory_space<vmem>>) attributes {dimension_semantics = [#tpu.dimension_semantics<parallel>], iteration_bounds = array<i64: 2>, scalar_prefetch = 0 : i64, scratch_operands = 0 : i64, tpu.core_type = #tpu.core_type<tc>, window_params = [{transform_indices = @transform_0, window_bounds = array<i64: 1, 32, 32, 64>}, {pipeline_mode = #tpu.pipeline_mode<synchronous>, transform_indices = @transform_1, window_bounds = array<i64: 1, 1, 64>}, {pipeline_mode = #tpu.pipeline_mode<synchronous>, transform_indices = @transform_2, window_bounds = array<i64: 1, 1, 64>}, {transform_indices = @transform_3, window_bounds = array<i64: 1, 32, 32, 64>}]} {
    %c0 = arith.constant 0 : index
    %c0_0 = arith.constant 0 : index
    %c0_1 = arith.constant 0 : index
    %c0_2 = arith.constant 0 : index
    %0 = vector.load %arg1[%c0, %c0_0, %c0_1, %c0_2] : memref<1x32x32x64xf32, #tpu.memory_space<vmem>>, vector<1x32x32x64xf32>
    %1 = vector.shape_cast %0 : vector<1x32x32x64xf32> to vector<32x32x64xf32>
    %2 = vector.shape_cast %1 : vector<32x32x64xf32> to vector<1x32x32x64xf32>
    %cst = arith.constant dense<0.000000e+00> : vector<1xf32>
    %3 = vector.multi_reduction <add>, %2, %cst [1, 2, 3] : vector<1x32x32x64xf32> to vector<1xf32>
    %4 = vector.shape_cast %3 : vector<1xf32> to vector<1x1x1x1xf32>
    %5 = vector.extract %4[0, 0, 0, 0] : f32 from vector<1x1x1x1xf32>
    %cst_3 = arith.constant 6.553600e+04 : f32
    %6 = arith.divf %5, %cst_3 : f32
    %7 = vector.broadcast %6 : f32 to vector<32x32x64xf32>
    %8 = arith.subf %1, %7 : vector<32x32x64xf32>
    %9 = arith.mulf %8, %8 : vector<32x32x64xf32>
    %10 = vector.shape_cast %9 : vector<32x32x64xf32> to vector<1x32x32x64xf32>
    %cst_4 = arith.constant dense<0.000000e+00> : vector<1xf32>
    %11 = vector.multi_reduction <add>, %10, %cst_4 [1, 2, 3] : vector<1x32x32x64xf32> to vector<1xf32>
    %12 = vector.shape_cast %11 : vector<1xf32> to vector<1x1x1x1xf32>
    %13 = vector.extract %12[0, 0, 0, 0] : f32 from vector<1x1x1x1xf32>
    %cst_5 = arith.constant 6.553500e+04 : f32
    %14 = arith.divf %13, %cst_5 : f32
    %15 = math.sqrt %14 : f32
    %cst_6 = arith.constant 9.99999974E-6 : f32
    %16 = arith.addf %15, %cst_6 : f32
    %17 = vector.broadcast %16 : f32 to vector<32x32x64xf32>
    %18 = arith.divf %8, %17 : vector<32x32x64xf32>
    %c0_7 = arith.constant 0 : index
    %c0_8 = arith.constant 0 : index
    %c0_9 = arith.constant 0 : index
    %19 = vector.load %arg2[%c0_7, %c0_8, %c0_9] : memref<1x1x64xf32, #tpu.memory_space<vmem>>, vector<1x1x64xf32>
    %20 = vector.broadcast %19 : vector<1x1x64xf32> to vector<32x32x64xf32>
    %21 = arith.mulf %18, %20 : vector<32x32x64xf32>
    %c0_10 = arith.constant 0 : index
    %c0_11 = arith.constant 0 : index
    %c0_12 = arith.constant 0 : index
    %22 = vector.load %arg3[%c0_10, %c0_11, %c0_12] : memref<1x1x64xf32, #tpu.memory_space<vmem>>, vector<1x1x64xf32>
    %23 = vector.broadcast %22 : vector<1x1x64xf32> to vector<32x32x64xf32>
    %24 = arith.addf %21, %23 : vector<32x32x64xf32>
    %cst_13 = arith.constant 0.000000e+00 : f32
    %25 = vector.broadcast %cst_13 : f32 to vector<32x32x64xf32>
    %26 = arith.maximumf %24, %25 : vector<32x32x64xf32>
    %c0_14 = arith.constant 0 : index
    %c0_15 = arith.constant 0 : index
    %c0_16 = arith.constant 0 : index
    %c0_17 = arith.constant 0 : index
    %27 = vector.load %arg4[%c0_14, %c0_15, %c0_16, %c0_17] : memref<1x32x32x64xf32, #tpu.memory_space<vmem>>, vector<1x32x32x64xf32>
    %28 = vector.shape_cast %27 : vector<1x32x32x64xf32> to vector<32x32x64xf32>
    %29 = vector.shape_cast %26 : vector<32x32x64xf32> to vector<1x32x32x64xf32>
    tpu.vector_store %arg4[%c0_14, %c0_15, %c0_16, %c0_17], %29 {strides = array<i32>} : memref<1x32x32x64xf32, #tpu.memory_space<vmem>>, vector<1x32x32x64xf32>,
    return
  }
  func.func @transform_0(%arg0: i32) -> (i32, i32, i32, i32) {
    %c0_i32 = arith.constant 0 : i32
    %c0_i32_0 = arith.constant 0 : i32
    %c0_i32_1 = arith.constant 0 : i32
    %c0_i32_2 = arith.constant 0 : i32
    return %arg0, %c0_i32, %c0_i32_0, %c0_i32_1 : i32, i32, i32, i32
  }
  func.func @transform_1(%arg0: i32) -> (i32, i32, i32) {
    %c0_i32 = arith.constant 0 : i32
    %c0_i32_0 = arith.constant 0 : i32
    %c0_i32_1 = arith.constant 0 : i32
    %c0_i32_2 = arith.constant 0 : i32
    return %c0_i32, %c0_i32_0, %c0_i32_1 : i32, i32, i32
  }
  func.func @transform_2(%arg0: i32) -> (i32, i32, i32) {
    %c0_i32 = arith.constant 0 : i32
    %c0_i32_0 = arith.constant 0 : i32
    %c0_i32_1 = arith.constant 0 : i32
    %c0_i32_2 = arith.constant 0 : i32
    return %c0_i32, %c0_i32_0, %c0_i32_1 : i32, i32, i32
  }
  func.func @transform_3(%arg0: i32) -> (i32, i32, i32, i32) {
    %c0_i32 = arith.constant 0 : i32
    %c0_i32_0 = arith.constant 0 : i32
    %c0_i32_1 = arith.constant 0 : i32
    %c0_i32_2 = arith.constant 0 : i32
    return %arg0, %c0_i32, %c0_i32_0, %c0_i32_1 : i32, i32, i32, i32
  }
}

module attributes {stable_mosaic.version = 11 : i64} {
  func.func @_row_conv_kernel(%arg0: i32, %arg1: i32, %arg2: memref<1x1x38x64xbf16, #tpu.memory_space<vmem>>, %arg3: memref<1x1x38x64xbf16, #tpu.memory_space<vmem>>, %arg4: memref<1x1x38x64xbf16, #tpu.memory_space<vmem>>, %arg5: memref<1x1x38x64xbf16, #tpu.memory_space<vmem>>, %arg6: memref<1x1x38x64xbf16, #tpu.memory_space<vmem>>, %arg7: memref<1x1x38x64xbf16, #tpu.memory_space<vmem>>, %arg8: memref<1x1x38x64xbf16, #tpu.memory_space<vmem>>, %arg9: memref<3136x3xbf16, #tpu.memory_space<vmem>>, %arg10: memref<1x3xf32, #tpu.memory_space<vmem>>, %arg11: memref<1x1x32x3xf32, #tpu.memory_space<vmem>>) attributes {dimension_semantics = [#tpu.dimension_semantics<parallel>, #tpu.dimension_semantics<parallel>], iteration_bounds = array<i64: 2, 32>, scalar_prefetch = 0 : i64, scratch_operands = 0 : i64, tpu.core_type = #tpu.core_type<tc>, window_params = [{transform_indices = @transform_0, window_bounds = array<i64: 1, 1, 38, 64>}, {transform_indices = @transform_1, window_bounds = array<i64: 1, 1, 38, 64>}, {transform_indices = @transform_2, window_bounds = array<i64: 1, 1, 38, 64>}, {transform_indices = @transform_3, window_bounds = array<i64: 1, 1, 38, 64>}, {transform_indices = @transform_4, window_bounds = array<i64: 1, 1, 38, 64>}, {transform_indices = @transform_5, window_bounds = array<i64: 1, 1, 38, 64>}, {transform_indices = @transform_6, window_bounds = array<i64: 1, 1, 38, 64>}, {pipeline_mode = #tpu.pipeline_mode<synchronous>, transform_indices = @transform_7, window_bounds = array<i64: 3136, 3>}, {pipeline_mode = #tpu.pipeline_mode<synchronous>, transform_indices = @transform_8, window_bounds = array<i64: 1, 3>}, {transform_indices = @transform_9, window_bounds = array<i64: 1, 1, 32, 3>}]} {
    %c0 = arith.constant 0 : index
    %c0_0 = arith.constant 0 : index
    %c0_1 = arith.constant 0 : index
    %c0_2 = arith.constant 0 : index
    %0 = vector.load %arg2[%c0, %c0_0, %c0_1, %c0_2] : memref<1x1x38x64xbf16, #tpu.memory_space<vmem>>, vector<1x1x38x64xbf16>
    %1 = vector.shape_cast %0 : vector<1x1x38x64xbf16> to vector<38x64xbf16>
    %2 = vector.extract_strided_slice %1 {offsets = [0, 0], sizes = [32, 64], strides = [1, 1]} : vector<38x64xbf16> to vector<32x64xbf16>
    %3 = vector.extract_strided_slice %1 {offsets = [1, 0], sizes = [32, 64], strides = [1, 1]} : vector<38x64xbf16> to vector<32x64xbf16>
    %4 = vector.extract_strided_slice %1 {offsets = [2, 0], sizes = [32, 64], strides = [1, 1]} : vector<38x64xbf16> to vector<32x64xbf16>
    %5 = vector.extract_strided_slice %1 {offsets = [3, 0], sizes = [32, 64], strides = [1, 1]} : vector<38x64xbf16> to vector<32x64xbf16>
    %6 = vector.extract_strided_slice %1 {offsets = [4, 0], sizes = [32, 64], strides = [1, 1]} : vector<38x64xbf16> to vector<32x64xbf16>
    %7 = vector.extract_strided_slice %1 {offsets = [5, 0], sizes = [32, 64], strides = [1, 1]} : vector<38x64xbf16> to vector<32x64xbf16>
    %8 = vector.extract_strided_slice %1 {offsets = [6, 0], sizes = [32, 64], strides = [1, 1]} : vector<38x64xbf16> to vector<32x64xbf16>
    %c0_3 = arith.constant 0 : index
    %c0_4 = arith.constant 0 : index
    %c0_5 = arith.constant 0 : index
    %c0_6 = arith.constant 0 : index
    %9 = vector.load %arg3[%c0_3, %c0_4, %c0_5, %c0_6] : memref<1x1x38x64xbf16, #tpu.memory_space<vmem>>, vector<1x1x38x64xbf16>
    %10 = vector.shape_cast %9 : vector<1x1x38x64xbf16> to vector<38x64xbf16>
    %11 = vector.extract_strided_slice %10 {offsets = [0, 0], sizes = [32, 64], strides = [1, 1]} : vector<38x64xbf16> to vector<32x64xbf16>
    %12 = vector.extract_strided_slice %10 {offsets = [1, 0], sizes = [32, 64], strides = [1, 1]} : vector<38x64xbf16> to vector<32x64xbf16>
    %13 = vector.extract_strided_slice %10 {offsets = [2, 0], sizes = [32, 64], strides = [1, 1]} : vector<38x64xbf16> to vector<32x64xbf16>
    %14 = vector.extract_strided_slice %10 {offsets = [3, 0], sizes = [32, 64], strides = [1, 1]} : vector<38x64xbf16> to vector<32x64xbf16>
    %15 = vector.extract_strided_slice %10 {offsets = [4, 0], sizes = [32, 64], strides = [1, 1]} : vector<38x64xbf16> to vector<32x64xbf16>
    %16 = vector.extract_strided_slice %10 {offsets = [5, 0], sizes = [32, 64], strides = [1, 1]} : vector<38x64xbf16> to vector<32x64xbf16>
    %17 = vector.extract_strided_slice %10 {offsets = [6, 0], sizes = [32, 64], strides = [1, 1]} : vector<38x64xbf16> to vector<32x64xbf16>
    %c0_7 = arith.constant 0 : index
    %c0_8 = arith.constant 0 : index
    %c0_9 = arith.constant 0 : index
    %c0_10 = arith.constant 0 : index
    %18 = vector.load %arg4[%c0_7, %c0_8, %c0_9, %c0_10] : memref<1x1x38x64xbf16, #tpu.memory_space<vmem>>, vector<1x1x38x64xbf16>
    %19 = vector.shape_cast %18 : vector<1x1x38x64xbf16> to vector<38x64xbf16>
    %20 = vector.extract_strided_slice %19 {offsets = [0, 0], sizes = [32, 64], strides = [1, 1]} : vector<38x64xbf16> to vector<32x64xbf16>
    %21 = vector.extract_strided_slice %19 {offsets = [1, 0], sizes = [32, 64], strides = [1, 1]} : vector<38x64xbf16> to vector<32x64xbf16>
    %22 = vector.extract_strided_slice %19 {offsets = [2, 0], sizes = [32, 64], strides = [1, 1]} : vector<38x64xbf16> to vector<32x64xbf16>
    %23 = vector.extract_strided_slice %19 {offsets = [3, 0], sizes = [32, 64], strides = [1, 1]} : vector<38x64xbf16> to vector<32x64xbf16>
    %24 = vector.extract_strided_slice %19 {offsets = [4, 0], sizes = [32, 64], strides = [1, 1]} : vector<38x64xbf16> to vector<32x64xbf16>
    %25 = vector.extract_strided_slice %19 {offsets = [5, 0], sizes = [32, 64], strides = [1, 1]} : vector<38x64xbf16> to vector<32x64xbf16>
    %26 = vector.extract_strided_slice %19 {offsets = [6, 0], sizes = [32, 64], strides = [1, 1]} : vector<38x64xbf16> to vector<32x64xbf16>
    %c0_11 = arith.constant 0 : index
    %c0_12 = arith.constant 0 : index
    %c0_13 = arith.constant 0 : index
    %c0_14 = arith.constant 0 : index
    %27 = vector.load %arg5[%c0_11, %c0_12, %c0_13, %c0_14] : memref<1x1x38x64xbf16, #tpu.memory_space<vmem>>, vector<1x1x38x64xbf16>
    %28 = vector.shape_cast %27 : vector<1x1x38x64xbf16> to vector<38x64xbf16>
    %29 = vector.extract_strided_slice %28 {offsets = [0, 0], sizes = [32, 64], strides = [1, 1]} : vector<38x64xbf16> to vector<32x64xbf16>
    %30 = vector.extract_strided_slice %28 {offsets = [1, 0], sizes = [32, 64], strides = [1, 1]} : vector<38x64xbf16> to vector<32x64xbf16>
    %31 = vector.extract_strided_slice %28 {offsets = [2, 0], sizes = [32, 64], strides = [1, 1]} : vector<38x64xbf16> to vector<32x64xbf16>
    %32 = vector.extract_strided_slice %28 {offsets = [3, 0], sizes = [32, 64], strides = [1, 1]} : vector<38x64xbf16> to vector<32x64xbf16>
    %33 = vector.extract_strided_slice %28 {offsets = [4, 0], sizes = [32, 64], strides = [1, 1]} : vector<38x64xbf16> to vector<32x64xbf16>
    %34 = vector.extract_strided_slice %28 {offsets = [5, 0], sizes = [32, 64], strides = [1, 1]} : vector<38x64xbf16> to vector<32x64xbf16>
    %35 = vector.extract_strided_slice %28 {offsets = [6, 0], sizes = [32, 64], strides = [1, 1]} : vector<38x64xbf16> to vector<32x64xbf16>
    %c0_15 = arith.constant 0 : index
    %c0_16 = arith.constant 0 : index
    %c0_17 = arith.constant 0 : index
    %c0_18 = arith.constant 0 : index
    %36 = vector.load %arg6[%c0_15, %c0_16, %c0_17, %c0_18] : memref<1x1x38x64xbf16, #tpu.memory_space<vmem>>, vector<1x1x38x64xbf16>
    %37 = vector.shape_cast %36 : vector<1x1x38x64xbf16> to vector<38x64xbf16>
    %38 = vector.extract_strided_slice %37 {offsets = [0, 0], sizes = [32, 64], strides = [1, 1]} : vector<38x64xbf16> to vector<32x64xbf16>
    %39 = vector.extract_strided_slice %37 {offsets = [1, 0], sizes = [32, 64], strides = [1, 1]} : vector<38x64xbf16> to vector<32x64xbf16>
    %40 = vector.extract_strided_slice %37 {offsets = [2, 0], sizes = [32, 64], strides = [1, 1]} : vector<38x64xbf16> to vector<32x64xbf16>
    %41 = vector.extract_strided_slice %37 {offsets = [3, 0], sizes = [32, 64], strides = [1, 1]} : vector<38x64xbf16> to vector<32x64xbf16>
    %42 = vector.extract_strided_slice %37 {offsets = [4, 0], sizes = [32, 64], strides = [1, 1]} : vector<38x64xbf16> to vector<32x64xbf16>
    %43 = vector.extract_strided_slice %37 {offsets = [5, 0], sizes = [32, 64], strides = [1, 1]} : vector<38x64xbf16> to vector<32x64xbf16>
    %44 = vector.extract_strided_slice %37 {offsets = [6, 0], sizes = [32, 64], strides = [1, 1]} : vector<38x64xbf16> to vector<32x64xbf16>
    %c0_19 = arith.constant 0 : index
    %c0_20 = arith.constant 0 : index
    %c0_21 = arith.constant 0 : index
    %c0_22 = arith.constant 0 : index
    %45 = vector.load %arg7[%c0_19, %c0_20, %c0_21, %c0_22] : memref<1x1x38x64xbf16, #tpu.memory_space<vmem>>, vector<1x1x38x64xbf16>
    %46 = vector.shape_cast %45 : vector<1x1x38x64xbf16> to vector<38x64xbf16>
    %47 = vector.extract_strided_slice %46 {offsets = [0, 0], sizes = [32, 64], strides = [1, 1]} : vector<38x64xbf16> to vector<32x64xbf16>
    %48 = vector.extract_strided_slice %46 {offsets = [1, 0], sizes = [32, 64], strides = [1, 1]} : vector<38x64xbf16> to vector<32x64xbf16>
    %49 = vector.extract_strided_slice %46 {offsets = [2, 0], sizes = [32, 64], strides = [1, 1]} : vector<38x64xbf16> to vector<32x64xbf16>
    %50 = vector.extract_strided_slice %46 {offsets = [3, 0], sizes = [32, 64], strides = [1, 1]} : vector<38x64xbf16> to vector<32x64xbf16>
    %51 = vector.extract_strided_slice %46 {offsets = [4, 0], sizes = [32, 64], strides = [1, 1]} : vector<38x64xbf16> to vector<32x64xbf16>
    %52 = vector.extract_strided_slice %46 {offsets = [5, 0], sizes = [32, 64], strides = [1, 1]} : vector<38x64xbf16> to vector<32x64xbf16>
    %53 = vector.extract_strided_slice %46 {offsets = [6, 0], sizes = [32, 64], strides = [1, 1]} : vector<38x64xbf16> to vector<32x64xbf16>
    %c0_23 = arith.constant 0 : index
    %c0_24 = arith.constant 0 : index
    %c0_25 = arith.constant 0 : index
    %c0_26 = arith.constant 0 : index
    %54 = vector.load %arg8[%c0_23, %c0_24, %c0_25, %c0_26] : memref<1x1x38x64xbf16, #tpu.memory_space<vmem>>, vector<1x1x38x64xbf16>
    %55 = vector.shape_cast %54 : vector<1x1x38x64xbf16> to vector<38x64xbf16>
    %56 = vector.extract_strided_slice %55 {offsets = [0, 0], sizes = [32, 64], strides = [1, 1]} : vector<38x64xbf16> to vector<32x64xbf16>
    %57 = vector.extract_strided_slice %55 {offsets = [1, 0], sizes = [32, 64], strides = [1, 1]} : vector<38x64xbf16> to vector<32x64xbf16>
    %58 = vector.extract_strided_slice %55 {offsets = [2, 0], sizes = [32, 64], strides = [1, 1]} : vector<38x64xbf16> to vector<32x64xbf16>
    %59 = vector.extract_strided_slice %55 {offsets = [3, 0], sizes = [32, 64], strides = [1, 1]} : vector<38x64xbf16> to vector<32x64xbf16>
    %60 = vector.extract_strided_slice %55 {offsets = [4, 0], sizes = [32, 64], strides = [1, 1]} : vector<38x64xbf16> to vector<32x64xbf16>
    %61 = vector.extract_strided_slice %55 {offsets = [5, 0], sizes = [32, 64], strides = [1, 1]} : vector<38x64xbf16> to vector<32x64xbf16>
    %62 = vector.extract_strided_slice %55 {offsets = [6, 0], sizes = [32, 64], strides = [1, 1]} : vector<38x64xbf16> to vector<32x64xbf16>
    %63 = tpu.concatenate %2, %3, %4, %5, %6, %7, %8, %11, %12, %13, %14, %15, %16, %17, %20, %21 in 1 : vector<32x64xbf16>, vector<32x64xbf16>, vector<32x64xbf16>, vector<32x64xbf16>, vector<32x64xbf16>, vector<32x64xbf16>, vector<32x64xbf16>, vector<32x64xbf16>, vector<32x64xbf16>, vector<32x64xbf16>, vector<32x64xbf16>, vector<32x64xbf16>, vector<32x64xbf16>, vector<32x64xbf16>, vector<32x64xbf16>, vector<32x64xbf16> -> vector<32x1024xbf16>
    %64 = tpu.concatenate %22, %23, %24, %25, %26, %29, %30, %31, %32, %33, %34, %35, %38, %39, %40, %41 in 1 : vector<32x64xbf16>, vector<32x64xbf16>, vector<32x64xbf16>, vector<32x64xbf16>, vector<32x64xbf16>, vector<32x64xbf16>, vector<32x64xbf16>, vector<32x64xbf16>, vector<32x64xbf16>, vector<32x64xbf16>, vector<32x64xbf16>, vector<32x64xbf16>, vector<32x64xbf16>, vector<32x64xbf16>, vector<32x64xbf16>, vector<32x64xbf16> -> vector<32x1024xbf16>
    %65 = tpu.concatenate %42, %43, %44, %47, %48, %49, %50, %51, %52, %53, %56, %57, %58, %59, %60, %61 in 1 : vector<32x64xbf16>, vector<32x64xbf16>, vector<32x64xbf16>, vector<32x64xbf16>, vector<32x64xbf16>, vector<32x64xbf16>, vector<32x64xbf16>, vector<32x64xbf16>, vector<32x64xbf16>, vector<32x64xbf16>, vector<32x64xbf16>, vector<32x64xbf16>, vector<32x64xbf16>, vector<32x64xbf16>, vector<32x64xbf16>, vector<32x64xbf16> -> vector<32x1024xbf16>
    %66 = tpu.concatenate %63, %64, %65, %62 in 1 : vector<32x1024xbf16>, vector<32x1024xbf16>, vector<32x1024xbf16>, vector<32x64xbf16> -> vector<32x3136xbf16>
    %c0_27 = arith.constant 0 : index
    %c0_28 = arith.constant 0 : index
    %67 = vector.load %arg9[%c0_27, %c0_28] : memref<3136x3xbf16, #tpu.memory_space<vmem>>, vector<3136x3xbf16>
    %cst = arith.constant dense<0.000000e+00> : vector<32x3xf32>
    %68 = tpu.matmul %66, %67, %cst {dimension_numbers = #tpu.dot_dimension_numbers<[1], [0], [0], [1], [0, 0, 1, 1], [], []>} : vector<32x3136xbf16>, vector<3136x3xbf16>, vector<32x3xf32> -> vector<32x3xf32>
    %c0_29 = arith.constant 0 : index
    %c0_30 = arith.constant 0 : index
    %69 = vector.load %arg10[%c0_29, %c0_30] : memref<1x3xf32, #tpu.memory_space<vmem>>, vector<1x3xf32>
    %70 = vector.broadcast %69 : vector<1x3xf32> to vector<32x3xf32>
    %71 = arith.addf %68, %70 : vector<32x3xf32>
    %72 = math.tanh %71 : vector<32x3xf32>
    %c0_31 = arith.constant 0 : index
    %c0_32 = arith.constant 0 : index
    %c0_33 = arith.constant 0 : index
    %c0_34 = arith.constant 0 : index
    %73 = vector.load %arg11[%c0_31, %c0_32, %c0_33, %c0_34] : memref<1x1x32x3xf32, #tpu.memory_space<vmem>>, vector<1x1x32x3xf32>
    %74 = vector.shape_cast %73 : vector<1x1x32x3xf32> to vector<32x3xf32>
    %75 = vector.shape_cast %72 : vector<32x3xf32> to vector<1x1x32x3xf32>
    tpu.vector_store %arg11[%c0_31, %c0_32, %c0_33, %c0_34], %75 {strides = array<i32>} : memref<1x1x32x3xf32, #tpu.memory_space<vmem>>, vector<1x1x32x3xf32>,
    return
  }
  func.func @transform_0(%arg0: i32, %arg1: i32) -> (i32, i32, i32, i32) {
    %c0_i32 = arith.constant 0 : i32
    %0 = arith.addi %arg1, %c0_i32 : i32
    %c0_i32_0 = arith.constant 0 : i32
    %c0_i32_1 = arith.constant 0 : i32
    %c0_i32_2 = arith.constant 0 : i32
    return %arg0, %0, %c0_i32_0, %c0_i32_1 : i32, i32, i32, i32
  }
  func.func @transform_1(%arg0: i32, %arg1: i32) -> (i32, i32, i32, i32) {
    %c1_i32 = arith.constant 1 : i32
    %0 = arith.addi %arg1, %c1_i32 : i32
    %c0_i32 = arith.constant 0 : i32
    %c0_i32_0 = arith.constant 0 : i32
    %c0_i32_1 = arith.constant 0 : i32
    return %arg0, %0, %c0_i32, %c0_i32_0 : i32, i32, i32, i32
  }
  func.func @transform_2(%arg0: i32, %arg1: i32) -> (i32, i32, i32, i32) {
    %c2_i32 = arith.constant 2 : i32
    %0 = arith.addi %arg1, %c2_i32 : i32
    %c0_i32 = arith.constant 0 : i32
    %c0_i32_0 = arith.constant 0 : i32
    %c0_i32_1 = arith.constant 0 : i32
    return %arg0, %0, %c0_i32, %c0_i32_0 : i32, i32, i32, i32
  }
  func.func @transform_3(%arg0: i32, %arg1: i32) -> (i32, i32, i32, i32) {
    %c3_i32 = arith.constant 3 : i32
    %0 = arith.addi %arg1, %c3_i32 : i32
    %c0_i32 = arith.constant 0 : i32
    %c0_i32_0 = arith.constant 0 : i32
    %c0_i32_1 = arith.constant 0 : i32
    return %arg0, %0, %c0_i32, %c0_i32_0 : i32, i32, i32, i32
  }
  func.func @transform_4(%arg0: i32, %arg1: i32) -> (i32, i32, i32, i32) {
    %c4_i32 = arith.constant 4 : i32
    %0 = arith.addi %arg1, %c4_i32 : i32
    %c0_i32 = arith.constant 0 : i32
    %c0_i32_0 = arith.constant 0 : i32
    %c0_i32_1 = arith.constant 0 : i32
    return %arg0, %0, %c0_i32, %c0_i32_0 : i32, i32, i32, i32
  }
  func.func @transform_5(%arg0: i32, %arg1: i32) -> (i32, i32, i32, i32) {
    %c5_i32 = arith.constant 5 : i32
    %0 = arith.addi %arg1, %c5_i32 : i32
    %c0_i32 = arith.constant 0 : i32
    %c0_i32_0 = arith.constant 0 : i32
    %c0_i32_1 = arith.constant 0 : i32
    return %arg0, %0, %c0_i32, %c0_i32_0 : i32, i32, i32, i32
  }
  func.func @transform_6(%arg0: i32, %arg1: i32) -> (i32, i32, i32, i32) {
    %c6_i32 = arith.constant 6 : i32
    %0 = arith.addi %arg1, %c6_i32 : i32
    %c0_i32 = arith.constant 0 : i32
    %c0_i32_0 = arith.constant 0 : i32
    %c0_i32_1 = arith.constant 0 : i32
    return %arg0, %0, %c0_i32, %c0_i32_0 : i32, i32, i32, i32
  }
  func.func @transform_7(%arg0: i32, %arg1: i32) -> (i32, i32) {
    %c0_i32 = arith.constant 0 : i32
    %c0_i32_0 = arith.constant 0 : i32
    %c0_i32_1 = arith.constant 0 : i32
    return %c0_i32, %c0_i32_0 : i32, i32
  }
  func.func @transform_8(%arg0: i32, %arg1: i32) -> (i32, i32) {
    %c0_i32 = arith.constant 0 : i32
    %c0_i32_0 = arith.constant 0 : i32
    %c0_i32_1 = arith.constant 0 : i32
    return %c0_i32, %c0_i32_0 : i32, i32
  }
  func.func @transform_9(%arg0: i32, %arg1: i32) -> (i32, i32, i32, i32) {
    %c0_i32 = arith.constant 0 : i32
    %c0_i32_0 = arith.constant 0 : i32
    %c0_i32_1 = arith.constant 0 : i32
    return %arg0, %arg1, %c0_i32, %c0_i32_0 : i32, i32, i32, i32
  }
}

</mosaic_0001>

<bundles_post_ra>
// kernel: _lambda_.27
= control target key start
LH: loop header
LB: loop body
LE: loop exit
PB: predicated region body
PF: predicated region fallthrough
CT: control target
= control target key end

     0   :  { %s1107_s12 = smov 0   ;;  %s1109_s13 = smov 0   ;;  %s1274_s0 = inlined_call_operand.vmem [shape: bf16[128,128], index: 0, kind: input, shape index: {}]   ;;  %s1275_s1 = inlined_call_operand.vmem [shape: bf16[128,256], index: 1, kind: input, shape index: {}]   ;;  %s1276_s2 = inlined_call_operand.vmem [shape: f32[1,256], index: 2, kind: input, shape index: {}]   ;;  %s1277_s3 = inlined_call_operand.vmem [shape: f32[128,256], index: 3, kind: output, shape index: {}]  }
   0x1   :  { %s1111_s14 = smov 0   ;;  %s1113_s15 = smov 0  }
   0x2   :  { %s1115_s16 = smov 0  }
   0x3 LB: > { %s28_s17 = sadd.s32 1, %s1081_s15  ;;  %s896_s18 = sadd.s32 4294967295, %s1085_s16   ;;  %s1085_s16 = sphi %s1115_s16, %s13_s16   ;;  %s1081_s15 = sphi %s1113_s15, %s1282_s15   ;;  %s1077_s14 = sphi %s1111_s14, %s1281_s14   ;;  %s1073_s13 = sphi %s1109_s13, %s1280_s13   ;;  %s1069_s12 = sphi %s1107_s12, %s1279_s12  }
   0x4   : > { %p30_p0 = scmp.ge.s32.totalorder %s28_s17, 2  ;;  %p76_p1 = scmp.ne.s32.totalorder %s1073_s13, %s1069_s12 }
   0x5   : > { %p77_p2 = scmp.eq.s32.totalorder %s1085_s16, 0  ;;  %p134_p4 = scmp.eq.s32.totalorder %s896_s18, 1 }
   0x6   : > { %s1284_s17 = smov (%p30_p0, %s28_s17), 0  ;;  %s69_s20 = sadd.s32 1, %s1073_s13 }
   0x7   : > { %p78_p3 = por %p77_p2, %p76_p1  ;;  %s65_s19 = ssub.s32 %s1081_s15, %s1284_s17 }
   0x8   : > { %p67_p5 = scmp.eq.s32.totalorder %s65_s19, 0  ;;  %p1142_p6 = por %p134_p4, %p76_p1 }
   0x9   : > { %p900_p7 = scmp.ge.s32.totalorder %s1085_s16, 2 }
   0xa   : > { %s1147_s22 = scalar_select %p67_p5, %s1073_s13, %s69_s20  }
   0xb   : > { %168 = sbr.rel (%p900_p7) target bundleno = 32 (0x20), region = 20 }
  0x12   : > { %171 = sbr.rel (!%p78_p3) target bundleno = 32 (0x20), region = 24  ;;  %s173_s23 = sand.u32 (%p78_p3), 1, %s1073_s13  }
  0x13   : > { %s902_s24 = sshll.u32 (%p78_p3), %s1081_s15, 2  ;;  %s901_s25 = sshll.u32 (%p78_p3), %s173_s23, 6 }
  0x14   : > { %s1155_s28 = scalar_lea.vmem (%p78_p3), %s1275_s1, %s902_s24  ;;  %s175_s29 = scalar_lea.vmem (%p78_p3), [#allocation3], %s901_s25 }
  0x15   : > { %v196_v0 = vld [vmem:[%s1155_s28] sm:$0xf] (%p78_p3)  ;;  %v198_v1 = vld [vmem:[%s1155_s28 + $0x8] sm:$0xf] (%p78_p3)  ;;  %v200_v2 = vld [vmem:[%s1155_s28 + $0x10] sm:$0xf] (%p78_p3) }
  0x16   : > { %197 = vst [vmem:[%s175_s29] sm:$0xf] (%p78_p3), %v196_v0  ;;  %199 = vst [vmem:[%s175_s29 + $0x4] sm:$0xf] (%p78_p3), %v198_v1  ;;  %v202_v3 = vld [vmem:[%s1155_s28 + $0x18] sm:$0xf] (%p78_p3) }
  0x17   : > { %v204_v4 = vld [vmem:[%s1155_s28 + $0x20] sm:$0xf] (%p78_p3)  ;;  %201 = vst [vmem:[%s175_s29 + $0x8] sm:$0xf] (%p78_p3), %v200_v2  ;;  %203 = vst [vmem:[%s175_s29 + $0xc] sm:$0xf] (%p78_p3), %v202_v3 }
  0x18   : > { %205 = vst [vmem:[%s175_s29 + $0x10] sm:$0xf] (%p78_p3), %v204_v4  ;;  %v206_v5 = vld [vmem:[%s1155_s28 + $0x28] sm:$0xf] (%p78_p3)  ;;  %v208_v6 = vld [vmem:[%s1155_s28 + $0x30] sm:$0xf] (%p78_p3) }
  0x19   : > { %v210_v7 = vld [vmem:[%s1155_s28 + $0x38] sm:$0xf]  ;;  %207 = vst [vmem:[%s175_s29 + $0x14] sm:$0xf] %v206_v5  ;;  %209 = vst [vmem:[%s175_s29 + $0x18] sm:$0xf] %v208_v6 }
  0x1a   : > { %211 = vst [vmem:[%s175_s29 + $0x1c] sm:$0xf] %v210_v7  ;;  %v212_v8 = vld [vmem:[%s1155_s28 + $0x40] sm:$0xf]  ;;  %v214_v9 = vld [vmem:[%s1155_s28 + $0x48] sm:$0xf] }
  0x1b   : > { %v216_v10 = vld [vmem:[%s1155_s28 + $0x50] sm:$0xf]  ;;  %213 = vst [vmem:[%s175_s29 + $0x20] sm:$0xf] %v212_v8  ;;  %215 = vst [vmem:[%s175_s29 + $0x24] sm:$0xf] %v214_v9 }
  0x1c   : > { %217 = vst [vmem:[%s175_s29 + $0x28] sm:$0xf] %v216_v10  ;;  %v218_v11 = vld [vmem:[%s1155_s28 + $0x58] sm:$0xf]  ;;  %v220_v12 = vld [vmem:[%s1155_s28 + $0x60] sm:$0xf] }
  0x1d   : > { %v222_v13 = vld [vmem:[%s1155_s28 + $0x68] sm:$0xf]  ;;  %219 = vst [vmem:[%s175_s29 + $0x2c] sm:$0xf] %v218_v11  ;;  %221 = vst [vmem:[%s175_s29 + $0x30] sm:$0xf] %v220_v12 }
  0x1e   : > { %223 = vst [vmem:[%s175_s29 + $0x34] sm:$0xf] %v222_v13  ;;  %v224_v14 = vld [vmem:[%s1155_s28 + $0x70] sm:$0xf]  ;;  %v226_v15 = vld [vmem:[%s1155_s28 + $0x78] sm:$0xf] }
  0x1f   : > { %225 = vst [vmem:[%s175_s29 + $0x38] sm:$0xf] %v224_v14  ;;  %227 = vst [vmem:[%s175_s29 + $0x3c] sm:$0xf] %v226_v15 }
  0x20 PF: > { %p903_p8 = scmp.ge.s32.totalorder %s1085_s16, 1  ;;  %p287_p9 = scmp.lt.s32.totalorder %s1085_s16, 3 }
  0x22   : > { %p288_p10 = pnand %p903_p8, %p287_p9 }
  0x23   : > { %s294_s30 = sand.u32 (!%p288_p10), 1, %s1069_s12   ;;  %v1039_v16 = vld [vmem:[%s1274_s0] sm:$0xff] (!%p288_p10)   ;;  %v1041_v26 = vld [vmem:[%s1274_s0 + $0x8] sm:$0xff] (!%p288_p10)   ;;  %v1043_v28 = vld [vmem:[%s1274_s0 + $0x10] sm:$0xff] (!%p288_p10)   ;;  %p337_p11 = scmp.lt.s32.totalorder (!%p288_p10), %s1077_s14, 1 }
  0x24   : > { %291 = sbr.rel (%p288_p10) target bundleno = 306 (0x132), region = 69  ;;  %s904_s6 = sshll.u32 (!%p288_p10), %s294_s30, 6  ;;  %v1040_v17 = vld [vmem:[%s1274_s0 + $0x20] sm:$0xff] (!%p288_p10)   ;;  %959 = vmatprep.mubr.bf16.mxu0 (!%p288_p10), %v1039_v16  ;;  %v1042_v27 = vld [vmem:[%s1274_s0 + $0x28] sm:$0xff] (!%p288_p10)   ;;  %v1044_v29 = vld [vmem:[%s1274_s0 + $0x30] sm:$0xff] (!%p288_p10)  }
  0x25   : > { %s1184_s9 = scalar_lea.vmem (!%p288_p10), [#allocation3], %s904_s6  ;;  %967 = vmatprep.mubr.bf16.mxu1 (!%p288_p10), %v1040_v17  ;;  %v1045_v30 = vld [vmem:[%s1274_s0 + $0x18] sm:$0xff] (!%p288_p10)   ;;  %s905_s8 = sshll.u32 (!%p288_p10), %s294_s30, 7 }
  0x26   : > { %v1031_v18 = vld [vmem:[%s1184_s9] sm:$0xff] (!%p288_p10)   ;;  %v1032_v19 = vld [vmem:[%s1184_s9 + $0x8] sm:$0xff] (!%p288_p10)   ;;  %v1033_v20 = vld [vmem:[%s1184_s9 + $0x10] sm:$0xff] (!%p288_p10)  }
  0x27   : > { %943 = vmatprep.subr.bf16.mxu0 (!%p288_p10), %v1031_v18  ;;  %975 = vmatprep.subr.bf16.mxu1 (!%p288_p10), %v1031_v18  ;;  %v1034_v21 = vld [vmem:[%s1184_s9 + $0x18] sm:$0xff] (!%p288_p10)   ;;  %v1035_v22 = vld [vmem:[%s1184_s9 + $0x20] sm:$0xff] (!%p288_p10)   ;;  %v1036_v23 = vld [vmem:[%s1184_s9 + $0x28] sm:$0xff] (!%p288_p10)  }
  0x28   : > { %944 = vmatpush3.bf16.msra.mxu0 (!%p288_p10), %v1031_v18  ;;  %983 = vmatpush3.bf16.msra.mxu1 (!%p288_p10), %v1031_v18  ;;  %v1037_v24 = vld [vmem:[%s1184_s9 + $0x30] sm:$0xff] (!%p288_p10)   ;;  %v1038_v25 = vld [vmem:[%s1184_s9 + $0x38] sm:$0xff] (!%p288_p10)   ;;  %s1219_s9 = scalar_lea.vmem (!%p288_p10), [#allocation4], %s905_s8 }
  0x29   : > { %945 = vmatprep.subr.bf16.mxu0 (!%p288_p10), %v1032_v19  ;;  %976 = vmatprep.subr.bf16.mxu1 (!%p288_p10), %v1032_v19  ;;  %v1046_v31 = vld [vmem:[%s1274_s0 + $0x38] sm:$0xff] (!%p288_p10)  }
  0x2b   : > { %s338_s4 = scalar_select %p337_p11, %s1077_s14, 1 }
  0x2c   : > { %946 = vmatpush3.bf16.msra.mxu0 %v1032_v19  ;;  %984 = vmatpush3.bf16.msra.mxu1 %v1032_v19  ;;  %s924_s12 = sshll.u32 (%p1142_p6), %s1077_s14, 3 }
  0x2d   : > { %947 = vmatprep.subr.bf16.mxu0 %v1033_v20  ;;  %977 = vmatprep.subr.bf16.mxu1 %v1033_v20  ;;  %s339_s7 = scalar_lea.vmem %s1276_s2, %s338_s4  ;;  %s704_s11 = scalar_lea.vmem (%p1142_p6), %s1277_s3, %s924_s12 }
  0x2e   : > { %v922_v32 = vld [vmem:[%s339_s7] ss:$0 sm:$0xff] }
  0x30   : > { %948 = vmatpush3.bf16.msra.mxu0 %v1033_v20  ;;  %985 = vmatpush3.bf16.msra.mxu1 %v1033_v20 }
  0x31   : > { %949 = vmatprep.subr.bf16.mxu0 %v1034_v21  ;;  %978 = vmatprep.subr.bf16.mxu1 %v1034_v21 }
  0x34   : > { %950 = vmatpush3.bf16.msra.mxu0 %v1034_v21  ;;  %986 = vmatpush3.bf16.msra.mxu1 %v1034_v21 }
  0x35   : > { %951 = vmatprep.subr.bf16.mxu0 %v1035_v22  ;;  %979 = vmatprep.subr.bf16.mxu1 %v1035_v22 }
  0x38   : > { %952 = vmatpush3.bf16.msra.mxu0 %v1035_v22  ;;  %987 = vmatpush3.bf16.msra.mxu1 %v1035_v22 }
  0x39   : > { %953 = vmatprep.subr.bf16.mxu0 %v1036_v23  ;;  %980 = vmatprep.subr.bf16.mxu1 %v1036_v23 }
  0x3c   : > { %954 = vmatpush3.bf16.msra.mxu0 %v1036_v23  ;;  %988 = vmatpush3.bf16.msra.mxu1 %v1036_v23 }
  0x3d   : > { %955 = vmatprep.subr.bf16.mxu0 %v1037_v24  ;;  %981 = vmatprep.subr.bf16.mxu1 %v1037_v24 }
  0x40   : > { %956 = vmatpush3.bf16.msra.mxu0 %v1037_v24  ;;  %989 = vmatpush3.bf16.msra.mxu1 %v1037_v24 }
  0x41   : > { %957 = vmatprep.subr.bf16.mxu0 %v1038_v25  ;;  %982 = vmatprep.subr.bf16.mxu1 %v1038_v25 }
  0x44   : > { %958 = vmatpush3.bf16.msra.mxu0 %v1038_v25  ;;  %990 = vmatpush3.bf16.msra.mxu1 %v1038_v25 }
  0x47   : > { %960 = vmatmul.mubr.bf16.vlgmr.msra.gmra.mrb[0].mxu0 %v1041_v26  ;;  %968 = vmatmul.mubr.bf16.vlgmr.msra.gmra.mrb[0].mxu1 %v1042_v27 }
  0x48   : > { %963 = vmatprep.mubr.bf16.mxu0 %v1043_v28  ;;  %971 = vmatprep.mubr.bf16.mxu1 %v1044_v29 }
  0x4f   : > { %964 = vmatmul.mubr.bf16.gmra.mrb[4].mxu0 %v1045_v30  ;;  %972 = vmatmul.mubr.bf16.gmra.mrb[4].mxu1 %v1046_v31 }
 0x11a   : > { %v961_v33 = vpop.f32.mrb[0].mxu0  ;;  %v969_v34 = vpop.f32.mrb[0].mxu1 }
 0x11b   : > { %v663_v35 = vadd.f32 %v961_v33, %v922_v32  ;;  %v671_v36 = vadd.f32 %v969_v34, %v922_v32  ;;  %v540_v37 = vpop.f32.mrb[1].mxu0  ;;  %v572_v38 = vpop.f32.mrb[1].mxu1 }
 0x11c   : > { %v661_v39 = vadd.f32 %v922_v32, %v540_v37  ;;  %v669_v40 = vadd.f32 %v922_v32, %v572_v38  ;;  %v962_v41 = vpop.f32.mrb[2].mxu0  ;;  %v970_v42 = vpop.f32.mrb[2].mxu1 }
 0x11d   : > { %679 = vst [vmem:[%s1219_s9 + $0x10] sm:$0xff] %v663_v35  ;;  %687 = vst [vmem:[%s1219_s9 + $0x50] sm:$0xff] %v671_v36  ;;  %v664_v43 = vadd.f32 %v962_v41, %v922_v32  ;;  %v672_v44 = vadd.f32 %v970_v42, %v922_v32  ;;  %v543_v45 = vpop.f32.mrb[3].mxu0  ;;  %v575_v46 = vpop.f32.mrb[3].mxu1 }
 0x11e   : > { %677 = vst [vmem:[%s1219_s9] sm:$0xff] %v661_v39  ;;  %685 = vst [vmem:[%s1219_s9 + $0x40] sm:$0xff] %v669_v40  ;;  %v662_v47 = vadd.f32 %v922_v32, %v543_v45  ;;  %v670_v48 = vadd.f32 %v922_v32, %v575_v46 }
 0x11f   : > { %680 = vst [vmem:[%s1219_s9 + $0x18] sm:$0xff] %v664_v43  ;;  %688 = vst [vmem:[%s1219_s9 + $0x58] sm:$0xff] %v672_v44 }
 0x120   : > { %678 = vst [vmem:[%s1219_s9 + $0x8] sm:$0xff] %v662_v47  ;;  %686 = vst [vmem:[%s1219_s9 + $0x48] sm:$0xff] %v670_v48 }
 0x122   : > { %v965_v49 = vpop.f32.mrb[4].mxu0  ;;  %v973_v50 = vpop.f32.mrb[4].mxu1  ;;  %699 = sbr.rel (!%p1142_p6) target bundleno = 306 (0x132), region = 85 }
 0x123   : > { %v667_v51 = vadd.f32 %v965_v49, %v922_v32  ;;  %v675_v52 = vadd.f32 %v973_v50, %v922_v32  ;;  %v556_v53 = vpop.f32.mrb[5].mxu0  ;;  %v588_v54 = vpop.f32.mrb[5].mxu1 }
 0x124   : > { %v665_v55 = vadd.f32 %v922_v32, %v556_v53  ;;  %v673_v56 = vadd.f32 %v922_v32, %v588_v54  ;;  %v966_v57 = vpop.f32.mrb[6].mxu0  ;;  %v974_v58 = vpop.f32.mrb[6].mxu1  ;;  %v766_v3 = vld [vmem:[%s1219_s9 + $0x10] sm:$0xff] (%p1142_p6) }
 0x125   : > { %683 = vst [vmem:[%s1219_s9 + $0x30] sm:$0xff] %v667_v51  ;;  %691 = vst [vmem:[%s1219_s9 + $0x70] sm:$0xff] %v675_v52  ;;  %v668_v59 = vadd.f32 %v966_v57, %v922_v32  ;;  %v676_v60 = vadd.f32 %v974_v58, %v922_v32  ;;  %v559_v61 = vpop.f32.mrb[7].mxu0  ;;  %v591_v62 = vpop.f32.mrb[7].mxu1  ;;  %v762_v1 = vld [vmem:[%s1219_s9] sm:$0xff] (%p1142_p6)  ;;  %v782_v11 = vld [vmem:[%s1219_s9 + $0x50] sm:$0xff] (%p1142_p6) }
 0x126   : > { %681 = vst [vmem:[%s1219_s9 + $0x20] sm:$0xff] %v665_v55  ;;  %689 = vst [vmem:[%s1219_s9 + $0x60] sm:$0xff] %v673_v56  ;;  %v666_v63 = vadd.f32 %v922_v32, %v559_v61  ;;  %v674_v0 = vadd.f32 %v922_v32, %v591_v62  ;;  %v768_v4 = vld [vmem:[%s1219_s9 + $0x18] sm:$0xff] (%p1142_p6)  ;;  %v778_v9 = vld [vmem:[%s1219_s9 + $0x40] sm:$0xff] (%p1142_p6) }
 0x127   : > { %684 = vst [vmem:[%s1219_s9 + $0x38] sm:$0xff] %v668_v59  ;;  %692 = vst [vmem:[%s1219_s9 + $0x78] sm:$0xff] %v676_v60  ;;  %v764_v2 = vld [vmem:[%s1219_s9 + $0x8] sm:$0xff] (%p1142_p6)  ;;  %v784_v12 = vld [vmem:[%s1219_s9 + $0x58] sm:$0xff] (%p1142_p6) }
 0x128   : > { %682 = vst [vmem:[%s1219_s9 + $0x28] sm:$0xff] %v666_v63  ;;  %690 = vst [vmem:[%s1219_s9 + $0x68] sm:$0xff] %v674_v0  ;;  %v780_v10 = vld [vmem:[%s1219_s9 + $0x48] sm:$0xff] (%p1142_p6) }
 0x129   : > { %763 = vst [vmem:[%s704_s11] sm:$0xff] %v762_v1  ;;  %765 = vst [vmem:[%s704_s11 + $0x10] sm:$0xff] %v764_v2 }
 0x12a   : > { %767 = vst [vmem:[%s704_s11 + $0x20] sm:$0xff] %v766_v3  ;;  %769 = vst [vmem:[%s704_s11 + $0x30] sm:$0xff] %v768_v4 }
 0x12b   : > { %779 = vst [vmem:[%s704_s11 + $0x80] sm:$0xff] %v778_v9  ;;  %781 = vst [vmem:[%s704_s11 + $0x90] sm:$0xff] %v780_v10 }
 0x12c   : > { %v774_v7 = vld [vmem:[%s1219_s9 + $0x30] sm:$0xff]  ;;  %783 = vst [vmem:[%s704_s11 + $0xa0] sm:$0xff] %v782_v11  ;;  %785 = vst [vmem:[%s704_s11 + $0xb0] sm:$0xff] %v784_v12 }
 0x12d   : > { %v770_v5 = vld [vmem:[%s1219_s9 + $0x20] sm:$0xff]  ;;  %775 = vst [vmem:[%s704_s11 + $0x60] sm:$0xff] %v774_v7  ;;  %v790_v15 = vld [vmem:[%s1219_s9 + $0x70] sm:$0xff] }
 0x12e   : > { %771 = vst [vmem:[%s704_s11 + $0x40] sm:$0xff] %v770_v5  ;;  %v776_v8 = vld [vmem:[%s1219_s9 + $0x38] sm:$0xff]  ;;  %v786_v13 = vld [vmem:[%s1219_s9 + $0x60] sm:$0xff]  ;;  %791 = vst [vmem:[%s704_s11 + $0xe0] sm:$0xff] %v790_v15 }
 0x12f   : > { %v772_v6 = vld [vmem:[%s1219_s9 + $0x28] sm:$0xff]  ;;  %777 = vst [vmem:[%s704_s11 + $0x70] sm:$0xff] %v776_v8  ;;  %787 = vst [vmem:[%s704_s11 + $0xc0] sm:$0xff] %v786_v13  ;;  %v792_v16 = vld [vmem:[%s1219_s9 + $0x78] sm:$0xff] }
 0x130   : > { %773 = vst [vmem:[%s704_s11 + $0x50] sm:$0xff] %v772_v6  ;;  %v788_v14 = vld [vmem:[%s1219_s9 + $0x68] sm:$0xff]  ;;  %793 = vst [vmem:[%s704_s11 + $0xf0] sm:$0xff] %v792_v16 }
 0x131   : > { %789 = vst [vmem:[%s704_s11 + $0xd0] sm:$0xff] %v788_v14 }
 0x132 PF: > { %s13_s16 = sadd.s32 1, %s1085_s16   ;;  %s1279_s12 = smov %s1073_s13 }
 0x133   : > { %p10_p12 = scmp.ge.s32.totalorder %s13_s16, 4   ;;  %s1280_s13 = smov %s1147_s22 }
 0x134   : > { %s1281_s14 = smov %s1081_s15  ;;  %s1282_s15 = smov %s1284_s17 }
 0x135   :  { %12 = sbr.rel (!%p10_p12) target bundleno = 3 (0x3), region = 160 }

// kernel: _lambda_.24
= control target key start
LH: loop header
LB: loop body
LE: loop exit
PB: predicated region body
PF: predicated region fallthrough
CT: control target
= control target key end

     0   :  { %s433_s12 = smov 0   ;;  %s487_s0 = inlined_call_operand.vmem [shape: f32[2,8,8,64], index: 0, kind: input, shape index: {}]   ;;  %s488_s1 = inlined_call_operand.vmem [shape: f32[1,1,64], index: 1, kind: input, shape index: {}]   ;;  %s489_s2 = inlined_call_operand.vmem [shape: f32[1,1,64], index: 2, kind: input, shape index: {}]   ;;  %s490_s3 = inlined_call_operand.vmem [shape: f32[2,8,8,64], index: 3, kind: output, shape index: {}]  }
   0x1 LB: > { %s372_s13 = sadd.s32 4294967295, %s411_s12   ;;  %p376_p0 = scmp.ge.s32.totalorder %s411_s12, 1  ;;  %s411_s12 = sphi %s433_s12, %s13_s12  }
   0x2   : > { %p137_p1 = scmp.lt.s32.totalorder %s411_s12, 3 }
   0x4   : > { %p138_p2 = pnand %p376_p0, %p137_p1 }
   0x5   : > { %p161_p3 = scmp.lt.s32.totalorder (!%p138_p2), %s372_s13, 1  ;;  %vm179_vm0 = vcmask (!%p138_p2), 523264  }
   0x6   : > { %141 = sbr.rel (%p138_p2) target bundleno = 556 (0x22c), region = 32 }
   0xd   : > { %s492_s13 = smov (!%p161_p3, %s372_s13), 1 }
   0xe   : > { %s385_s14 = sshll.u32 %s492_s13, 6 }
   0xf   : > { %s165_s17 = scalar_lea.vmem %s487_s0, %s385_s14  ;;  %s170_s30 = scalar_lea.vmem %s490_s3, %s385_s14 }
  0x10   : > { %v171_v0 = vld [vmem:[%s165_s17] sm:$0xff]  ;;  %v172_v1 = vld [vmem:[%s165_s17 + $0x8] sm:$0xff]  ;;  %v173_v2 = vld [vmem:[%s165_s17 + $0x10] sm:$0xff] }
  0x11   : > { %v174_v3 = vld [vmem:[%s165_s17 + $0x18] sm:$0xff]  ;;  %v180_v4 = vsel %vm179_vm0, %v171_v0, 0.0  ;;  %v181_v5 = vsel %vm179_vm0, %v172_v1, 0.0  ;;  %v183_v6 = vsel %vm179_vm0, %v173_v2, 0.0  ;;  %v175_v7 = vld [vmem:[%s165_s17 + $0x20] sm:$0xff]  ;;  %v176_v10 = vld [vmem:[%s165_s17 + $0x28] sm:$0xff] }
  0x12   : > { %v182_v8 = vadd.f32 %v181_v5, %v180_v4  ;;  %v185_v9 = vsel %vm179_vm0, %v174_v3, 0.0  ;;  %v187_v12 = vsel %vm179_vm0, %v175_v7, 0.0  ;;  %v177_v13 = vld [vmem:[%s165_s17 + $0x30] sm:$0xff]  ;;  %v189_v15 = vsel %vm179_vm0, %v176_v10, 0.0  ;;  %v178_v16 = vld [vmem:[%s165_s17 + $0x38] sm:$0xff] }
  0x13   : > { %v191_v18 = vsel %vm179_vm0, %v177_v13, 0.0  ;;  %v193_v20 = vsel %vm179_vm0, %v178_v16, 0.0 }
  0x14   : > { %v184_v11 = vadd.f32 %v183_v6, %v182_v8 }
  0x16   : > { %v186_v14 = vadd.f32 %v185_v9, %v184_v11 }
  0x18   : > { %v188_v17 = vadd.f32 %v187_v12, %v186_v14 }
  0x1a   : > { %v190_v19 = vadd.f32 %v189_v15, %v188_v17 }
  0x1c   : > { %v192_v21 = vadd.f32 %v191_v18, %v190_v19 }
  0x1e   : > { %v194_v22 = vadd.f32 %v193_v20, %v192_v21 }
  0x20   : > { %195 = vadd.xlane.f32.xlu0 %v194_v22  ;;  %v382_v22 = vld [vmem:[%s489_s2] ss:$0 sm:$0xff] }
  0xad   : > { %v196_v23 = vpop.xlane.xlu0 %195 }
  0xae   : > { %v197_v24 = vrot.slane %v196_v23, 4 }
  0xb0   : > { %v198_v25 = vadd.f32 %v197_v24, %v196_v23 }
  0xb2   : > { %v199_v26 = vrot.slane %v198_v25, 2 }
  0xb4   : > { %v200_v27 = vadd.f32 %v199_v26, %v198_v25 }
  0xb6   : > { %v201_v28 = vrot.slane %v200_v27, 1 }
  0xb8   : > { %v202_v29 = vadd.f32 %v201_v28, %v200_v27 }
  0xba   : > { %387 = vpush %v202_v29 }
  0xeb   : > { %s388_s18 = spop %387 }
  0xec   : > { %s206_s19 = smul.f32 0.00024414063, %s388_s18 }
  0xee   : > { %v207_v30 = vstv %s206_s19 }
  0xef   : > { %v208_v31 = vsub.f32 %v171_v0, %v207_v30  ;;  %v209_v32 = vsub.f32 %v172_v1, %v207_v30  ;;  %v210_v33 = vsub.f32 %v173_v2, %v207_v30  ;;  %v211_v34 = vsub.f32 %v174_v3, %v207_v30 }
  0xf0   : > { %v212_v35 = vsub.f32 %v175_v7, %v207_v30  ;;  %v213_v39 = vsub.f32 %v176_v10, %v207_v30  ;;  %v214_v44 = vsub.f32 %v177_v13, %v207_v30  ;;  %v215_v48 = vsub.f32 %v178_v16, %v207_v30  ;;  %v381_v13 = vld [vmem:[%s488_s1] ss:$0 sm:$0xff] }
  0xf1   : > { %v216_v36 = vmul.f32 %v208_v31, %v208_v31  ;;  %v217_v37 = vmul.f32 %v209_v32, %v209_v32  ;;  %v218_v38 = vmul.f32 %v210_v33, %v210_v33  ;;  %v219_v40 = vmul.f32 %v211_v34, %v211_v34 }
  0xf2   : > { %v220_v45 = vmul.f32 %v212_v35, %v212_v35  ;;  %v221_v49 = vmul.f32 %v213_v39, %v213_v39  ;;  %v222_v52 = vmul.f32 %v214_v44, %v214_v44  ;;  %v223_v55 = vmul.f32 %v215_v48, %v215_v48 }
  0xf3   : > { %v224_v41 = vsel %vm179_vm0, %v216_v36, 0.0  ;;  %v225_v42 = vsel %vm179_vm0, %v217_v37, 0.0  ;;  %v227_v46 = vsel %vm179_vm0, %v218_v38, 0.0  ;;  %v229_v50 = vsel %vm179_vm0, %v219_v40, 0.0 }
  0xf4   : > { %v226_v43 = vadd.f32 %v225_v42, %v224_v41  ;;  %v231_v53 = vsel %vm179_vm0, %v220_v45, 0.0  ;;  %v233_v56 = vsel %vm179_vm0, %v221_v49, 0.0  ;;  %v235_v58 = vsel %vm179_vm0, %v222_v52, 0.0 }
  0xf5   : > { %v237_v60 = vsel %vm179_vm0, %v223_v55, 0.0 }
  0xf6   : > { %v228_v47 = vadd.f32 %v227_v46, %v226_v43 }
  0xf8   : > { %v230_v51 = vadd.f32 %v229_v50, %v228_v47 }
  0xfa   : > { %v232_v54 = vadd.f32 %v231_v53, %v230_v51 }
  0xfc   : > { %v234_v57 = vadd.f32 %v233_v56, %v232_v54 }
  0xfe   : > { %v236_v59 = vadd.f32 %v235_v58, %v234_v57 }
 0x100   : > { %v238_v61 = vadd.f32 %v237_v60, %v236_v59 }
 0x102   : > { %239 = vadd.xlane.f32.xlu0 %v238_v61 }
 0x18f   : > { %v240_v62 = vpop.xlane.xlu0 %239 }
 0x190   : > { %v241_v63 = vrot.slane %v240_v62, 4 }
 0x192   : > { %v242_v0 = vadd.f32 %v241_v63, %v240_v62 }
 0x194   : > { %v243_v1 = vrot.slane %v242_v0, 2 }
 0x196   : > { %v244_v2 = vadd.f32 %v243_v1, %v242_v0 }
 0x198   : > { %v245_v3 = vrot.slane %v244_v2, 1 }
 0x19a   : > { %v246_v4 = vadd.f32 %v245_v3, %v244_v2 }
 0x19c   : > { %389 = vpush %v246_v4 }
 0x1cd   : > { %s390_s20 = spop %389 }
 0x1ce   : > { %s250_s21 = smul.f32 0.00024420026, %s390_s20 }
 0x1d0   : > { %v251_v5 = vstv %s250_s21 }
 0x1d1   : > { %401 = vrsqrt.f32 %v251_v5  ;;  %vm254_vm1 = vcmp.eq.f32.partialorder %v251_v5, inf  ;;  %v257_v8 = vand.u32 2147483648, %v251_v5  ;;  %vm256_vm2 = vcmp.eq.f32.partialorder %v251_v5, 0.0 }
 0x1db   : > { %v402_v6 = vpop.eup %401 }
 0x1dc   : > { %v253_v7 = vmul.f32 %v402_v6, %v251_v5 }
 0x1de   : > { %v255_v9 = vsel %vm254_vm1, %v251_v5, %v253_v7 }
 0x1df   : > { %v258_v10 = vsel %vm256_vm2, %v257_v8, %v255_v9 }
 0x1e0   : > { %391 = vpush %v258_v10 }
 0x211   : > { %s392_s22 = spop %391 }
 0x212   : > { %s260_s23 = sadd.f32 1e-05, %s392_s22 }
 0x214   : > { %v261_v11 = vstv %s260_s23 }
 0x215   : > { %403 = vrcp.f32 %v261_v11 }
 0x21f   : > { %v404_v12 = vpop.eup %403 }
 0x220   : > { %v263_v14 = vmul.f32 %v404_v12, %v208_v31  ;;  %v264_v15 = vmul.f32 %v404_v12, %v209_v32  ;;  %v265_v16 = vmul.f32 %v404_v12, %v210_v33  ;;  %v266_v17 = vmul.f32 %v404_v12, %v211_v34 }
 0x221   : > { %v267_v18 = vmul.f32 %v404_v12, %v212_v35  ;;  %v268_v19 = vmul.f32 %v404_v12, %v213_v39  ;;  %v269_v20 = vmul.f32 %v404_v12, %v214_v44  ;;  %v270_v21 = vmul.f32 %v404_v12, %v215_v48 }
 0x222   : > { %v278_v23 = vmul.f32 %v381_v13, %v263_v14  ;;  %v279_v24 = vmul.f32 %v381_v13, %v264_v15  ;;  %v280_v25 = vmul.f32 %v381_v13, %v265_v16  ;;  %v281_v26 = vmul.f32 %v381_v13, %v266_v17 }
 0x223   : > { %v282_v27 = vmul.f32 %v381_v13, %v267_v18  ;;  %v283_v28 = vmul.f32 %v381_v13, %v268_v19  ;;  %v284_v29 = vmul.f32 %v381_v13, %v269_v20  ;;  %v285_v30 = vmul.f32 %v381_v13, %v270_v21 }
 0x224   : > { %v293_v31 = vadd.f32 %v382_v22, %v278_v23  ;;  %v294_v32 = vadd.f32 %v382_v22, %v279_v24  ;;  %v295_v33 = vadd.f32 %v382_v22, %v280_v25  ;;  %v296_v34 = vadd.f32 %v382_v22, %v281_v26 }
 0x225   : > { %v297_v35 = vadd.f32 %v382_v22, %v282_v27  ;;  %v298_v36 = vadd.f32 %v382_v22, %v283_v28  ;;  %v299_v37 = vadd.f32 %v382_v22, %v284_v29  ;;  %v300_v38 = vadd.f32 %v382_v22, %v285_v30 }
 0x226   : > { %v301_v39 = vmax.f32 %v293_v31, 0.0  ;;  %v302_v40 = vmax.f32 %v294_v32, 0.0  ;;  %v303_v41 = vmax.f32 %v295_v33, 0.0  ;;  %v304_v42 = vmax.f32 %v296_v34, 0.0 }
 0x227   : > { %v305_v43 = vmax.f32 %v297_v35, 0.0  ;;  %v306_v44 = vmax.f32 %v298_v36, 0.0  ;;  %v307_v45 = vmax.f32 %v299_v37, 0.0  ;;  %v308_v46 = vmax.f32 %v300_v38, 0.0 }
 0x228   : > { %309 = vst.msk [vmem:[%s170_s30] sm:$0xff] %vm179_vm0, %v301_v39  ;;  %310 = vst.msk [vmem:[%s170_s30 + $0x8] sm:$0xff] %vm179_vm0, %v302_v40 }
 0x229   : > { %311 = vst.msk [vmem:[%s170_s30 + $0x10] sm:$0xff] %vm179_vm0, %v303_v41  ;;  %312 = vst.msk [vmem:[%s170_s30 + $0x18] sm:$0xff] %vm179_vm0, %v304_v42 }
 0x22a   : > { %313 = vst.msk [vmem:[%s170_s30 + $0x20] sm:$0xff] %vm179_vm0, %v305_v43  ;;  %314 = vst.msk [vmem:[%s170_s30 + $0x28] sm:$0xff] %vm179_vm0, %v306_v44 }
 0x22b   : > { %315 = vst.msk [vmem:[%s170_s30 + $0x30] sm:$0xff] %vm179_vm0, %v307_v45  ;;  %316 = vst.msk [vmem:[%s170_s30 + $0x38] sm:$0xff] %vm179_vm0, %v308_v46 }
 0x22c PF: > { %s13_s12 = sadd.s32 1, %s411_s12  }
 0x22d   : > { %p10_p4 = scmp.ge.s32.totalorder %s13_s12, 4  }
 0x22f   :  { %12 = sbr.rel (!%p10_p4) target bundleno = 1 (0x1), region = 62 }

// kernel: _lambda_.23
= control target key start
LH: loop header
LB: loop body
LE: loop exit
PB: predicated region body
PF: predicated region fallthrough
CT: control target
= control target key end

     0   :  { %s804_s1 = inlined_call_operand.vmem [shape: bf16[256,128], index: 1, kind: input, shape index: {}]   ;;  %s805_s0 = inlined_call_operand.vmem [shape: bf16[128,256], index: 0, kind: input, shape index: {}]   ;;  %s806_s2 = inlined_call_operand.vmem [shape: f32[1,128], index: 2, kind: input, shape index: {}]   ;;  %s807_s3 = inlined_call_operand.vmem [shape: f32[128,128], index: 3, kind: output, shape index: {}]  }
   0x1   :  { %v579_v0 = vld [vmem:[%s804_s1 + $0x40] sm:$0xff]   ;;  %v581_v2 = vld [vmem:[%s804_s1 + $0x48] sm:$0xff]   ;;  %v583_v4 = vld [vmem:[%s804_s1 + $0x50] sm:$0xff]  }
   0x2   :  { %v580_v1 = vld [vmem:[%s804_s1] sm:$0xff]   ;;  %499 = vmatprep.subr.bf16.mxu0 %v579_v0  ;;  %563 = vmatprep.subr.bf16.mxu1 %v579_v0  ;;  %v582_v3 = vld [vmem:[%s804_s1 + $0x8] sm:$0xff]   ;;  %v584_v5 = vld [vmem:[%s804_s1 + $0x10] sm:$0xff]  }
   0x3   :  { %500 = vmatpush3.bf16.msra.mxu0 %v580_v1  ;;  %571 = vmatpush3.bf16.msra.mxu1 %v580_v1  ;;  %v585_v6 = vld [vmem:[%s804_s1 + $0x58] sm:$0xff]   ;;  %v587_v8 = vld [vmem:[%s804_s1 + $0x60] sm:$0xff]   ;;  %v589_v10 = vld [vmem:[%s804_s1 + $0x68] sm:$0xff]  }
   0x4   :  { %501 = vmatprep.subr.bf16.mxu0 %v581_v2  ;;  %564 = vmatprep.subr.bf16.mxu1 %v581_v2  ;;  %v586_v7 = vld [vmem:[%s804_s1 + $0x18] sm:$0xff]   ;;  %v588_v9 = vld [vmem:[%s804_s1 + $0x20] sm:$0xff]   ;;  %v590_v13 = vld [vmem:[%s804_s1 + $0x28] sm:$0xff]  }
   0x5   :  { %v597_v11 = vld [vmem:[%s805_s0 + $0x4] ss:$8 sps:$4 sm:$0xff]   ;;  %v591_v14 = vld [vmem:[%s804_s1 + $0x70] sm:$0xff]   ;;  %v593_v16 = vld [vmem:[%s804_s1 + $0x78] sm:$0xff]  }
   0x6   :  { %v600_v12 = vld [vmem:[%s805_s0 + $0x44] ss:$8 sps:$4 sm:$0xff]   ;;  %307 = vmatprep.mubr.bf16.mxu0 %v597_v11  ;;  %v592_v15 = vld [vmem:[%s804_s1 + $0x30] sm:$0xff]   ;;  %v594_v17 = vld [vmem:[%s804_s1 + $0x38] sm:$0xff]  }
   0x7   :  { %502 = vmatpush3.bf16.msra.mxu0 %v582_v3  ;;  %572 = vmatpush3.bf16.msra.mxu1 %v582_v3  ;;  %v595_v18 = vld [vmem:[%s805_s0] ss:$8 sps:$4 sm:$0xff]   ;;  %v601_v20 = vld [vmem:[%s805_s0 + $0x14] ss:$8 sps:$4 sm:$0xff]   ;;  %v605_v22 = vld [vmem:[%s805_s0 + $0x10] ss:$8 sps:$4 sm:$0xff]  }
   0x8   :  { %503 = vmatprep.subr.bf16.mxu0 %v583_v4  ;;  %565 = vmatprep.subr.bf16.mxu1 %v583_v4  ;;  %v598_v19 = vld [vmem:[%s805_s0 + $0x40] ss:$8 sps:$4 sm:$0xff]   ;;  %v603_v21 = vld [vmem:[%s805_s0 + $0x54] ss:$8 sps:$4 sm:$0xff]   ;;  %v606_v23 = vld [vmem:[%s805_s0 + $0x50] ss:$8 sps:$4 sm:$0xff]  }
   0x9   :  { %339 = vmatprep.mubr.bf16.mxu1 %v600_v12  ;;  %v607_v24 = vld [vmem:[%s805_s0 + $0x24] ss:$8 sps:$4 sm:$0xff]   ;;  %v611_v26 = vld [vmem:[%s805_s0 + $0x20] ss:$8 sps:$4 sm:$0xff]   ;;  %v613_v28 = vld [vmem:[%s805_s0 + $0x34] ss:$8 sps:$4 sm:$0xff]  }
   0xa   :  { %v609_v25 = vld [vmem:[%s805_s0 + $0x64] ss:$8 sps:$4 sm:$0xff]   ;;  %v612_v27 = vld [vmem:[%s805_s0 + $0x60] ss:$8 sps:$4 sm:$0xff]   ;;  %v615_v29 = vld [vmem:[%s805_s0 + $0x74] ss:$8 sps:$4 sm:$0xff]  }
   0xb   :  { %504 = vmatpush3.bf16.msra.mxu0 %v584_v5  ;;  %573 = vmatpush3.bf16.msra.mxu1 %v584_v5  ;;  %v617_v30 = vld [vmem:[%s805_s0 + $0x30] ss:$8 sps:$4 sm:$0xff]   ;;  %v738_v35 = vld [vmem:[%s806_s2] ss:$0 sm:$0xff] }
   0xc   :  { %505 = vmatprep.subr.bf16.mxu0 %v585_v6  ;;  %566 = vmatprep.subr.bf16.mxu1 %v585_v6  ;;  %v618_v31 = vld [vmem:[%s805_s0 + $0x70] ss:$8 sps:$4 sm:$0xff]  }
   0xf   :  { %506 = vmatpush3.bf16.msra.mxu0 %v586_v7  ;;  %574 = vmatpush3.bf16.msra.mxu1 %v586_v7 }
  0x10   :  { %507 = vmatprep.subr.bf16.mxu0 %v587_v8  ;;  %567 = vmatprep.subr.bf16.mxu1 %v587_v8 }
  0x13   :  { %508 = vmatpush3.bf16.msra.mxu0 %v588_v9  ;;  %575 = vmatpush3.bf16.msra.mxu1 %v588_v9 }
  0x14   :  { %509 = vmatprep.subr.bf16.mxu0 %v589_v10  ;;  %568 = vmatprep.subr.bf16.mxu1 %v589_v10 }
  0x17   :  { %510 = vmatpush3.bf16.msra.mxu0 %v590_v13  ;;  %576 = vmatpush3.bf16.msra.mxu1 %v590_v13 }
  0x18   :  { %511 = vmatprep.subr.bf16.mxu0 %v591_v14  ;;  %569 = vmatprep.subr.bf16.mxu1 %v591_v14 }
  0x1b   :  { %512 = vmatpush3.bf16.msra.mxu0 %v592_v15  ;;  %577 = vmatpush3.bf16.msra.mxu1 %v592_v15 }
  0x1c   :  { %513 = vmatprep.subr.bf16.mxu0 %v593_v16  ;;  %570 = vmatprep.subr.bf16.mxu1 %v593_v16 }
  0x1f   :  { %514 = vmatpush3.bf16.msra.mxu0 %v594_v17  ;;  %578 = vmatpush3.bf16.msra.mxu1 %v594_v17 }
  0x22   :  { %308 = vmatmul.mubr.bf16.vlgmr.msra.gmra.mrb[0].mxu0 %v595_v18  ;;  %340 = vmatmul.mubr.bf16.vlgmr.msra.gmra.mrb[0].mxu1 %v598_v19 }
  0x23   :  { %315 = vmatprep.mubr.bf16.mxu0 %v601_v20  ;;  %347 = vmatprep.mubr.bf16.mxu1 %v603_v21 }
  0x2a   :  { %316 = vmatmul.mubr.bf16.gmra.mrb[4].mxu0 %v605_v22  ;;  %348 = vmatmul.mubr.bf16.gmra.mrb[4].mxu1 %v606_v23 }
  0x2b   :  { %323 = vmatprep.mubr.bf16.mxu0 %v607_v24  ;;  %355 = vmatprep.mubr.bf16.mxu1 %v609_v25 }
  0x32   :  { %324 = vmatmul.mubr.bf16.gmra.mrb[8].mxu0 %v611_v26  ;;  %356 = vmatmul.mubr.bf16.gmra.mrb[8].mxu1 %v612_v27 }
  0x33   :  { %331 = vmatprep.mubr.bf16.mxu0 %v613_v28  ;;  %363 = vmatprep.mubr.bf16.mxu1 %v615_v29 }
  0x3a   :  { %332 = vmatmul.mubr.bf16.gmra.mrb[12].mxu0 %v617_v30  ;;  %364 = vmatmul.mubr.bf16.gmra.mrb[12].mxu1 %v618_v31 }
  0xf5   :  { %v515_v32 = vpop.f32.mrb[0].mxu0  ;;  %v539_v33 = vpop.f32.mrb[0].mxu1 }
  0xf6   :  { %v516_v34 = vpop.f32.mrb[1].mxu0  ;;  %v540_v36 = vpop.f32.mrb[1].mxu1 }
  0xf7   :  { %v517_v37 = vadd.f32 %v516_v34, %v515_v32  ;;  %v541_v38 = vadd.f32 %v540_v36, %v539_v33  ;;  %v518_v39 = vpop.f32.mrb[2].mxu0  ;;  %v542_v40 = vpop.f32.mrb[2].mxu1 }
  0xf8   :  { %v519_v41 = vpop.f32.mrb[3].mxu0  ;;  %v543_v42 = vpop.f32.mrb[3].mxu1 }
  0xf9   :  { %v430_v43 = vadd.f32 %v517_v37, %v738_v35  ;;  %v438_v44 = vadd.f32 %v541_v38, %v738_v35  ;;  %v520_v45 = vadd.f32 %v519_v41, %v518_v39  ;;  %v544_v46 = vadd.f32 %v543_v42, %v542_v40 }
  0xfb   :  { %446 = vst [vmem:[%s807_s3] sm:$0xff] %v430_v43  ;;  %454 = vst [vmem:[%s807_s3 + $0x40] sm:$0xff] %v438_v44  ;;  %v431_v47 = vadd.f32 %v520_v45, %v738_v35  ;;  %v439_v48 = vadd.f32 %v544_v46, %v738_v35 }
  0xfd   :  { %447 = vst [vmem:[%s807_s3 + $0x8] sm:$0xff] %v431_v47  ;;  %455 = vst [vmem:[%s807_s3 + $0x48] sm:$0xff] %v439_v48  ;;  %v521_v49 = vpop.f32.mrb[4].mxu0  ;;  %v545_v50 = vpop.f32.mrb[4].mxu1 }
  0xfe   :  { %v522_v51 = vpop.f32.mrb[5].mxu0  ;;  %v546_v52 = vpop.f32.mrb[5].mxu1 }
  0xff   :  { %v523_v53 = vadd.f32 %v522_v51, %v521_v49  ;;  %v547_v54 = vadd.f32 %v546_v52, %v545_v50  ;;  %v524_v55 = vpop.f32.mrb[6].mxu0  ;;  %v548_v56 = vpop.f32.mrb[6].mxu1 }
 0x100   :  { %v525_v57 = vpop.f32.mrb[7].mxu0  ;;  %v549_v58 = vpop.f32.mrb[7].mxu1 }
 0x101   :  { %v432_v59 = vadd.f32 %v523_v53, %v738_v35  ;;  %v440_v60 = vadd.f32 %v547_v54, %v738_v35  ;;  %v526_v61 = vadd.f32 %v525_v57, %v524_v55  ;;  %v550_v62 = vadd.f32 %v549_v58, %v548_v56 }
 0x103   :  { %448 = vst [vmem:[%s807_s3 + $0x10] sm:$0xff] %v432_v59  ;;  %456 = vst [vmem:[%s807_s3 + $0x50] sm:$0xff] %v440_v60  ;;  %v433_v63 = vadd.f32 %v526_v61, %v738_v35  ;;  %v441_v0 = vadd.f32 %v550_v62, %v738_v35 }
 0x105   :  { %449 = vst [vmem:[%s807_s3 + $0x18] sm:$0xff] %v433_v63  ;;  %457 = vst [vmem:[%s807_s3 + $0x58] sm:$0xff] %v441_v0  ;;  %v527_v1 = vpop.f32.mrb[8].mxu0  ;;  %v551_v2 = vpop.f32.mrb[8].mxu1 }
 0x106   :  { %v528_v3 = vpop.f32.mrb[9].mxu0  ;;  %v552_v4 = vpop.f32.mrb[9].mxu1 }
 0x107   :  { %v529_v5 = vadd.f32 %v528_v3, %v527_v1  ;;  %v553_v6 = vadd.f32 %v552_v4, %v551_v2  ;;  %v530_v7 = vpop.f32.mrb[10].mxu0  ;;  %v554_v8 = vpop.f32.mrb[10].mxu1 }
 0x108   :  { %v531_v9 = vpop.f32.mrb[11].mxu0  ;;  %v555_v10 = vpop.f32.mrb[11].mxu1 }
 0x109   :  { %v434_v11 = vadd.f32 %v529_v5, %v738_v35  ;;  %v442_v12 = vadd.f32 %v553_v6, %v738_v35  ;;  %v532_v13 = vadd.f32 %v531_v9, %v530_v7  ;;  %v556_v14 = vadd.f32 %v555_v10, %v554_v8 }
 0x10b   :  { %450 = vst [vmem:[%s807_s3 + $0x20] sm:$0xff] %v434_v11  ;;  %458 = vst [vmem:[%s807_s3 + $0x60] sm:$0xff] %v442_v12  ;;  %v435_v15 = vadd.f32 %v532_v13, %v738_v35  ;;  %v443_v16 = vadd.f32 %v556_v14, %v738_v35 }
 0x10d   :  { %451 = vst [vmem:[%s807_s3 + $0x28] sm:$0xff] %v435_v15  ;;  %459 = vst [vmem:[%s807_s3 + $0x68] sm:$0xff] %v443_v16  ;;  %v533_v17 = vpop.f32.mrb[12].mxu0  ;;  %v557_v18 = vpop.f32.mrb[12].mxu1 }
 0x10e   :  { %v534_v19 = vpop.f32.mrb[13].mxu0  ;;  %v558_v20 = vpop.f32.mrb[13].mxu1 }
 0x10f   :  { %v535_v21 = vadd.f32 %v534_v19, %v533_v17  ;;  %v559_v22 = vadd.f32 %v558_v20, %v557_v18  ;;  %v536_v23 = vpop.f32.mrb[14].mxu0  ;;  %v560_v24 = vpop.f32.mrb[14].mxu1 }
 0x110   :  { %v537_v25 = vpop.f32.mrb[15].mxu0  ;;  %v561_v26 = vpop.f32.mrb[15].mxu1 }
 0x111   :  { %v436_v27 = vadd.f32 %v535_v21, %v738_v35  ;;  %v444_v28 = vadd.f32 %v559_v22, %v738_v35  ;;  %v538_v29 = vadd.f32 %v537_v25, %v536_v23  ;;  %v562_v30 = vadd.f32 %v561_v26, %v560_v24 }
 0x113   :  { %452 = vst [vmem:[%s807_s3 + $0x30] sm:$0xff] %v436_v27  ;;  %460 = vst [vmem:[%s807_s3 + $0x70] sm:$0xff] %v444_v28  ;;  %v437_v31 = vadd.f32 %v538_v29, %v738_v35  ;;  %v445_v32 = vadd.f32 %v562_v30, %v738_v35 }
 0x115   :  { %453 = vst [vmem:[%s807_s3 + $0x38] sm:$0xff] %v437_v31  ;;  %461 = vst [vmem:[%s807_s3 + $0x78] sm:$0xff] %v445_v32 }

// kernel: _lambda_.25
= control target key start
LH: loop header
LB: loop body
LE: loop exit
PB: predicated region body
PF: predicated region fallthrough
CT: control target
= control target key end

     0   :  { %s1238_s18 = smov 0   ;;  %s1240_s19 = smov 0   ;;  %s1452_s0 = inlined_call_operand.vmem [shape: bf16[2,10,10,64], index: 0, kind: input, shape index: {}, may-alias: {0,1,2}]   ;;  %s1453_s1 = inlined_call_operand.vmem [shape: bf16[2,10,10,64], index: 1, kind: input, shape index: {}, may-alias: {0,1,2}]   ;;  %s1454_s2 = inlined_call_operand.vmem [shape: bf16[2,10,10,64], index: 2, kind: input, shape index: {}, may-alias: {0,1,2}]   ;;  %s1455_s3 = inlined_call_operand.vmem [shape: bf16[576,64], index: 3, kind: input, shape index: {}]   ;;  %s1456_s4 = inlined_call_operand.vmem [shape: f32[1,64], index: 4, kind: input, shape index: {}]   ;;  %s1457_s5 = inlined_call_operand.vmem [shape: f32[2,8,8,64], index: 5, kind: output, shape index: {}]  }
   0x1   :  { %s1242_s20 = smov 0   ;;  %s1244_s21 = smov 0  }
   0x2   :  { %s1246_s22 = smov 0  }
   0x3 LB: > { %s24_s23 = sadd.s32 1, %s1195_s20  ;;  %s27_s24 = sadd.s32 1, %s1199_s21  ;;  %s1203_s22 = sphi %s1246_s22, %s15_s22   ;;  %s1199_s21 = sphi %s1244_s21, %s1462_s21   ;;  %s1195_s20 = sphi %s1242_s20, %s1461_s20   ;;  %s1191_s19 = sphi %s1240_s19, %s1460_s19   ;;  %s1187_s18 = sphi %s1238_s18, %s1459_s18  }
   0x4   : > { %p25_p0 = scmp.ge.s32.totalorder %s24_s23, 8  ;;  %p967_p1 = scmp.ge.s32.totalorder %s1203_s22, 1 }
   0x5   : > { %p247_p2 = scmp.lt.s32.totalorder %s1203_s22, 17 }
   0x6   : > { %s1464_s23 = smov (%p25_p0, %s24_s23), 0  ;;  %s1466_s24 = smov (!%p25_p0, %s27_s24), %s1199_s21 }
   0x7   : > { %p248_p3 = pnand %p967_p1, %p247_p2  ;;  %p29_p4 = scmp.ge.s32.totalorder %s1466_s24, 2 }
   0x8   : > { %p302_p5 = scmp.lt.s32.totalorder (!%p248_p3), %s1191_s19, 1  ;;  %s311_s25 = sadd.s32 (!%p248_p3), 1, %s1187_s18  ;;  %v1129_v0 = vld [vmem:[%s1455_s3 + $0x40] sm:$0xff] (!%p248_p3)   ;;  %v1131_v2 = vld [vmem:[%s1455_s3 + $0x48] sm:$0xff] (!%p248_p3)   ;;  %v1135_v6 = vld [vmem:[%s1455_s3 + $0x50] sm:$0xff] (!%p248_p3)   ;;  %v1206_v49 = vmov (!%p248_p3), 0.0  }
   0x9   : > { %s1468_s24 = smov (%p29_p4, %s1466_s24), 0  ;;  %251 = sbr.rel (%p248_p3) target bundleno = 384 (0x180), region = 40 }
   0xa   : > { %p314_p6 = scmp.lt.s32.totalorder (!%p248_p3), %s311_s25, 9  ;;  %v1130_v1 = vld [vmem:[%s1455_s3] sm:$0xff] (!%p248_p3)   ;;  %1020 = vmatprep.subr.bf16.mxu0 (!%p248_p3), %v1129_v0  ;;  %v1132_v3 = vld [vmem:[%s1455_s3 + $0x8] sm:$0xff] (!%p248_p3)   ;;  %s322_s10 = sadd.s32 (!%p248_p3), 2, %s1187_s18  ;;  %v1136_v7 = vld [vmem:[%s1455_s3 + $0x10] sm:$0xff] (!%p248_p3)   ;;  %vm396_vm0 = vcmask (!%p248_p3), 523264  }
   0xb   : > { %1021 = vmatpush3.bf16.msra.mxu0 (!%p248_p3), %v1130_v1  ;;  %p1289_p7 = scmp.lt.s32.totalorder (!%p248_p3), %s322_s10, 9  ;;  %v1133_v4 = vld [vmem:[%s1455_s3 + $0xc0] sm:$0xff] (!%p248_p3)   ;;  %p304_p8 = scmp.lt.s32.totalorder (!%p248_p3), %s1187_s18, 9  ;;  %v1137_v9 = vld [vmem:[%s1455_s3 + $0xc8] sm:$0xff] (!%p248_p3)   ;;  %v1139_v12 = vld [vmem:[%s1455_s3 + $0x58] sm:$0xff] (!%p248_p3)   ;;  %vm1207_vm1 = vmmov (!%p248_p3), 0  }
   0xc   : > { %1022 = vmatprep.subr.bf16.mxu0 (!%p248_p3), %v1131_v2  ;;  %v1134_v5 = vld [vmem:[%s1455_s3 + $0x80] sm:$0xff] (!%p248_p3)   ;;  %1042 = vmatprep.subr.bf16.mxu1 (!%p248_p3), %v1133_v4  ;;  %v1138_v11 = vld [vmem:[%s1455_s3 + $0x88] sm:$0xff] (!%p248_p3)   ;;  %s1205_s12 = smov (!%p248_p3), 64   ;;  %v1140_v13 = vld [vmem:[%s1455_s3 + $0x18] sm:$0xff] (!%p248_p3)   ;;  %p335_p9 = scmp.lt.s32.totalorder (!%p248_p3), %s1187_s18, 7 }
   0xd   : > { %1043 = vmatpush3.bf16.msra.mxu1 (!%p248_p3), %v1134_v5  ;;  %v1141_v14 = vld [vmem:[%s1455_s3 + $0xd0] sm:$0xff] (!%p248_p3)   ;;  %v1143_v25 = vld [vmem:[%s1455_s3 + $0x60] sm:$0xff] (!%p248_p3)   ;;  %v1145_v31 = vld [vmem:[%s1455_s3 + $0xd8] sm:$0xff] (!%p248_p3)  }
   0xe   : > { %1044 = vmatprep.subr.bf16.mxu1 (!%p248_p3), %v1137_v9  ;;  %v1142_v22 = vld [vmem:[%s1455_s3 + $0x90] sm:$0xff] (!%p248_p3)   ;;  %v1144_v26 = vld [vmem:[%s1455_s3 + $0x20] sm:$0xff] (!%p248_p3)   ;;  %v1146_v33 = vld [vmem:[%s1455_s3 + $0x98] sm:$0xff] (!%p248_p3)  }
   0xf   : > { %1023 = vmatpush3.bf16.msra.mxu0 (!%p248_p3), %v1132_v3  ;;  %v1147_v35 = vld [vmem:[%s1455_s3 + $0x68] sm:$0xff] (!%p248_p3)   ;;  %v1149_v39 = vld [vmem:[%s1455_s3 + $0xe0] sm:$0xff] (!%p248_p3)   ;;  %v1151_v41 = vld [vmem:[%s1455_s3 + $0x70] sm:$0xff] (!%p248_p3)  }
  0x10   : > { %s1470_s19 = smov (!%p302_p5, %s1191_s19), 1  ;;  %s1472_s25 = smov (!%p314_p6, %s311_s25), 9  ;;  %1024 = vmatprep.subr.bf16.mxu0 %v1135_v6  ;;  %v1148_v37 = vld [vmem:[%s1455_s3 + $0x28] sm:$0xff]   ;;  %v1150_v40 = vld [vmem:[%s1455_s3 + $0xa0] sm:$0xff]   ;;  %v1152_v42 = vld [vmem:[%s1455_s3 + $0x30] sm:$0xff]  }
  0x11   : > { %s1286_s9 = smul.u32 20, %s1470_s19  ;;  %s970_s11 = sshll.u32 %s1472_s25, 1  ;;  %1045 = vmatpush3.bf16.msra.mxu1 %v1138_v11  ;;  %v1153_v43 = vld [vmem:[%s1455_s3 + $0xe8] sm:$0xff]   ;;  %v1155_v45 = vld [vmem:[%s1455_s3 + $0x78] sm:$0xff]   ;;  %v1157_v47 = vld [vmem:[%s1455_s3 + $0xf0] sm:$0xff]  }
  0x12   : > { %s1474_s10 = smov (!%p1289_p7, %s322_s10), 9  ;;  %1046 = vmatprep.subr.bf16.mxu1 %v1141_v14  ;;  %v1154_v44 = vld [vmem:[%s1455_s3 + $0xa8] sm:$0xff]   ;;  %v1156_v46 = vld [vmem:[%s1455_s3 + $0x38] sm:$0xff]   ;;  %v1158_v48 = vld [vmem:[%s1455_s3 + $0xb0] sm:$0xff]  }
  0x13   : > { %s318_s17 = sadd.s32 %s1286_s9, %s970_s11  ;;  %s972_s16 = sshll.u32 %s1474_s10, 1  ;;  %1025 = vmatpush3.bf16.msra.mxu0 %v1136_v7  ;;  %v1159_v50 = vld [vmem:[%s1455_s3 + $0xf8] sm:$0xff]   ;;  %v1160_v59 = vld [vmem:[%s1455_s3 + $0x100] sm:$0xff]   ;;  %v1162_v1 = vld [vmem:[%s1455_s3 + $0x108] sm:$0xff]  }
  0x14   : > { %s971_s25 = sshll.u32 %s318_s17, 2  ;;  %s329_s27 = sadd.s32 %s1286_s9, %s972_s16  ;;  %1026 = vmatprep.subr.bf16.mxu0 %v1139_v12  ;;  %v1161_v51 = vld [vmem:[%s1455_s3 + $0xb8] sm:$0xff]   ;;  %v1163_v3 = vld [vmem:[%s1455_s3 + $0x110] sm:$0xff]  }
  0x15   : > { %s320_s7 = scalar_lea.vmem %s1453_s1, %s971_s25  ;;  %s973_s28 = sshll.u32 %s329_s27, 2  ;;  %1047 = vmatpush3.bf16.msra.mxu1 %v1142_v22  ;;  %v1164_v4 = vld [vmem:[%s1455_s3 + $0x118] sm:$0xff]  }
  0x16   : > { %v344_v8 = vld [vmem:[%s320_s7] sm:$0xf]  ;;  %s305_s13 = scalar_select %p304_p8, %s1187_s18, 9  ;;  %v345_v15 = vld [vmem:[%s320_s7 + $0x4] sm:$0x1]  ;;  %1048 = vmatprep.subr.bf16.mxu1 %v1145_v31 }
  0x17   : > { %v977_v10 = vcombine.low %v344_v8, %v344_v8  ;;  %s331_s11 = scalar_lea.vmem %s1454_s2, %s973_s28  ;;  %1027 = vmatpush3.bf16.msra.mxu0 %v1140_v13  ;;  %v978_v29 = vcombine.low %v344_v8, %v345_v15  ;;  %v980_v8 = vld [vmem:[%s1456_s4] ss:$0 sm:$0xff]  ;;  %s1476_s18 = smov (!%p335_p9, %s1187_s18), 7 }
  0x18   : > { %s968_s25 = sshll.u32 %s305_s13, 1  ;;  %v1334_v16 = vld [vmem:[%s331_s11] sm:$0xf]  ;;  %v347_v17 = vld [vmem:[%s331_s11 + $0x4] sm:$0x1]  ;;  %1028 = vmatprep.subr.bf16.mxu0 %v1143_v25 }
  0x19   : > { %366 = vrot.lane.b32.xlu0 %v977_v10, %s1205_s12  ;;  %s308_s29 = sadd.s32 %s1286_s9, %s968_s25  ;;  %v1340_v18 = vcombine.low %v1334_v16, %v347_v17  ;;  %1049 = vmatpush3.bf16.msra.mxu1 %v1146_v33  ;;  %v378_v38 = vrot.slane %v978_v29, 1  ;;  %v374_v55 = vshll.u32 %v978_v29, 16  ;;  %v372_v56 = vshrl.u32 %v978_v29, 16 }
  0x1a   : > { %s969_s14 = sshll.u32 %s308_s29, 2  ;;  %1050 = vmatprep.subr.bf16.mxu1 %v1149_v39 }
  0x1b   : > { %s310_s16 = scalar_lea.vmem %s1452_s0, %s969_s14  ;;  %v387_v23 = vshrl.u32 %v1340_v18, 16  ;;  %v389_v24 = vshll.u32 %v1340_v18, 16  ;;  %1029 = vmatpush3.bf16.msra.mxu0 %v1144_v26  ;;  %v376_v57 = vrot.slane %v374_v55, 1  ;;  %v395_v5 = vrot.slane %v1340_v18, 1 }
  0x1c   : > { %v1342_v19 = vld [vmem:[%s310_s16] sm:$0xf]  ;;  %v343_v20 = vld [vmem:[%s310_s16 + $0x4] sm:$0x1]  ;;  %1030 = vmatprep.subr.bf16.mxu0 %v1147_v35 }
  0x1d   : > { %v976_v21 = vcombine.low %v1342_v19, %v343_v20  ;;  %v391_v30 = vrot.slane %v389_v24, 1  ;;  %1051 = vmatpush3.bf16.msra.mxu1 %v1150_v40  ;;  %v377_v62 = vor.u32 %v376_v57, %v372_v56 }
  0x1e   : > { %1052 = vmatprep.subr.bf16.mxu1 %v1153_v43 }
  0x1f   : > { %v354_v27 = vshrl.u32 %v976_v21, 16  ;;  %v356_v28 = vshll.u32 %v976_v21, 16  ;;  %v392_v34 = vor.u32 %v391_v30, %v387_v23  ;;  %1031 = vmatpush3.bf16.msra.mxu0 %v1148_v37  ;;  %v362_v52 = vrot.slane %v976_v21, 1 }
  0x20   : > { %1032 = vmatprep.subr.bf16.mxu0 %v1151_v41 }
  0x21   : > { %v358_v32 = vrot.slane %v356_v28, 1  ;;  %393 = vrot.lane.b32.xlu1 %v392_v34, %s1205_s12  ;;  %1053 = vmatpush3.bf16.msra.mxu1 %v1154_v44 }
  0x22   : > { %1054 = vmatprep.subr.bf16.mxu1 %v1157_v47 }
  0x23   : > { %v359_v36 = vor.u32 %v358_v32, %v354_v27  ;;  %1033 = vmatpush3.bf16.msra.mxu0 %v1152_v42 }
  0x24   : > { %1034 = vmatprep.subr.bf16.mxu0 %v1155_v45 }
  0x25   : > { %360 = vrot.lane.b32.xlu0 %v359_v36, %s1205_s12  ;;  %379 = vrot.lane.b32.xlu1 %v378_v38, %s1205_s12  ;;  %s974_s12 = sshll.u32 %s1470_s19, 3 }
  0x26   : > { %1055 = vmatpush3.bf16.msra.mxu1 %v1158_v48  ;;  %s338_s17 = sadd.s32 %s974_s12, %s1476_s18 }
  0x27   : > { %1035 = vmatpush3.bf16.msra.mxu0 %v1156_v46  ;;  %1056 = vmatprep.subr.bf16.mxu1 %v1159_v50  ;;  %s975_s9 = sshll.u32 %s338_s17, 3 }
  0x28   : > { %1069 = vmatprep.subr.bf16.mxu0 %v1206_v49  ;;  %s340_s26 = scalar_lea.vmem %s1457_s5, %s975_s9 }
  0x2a   : > { %1057 = vmatpush3.bf16.msra.mxu1 %v1161_v51 }
  0x8b   : > { %v367_v53 = vpop.permute.xlu0 %366 }
  0x8c   : > { %v403_v54 = vsel %vm396_vm0, %v362_v52, %v367_v53 }
  0x8d   : > { %743 = vmatprep.mubr.bf16.mxu0 %v403_v54 }
  0x93   : > { %v394_v58 = vpop.permute.xlu1 %393 }
  0x94   : > { %v411_v61 = vsel %vm396_vm0, %v1334_v16, %v394_v58 }
  0x95   : > { %783 = vmatprep.mubr.bf16.mxu1 %v411_v61 }
  0x97   : > { %v361_v60 = vpop.permute.xlu0 %360  ;;  %v380_v0 = vpop.permute.xlu1 %379 }
  0x98   : > { %v399_v63 = vsel %vm396_vm0, %v1342_v19, %v361_v60  ;;  %v407_v2 = vsel %vm396_vm0, %v377_v62, %v380_v0 }
  0x99   : > { %744 = vmatmul.mubr.bf16.vlgmr.msra.gmra.mrb[0].mxu0 %v399_v63  ;;  %784 = vmatmul.mubr.bf16.vlgmr.msra.gmra.mrb[0].mxu1 %v407_v2 }
  0x9a   : > { %1070 = vmatpush3.bf16.msra.mxu0 %v1160_v59  ;;  %1077 = vmatprep.mubr.msk.bf16.mxu0 %vm1207_vm1, %v1206_v49 }
  0x9b   : > { %1071 = vmatprep.subr.bf16.mxu0 %v1206_v49 }
  0x9e   : > { %1072 = vmatpush3.bf16.msra.mxu0 %v1162_v1 }
  0x9f   : > { %1073 = vmatprep.subr.bf16.mxu0 %v1206_v49 }
  0xa2   : > { %1074 = vmatpush3.bf16.msra.mxu0 %v1163_v3 }
  0xa3   : > { %1075 = vmatprep.subr.bf16.mxu0 %v1206_v49 }
  0xa6   : > { %1076 = vmatpush3.bf16.msra.mxu0 %v1164_v4 }
  0xa9   : > { %1078 = vmatmul.mubr.msk.bf16.vlgmr.msra.gmra.mrb[4].mxu0 %vm396_vm0, %v395_v5 }
 0x16c   : > { %v1036_v6 = vpop.f32.mrb[0].mxu0  ;;  %v1058_v12 = vpop.f32.mrb[0].mxu1 }
 0x16d   : > { %v1037_v7 = vpop.f32.mrb[1].mxu0  ;;  %v1059_v13 = vpop.f32.mrb[1].mxu1 }
 0x16e   : > { %v1038_v9 = vadd.f32 %v1037_v7, %v1036_v6  ;;  %v1039_v10 = vpop.f32.mrb[2].mxu0  ;;  %v1060_v15 = vadd.f32 %v1059_v13, %v1058_v12  ;;  %v1061_v16 = vpop.f32.mrb[2].mxu1 }
 0x16f   : > { %v1040_v11 = vpop.f32.mrb[3].mxu0  ;;  %v1062_v17 = vpop.f32.mrb[3].mxu1 }
 0x170   : > { %v746_v14 = vadd.f32 %v1038_v9, %v980_v8 }
 0x172   : > { %v786_v18 = vadd.f32 %v1060_v15, %v746_v14 }
 0x17c   : > { %v825_v19 = vpop.f32.mrb[4].mxu0 }
 0x17d   : > { %v826_v20 = vadd.f32 %v825_v19, %v786_v18  ;;  %v1079_v21 = vpop.f32.mrb[5].mxu0 }
 0x17e   : > { %v828_v22 = vpop.f32.mrb[6].mxu0 }
 0x17f   : > { %831 = vst.msk [vmem:[%s340_s26] sm:$0xff] %vm396_vm0, %v826_v20  ;;  %v1080_v23 = vpop.f32.mrb[7].mxu0 }
 0x180 PF: > { %s15_s22 = sadd.s32 1, %s1203_s22   ;;  %s1459_s18 = smov %s1195_s20 }
 0x181   : > { %p12_p10 = scmp.ge.s32.totalorder %s15_s22, 18   ;;  %s1460_s19 = smov %s1199_s21 }
 0x182   : > { %s1461_s20 = smov %s1464_s23  ;;  %s1462_s21 = smov %s1468_s24 }
 0x183   :  { %14 = sbr.rel (!%p12_p10) target bundleno = 3 (0x3), region = 76 }

// kernel: _lambda_.28
= control target key start
LH: loop header
LB: loop body
LE: loop exit
PB: predicated region body
PF: predicated region fallthrough
CT: control target
= control target key end

     0   :  { %s587_s15 = smov 0   ;;  %s744_s0 = inlined_call_operand.vmem [shape: f32[2,8,8,256], index: 0, kind: input, shape index: {}]   ;;  %s745_s1 = inlined_call_operand.vmem [shape: f32[1,1,256], index: 1, kind: input, shape index: {}]   ;;  %s746_s2 = inlined_call_operand.vmem [shape: f32[1,1,256], index: 2, kind: input, shape index: {}]   ;;  %s747_s3 = inlined_call_operand.vmem [shape: f32[2,8,8,256], index: 3, kind: input, shape index: {}]   ;;  %s748_s4 = inlined_call_operand.vmem [shape: f32[2,8,8,256], index: 4, kind: output, shape index: {}]  }
   0x1 LB: > { %s520_s16 = sadd.s32 4294967295, %s560_s15   ;;  %p524_p0 = scmp.ge.s32.totalorder %s560_s15, 1  ;;  %s560_s15 = sphi %s587_s15, %s14_s15  }
   0x2   : > { %p172_p1 = scmp.lt.s32.totalorder %s560_s15, 3 }
   0x4   : > { %p173_p2 = pnand %p524_p0, %p172_p1 }
   0x5   : > { %p203_p3 = scmp.lt.s32.totalorder (!%p173_p2), %s520_s16, 1 }
   0x6   : > { %176 = sbr.rel (%p173_p2) target bundleno = 597 (0x255), region = 36 }
   0xd   : > { %s750_s16 = smov (!%p203_p3, %s520_s16), 1 }
   0xe   : > { %s595_s17 = sshll.u32 %s750_s16, 7 }
   0xf   : > { %s207_s20 = scalar_lea.vmem %s744_s0, %s595_s17  ;;  %s685_s7 = scalar_lea.vmem %s747_s3, %s595_s17 }
  0x10   : > { %v218_v0 = vld [vmem:[%s207_s20] sm:$0xff]  ;;  %v219_v1 = vld [vmem:[%s207_s20 + $0x8] sm:$0xff]  ;;  %v220_v2 = vld [vmem:[%s207_s20 + $0x10] sm:$0xff]  ;;  %s713_s10 = scalar_lea.vmem %s748_s4, %s595_s17 }
  0x11   : > { %v234_v3 = vadd.f32 %v219_v1, %v218_v0  ;;  %v221_v4 = vld [vmem:[%s207_s20 + $0x18] sm:$0xff]  ;;  %v222_v6 = vld [vmem:[%s207_s20 + $0x20] sm:$0xff]  ;;  %v223_v8 = vld [vmem:[%s207_s20 + $0x28] sm:$0xff] }
  0x12   : > { %v224_v10 = vld [vmem:[%s207_s20 + $0x30] sm:$0xff]  ;;  %v225_v12 = vld [vmem:[%s207_s20 + $0x38] sm:$0xff]  ;;  %v226_v14 = vld [vmem:[%s207_s20 + $0x40] sm:$0xff] }
  0x13   : > { %v235_v5 = vadd.f32 %v234_v3, %v220_v2  ;;  %v227_v16 = vld [vmem:[%s207_s20 + $0x48] sm:$0xff]  ;;  %v228_v18 = vld [vmem:[%s207_s20 + $0x50] sm:$0xff]  ;;  %v229_v20 = vld [vmem:[%s207_s20 + $0x58] sm:$0xff] }
  0x14   : > { %v230_v22 = vld [vmem:[%s207_s20 + $0x60] sm:$0xff]  ;;  %v231_v24 = vld [vmem:[%s207_s20 + $0x68] sm:$0xff]  ;;  %v232_v26 = vld [vmem:[%s207_s20 + $0x70] sm:$0xff] }
  0x15   : > { %v236_v7 = vadd.f32 %v235_v5, %v221_v4  ;;  %v233_v28 = vld [vmem:[%s207_s20 + $0x78] sm:$0xff] }
  0x17   : > { %v237_v9 = vadd.f32 %v236_v7, %v222_v6 }
  0x19   : > { %v238_v11 = vadd.f32 %v237_v9, %v223_v8 }
  0x1b   : > { %v239_v13 = vadd.f32 %v238_v11, %v224_v10 }
  0x1d   : > { %v240_v15 = vadd.f32 %v239_v13, %v225_v12 }
  0x1f   : > { %v241_v17 = vadd.f32 %v240_v15, %v226_v14 }
  0x21   : > { %v242_v19 = vadd.f32 %v241_v17, %v227_v16 }
  0x23   : > { %v243_v21 = vadd.f32 %v242_v19, %v228_v18 }
  0x25   : > { %v244_v23 = vadd.f32 %v243_v21, %v229_v20 }
  0x27   : > { %v245_v25 = vadd.f32 %v244_v23, %v230_v22 }
  0x29   : > { %v246_v27 = vadd.f32 %v245_v25, %v231_v24 }
  0x2b   : > { %v247_v29 = vadd.f32 %v246_v27, %v232_v26 }
  0x2d   : > { %v248_v30 = vadd.f32 %v247_v29, %v233_v28 }
  0x2f   : > { %249 = vadd.xlane.f32.xlu0 %v248_v30 }
  0xbc   : > { %v250_v31 = vpop.xlane.xlu0 %249 }
  0xbd   : > { %v251_v32 = vrot.slane %v250_v31, 4 }
  0xbf   : > { %v252_v33 = vadd.f32 %v251_v32, %v250_v31 }
  0xc1   : > { %v253_v34 = vrot.slane %v252_v33, 2 }
  0xc3   : > { %v254_v35 = vadd.f32 %v253_v34, %v252_v33 }
  0xc5   : > { %v255_v36 = vrot.slane %v254_v35, 1 }
  0xc7   : > { %v256_v37 = vadd.f32 %v255_v36, %v254_v35  ;;  %v351_v35 = vlaneseq }
  0xc9   : > { %536 = vpush %v256_v37  ;;  %v352_v37 = vshrl.u32 %v351_v35, 7 }
  0xfa   : > { %s537_s21 = spop %536 }
  0xfb   : > { %s260_s22 = smul.f32 6.1035156e-05, %s537_s21 }
  0xfd   : > { %v261_v38 = vstv %s260_s22 }
  0xfe   : > { %v601_v39 = vsub.f32 %v218_v0, %v261_v38  ;;  %v603_v40 = vsub.f32 %v219_v1, %v261_v38  ;;  %v605_v41 = vsub.f32 %v220_v2, %v261_v38  ;;  %v611_v44 = vsub.f32 %v221_v4, %v261_v38 }
  0xff   : > { %v613_v45 = vsub.f32 %v222_v6, %v261_v38  ;;  %v617_v48 = vsub.f32 %v223_v8, %v261_v38  ;;  %v621_v51 = vsub.f32 %v224_v10, %v261_v38  ;;  %v625_v54 = vsub.f32 %v225_v12, %v261_v38 }
 0x100   : > { %v278_v42 = vmul.f32 %v601_v39, %v601_v39  ;;  %v279_v43 = vmul.f32 %v603_v40, %v603_v40  ;;  %v280_v46 = vmul.f32 %v605_v41, %v605_v41  ;;  %v281_v49 = vmul.f32 %v611_v44, %v611_v44 }
 0x101   : > { %v282_v52 = vmul.f32 %v613_v45, %v613_v45  ;;  %v283_v55 = vmul.f32 %v617_v48, %v617_v48  ;;  %v629_v57 = vsub.f32 %v226_v14, %v261_v38  ;;  %v284_v58 = vmul.f32 %v621_v51, %v621_v51 }
 0x102   : > { %v294_v47 = vadd.f32 %v279_v43, %v278_v42  ;;  %v633_v60 = vsub.f32 %v227_v16, %v261_v38  ;;  %v285_v61 = vmul.f32 %v625_v54, %v625_v54  ;;  %v637_v63 = vsub.f32 %v228_v18, %v261_v38  ;;  %v349_v43 = vld [vmem:[%s745_s1] sm:$0x3] }
 0x103   : > { %v286_v0 = vmul.f32 %v629_v57, %v629_v57  ;;  %v641_v2 = vsub.f32 %v229_v20, %v261_v38  ;;  %v645_v5 = vsub.f32 %v230_v22, %v261_v38  ;;  %v649_v8 = vsub.f32 %v231_v24, %v261_v38 }
 0x104   : > { %v295_v50 = vadd.f32 %v294_v47, %v280_v46  ;;  %v287_v3 = vmul.f32 %v633_v60, %v633_v60  ;;  %v288_v6 = vmul.f32 %v637_v63, %v637_v63  ;;  %v276_v11 = vsub.f32 %v232_v26, %v261_v38  ;;  %v377_v46 = vld [vmem:[%s746_s2] sm:$0x3] }
 0x105   : > { %v289_v9 = vmul.f32 %v641_v2, %v641_v2  ;;  %v290_v12 = vmul.f32 %v645_v5, %v645_v5  ;;  %v277_v14 = vsub.f32 %v233_v28, %v261_v38  ;;  %v291_v15 = vmul.f32 %v649_v8, %v649_v8 }
 0x106   : > { %v296_v53 = vadd.f32 %v295_v50, %v281_v49  ;;  %v292_v17 = vmul.f32 %v276_v11, %v276_v11  ;;  %v353_v38 = vsub.s32 0, %v352_v37  ;;  %v357_v42 = vsub.s32 1, %v352_v37  ;;  %v415_v37 = vld [vmem:[%s685_s7 + $0x50] sm:$0xff] }
 0x107   : > { %v293_v19 = vmul.f32 %v277_v14, %v277_v14 }
 0x108   : > { %v297_v56 = vadd.f32 %v296_v53, %v282_v52  ;;  %v354_v49 = vrot.slane %v349_v43, %v353_v38  ;;  %v358_v50 = vrot.slane %v349_v43, %v357_v42  ;;  %v663_v52 = vrot.slane %v377_v46, %v353_v38  ;;  %v416_v38 = vld [vmem:[%s685_s7 + $0x58] sm:$0xff] }
 0x109   : > { %v665_v53 = vrot.slane %v377_v46, %v357_v42  ;;  %v417_v42 = vld [vmem:[%s685_s7 + $0x60] sm:$0xff] }
 0x10a   : > { %v298_v59 = vadd.f32 %v297_v56, %v283_v55 }
 0x10c   : > { %v299_v62 = vadd.f32 %v298_v59, %v284_v58 }
 0x10e   : > { %v300_v1 = vadd.f32 %v299_v62, %v285_v61 }
 0x110   : > { %v301_v4 = vadd.f32 %v300_v1, %v286_v0 }
 0x112   : > { %v302_v7 = vadd.f32 %v301_v4, %v287_v3 }
 0x114   : > { %v303_v10 = vadd.f32 %v302_v7, %v288_v6 }
 0x116   : > { %v304_v13 = vadd.f32 %v303_v10, %v289_v9 }
 0x118   : > { %v305_v16 = vadd.f32 %v304_v13, %v290_v12 }
 0x11a   : > { %v306_v18 = vadd.f32 %v305_v16, %v291_v15  ;;  %v406_v16 = vld [vmem:[%s685_s7 + $0x8] sm:$0xff] }
 0x11c   : > { %v307_v20 = vadd.f32 %v306_v18, %v292_v17  ;;  %v407_v17 = vld [vmem:[%s685_s7 + $0x10] sm:$0xff]  ;;  %v408_v18 = vld [vmem:[%s685_s7 + $0x18] sm:$0xff] }
 0x11e   : > { %v308_v21 = vadd.f32 %v307_v20, %v293_v19 }
 0x120   : > { %309 = vadd.xlane.f32.xlu0 %v308_v21 }
 0x1ad   : > { %v310_v22 = vpop.xlane.xlu0 %309 }
 0x1ae   : > { %v311_v23 = vrot.slane %v310_v22, 4 }
 0x1b0   : > { %v312_v24 = vadd.f32 %v311_v23, %v310_v22  ;;  %v409_v23 = vld [vmem:[%s685_s7 + $0x20] sm:$0xff] }
 0x1b2   : > { %v313_v25 = vrot.slane %v312_v24, 2 }
 0x1b4   : > { %v314_v26 = vadd.f32 %v313_v25, %v312_v24  ;;  %v410_v24 = vld [vmem:[%s685_s7 + $0x28] sm:$0xff]  ;;  %v411_v25 = vld [vmem:[%s685_s7 + $0x30] sm:$0xff] }
 0x1b6   : > { %v315_v27 = vrot.slane %v314_v26, 1 }
 0x1b8   : > { %v316_v29 = vadd.f32 %v315_v27, %v314_v26 }
 0x1ba   : > { %538 = vpush %v316_v29 }
 0x1eb   : > { %s539_s23 = spop %538 }
 0x1ec   : > { %s320_s24 = smul.f32 6.103888e-05, %s539_s23 }
 0x1ee   : > { %v321_v28 = vstv %s320_s24 }
 0x1ef   : > { %550 = vrsqrt.f32 %v321_v28  ;;  %vm324_vm0 = vcmp.eq.f32.partialorder %v321_v28, inf  ;;  %v327_v32 = vand.u32 2147483648, %v321_v28  ;;  %vm326_vm1 = vcmp.eq.f32.partialorder %v321_v28, 0.0 }
 0x1f9   : > { %v551_v30 = vpop.eup %550 }
 0x1fa   : > { %v323_v31 = vmul.f32 %v551_v30, %v321_v28  ;;  %v412_v30 = vld [vmem:[%s685_s7 + $0x38] sm:$0xff] }
 0x1fc   : > { %v325_v33 = vsel %vm324_vm0, %v321_v28, %v323_v31  ;;  %v413_v31 = vld [vmem:[%s685_s7 + $0x40] sm:$0xff] }
 0x1fd   : > { %v328_v34 = vsel %vm326_vm1, %v327_v32, %v325_v33  ;;  %v414_v32 = vld [vmem:[%s685_s7 + $0x48] sm:$0xff] }
 0x1fe   : > { %540 = vpush %v328_v34 }
 0x22f   : > { %s541_s25 = spop %540 }
 0x230   : > { %s330_s26 = sadd.f32 1e-05, %s541_s25 }
 0x232   : > { %v331_v36 = vstv %s330_s26 }
 0x233   : > { %552 = vrcp.f32 %v331_v36 }
 0x23d   : > { %v553_v47 = vpop.eup %552 }
 0x23e   : > { %v333_v55 = vmul.f32 %v553_v47, %v601_v39  ;;  %v334_v56 = vmul.f32 %v553_v47, %v603_v40  ;;  %v335_v58 = vmul.f32 %v553_v47, %v605_v41  ;;  %v336_v59 = vmul.f32 %v553_v47, %v611_v44 }
 0x23f   : > { %v337_v61 = vmul.f32 %v553_v47, %v613_v45  ;;  %v338_v62 = vmul.f32 %v553_v47, %v617_v48  ;;  %v339_v0 = vmul.f32 %v553_v47, %v621_v51  ;;  %v340_v1 = vmul.f32 %v553_v47, %v625_v54 }
 0x240   : > { %v341_v3 = vmul.f32 %v553_v47, %v629_v57  ;;  %v342_v4 = vmul.f32 %v553_v47, %v633_v60  ;;  %v343_v39 = vmul.f32 %v553_v47, %v637_v63  ;;  %v344_v40 = vmul.f32 %v553_v47, %v641_v2 }
 0x241   : > { %v345_v41 = vmul.f32 %v553_v47, %v645_v5  ;;  %v346_v44 = vmul.f32 %v553_v47, %v649_v8  ;;  %v347_v6 = vmul.f32 %v553_v47, %v276_v11  ;;  %v348_v45 = vmul.f32 %v553_v47, %v277_v14  ;;  %v405_v11 = vld [vmem:[%s685_s7] sm:$0xff] }
 0x242   : > { %v361_v48 = vmul.f32 %v354_v49, %v333_v55  ;;  %v362_v51 = vmul.f32 %v358_v50, %v334_v56  ;;  %v363_v54 = vmul.f32 %v354_v49, %v335_v58  ;;  %v364_v57 = vmul.f32 %v358_v50, %v336_v59  ;;  %v419_v55 = vld [vmem:[%s685_s7 + $0x70] sm:$0xff]  ;;  %v420_v56 = vld [vmem:[%s685_s7 + $0x78] sm:$0xff] }
 0x243   : > { %v365_v60 = vmul.f32 %v354_v49, %v337_v61  ;;  %v366_v63 = vmul.f32 %v358_v50, %v338_v62  ;;  %v367_v2 = vmul.f32 %v354_v49, %v339_v0  ;;  %v368_v5 = vmul.f32 %v358_v50, %v340_v1 }
 0x244   : > { %v369_v7 = vmul.f32 %v354_v49, %v341_v3  ;;  %v370_v8 = vmul.f32 %v358_v50, %v342_v4  ;;  %v371_v9 = vmul.f32 %v354_v49, %v343_v39  ;;  %v372_v10 = vmul.f32 %v358_v50, %v344_v40 }
 0x245   : > { %v373_v12 = vmul.f32 %v354_v49, %v345_v41  ;;  %v374_v13 = vmul.f32 %v358_v50, %v346_v44  ;;  %v375_v14 = vmul.f32 %v354_v49, %v347_v6  ;;  %v376_v15 = vmul.f32 %v358_v50, %v348_v45  ;;  %v418_v50 = vld [vmem:[%s685_s7 + $0x68] sm:$0xff] }
 0x246   : > { %v389_v19 = vadd.f32 %v663_v52, %v361_v48  ;;  %v390_v20 = vadd.f32 %v665_v53, %v362_v51  ;;  %v391_v21 = vadd.f32 %v663_v52, %v363_v54  ;;  %v392_v22 = vadd.f32 %v665_v53, %v364_v57 }
 0x247   : > { %v393_v26 = vadd.f32 %v663_v52, %v365_v60  ;;  %v394_v27 = vadd.f32 %v665_v53, %v366_v63  ;;  %v395_v29 = vadd.f32 %v663_v52, %v367_v2  ;;  %v396_v28 = vadd.f32 %v665_v53, %v368_v5 }
 0x248   : > { %v397_v33 = vadd.f32 %v663_v52, %v369_v7  ;;  %v398_v34 = vadd.f32 %v665_v53, %v370_v8  ;;  %v399_v35 = vadd.f32 %v663_v52, %v371_v9  ;;  %v400_v36 = vadd.f32 %v665_v53, %v372_v10 }
 0x249   : > { %v401_v43 = vadd.f32 %v663_v52, %v373_v12  ;;  %v402_v46 = vadd.f32 %v665_v53, %v374_v13  ;;  %v403_v47 = vadd.f32 %v663_v52, %v375_v14  ;;  %v404_v49 = vadd.f32 %v665_v53, %v376_v15 }
 0x24a   : > { %v421_v58 = vadd.f32 %v405_v11, %v389_v19  ;;  %v422_v59 = vadd.f32 %v406_v16, %v390_v20  ;;  %v423_v61 = vadd.f32 %v407_v17, %v391_v21  ;;  %v424_v62 = vadd.f32 %v408_v18, %v392_v22 }
 0x24b   : > { %v425_v0 = vadd.f32 %v409_v23, %v393_v26  ;;  %v426_v1 = vadd.f32 %v410_v24, %v394_v27  ;;  %v427_v3 = vadd.f32 %v411_v25, %v395_v29  ;;  %v428_v52 = vadd.f32 %v412_v30, %v396_v28 }
 0x24c   : > { %v429_v53 = vadd.f32 %v413_v31, %v397_v33  ;;  %v430_v4 = vadd.f32 %v414_v32, %v398_v34  ;;  %v431_v39 = vadd.f32 %v415_v37, %v399_v35  ;;  %v432_v40 = vadd.f32 %v416_v38, %v400_v36  ;;  %437 = vst [vmem:[%s713_s10] sm:$0xff] %v421_v58 }
 0x24d   : > { %438 = vst [vmem:[%s713_s10 + $0x8] sm:$0xff] %v422_v59  ;;  %439 = vst [vmem:[%s713_s10 + $0x10] sm:$0xff] %v423_v61  ;;  %v433_v41 = vadd.f32 %v417_v42, %v401_v43  ;;  %v434_v44 = vadd.f32 %v418_v50, %v402_v46  ;;  %v435_v6 = vadd.f32 %v419_v55, %v403_v47 }
 0x24e   : > { %440 = vst [vmem:[%s713_s10 + $0x18] sm:$0xff] %v424_v62  ;;  %v436_v45 = vadd.f32 %v420_v56, %v404_v49  ;;  %441 = vst [vmem:[%s713_s10 + $0x20] sm:$0xff] %v425_v0 }
 0x24f   : > { %442 = vst [vmem:[%s713_s10 + $0x28] sm:$0xff] %v426_v1  ;;  %443 = vst [vmem:[%s713_s10 + $0x30] sm:$0xff] %v427_v3 }
 0x250   : > { %444 = vst [vmem:[%s713_s10 + $0x38] sm:$0xff] %v428_v52  ;;  %445 = vst [vmem:[%s713_s10 + $0x40] sm:$0xff] %v429_v53 }
 0x251   : > { %446 = vst [vmem:[%s713_s10 + $0x48] sm:$0xff] %v430_v4  ;;  %447 = vst [vmem:[%s713_s10 + $0x50] sm:$0xff] %v431_v39 }
 0x252   : > { %448 = vst [vmem:[%s713_s10 + $0x58] sm:$0xff] %v432_v40  ;;  %449 = vst [vmem:[%s713_s10 + $0x60] sm:$0xff] %v433_v41 }
 0x253   : > { %450 = vst [vmem:[%s713_s10 + $0x68] sm:$0xff] %v434_v44  ;;  %451 = vst [vmem:[%s713_s10 + $0x70] sm:$0xff] %v435_v6 }
 0x254   : > { %452 = vst [vmem:[%s713_s10 + $0x78] sm:$0xff] %v436_v45 }
 0x255 PF: > { %s14_s15 = sadd.s32 1, %s560_s15  }
 0x256   : > { %p11_p4 = scmp.ge.s32.totalorder %s14_s15, 4  }
 0x258   :  { %13 = sbr.rel (!%p11_p4) target bundleno = 1 (0x1), region = 69 }

// kernel: _lambda_.42
= control target key start
LH: loop header
LB: loop body
LE: loop exit
PB: predicated region body
PF: predicated region fallthrough
CT: control target
= control target key end

     0   :  { %s656_s12 = smov 0   ;;  %s1112_s0 = inlined_call_operand.vmem [shape: f32[2,16,16,128], index: 0, kind: input, shape index: {}]   ;;  %s1113_s1 = inlined_call_operand.vmem [shape: f32[1,1,128], index: 1, kind: input, shape index: {}]   ;;  %s1114_s2 = inlined_call_operand.vmem [shape: f32[1,1,128], index: 2, kind: input, shape index: {}]   ;;  %s1115_s3 = inlined_call_operand.vmem [shape: f32[2,16,16,128], index: 3, kind: output, shape index: {}]  }
   0x1 LB: > { %s595_s13 = sadd.s32 4294967295, %s634_s12   ;;  %p599_p0 = scmp.ge.s32.totalorder %s634_s12, 1  ;;  %s634_s12 = sphi %s656_s12, %s13_s12  }
   0x2   : > { %p137_p1 = scmp.lt.s32.totalorder %s634_s12, 3 }
   0x4   : > { %p138_p2 = pnand %p599_p0, %p137_p1 }
   0x5   : > { %p161_p3 = scmp.lt.s32.totalorder (!%p138_p2), %s595_s13, 1 }
   0x6   : > { %141 = sbr.rel (%p138_p2) target bundleno = 680 (0x2a8), region = 32 }
   0xd   : > { %s1117_s13 = smov (!%p161_p3, %s595_s13), 1 }
   0xe   : > { %s608_s14 = sshll.u32 %s1117_s13, 8 }
   0xf   : > { %s672_s17 = scalar_lea.vmem %s1112_s0, %s608_s14  ;;  %s1055_s30 = scalar_lea.vmem %s1115_s3, %s608_s14 }
  0x10   : > { %v675_v0 = vld [vmem:[%s672_s17] sm:$0xff]  ;;  %v678_v1 = vld [vmem:[%s672_s17 + $0x8] sm:$0xff]  ;;  %v681_v2 = vld [vmem:[%s672_s17 + $0x10] sm:$0xff] }
  0x11   : > { %v203_v3 = vadd.f32 %v678_v1, %v675_v0  ;;  %v686_v4 = vld [vmem:[%s672_s17 + $0x18] sm:$0xff]  ;;  %v690_v6 = vld [vmem:[%s672_s17 + $0x20] sm:$0xff]  ;;  %v694_v8 = vld [vmem:[%s672_s17 + $0x28] sm:$0xff] }
  0x12   : > { %v698_v10 = vld [vmem:[%s672_s17 + $0x30] sm:$0xff]  ;;  %v702_v12 = vld [vmem:[%s672_s17 + $0x38] sm:$0xff]  ;;  %v706_v14 = vld [vmem:[%s672_s17 + $0x40] sm:$0xff] }
  0x13   : > { %v204_v5 = vadd.f32 %v203_v3, %v681_v2  ;;  %v710_v16 = vld [vmem:[%s672_s17 + $0x48] sm:$0xff]  ;;  %v714_v18 = vld [vmem:[%s672_s17 + $0x50] sm:$0xff]  ;;  %v718_v20 = vld [vmem:[%s672_s17 + $0x58] sm:$0xff] }
  0x14   : > { %v722_v22 = vld [vmem:[%s672_s17 + $0x60] sm:$0xff]  ;;  %v726_v24 = vld [vmem:[%s672_s17 + $0x68] sm:$0xff]  ;;  %v730_v26 = vld [vmem:[%s672_s17 + $0x70] sm:$0xff] }
  0x15   : > { %v205_v7 = vadd.f32 %v204_v5, %v686_v4  ;;  %v734_v28 = vld [vmem:[%s672_s17 + $0x78] sm:$0xff]  ;;  %v738_v30 = vld [vmem:[%s672_s17 + $0x80] sm:$0xff]  ;;  %v742_v32 = vld [vmem:[%s672_s17 + $0x88] sm:$0xff] }
  0x16   : > { %v746_v34 = vld [vmem:[%s672_s17 + $0x90] sm:$0xff]  ;;  %v750_v36 = vld [vmem:[%s672_s17 + $0x98] sm:$0xff]  ;;  %v754_v38 = vld [vmem:[%s672_s17 + $0xa0] sm:$0xff] }
  0x17   : > { %v206_v9 = vadd.f32 %v205_v7, %v690_v6  ;;  %v758_v40 = vld [vmem:[%s672_s17 + $0xa8] sm:$0xff]  ;;  %v762_v42 = vld [vmem:[%s672_s17 + $0xb0] sm:$0xff]  ;;  %v766_v44 = vld [vmem:[%s672_s17 + $0xb8] sm:$0xff] }
  0x18   : > { %v770_v46 = vld [vmem:[%s672_s17 + $0xc0] sm:$0xff]  ;;  %v774_v48 = vld [vmem:[%s672_s17 + $0xc8] sm:$0xff]  ;;  %v778_v50 = vld [vmem:[%s672_s17 + $0xd0] sm:$0xff] }
  0x19   : > { %v207_v11 = vadd.f32 %v206_v9, %v694_v8  ;;  %v782_v52 = vld [vmem:[%s672_s17 + $0xd8] sm:$0xff]  ;;  %v786_v54 = vld [vmem:[%s672_s17 + $0xe0] sm:$0xff]  ;;  %v790_v56 = vld [vmem:[%s672_s17 + $0xe8] sm:$0xff] }
  0x1a   : > { %v794_v58 = vld [vmem:[%s672_s17 + $0xf0] sm:$0xff]  ;;  %v798_v60 = vld [vmem:[%s672_s17 + $0xf8] sm:$0xff] }
  0x1b   : > { %v208_v13 = vadd.f32 %v207_v11, %v698_v10 }
  0x1d   : > { %v209_v15 = vadd.f32 %v208_v13, %v702_v12 }
  0x1f   : > { %v210_v17 = vadd.f32 %v209_v15, %v706_v14 }
  0x21   : > { %v211_v19 = vadd.f32 %v210_v17, %v710_v16 }
  0x23   : > { %v212_v21 = vadd.f32 %v211_v19, %v714_v18 }
  0x25   : > { %v213_v23 = vadd.f32 %v212_v21, %v718_v20 }
  0x27   : > { %v214_v25 = vadd.f32 %v213_v23, %v722_v22 }
  0x29   : > { %v215_v27 = vadd.f32 %v214_v25, %v726_v24 }
  0x2b   : > { %v216_v29 = vadd.f32 %v215_v27, %v730_v26 }
  0x2d   : > { %v217_v31 = vadd.f32 %v216_v29, %v734_v28 }
  0x2f   : > { %v218_v33 = vadd.f32 %v217_v31, %v738_v30 }
  0x31   : > { %v219_v35 = vadd.f32 %v218_v33, %v742_v32 }
  0x33   : > { %v220_v37 = vadd.f32 %v219_v35, %v746_v34 }
  0x35   : > { %v221_v39 = vadd.f32 %v220_v37, %v750_v36 }
  0x37   : > { %v222_v41 = vadd.f32 %v221_v39, %v754_v38 }
  0x39   : > { %v223_v43 = vadd.f32 %v222_v41, %v758_v40 }
  0x3b   : > { %v224_v45 = vadd.f32 %v223_v43, %v762_v42 }
  0x3d   : > { %v225_v47 = vadd.f32 %v224_v45, %v766_v44 }
  0x3f   : > { %v226_v49 = vadd.f32 %v225_v47, %v770_v46 }
  0x41   : > { %v227_v51 = vadd.f32 %v226_v49, %v774_v48 }
  0x43   : > { %v228_v53 = vadd.f32 %v227_v51, %v778_v50 }
  0x45   : > { %v229_v55 = vadd.f32 %v228_v53, %v782_v52 }
  0x47   : > { %v230_v57 = vadd.f32 %v229_v55, %v786_v54 }
  0x49   : > { %v231_v59 = vadd.f32 %v230_v57, %v790_v56 }
  0x4b   : > { %v232_v61 = vadd.f32 %v231_v59, %v794_v58 }
  0x4d   : > { %v233_v62 = vadd.f32 %v232_v61, %v798_v60 }
  0x4f   : > { %234 = vadd.xlane.f32.xlu0 %v233_v62 }
  0xdc   : > { %v235_v63 = vpop.xlane.xlu0 %234 }
  0xdd   : > { %v236_v3 = vrot.slane %v235_v63, 4 }
  0xdf   : > { %v237_v5 = vadd.f32 %v236_v3, %v235_v63 }
  0xe1   : > { %v238_v7 = vrot.slane %v237_v5, 2 }
  0xe3   : > { %v239_v9 = vadd.f32 %v238_v7, %v237_v5 }
  0xe5   : > { %v240_v11 = vrot.slane %v239_v9, 1 }
  0xe7   : > { %v241_v13 = vadd.f32 %v240_v11, %v239_v9 }
  0xe9   : > { %610 = vpush %v241_v13 }
 0x11a   : > { %s611_s18 = spop %610 }
 0x11b   : > { %s245_s19 = smul.f32 3.0517578e-05, %s611_s18 }
 0x11d   : > { %v802_v15 = vstv %s245_s19 }
 0x11e   : > { %v806_v17 = vsub.f32 %v675_v0, %v802_v15  ;;  %v810_v19 = vsub.f32 %v678_v1, %v802_v15  ;;  %v814_v21 = vsub.f32 %v681_v2, %v802_v15  ;;  %v822_v27 = vsub.f32 %v686_v4, %v802_v15 }
 0x11f   : > { %v826_v0 = vsub.f32 %v690_v6, %v802_v15  ;;  %v832_v2 = vsub.f32 %v694_v8, %v802_v15  ;;  %v838_v4 = vsub.f32 %v698_v10, %v802_v15  ;;  %v844_v37 = vsub.f32 %v702_v12, %v802_v15 }
 0x120   : > { %v279_v23 = vmul.f32 %v806_v17, %v806_v17  ;;  %v280_v25 = vmul.f32 %v810_v19, %v810_v19  ;;  %v281_v1 = vmul.f32 %v814_v21, %v814_v21  ;;  %v282_v31 = vmul.f32 %v822_v27, %v822_v27 }
 0x121   : > { %v283_v6 = vmul.f32 %v826_v0, %v826_v0  ;;  %v284_v8 = vmul.f32 %v832_v2, %v832_v2  ;;  %v850_v41 = vsub.f32 %v706_v14, %v802_v15  ;;  %v285_v10 = vmul.f32 %v838_v4, %v838_v4 }
 0x122   : > { %v311_v29 = vadd.f32 %v280_v25, %v279_v23  ;;  %v856_v45 = vsub.f32 %v710_v16, %v802_v15  ;;  %v286_v12 = vmul.f32 %v844_v37, %v844_v37  ;;  %v862_v49 = vsub.f32 %v714_v18, %v802_v15 }
 0x123   : > { %v287_v14 = vmul.f32 %v850_v41, %v850_v41  ;;  %v868_v53 = vsub.f32 %v718_v20, %v802_v15  ;;  %v874_v57 = vsub.f32 %v722_v22, %v802_v15  ;;  %v880_v61 = vsub.f32 %v726_v24, %v802_v15 }
 0x124   : > { %v312_v33 = vadd.f32 %v311_v29, %v281_v1  ;;  %v288_v16 = vmul.f32 %v856_v45, %v856_v45  ;;  %v289_v18 = vmul.f32 %v862_v49, %v862_v49  ;;  %v886_v63 = vsub.f32 %v730_v26, %v802_v15 }
 0x125   : > { %v290_v20 = vmul.f32 %v868_v53, %v868_v53  ;;  %v291_v22 = vmul.f32 %v874_v57, %v874_v57  ;;  %v892_v5 = vsub.f32 %v734_v28, %v802_v15  ;;  %v292_v24 = vmul.f32 %v880_v61, %v880_v61 }
 0x126   : > { %v313_v35 = vadd.f32 %v312_v33, %v282_v31  ;;  %v898_v9 = vsub.f32 %v738_v30, %v802_v15  ;;  %v293_v26 = vmul.f32 %v886_v63, %v886_v63  ;;  %v904_v13 = vsub.f32 %v742_v32, %v802_v15 }
 0x127   : > { %v294_v28 = vmul.f32 %v892_v5, %v892_v5  ;;  %v910_v25 = vsub.f32 %v746_v34, %v802_v15  ;;  %v916_v29 = vsub.f32 %v750_v36, %v802_v15  ;;  %v922_v33 = vsub.f32 %v754_v38, %v802_v15 }
 0x128   : > { %v314_v39 = vadd.f32 %v313_v35, %v283_v6  ;;  %v295_v30 = vmul.f32 %v898_v9, %v898_v9  ;;  %v296_v32 = vmul.f32 %v904_v13, %v904_v13  ;;  %v928_v35 = vsub.f32 %v758_v40, %v802_v15 }
 0x129   : > { %v297_v34 = vmul.f32 %v910_v25, %v910_v25  ;;  %v298_v36 = vmul.f32 %v916_v29, %v916_v29  ;;  %v299_v38 = vmul.f32 %v922_v33, %v922_v33 }
 0x12a   : > { %v315_v43 = vadd.f32 %v314_v39, %v284_v8  ;;  %v934_v39 = vsub.f32 %v762_v42, %v802_v15  ;;  %v300_v40 = vmul.f32 %v928_v35, %v928_v35 }
 0x12c   : > { %v316_v47 = vadd.f32 %v315_v43, %v285_v10  ;;  %v940_v43 = vsub.f32 %v766_v44, %v802_v15  ;;  %v301_v42 = vmul.f32 %v934_v39, %v934_v39 }
 0x12e   : > { %v317_v51 = vadd.f32 %v316_v47, %v286_v12  ;;  %v946_v47 = vsub.f32 %v770_v46, %v802_v15  ;;  %v302_v44 = vmul.f32 %v940_v43, %v940_v43 }
 0x130   : > { %v318_v55 = vadd.f32 %v317_v51, %v287_v14  ;;  %v952_v51 = vsub.f32 %v774_v48, %v802_v15  ;;  %v303_v46 = vmul.f32 %v946_v47, %v946_v47 }
 0x132   : > { %v319_v59 = vadd.f32 %v318_v55, %v288_v16  ;;  %v958_v55 = vsub.f32 %v778_v50, %v802_v15  ;;  %v304_v48 = vmul.f32 %v952_v51, %v952_v51 }
 0x134   : > { %v320_v62 = vadd.f32 %v319_v59, %v289_v18  ;;  %v964_v59 = vsub.f32 %v782_v52, %v802_v15  ;;  %v305_v50 = vmul.f32 %v958_v55, %v958_v55 }
 0x136   : > { %v321_v3 = vadd.f32 %v320_v62, %v290_v20  ;;  %v970_v62 = vsub.f32 %v786_v54, %v802_v15  ;;  %v306_v52 = vmul.f32 %v964_v59, %v964_v59 }
 0x138   : > { %v322_v7 = vadd.f32 %v321_v3, %v291_v22  ;;  %v976_v3 = vsub.f32 %v790_v56, %v802_v15  ;;  %v307_v54 = vmul.f32 %v970_v62, %v970_v62 }
 0x13a   : > { %v323_v11 = vadd.f32 %v322_v7, %v292_v24  ;;  %v982_v7 = vsub.f32 %v794_v58, %v802_v15  ;;  %v308_v56 = vmul.f32 %v976_v3, %v976_v3 }
 0x13c   : > { %v324_v23 = vadd.f32 %v323_v11, %v293_v26  ;;  %v988_v11 = vsub.f32 %v798_v60, %v802_v15 }
 0x13e   : > { %v325_v1 = vadd.f32 %v324_v23, %v294_v28  ;;  %v309_v23 = vmul.f32 %v982_v7, %v982_v7  ;;  %v310_v58 = vmul.f32 %v988_v11, %v988_v11 }
 0x140   : > { %v326_v31 = vadd.f32 %v325_v1, %v295_v30 }
 0x142   : > { %v327_v6 = vadd.f32 %v326_v31, %v296_v32 }
 0x144   : > { %v328_v8 = vadd.f32 %v327_v6, %v297_v34 }
 0x146   : > { %v329_v10 = vadd.f32 %v328_v8, %v298_v36 }
 0x148   : > { %v330_v12 = vadd.f32 %v329_v10, %v299_v38 }
 0x14a   : > { %v331_v14 = vadd.f32 %v330_v12, %v300_v40 }
 0x14c   : > { %v332_v16 = vadd.f32 %v331_v14, %v301_v42 }
 0x14e   : > { %v333_v18 = vadd.f32 %v332_v16, %v302_v44 }
 0x150   : > { %v334_v20 = vadd.f32 %v333_v18, %v303_v46 }
 0x152   : > { %v335_v22 = vadd.f32 %v334_v20, %v304_v48 }
 0x154   : > { %v336_v24 = vadd.f32 %v335_v22, %v305_v50 }
 0x156   : > { %v337_v26 = vadd.f32 %v336_v24, %v306_v52 }
 0x158   : > { %v338_v28 = vadd.f32 %v337_v26, %v307_v54 }
 0x15a   : > { %v339_v30 = vadd.f32 %v338_v28, %v308_v56 }
 0x15c   : > { %v340_v1 = vadd.f32 %v339_v30, %v309_v23 }
 0x15e   : > { %v341_v32 = vadd.f32 %v340_v1, %v310_v58 }
 0x160   : > { %342 = vadd.xlane.f32.xlu0 %v341_v32 }
 0x1ed   : > { %v343_v31 = vpop.xlane.xlu0 %342 }
 0x1ee   : > { %v344_v34 = vrot.slane %v343_v31, 4 }
 0x1f0   : > { %v345_v6 = vadd.f32 %v344_v34, %v343_v31 }
 0x1f2   : > { %v346_v36 = vrot.slane %v345_v6, 2 }
 0x1f4   : > { %v347_v60 = vadd.f32 %v346_v36, %v345_v6 }
 0x1f6   : > { %v348_v15 = vrot.slane %v347_v60, 1 }
 0x1f8   : > { %v349_v8 = vadd.f32 %v348_v15, %v347_v60 }
 0x1fa   : > { %612 = vpush %v349_v8 }
 0x22b   : > { %s613_s20 = spop %612 }
 0x22c   : > { %s353_s21 = smul.f32 3.051851e-05, %s613_s20 }
 0x22e   : > { %v354_v38 = vstv %s353_s21 }
 0x22f   : > { %624 = vrsqrt.f32 %v354_v38  ;;  %vm357_vm0 = vcmp.eq.f32.partialorder %v354_v38, inf  ;;  %v360_v12 = vand.u32 2147483648, %v354_v38  ;;  %vm359_vm1 = vcmp.eq.f32.partialorder %v354_v38, 0.0 }
 0x239   : > { %v625_v10 = vpop.eup %624 }
 0x23a   : > { %v356_v40 = vmul.f32 %v625_v10, %v354_v38  ;;  %v605_v10 = vld [vmem:[%s1114_s2] ss:$0 sm:$0xff] }
 0x23c   : > { %v358_v42 = vsel %vm357_vm0, %v354_v38, %v356_v40 }
 0x23d   : > { %v361_v14 = vsel %vm359_vm1, %v360_v12, %v358_v42 }
 0x23e   : > { %614 = vpush %v361_v14 }
 0x26f   : > { %s615_s22 = spop %614 }
 0x270   : > { %s363_s23 = sadd.f32 1e-05, %s615_s22 }
 0x272   : > { %v364_v44 = vstv %s363_s23 }
 0x273   : > { %626 = vrcp.f32 %v364_v44 }
 0x27d   : > { %v627_v16 = vpop.eup %626 }
 0x27e   : > { %v366_v46 = vmul.f32 %v627_v16, %v806_v17  ;;  %v367_v18 = vmul.f32 %v627_v16, %v810_v19  ;;  %v368_v48 = vmul.f32 %v627_v16, %v814_v21  ;;  %v369_v20 = vmul.f32 %v627_v16, %v822_v27 }
 0x27f   : > { %v370_v50 = vmul.f32 %v627_v16, %v826_v0  ;;  %v371_v22 = vmul.f32 %v627_v16, %v832_v2  ;;  %v372_v52 = vmul.f32 %v627_v16, %v838_v4  ;;  %v373_v24 = vmul.f32 %v627_v16, %v844_v37 }
 0x280   : > { %v374_v54 = vmul.f32 %v627_v16, %v850_v41  ;;  %v375_v26 = vmul.f32 %v627_v16, %v856_v45  ;;  %v376_v17 = vmul.f32 %v627_v16, %v862_v49  ;;  %v377_v19 = vmul.f32 %v627_v16, %v868_v53 }
 0x281   : > { %v378_v21 = vmul.f32 %v627_v16, %v874_v57  ;;  %v379_v27 = vmul.f32 %v627_v16, %v880_v61  ;;  %v380_v0 = vmul.f32 %v627_v16, %v886_v63  ;;  %v381_v2 = vmul.f32 %v627_v16, %v892_v5  ;;  %v604_v63 = vld [vmem:[%s1113_s1] ss:$0 sm:$0xff] }
 0x282   : > { %v382_v4 = vmul.f32 %v627_v16, %v898_v9  ;;  %v383_v37 = vmul.f32 %v627_v16, %v904_v13  ;;  %v384_v41 = vmul.f32 %v627_v16, %v910_v25  ;;  %v385_v45 = vmul.f32 %v627_v16, %v916_v29 }
 0x283   : > { %v386_v49 = vmul.f32 %v627_v16, %v922_v33  ;;  %v387_v53 = vmul.f32 %v627_v16, %v928_v35  ;;  %v388_v57 = vmul.f32 %v627_v16, %v934_v39  ;;  %v389_v61 = vmul.f32 %v627_v16, %v940_v43 }
 0x284   : > { %v390_v5 = vmul.f32 %v627_v16, %v946_v47  ;;  %v391_v9 = vmul.f32 %v627_v16, %v952_v51  ;;  %v392_v13 = vmul.f32 %v627_v16, %v958_v55  ;;  %v393_v25 = vmul.f32 %v627_v16, %v964_v59 }
 0x285   : > { %v394_v29 = vmul.f32 %v627_v16, %v970_v62  ;;  %v395_v33 = vmul.f32 %v627_v16, %v976_v3  ;;  %v396_v35 = vmul.f32 %v627_v16, %v982_v7  ;;  %v397_v39 = vmul.f32 %v627_v16, %v988_v11 }
 0x286   : > { %v405_v43 = vmul.f32 %v604_v63, %v366_v46  ;;  %v406_v56 = vmul.f32 %v604_v63, %v367_v18  ;;  %v407_v28 = vmul.f32 %v604_v63, %v368_v48  ;;  %v408_v23 = vmul.f32 %v604_v63, %v369_v20 }
 0x287   : > { %v409_v30 = vmul.f32 %v604_v63, %v370_v50  ;;  %v410_v47 = vmul.f32 %v604_v63, %v371_v22  ;;  %v411_v58 = vmul.f32 %v604_v63, %v372_v52  ;;  %v412_v51 = vmul.f32 %v604_v63, %v373_v24 }
 0x288   : > { %v413_v1 = vmul.f32 %v604_v63, %v374_v54  ;;  %v414_v55 = vmul.f32 %v604_v63, %v375_v26  ;;  %v415_v32 = vmul.f32 %v604_v63, %v376_v17  ;;  %v416_v59 = vmul.f32 %v604_v63, %v377_v19 }
 0x289   : > { %v417_v31 = vmul.f32 %v604_v63, %v378_v21  ;;  %v418_v62 = vmul.f32 %v604_v63, %v379_v27  ;;  %v419_v34 = vmul.f32 %v604_v63, %v380_v0  ;;  %v420_v3 = vmul.f32 %v604_v63, %v381_v2 }
 0x28a   : > { %v421_v6 = vmul.f32 %v604_v63, %v382_v4  ;;  %v422_v7 = vmul.f32 %v604_v63, %v383_v37  ;;  %v423_v36 = vmul.f32 %v604_v63, %v384_v41  ;;  %v424_v11 = vmul.f32 %v604_v63, %v385_v45 }
 0x28b   : > { %v425_v60 = vmul.f32 %v604_v63, %v386_v49  ;;  %v426_v15 = vmul.f32 %v604_v63, %v387_v53  ;;  %v427_v8 = vmul.f32 %v604_v63, %v388_v57  ;;  %v428_v38 = vmul.f32 %v604_v63, %v389_v61 }
 0x28c   : > { %v429_v40 = vmul.f32 %v604_v63, %v390_v5  ;;  %v430_v12 = vmul.f32 %v604_v63, %v391_v9  ;;  %v431_v42 = vmul.f32 %v604_v63, %v392_v13  ;;  %v432_v14 = vmul.f32 %v604_v63, %v393_v25 }
 0x28d   : > { %v433_v44 = vmul.f32 %v604_v63, %v394_v29  ;;  %v434_v16 = vmul.f32 %v604_v63, %v395_v33  ;;  %v435_v46 = vmul.f32 %v604_v63, %v396_v35  ;;  %v436_v18 = vmul.f32 %v604_v63, %v397_v39 }
 0x28e   : > { %v444_v48 = vadd.f32 %v605_v10, %v405_v43  ;;  %v445_v20 = vadd.f32 %v605_v10, %v406_v56  ;;  %v446_v50 = vadd.f32 %v605_v10, %v407_v28  ;;  %v447_v22 = vadd.f32 %v605_v10, %v408_v23 }
 0x28f   : > { %v448_v52 = vadd.f32 %v605_v10, %v409_v30  ;;  %v449_v24 = vadd.f32 %v605_v10, %v410_v47  ;;  %v450_v54 = vadd.f32 %v605_v10, %v411_v58  ;;  %v451_v26 = vadd.f32 %v605_v10, %v412_v51 }
 0x290   : > { %v452_v17 = vadd.f32 %v605_v10, %v413_v1  ;;  %v453_v19 = vadd.f32 %v605_v10, %v414_v55  ;;  %v454_v21 = vadd.f32 %v605_v10, %v415_v32  ;;  %v455_v27 = vadd.f32 %v605_v10, %v416_v59 }
 0x291   : > { %v456_v0 = vadd.f32 %v605_v10, %v417_v31  ;;  %v457_v2 = vadd.f32 %v605_v10, %v418_v62  ;;  %v458_v4 = vadd.f32 %v605_v10, %v419_v34  ;;  %v459_v37 = vadd.f32 %v605_v10, %v420_v3 }
 0x292   : > { %v460_v41 = vadd.f32 %v605_v10, %v421_v6  ;;  %v461_v45 = vadd.f32 %v605_v10, %v422_v7  ;;  %v462_v49 = vadd.f32 %v605_v10, %v423_v36  ;;  %v463_v53 = vadd.f32 %v605_v10, %v424_v11 }
 0x293   : > { %v1034_v57 = vadd.f32 %v605_v10, %v425_v60  ;;  %v1036_v61 = vadd.f32 %v605_v10, %v426_v15  ;;  %v1038_v63 = vadd.f32 %v605_v10, %v427_v8  ;;  %v1040_v5 = vadd.f32 %v605_v10, %v428_v38 }
 0x294   : > { %v1042_v9 = vadd.f32 %v605_v10, %v429_v40  ;;  %v1044_v13 = vadd.f32 %v605_v10, %v430_v12  ;;  %v1046_v25 = vadd.f32 %v605_v10, %v431_v42  ;;  %v1048_v29 = vadd.f32 %v605_v10, %v432_v14 }
 0x295   : > { %v1057_v33 = vadd.f32 %v605_v10, %v433_v44  ;;  %v1059_v35 = vadd.f32 %v605_v10, %v434_v16  ;;  %v1061_v39 = vadd.f32 %v605_v10, %v435_v46  ;;  %v1063_v43 = vadd.f32 %v605_v10, %v436_v18 }
 0x296   : > { %v476_v56 = vmax.f32 %v444_v48, 0.0  ;;  %v477_v28 = vmax.f32 %v445_v20, 0.0  ;;  %v478_v23 = vmax.f32 %v446_v50, 0.0  ;;  %v479_v30 = vmax.f32 %v447_v22, 0.0 }
 0x297   : > { %v480_v47 = vmax.f32 %v448_v52, 0.0  ;;  %v481_v58 = vmax.f32 %v449_v24, 0.0  ;;  %v482_v51 = vmax.f32 %v450_v54, 0.0  ;;  %v483_v1 = vmax.f32 %v451_v26, 0.0 }
 0x298   : > { %v484_v55 = vmax.f32 %v452_v17, 0.0  ;;  %v485_v32 = vmax.f32 %v453_v19, 0.0  ;;  %v486_v59 = vmax.f32 %v454_v21, 0.0  ;;  %v487_v31 = vmax.f32 %v455_v27, 0.0  ;;  %508 = vst [vmem:[%s1055_s30] sm:$0xff] %v476_v56  ;;  %509 = vst [vmem:[%s1055_s30 + $0x8] sm:$0xff] %v477_v28 }
 0x299   : > { %510 = vst [vmem:[%s1055_s30 + $0x10] sm:$0xff] %v478_v23  ;;  %511 = vst [vmem:[%s1055_s30 + $0x18] sm:$0xff] %v479_v30  ;;  %v488_v62 = vmax.f32 %v456_v0, 0.0  ;;  %v489_v34 = vmax.f32 %v457_v2, 0.0  ;;  %v490_v3 = vmax.f32 %v458_v4, 0.0  ;;  %v491_v6 = vmax.f32 %v459_v37, 0.0 }
 0x29a   : > { %512 = vst [vmem:[%s1055_s30 + $0x20] sm:$0xff] %v480_v47  ;;  %513 = vst [vmem:[%s1055_s30 + $0x28] sm:$0xff] %v481_v58  ;;  %v492_v7 = vmax.f32 %v460_v41, 0.0  ;;  %v493_v36 = vmax.f32 %v461_v45, 0.0  ;;  %v494_v11 = vmax.f32 %v462_v49, 0.0  ;;  %v495_v60 = vmax.f32 %v463_v53, 0.0 }
 0x29b   : > { %514 = vst [vmem:[%s1055_s30 + $0x30] sm:$0xff] %v482_v51  ;;  %515 = vst [vmem:[%s1055_s30 + $0x38] sm:$0xff] %v483_v1  ;;  %v496_v15 = vmax.f32 %v1034_v57, 0.0  ;;  %v497_v8 = vmax.f32 %v1036_v61, 0.0  ;;  %v498_v38 = vmax.f32 %v1038_v63, 0.0  ;;  %v499_v10 = vmax.f32 %v1040_v5, 0.0 }
 0x29c   : > { %516 = vst [vmem:[%s1055_s30 + $0x40] sm:$0xff] %v484_v55  ;;  %517 = vst [vmem:[%s1055_s30 + $0x48] sm:$0xff] %v485_v32  ;;  %v500_v40 = vmax.f32 %v1042_v9, 0.0  ;;  %v501_v12 = vmax.f32 %v1044_v13, 0.0  ;;  %v502_v42 = vmax.f32 %v1046_v25, 0.0  ;;  %v503_v14 = vmax.f32 %v1048_v29, 0.0 }
 0x29d   : > { %518 = vst [vmem:[%s1055_s30 + $0x50] sm:$0xff] %v486_v59  ;;  %519 = vst [vmem:[%s1055_s30 + $0x58] sm:$0xff] %v487_v31  ;;  %v504_v44 = vmax.f32 %v1057_v33, 0.0  ;;  %v505_v16 = vmax.f32 %v1059_v35, 0.0  ;;  %v506_v46 = vmax.f32 %v1061_v39, 0.0  ;;  %v507_v18 = vmax.f32 %v1063_v43, 0.0 }
 0x29e   : > { %520 = vst [vmem:[%s1055_s30 + $0x60] sm:$0xff] %v488_v62  ;;  %521 = vst [vmem:[%s1055_s30 + $0x68] sm:$0xff] %v489_v34 }
 0x29f   : > { %522 = vst [vmem:[%s1055_s30 + $0x70] sm:$0xff] %v490_v3  ;;  %523 = vst [vmem:[%s1055_s30 + $0x78] sm:$0xff] %v491_v6 }
 0x2a0   : > { %524 = vst [vmem:[%s1055_s30 + $0x80] sm:$0xff] %v492_v7  ;;  %525 = vst [vmem:[%s1055_s30 + $0x88] sm:$0xff] %v493_v36 }
 0x2a1   : > { %526 = vst [vmem:[%s1055_s30 + $0x90] sm:$0xff] %v494_v11  ;;  %527 = vst [vmem:[%s1055_s30 + $0x98] sm:$0xff] %v495_v60 }
 0x2a2   : > { %528 = vst [vmem:[%s1055_s30 + $0xa0] sm:$0xff] %v496_v15  ;;  %529 = vst [vmem:[%s1055_s30 + $0xa8] sm:$0xff] %v497_v8 }
 0x2a3   : > { %530 = vst [vmem:[%s1055_s30 + $0xb0] sm:$0xff] %v498_v38  ;;  %531 = vst [vmem:[%s1055_s30 + $0xb8] sm:$0xff] %v499_v10 }
 0x2a4   : > { %532 = vst [vmem:[%s1055_s30 + $0xc0] sm:$0xff] %v500_v40  ;;  %533 = vst [vmem:[%s1055_s30 + $0xc8] sm:$0xff] %v501_v12 }
 0x2a5   : > { %534 = vst [vmem:[%s1055_s30 + $0xd0] sm:$0xff] %v502_v42  ;;  %535 = vst [vmem:[%s1055_s30 + $0xd8] sm:$0xff] %v503_v14 }
 0x2a6   : > { %536 = vst [vmem:[%s1055_s30 + $0xe0] sm:$0xff] %v504_v44  ;;  %537 = vst [vmem:[%s1055_s30 + $0xe8] sm:$0xff] %v505_v16 }
 0x2a7   : > { %538 = vst [vmem:[%s1055_s30 + $0xf0] sm:$0xff] %v506_v46  ;;  %539 = vst [vmem:[%s1055_s30 + $0xf8] sm:$0xff] %v507_v18 }
 0x2a8 PF: > { %s13_s12 = sadd.s32 1, %s634_s12  }
 0x2a9   : > { %p10_p4 = scmp.ge.s32.totalorder %s13_s12, 4  }
 0x2ab   :  { %12 = sbr.rel (!%p10_p4) target bundleno = 1 (0x1), region = 62 }

// kernel: _lambda_.41
= control target key start
LH: loop header
LB: loop body
LE: loop exit
PB: predicated region body
PF: predicated region fallthrough
CT: control target
= control target key end

     0   :  { %s2810_s18 = smov 0   ;;  %s2812_s19 = smov 0   ;;  %s3372_s0 = inlined_call_operand.vmem [shape: bf16[2,18,18,256], index: 0, kind: input, shape index: {}, may-alias: {0,1,2}]   ;;  %s3373_s1 = inlined_call_operand.vmem [shape: bf16[2,18,18,256], index: 1, kind: input, shape index: {}, may-alias: {0,1,2}]   ;;  %s3374_s2 = inlined_call_operand.vmem [shape: bf16[2,18,18,256], index: 2, kind: input, shape index: {}, may-alias: {0,1,2}]   ;;  %s3375_s3 = inlined_call_operand.vmem [shape: bf16[2304,128], index: 3, kind: input, shape index: {}]   ;;  %s3376_s4 = inlined_call_operand.vmem [shape: f32[1,128], index: 4, kind: input, shape index: {}]   ;;  %s3377_s5 = inlined_call_operand.vmem [shape: f32[2,16,16,128], index: 5, kind: output, shape index: {}]  }
   0x1   :  { %s2814_s20 = smov 0   ;;  %s2816_s21 = smov 0  }
   0x2   :  { %s2818_s22 = smov 0  }
   0x3 LB: > { %s24_s23 = sadd.s32 1, %s2770_s20  ;;  %s27_s24 = sadd.s32 1, %s2774_s21  ;;  %s2778_s22 = sphi %s2818_s22, %s15_s22   ;;  %s2774_s21 = sphi %s2816_s21, %s3381_s21   ;;  %s2770_s20 = sphi %s2814_s20, %s3380_s20   ;;  %s2766_s19 = sphi %s2812_s19, %s3379_s19   ;;  %s2762_s18 = sphi %s2810_s18, %s3378_s18  }
   0x4   : > { %p25_p0 = scmp.ge.s32.totalorder %s24_s23, 16  ;;  %p2173_p1 = scmp.ge.s32.totalorder %s2778_s22, 1 }
   0x5   : > { %p247_p2 = scmp.lt.s32.totalorder %s2778_s22, 33 }
   0x6   : > { %s3383_s23 = smov (%p25_p0, %s24_s23), 0  ;;  %s3385_s24 = smov (!%p25_p0, %s27_s24), %s2774_s21 }
   0x7   : > { %p248_p3 = pnand %p2173_p1, %p247_p2  ;;  %p29_p4 = scmp.ge.s32.totalorder %s3385_s24, 2 }
   0x8   : > { %v2581_v0 = vld [vmem:[%s3375_s3 + $0x40] sm:$0xff] (!%p248_p3)   ;;  %v2585_v4 = vld [vmem:[%s3375_s3 + $0x48] sm:$0xff] (!%p248_p3)   ;;  %v2589_v8 = vld [vmem:[%s3375_s3 + $0x50] sm:$0xff] (!%p248_p3)   ;;  %p303_p5 = scmp.lt.s32.totalorder (!%p248_p3), %s2766_s19, 1  ;;  %p305_p6 = scmp.lt.s32.totalorder (!%p248_p3), %s2762_s18, 17  ;;  %vm395_vm1 = vcmask (!%p248_p3), 1046528  }
   0x9   : > { %s3387_s24 = smov (%p29_p4, %s3385_s24), 0  ;;  %251 = sbr.rel (%p248_p3) target bundleno = 390 (0x186), region = 40 }
   0xa   : > { %v2582_v1 = vld [vmem:[%s3375_s3] sm:$0xff] (!%p248_p3)   ;;  %2339 = vmatprep.subr.bf16.mxu0 (!%p248_p3), %v2581_v0  ;;  %v2586_v5 = vld [vmem:[%s3375_s3 + $0x8] sm:$0xff] (!%p248_p3)   ;;  %v2590_v9 = vld [vmem:[%s3375_s3 + $0x10] sm:$0xff] (!%p248_p3)   ;;  %vm368_vm0 = vsmask.f32 (!%p248_p3), 7424  ;;  %s312_s8 = sadd.s32 (!%p248_p3), 1, %s2762_s18 }
   0xb   : > { %v2583_v2 = vld [vmem:[%s3375_s3 + $0xc0] sm:$0xff] (!%p248_p3)   ;;  %2340 = vmatpush3.bf16.msra.mxu0 (!%p248_p3), %v2582_v1  ;;  %v2587_v6 = vld [vmem:[%s3375_s3 + $0xc8] sm:$0xff] (!%p248_p3)   ;;  %v2591_v10 = vld [vmem:[%s3375_s3 + $0xd0] sm:$0xff] (!%p248_p3)   ;;  %p315_p7 = scmp.lt.s32.totalorder (!%p248_p3), %s312_s8, 17  ;;  %s323_s6 = sadd.s32 (!%p248_p3), 2, %s2762_s18 }
   0xc   : > { %v2584_v3 = vld [vmem:[%s3375_s3 + $0x80] sm:$0xff] (!%p248_p3)   ;;  %2361 = vmatprep.subr.bf16.mxu1 (!%p248_p3), %v2583_v2  ;;  %2341 = vmatprep.subr.bf16.mxu0 (!%p248_p3), %v2585_v4  ;;  %v2588_v7 = vld [vmem:[%s3375_s3 + $0x88] sm:$0xff] (!%p248_p3)   ;;  %v2592_v11 = vld [vmem:[%s3375_s3 + $0x90] sm:$0xff] (!%p248_p3)   ;;  %p326_p8 = scmp.lt.s32.totalorder (!%p248_p3), %s323_s6, 17  ;;  %p336_p9 = scmp.lt.s32.totalorder (!%p248_p3), %s2762_s18, 15 }
   0xd   : > { %2362 = vmatpush3.bf16.msra.mxu1 (!%p248_p3), %v2584_v3  ;;  %v2593_v12 = vld [vmem:[%s3375_s3 + $0x58] sm:$0xff] (!%p248_p3)   ;;  %v2597_v16 = vld [vmem:[%s3375_s3 + $0x60] sm:$0xff] (!%p248_p3)   ;;  %v2601_v20 = vld [vmem:[%s3375_s3 + $0x68] sm:$0xff] (!%p248_p3)  }
   0xe   : > { %2363 = vmatprep.subr.bf16.mxu1 (!%p248_p3), %v2587_v6  ;;  %v2594_v13 = vld [vmem:[%s3375_s3 + $0x18] sm:$0xff] (!%p248_p3)   ;;  %v2598_v17 = vld [vmem:[%s3375_s3 + $0x20] sm:$0xff] (!%p248_p3)   ;;  %v2602_v21 = vld [vmem:[%s3375_s3 + $0x28] sm:$0xff] (!%p248_p3)  }
   0xf   : > { %2342 = vmatpush3.bf16.msra.mxu0 (!%p248_p3), %v2586_v5  ;;  %v2595_v14 = vld [vmem:[%s3375_s3 + $0xd8] sm:$0xff] (!%p248_p3)   ;;  %v2599_v18 = vld [vmem:[%s3375_s3 + $0xe0] sm:$0xff] (!%p248_p3)   ;;  %v2603_v22 = vld [vmem:[%s3375_s3 + $0xe8] sm:$0xff] (!%p248_p3)  }
  0x10   : > { %2343 = vmatprep.subr.bf16.mxu0 %v2589_v8  ;;  %s3389_s19 = smov (!%p303_p5, %s2766_s19), 1  ;;  %v2596_v15 = vld [vmem:[%s3375_s3 + $0x98] sm:$0xff]   ;;  %v2600_v19 = vld [vmem:[%s3375_s3 + $0xa0] sm:$0xff]   ;;  %v2604_v23 = vld [vmem:[%s3375_s3 + $0xa8] sm:$0xff]   ;;  %s3391_s8 = smov (!%p315_p7, %s312_s8), 17 }
  0x11   : > { %2364 = vmatpush3.bf16.msra.mxu1 %v2588_v7  ;;  %s306_s12 = scalar_select %p305_p6, %s2762_s18, 17  ;;  %v2605_v24 = vld [vmem:[%s3375_s3 + $0x70] sm:$0xff]   ;;  %v2609_v28 = vld [vmem:[%s3375_s3 + $0x78] sm:$0xff]   ;;  %v2616_v34 = vld [vmem:[%s3375_s3 + $0x140] sm:$0xff]  }
  0x12   : > { %2365 = vmatprep.subr.bf16.mxu1 %v2591_v10  ;;  %s2905_s26 = smul.u32 108, %s3389_s19  ;;  %v2606_v25 = vld [vmem:[%s3375_s3 + $0x30] sm:$0xff]   ;;  %v2610_v29 = vld [vmem:[%s3375_s3 + $0x38] sm:$0xff]   ;;  %v2618_v38 = vld [vmem:[%s3375_s3 + $0x100] sm:$0xff]   ;;  %s3393_s6 = smov (!%p326_p8, %s323_s6), 17 }
  0x13   : > { %2344 = vmatpush3.bf16.msra.mxu0 %v2590_v9  ;;  %s2537_s29 = smul.u32 6, %s306_s12  ;;  %v2607_v26 = vld [vmem:[%s3375_s3 + $0xf0] sm:$0xff]   ;;  %v2611_v30 = vld [vmem:[%s3375_s3 + $0xf8] sm:$0xff]   ;;  %v2620_v44 = vld [vmem:[%s3375_s3 + $0x1c0] sm:$0xff]   ;;  %s3395_s18 = smov (!%p336_p9, %s2762_s18), 15 }
  0x14   : > { %2345 = vmatprep.subr.bf16.mxu0 %v2593_v12  ;;  %v2608_v27 = vld [vmem:[%s3375_s3 + $0xb0] sm:$0xff]   ;;  %v2614_v32 = vld [vmem:[%s3375_s3 + $0xb8] sm:$0xff]   ;;  %v2621_v49 = vld [vmem:[%s3375_s3 + $0x180] sm:$0xff]   ;;  %s2539_s9 = smul.u32 6, %s3391_s8  ;;  %s2177_s10 = sshll.u32 %s3395_s18, 1 }
  0x15   : > { %2366 = vmatpush3.bf16.msra.mxu1 %v2592_v11  ;;  %s309_s12 = sadd.s32 %s2905_s26, %s2537_s29  ;;  %v2622_v53 = vld [vmem:[%s3375_s3 + $0x148] sm:$0xff]   ;;  %v2626_v61 = vld [vmem:[%s3375_s3 + $0x150] sm:$0xff]   ;;  %v2630_v2 = vld [vmem:[%s3375_s3 + $0x158] sm:$0xff]  }
  0x16   : > { %2367 = vmatprep.subr.bf16.mxu1 %v2595_v14  ;;  %s2174_s28 = sshll.u32 %s309_s12, 2  ;;  %v2623_v54 = vld [vmem:[%s3375_s3 + $0x108] sm:$0xff]   ;;  %v2627_v62 = vld [vmem:[%s3375_s3 + $0x110] sm:$0xff]   ;;  %v2631_v3 = vld [vmem:[%s3375_s3 + $0x118] sm:$0xff]   ;;  %s319_s8 = sadd.s32 %s2539_s9, %s2905_s26 }
  0x17   : > { %2346 = vmatpush3.bf16.msra.mxu0 %v2594_v13  ;;  %s311_s13 = scalar_lea.vmem %s3372_s0, %s2174_s28  ;;  %v2624_v57 = vld [vmem:[%s3375_s3 + $0x1c8] sm:$0xff]   ;;  %v2628_v0 = vld [vmem:[%s3375_s3 + $0x1d0] sm:$0xff]   ;;  %v2632_v4 = vld [vmem:[%s3375_s3 + $0x1d8] sm:$0xff]   ;;  %s2175_s7 = sshll.u32 %s319_s8, 2 }
  0x18   : > { %2347 = vmatprep.subr.bf16.mxu0 %v2597_v16  ;;  %v2612_v31 = vld [vmem:[%s311_s13 + $0x4] ss:$8 sps:$4 sm:$0xff]   ;;  %v2953_v33 = vld [vmem:[%s311_s13] ss:$8 sps:$4 sm:$0xff]   ;;  %v346_v35 = vld [vmem:[%s311_s13 + $0x10] sm:$0x11]  ;;  %s3068_s28 = scalar_lea.vmem %s3373_s1, %s2175_s7 }
  0x19   : > { %2368 = vmatpush3.bf16.msra.mxu1 %v2596_v15  ;;  %1693 = vmatprep.mubr.bf16.mxu0 %v2612_v31  ;;  %v382_v36 = vshrl.u32 %v2612_v31, 16  ;;  %v384_v37 = vshll.u32 %v2612_v31, 16  ;;  %v2183_v39 = vcombine.high %v346_v35, %v346_v35  ;;  %v2962_v40 = vcombine.low %v346_v35, %v346_v35  ;;  %v2625_v59 = vld [vmem:[%s3375_s3 + $0x188] sm:$0xff]   ;;  %v2629_v1 = vld [vmem:[%s3375_s3 + $0x190] sm:$0xff]   ;;  %v2633_v5 = vld [vmem:[%s3375_s3 + $0x198] sm:$0xff]   ;;  %s2540_s13 = smul.u32 6, %s3393_s6 }
  0x1a   : > { %2369 = vmatprep.subr.bf16.mxu1 %v2599_v18  ;;  %v370_v41 = vshrl.u32 %v2953_v33, 16  ;;  %v372_v42 = vshll.u32 %v2953_v33, 16  ;;  %v399_v58 = vrot.slane %v2612_v31, 1  ;;  %v2634_v6 = vld [vmem:[%s3375_s3 + $0x160] sm:$0xff]   ;;  %v2638_v10 = vld [vmem:[%s3375_s3 + $0x168] sm:$0xff]   ;;  %v2642_v14 = vld [vmem:[%s3375_s3 + $0x170] sm:$0xff]  }
  0x1b   : > { %2348 = vmatpush3.bf16.msra.mxu0 %v2598_v17  ;;  %v386_v43 = vrot.slane %v384_v37, 1  ;;  %v389_v45 = vshll.u32 %v2183_v39, 16  ;;  %v377_v47 = vshll.u32 %v2962_v40, 16  ;;  %v400_v60 = vrot.slane %v2183_v39, 1  ;;  %v2635_v7 = vld [vmem:[%s3375_s3 + $0x120] sm:$0xff]   ;;  %v2639_v11 = vld [vmem:[%s3375_s3 + $0x128] sm:$0xff]   ;;  %s330_s6 = sadd.s32 %s2540_s13, %s2905_s26 }
  0x1c   : > { %2349 = vmatprep.subr.bf16.mxu0 %v2601_v20  ;;  %v374_v46 = vrot.slane %v372_v42, 1  ;;  %v2636_v8 = vld [vmem:[%s3375_s3 + $0x1e0] sm:$0xff]   ;;  %v2640_v12 = vld [vmem:[%s3375_s3 + $0x1e8] sm:$0xff]   ;;  %v2643_v15 = vld [vmem:[%s3375_s3 + $0x130] sm:$0xff]   ;;  %v396_v17 = vrot.slane %v2953_v33, 1  ;;  %s2176_s9 = sshll.u32 %s330_s6, 2 }
  0x1d   : > { %2370 = vmatpush3.bf16.msra.mxu1 %v2600_v19  ;;  %v387_v48 = vor.u32 %v386_v43, %v382_v36  ;;  %v391_v50 = vrot.slane %v389_v45, 1  ;;  %v379_v52 = vrot.slane %v377_v47, 1  ;;  %v401_v63 = vsel %vm395_vm1, %v399_v58, %v400_v60  ;;  %v2637_v9 = vld [vmem:[%s3375_s3 + $0x1a0] sm:$0xff]   ;;  %v2641_v13 = vld [vmem:[%s3375_s3 + $0x1a8] sm:$0xff]   ;;  %v2644_v16 = vld [vmem:[%s3375_s3 + $0x1f0] sm:$0xff]   ;;  %s332_s25 = scalar_lea.vmem %s3374_s2, %s2176_s9 }
  0x1e   : > { %2371 = vmatprep.subr.bf16.mxu1 %v2603_v22  ;;  %v375_v51 = vor.u32 %v374_v46, %v370_v41  ;;  %v2645_v18 = vld [vmem:[%s3375_s3 + $0x1b0] sm:$0xff]   ;;  %v397_v19 = vrot.slane %v2962_v40, 1  ;;  %v2646_v20 = vld [vmem:[%s3375_s3 + $0x178] sm:$0xff]   ;;  %v2657_v31 = vld [vmem:[%s3375_s3 + $0x248] sm:$0xff]  }
  0x1f   : > { %2350 = vmatpush3.bf16.msra.mxu0 %v2602_v21  ;;  %v392_v55 = vsel %vm368_vm0, %v387_v48, %v391_v50  ;;  %v2647_v21 = vld [vmem:[%s3375_s3 + $0x138] sm:$0xff]   ;;  %v2661_v35 = vld [vmem:[%s3375_s3 + $0x250] sm:$0xff]   ;;  %v2669_v43 = vld [vmem:[%s3375_s3 + $0x260] sm:$0xff]  }
  0x20   : > { %2351 = vmatprep.subr.bf16.mxu0 %v2605_v24  ;;  %v380_v56 = vsel %vm368_vm0, %v375_v51, %v379_v52  ;;  %1734 = vmatprep.mubr.bf16.mxu1 %v392_v55  ;;  %v2648_v22 = vld [vmem:[%s3375_s3 + $0x1f8] sm:$0xff]   ;;  %v398_v24 = vsel %vm395_vm1, %v396_v17, %v397_v19  ;;  %v2662_v36 = vld [vmem:[%s3375_s3 + $0x210] sm:$0xff]   ;;  %v2671_v45 = vld [vmem:[%s3375_s3 + $0x2e0] sm:$0xff]  }
  0x21   : > { %2372 = vmatpush3.bf16.msra.mxu1 %v2604_v23  ;;  %v2649_v23 = vld [vmem:[%s3375_s3 + $0x1b8] sm:$0xff]   ;;  %v2663_v37 = vld [vmem:[%s3375_s3 + $0x2d0] sm:$0xff]   ;;  %v2672_v46 = vld [vmem:[%s3375_s3 + $0x2a0] sm:$0xff]  }
  0x22   : > { %2373 = vmatprep.subr.bf16.mxu1 %v2607_v26  ;;  %v3078_v26 = vld [vmem:[%s3068_s28 + $0x4] ss:$8 sps:$4 sm:$0xff]   ;;  %v2665_v39 = vld [vmem:[%s3375_s3 + $0x258] sm:$0xff]   ;;  %v2677_v51 = vld [vmem:[%s3375_s3 + $0x270] sm:$0xff]  }
  0x23   : > { %2352 = vmatpush3.bf16.msra.mxu0 %v2606_v25  ;;  %v2650_v25 = vld [vmem:[%s3375_s3 + $0x240] sm:$0xff]   ;;  %v2666_v40 = vld [vmem:[%s3375_s3 + $0x218] sm:$0xff]   ;;  %v2673_v47 = vld [vmem:[%s3375_s3 + $0x268] sm:$0xff]   ;;  %v434_v52 = vshll.u32 %v3078_v26, 16 }
  0x24   : > { %2353 = vmatprep.subr.bf16.mxu0 %v2609_v28  ;;  %v3084_v28 = vld [vmem:[%s3068_s28] ss:$8 sps:$4 sm:$0xff]   ;;  %v2667_v41 = vld [vmem:[%s3375_s3 + $0x2d8] sm:$0xff]   ;;  %v2679_v55 = vld [vmem:[%s3375_s3 + $0x2f0] sm:$0xff]  }
  0x25   : > { %2374 = vmatpush3.bf16.msra.mxu1 %v2608_v27  ;;  %v2653_v27 = vld [vmem:[%s3375_s3 + $0x200] sm:$0xff]   ;;  %v2668_v42 = vld [vmem:[%s3375_s3 + $0x298] sm:$0xff]   ;;  %v2674_v48 = vld [vmem:[%s3375_s3 + $0x228] sm:$0xff]   ;;  %v420_v58 = vshrl.u32 %v3084_v28, 16  ;;  %v436_v60 = vrot.slane %v434_v52, 1 }
  0x26   : > { %2375 = vmatprep.subr.bf16.mxu1 %v2611_v30  ;;  %v2656_v30 = vld [vmem:[%s3375_s3 + $0x280] sm:$0xff]   ;;  %v2676_v50 = vld [vmem:[%s3375_s3 + $0x2a8] sm:$0xff]  }
  0x27   : > { %2354 = vmatpush3.bf16.msra.mxu0 %v2610_v29  ;;  %v2655_v29 = vld [vmem:[%s3375_s3 + $0x2c0] sm:$0xff]  }
  0x28   : > { %2383 = vmatprep.subr.bf16.mxu0 %v2616_v34  ;;  %v2660_v34 = vld [vmem:[%s3375_s3 + $0x288] sm:$0xff]   ;;  %v2690_v19 = vld [vmem:[%s3375_s3 + $0x380] sm:$0xff]  }
  0x29   : > { %2376 = vmatpush3.bf16.msra.mxu1 %v2614_v32  ;;  %v2658_v32 = vld [vmem:[%s3375_s3 + $0x208] sm:$0xff]   ;;  %v2722_v52 = vld [vmem:[%s3375_s3 + $0x440] sm:$0xff]  }
  0x2a   : > { %1694 = vmatmul.mubr.bf16.vlgmr.msra.gmra.mrb[0].mxu0 %v2953_v33  ;;  %2405 = vmatprep.subr.bf16.mxu1 %v2620_v44  ;;  %v2659_v33 = vld [vmem:[%s3375_s3 + $0x2c8] sm:$0xff]   ;;  %v2670_v44 = vld [vmem:[%s3375_s3 + $0x220] sm:$0xff]  }
  0x2b   : > { %2384 = vmatpush3.bf16.msra.mxu0 %v2618_v38  ;;  %1775 = vmatprep.mubr.bf16.mxu0 %v401_v63  ;;  %v2664_v38 = vld [vmem:[%s3375_s3 + $0x290] sm:$0xff]   ;;  %v2683_v63 = vld [vmem:[%s3375_s3 + $0x2f8] sm:$0xff]  }
  0x2c   : > { %2385 = vmatprep.subr.bf16.mxu0 %v2622_v53  ;;  %1735 = vmatmul.mubr.bf16.vlgmr.msra.gmra.mrb[0].mxu1 %v380_v56  ;;  %v2678_v53 = vld [vmem:[%s3375_s3 + $0x230] sm:$0xff]   ;;  %v432_v56 = vshrl.u32 %v3078_v26, 16 }
  0x2d   : > { %2406 = vmatpush3.bf16.msra.mxu1 %v2621_v49  ;;  %1816 = vmatprep.mubr.bf16.mxu1 %v3078_v26  ;;  %v2675_v49 = vld [vmem:[%s3375_s3 + $0x2e8] sm:$0xff]  }
  0x2e   : > { %2407 = vmatprep.subr.bf16.mxu1 %v2624_v57  ;;  %v2680_v57 = vld [vmem:[%s3375_s3 + $0x2b0] sm:$0xff]  }
  0x2f   : > { %2386 = vmatpush3.bf16.msra.mxu0 %v2623_v54  ;;  %v422_v54 = vshll.u32 %v3084_v28, 16 }
  0x30   : > { %2387 = vmatprep.subr.bf16.mxu0 %v2626_v61  ;;  %v2682_v61 = vld [vmem:[%s3375_s3 + $0x238] sm:$0xff]  }
  0x31   : > { %2408 = vmatpush3.bf16.msra.mxu1 %v2625_v59  ;;  %v2681_v59 = vld [vmem:[%s3375_s3 + $0x278] sm:$0xff]  }
  0x32   : > { %2409 = vmatprep.subr.bf16.mxu1 %v2628_v0  ;;  %v349_v0 = vld [vmem:[%s3068_s28 + $0x10] sm:$0x11]  ;;  %s2178_s28 = sshll.u32 %s3389_s19, 5 }
  0x33   : > { %2388 = vmatpush3.bf16.msra.mxu0 %v2627_v62  ;;  %v424_v62 = vrot.slane %v422_v54, 1  ;;  %v352_v54 = vld [vmem:[%s332_s25 + $0x10] sm:$0x11]  ;;  %s340_s7 = sadd.s32 %s2178_s28, %s2177_s10 }
  0x34   : > { %2389 = vmatprep.subr.bf16.mxu0 %v2630_v2  ;;  %v2685_v2 = vld [vmem:[%s3375_s3 + $0x2b8] sm:$0xff]   ;;  %s2179_s11 = sshll.u32 %s340_s7, 3 }
  0x35   : > { %2410 = vmatpush3.bf16.msra.mxu1 %v2629_v1  ;;  %v2187_v1 = vcombine.high %v349_v0, %v349_v0  ;;  %s342_s14 = scalar_lea.vmem %s3377_s5, %s2179_s11 }
  0x36   : > { %2411 = vmatprep.subr.bf16.mxu1 %v2632_v4  ;;  %v448_v4 = vrot.slane %v3078_v26, 1  ;;  %v2695_v26 = vld [vmem:[%s3375_s3 + $0x350] sm:$0xff]  }
  0x37   : > { %2390 = vmatpush3.bf16.msra.mxu0 %v2631_v3  ;;  %v2186_v3 = vcombine.low %v349_v0, %v349_v0 }
  0x38   : > { %2391 = vmatprep.subr.bf16.mxu0 %v2634_v6  ;;  %v2687_v6 = vld [vmem:[%s3375_s3 + $0x340] sm:$0xff]  }
  0x39   : > { %2412 = vmatpush3.bf16.msra.mxu1 %v2633_v5  ;;  %v437_v5 = vor.u32 %v436_v60, %v432_v56  ;;  %v2724_v56 = vld [vmem:[%s3375_s3 + $0x400] sm:$0xff]  }
  0x3a   : > { %2413 = vmatprep.subr.bf16.mxu1 %v2636_v8  ;;  %v439_v8 = vshll.u32 %v2187_v1, 16 }
  0x3b   : > { %2392 = vmatpush3.bf16.msra.mxu0 %v2635_v7  ;;  %v445_v7 = vrot.slane %v3084_v28, 1 }
  0x3c   : > { %2393 = vmatprep.subr.bf16.mxu0 %v2638_v10  ;;  %v427_v10 = vshll.u32 %v2186_v3, 16 }
  0x3d   : > { %2414 = vmatpush3.bf16.msra.mxu1 %v2637_v9  ;;  %v425_v9 = vor.u32 %v424_v62, %v420_v58  ;;  %v2190_v58 = vcombine.low %v352_v54, %v352_v54  ;;  %v2726_v62 = vld [vmem:[%s3375_s3 + $0x448] sm:$0xff]  }
  0x3e   : > { %2415 = vmatprep.subr.bf16.mxu1 %v2640_v12  ;;  %v2688_v12 = vld [vmem:[%s3375_s3 + $0x300] sm:$0xff]  }
  0x3f   : > { %2394 = vmatpush3.bf16.msra.mxu0 %v2639_v11  ;;  %v449_v11 = vrot.slane %v2187_v1, 1  ;;  %v476_v1 = vshll.u32 %v2190_v58, 16 }
  0x40   : > { %2395 = vmatprep.subr.bf16.mxu0 %v2642_v14  ;;  %v2689_v14 = vld [vmem:[%s3375_s3 + $0x3c0] sm:$0xff]  }
  0x41   : > { %2416 = vmatpush3.bf16.msra.mxu1 %v2641_v13  ;;  %v446_v13 = vrot.slane %v2186_v3, 1  ;;  %v450_v17 = vsel %vm395_vm1, %v448_v4, %v449_v11  ;;  %v2727_v3 = vld [vmem:[%s3375_s3 + $0x408] sm:$0xff]  }
  0x42   : > { %2417 = vmatprep.subr.bf16.mxu1 %v2644_v16  ;;  %v429_v16 = vrot.slane %v427_v10, 1 }
  0x43   : > { %2396 = vmatpush3.bf16.msra.mxu0 %v2643_v15  ;;  %v441_v15 = vrot.slane %v439_v8, 1  ;;  %v2728_v8 = vld [vmem:[%s3375_s3 + $0x450] sm:$0xff]  }
  0x44   : > { %2397 = vmatprep.subr.bf16.mxu0 %v2646_v20 }
  0x45   : > { %2418 = vmatpush3.bf16.msra.mxu1 %v2645_v18  ;;  %v447_v18 = vsel %vm395_vm1, %v445_v7, %v446_v13  ;;  %v442_v20 = vsel %vm368_vm0, %v437_v5, %v441_v15  ;;  %v478_v7 = vrot.slane %v476_v1, 1  ;;  %v2729_v13 = vld [vmem:[%s3375_s3 + $0x410] sm:$0xff]   ;;  %v2731_v15 = vld [vmem:[%s3375_s3 + $0x418] sm:$0xff]  }
  0x46   : > { %2419 = vmatprep.subr.bf16.mxu1 %v2648_v22  ;;  %v2691_v22 = vld [vmem:[%s3375_s3 + $0x348] sm:$0xff]  }
  0x47   : > { %2398 = vmatpush3.bf16.msra.mxu0 %v2647_v21  ;;  %v430_v21 = vsel %vm368_vm0, %v425_v9, %v429_v16  ;;  %v2732_v16 = vld [vmem:[%s3375_s3 + $0x460] sm:$0xff]  }
  0x48   : > { %2427 = vmatprep.subr.bf16.mxu0 %v2650_v25  ;;  %v2694_v25 = vld [vmem:[%s3375_s3 + $0x388] sm:$0xff]  }
  0x49   : > { %2420 = vmatpush3.bf16.msra.mxu1 %v2649_v23  ;;  %v2692_v23 = vld [vmem:[%s3375_s3 + $0x308] sm:$0xff]  }
  0x4a   : > { %1776 = vmatmul.mubr.bf16.vlgmr.msra.gmra.mrb[4].mxu0 %v398_v24  ;;  %2449 = vmatprep.subr.bf16.mxu1 %v2655_v29  ;;  %v2693_v24 = vld [vmem:[%s3375_s3 + $0x3c8] sm:$0xff]   ;;  %v2698_v29 = vld [vmem:[%s3375_s3 + $0x390] sm:$0xff]  }
  0x4b   : > { %2428 = vmatpush3.bf16.msra.mxu0 %v2653_v27  ;;  %1857 = vmatprep.mubr.bf16.mxu0 %v442_v20  ;;  %v2696_v27 = vld [vmem:[%s3375_s3 + $0x310] sm:$0xff]  }
  0x4c   : > { %2429 = vmatprep.subr.bf16.mxu0 %v2657_v31  ;;  %1817 = vmatmul.mubr.bf16.vlgmr.msra.gmra.mrb[4].mxu1 %v3084_v28  ;;  %v2697_v28 = vld [vmem:[%s3375_s3 + $0x3d0] sm:$0xff]   ;;  %v2700_v31 = vld [vmem:[%s3375_s3 + $0x318] sm:$0xff]  }
  0x4d   : > { %2450 = vmatpush3.bf16.msra.mxu1 %v2656_v30  ;;  %1898 = vmatprep.mubr.bf16.mxu1 %v450_v17  ;;  %v2699_v30 = vld [vmem:[%s3375_s3 + $0x358] sm:$0xff]   ;;  %v2733_v17 = vld [vmem:[%s3375_s3 + $0x420] sm:$0xff]   ;;  %v2736_v20 = vld [vmem:[%s3375_s3 + $0x470] sm:$0xff]  }
  0x4e   : > { %2451 = vmatprep.subr.bf16.mxu1 %v2659_v33  ;;  %v2702_v33 = vld [vmem:[%s3375_s3 + $0x398] sm:$0xff]  }
  0x4f   : > { %2430 = vmatpush3.bf16.msra.mxu0 %v2658_v32  ;;  %v2701_v32 = vld [vmem:[%s3375_s3 + $0x3d8] sm:$0xff]  }
  0x50   : > { %2431 = vmatprep.subr.bf16.mxu0 %v2661_v35  ;;  %v2704_v35 = vld [vmem:[%s3375_s3 + $0x320] sm:$0xff]  }
  0x51   : > { %2452 = vmatpush3.bf16.msra.mxu1 %v2660_v34  ;;  %v2703_v34 = vld [vmem:[%s3375_s3 + $0x360] sm:$0xff]  }
  0x52   : > { %2453 = vmatprep.subr.bf16.mxu1 %v2663_v37  ;;  %v2706_v37 = vld [vmem:[%s3375_s3 + $0x3a0] sm:$0xff]  }
  0x53   : > { %2432 = vmatpush3.bf16.msra.mxu0 %v2662_v36  ;;  %v2705_v36 = vld [vmem:[%s3375_s3 + $0x3e0] sm:$0xff]  }
  0x54   : > { %2433 = vmatprep.subr.bf16.mxu0 %v2665_v39  ;;  %v2708_v39 = vld [vmem:[%s3375_s3 + $0x328] sm:$0xff]  }
  0x55   : > { %2454 = vmatpush3.bf16.msra.mxu1 %v2664_v38  ;;  %v2707_v38 = vld [vmem:[%s3375_s3 + $0x368] sm:$0xff]  }
  0x56   : > { %2455 = vmatprep.subr.bf16.mxu1 %v2667_v41  ;;  %v2710_v41 = vld [vmem:[%s3375_s3 + $0x3a8] sm:$0xff]  }
  0x57   : > { %2434 = vmatpush3.bf16.msra.mxu0 %v2666_v40  ;;  %v2709_v40 = vld [vmem:[%s3375_s3 + $0x3e8] sm:$0xff]  }
  0x58   : > { %2435 = vmatprep.subr.bf16.mxu0 %v2669_v43  ;;  %v2712_v43 = vld [vmem:[%s3375_s3 + $0x330] sm:$0xff]  }
  0x59   : > { %2456 = vmatpush3.bf16.msra.mxu1 %v2668_v42  ;;  %v2711_v42 = vld [vmem:[%s3375_s3 + $0x370] sm:$0xff]  }
  0x5a   : > { %2457 = vmatprep.subr.bf16.mxu1 %v2671_v45  ;;  %v2714_v45 = vld [vmem:[%s3375_s3 + $0x3b0] sm:$0xff]  }
  0x5b   : > { %2436 = vmatpush3.bf16.msra.mxu0 %v2670_v44  ;;  %v2713_v44 = vld [vmem:[%s3375_s3 + $0x3f0] sm:$0xff]  }
  0x5c   : > { %2437 = vmatprep.subr.bf16.mxu0 %v2673_v47  ;;  %v2716_v47 = vld [vmem:[%s3375_s3 + $0x338] sm:$0xff]  }
  0x5d   : > { %2458 = vmatpush3.bf16.msra.mxu1 %v2672_v46  ;;  %v2715_v46 = vld [vmem:[%s3375_s3 + $0x378] sm:$0xff]  }
  0x5e   : > { %2459 = vmatprep.subr.bf16.mxu1 %v2675_v49  ;;  %v2718_v49 = vld [vmem:[%s332_s25 + $0x4] ss:$8 sps:$4 sm:$0xff]  }
  0x5f   : > { %2438 = vmatpush3.bf16.msra.mxu0 %v2674_v48  ;;  %v2717_v48 = vld [vmem:[%s3375_s3 + $0x3f8] sm:$0xff]   ;;  %v497_v4 = vrot.slane %v2718_v49, 1 }
  0x60   : > { %2439 = vmatprep.subr.bf16.mxu0 %v2677_v51  ;;  %v3290_v51 = vld [vmem:[%s332_s25] ss:$8 sps:$4 sm:$0xff]  }
  0x61   : > { %2460 = vmatpush3.bf16.msra.mxu1 %v2676_v50  ;;  %v2720_v50 = vld [vmem:[%s3375_s3 + $0x3b8] sm:$0xff]   ;;  %v471_v60 = vshll.u32 %v3290_v51, 16 }
  0x62   : > { %2461 = vmatprep.subr.bf16.mxu1 %v2679_v55  ;;  %v483_v55 = vshll.u32 %v2718_v49, 16 }
  0x63   : > { %2440 = vmatpush3.bf16.msra.mxu0 %v2678_v53  ;;  %v481_v53 = vshrl.u32 %v2718_v49, 16  ;;  %v473_v0 = vrot.slane %v471_v60, 1 }
  0x64   : > { %2441 = vmatprep.subr.bf16.mxu0 %v2681_v59  ;;  %v469_v59 = vshrl.u32 %v3290_v51, 16 }
  0x65   : > { %2462 = vmatpush3.bf16.msra.mxu1 %v2680_v57  ;;  %v2191_v57 = vcombine.high %v352_v54, %v352_v54 }
  0x66   : > { %2463 = vmatprep.subr.bf16.mxu1 %v2683_v63 }
  0x67   : > { %2442 = vmatpush3.bf16.msra.mxu0 %v2682_v61  ;;  %v485_v61 = vrot.slane %v483_v55, 1  ;;  %v488_v63 = vshll.u32 %v2191_v57, 16  ;;  %v498_v9 = vrot.slane %v2191_v57, 1 }
  0x68   : > { %2471 = vmatprep.subr.bf16.mxu0 %v2687_v6  ;;  %v474_v6 = vor.u32 %v473_v0, %v469_v59 }
  0x69   : > { %2464 = vmatpush3.bf16.msra.mxu1 %v2685_v2  ;;  %v486_v2 = vor.u32 %v485_v61, %v481_v53  ;;  %v490_v5 = vrot.slane %v488_v63, 1 }
  0x6a   : > { %2493 = vmatprep.subr.bf16.mxu1 %v2689_v14  ;;  %1858 = vmatmul.mubr.bf16.vlgmr.msra.gmra.mrb[8].mxu0 %v430_v21  ;;  %v479_v11 = vsel %vm368_vm0, %v474_v6, %v478_v7  ;;  %v2730_v14 = vld [vmem:[%s3375_s3 + $0x458] sm:$0xff]   ;;  %v2737_v21 = vld [vmem:[%s3375_s3 + $0x430] sm:$0xff]  }
  0x6b   : > { %2472 = vmatpush3.bf16.msra.mxu0 %v2688_v12  ;;  %1939 = vmatprep.mubr.bf16.mxu0 %v2718_v49  ;;  %v491_v10 = vsel %vm368_vm0, %v486_v2, %v490_v5  ;;  %v499_v12 = vsel %vm395_vm1, %v497_v4, %v498_v9 }
  0x6c   : > { %1899 = vmatmul.mubr.bf16.vlgmr.msra.gmra.mrb[8].mxu1 %v447_v18  ;;  %2473 = vmatprep.subr.bf16.mxu0 %v2691_v22  ;;  %v2734_v18 = vld [vmem:[%s3375_s3 + $0x468] sm:$0xff]   ;;  %v2738_v22 = vld [vmem:[%s3375_s3 + $0x478] sm:$0xff]  }
  0x6d   : > { %2494 = vmatpush3.bf16.msra.mxu1 %v2690_v19  ;;  %1980 = vmatprep.mubr.bf16.mxu1 %v491_v10  ;;  %v2735_v19 = vld [vmem:[%s3375_s3 + $0x428] sm:$0xff]  }
  0x6e   : > { %2495 = vmatprep.subr.bf16.mxu1 %v2693_v24  ;;  %v494_v24 = vrot.slane %v3290_v51, 1 }
  0x6f   : > { %2474 = vmatpush3.bf16.msra.mxu0 %v2692_v23  ;;  %v2739_v23 = vld [vmem:[%s3375_s3 + $0x438] sm:$0xff]  }
  0x70   : > { %2475 = vmatprep.subr.bf16.mxu0 %v2695_v26 }
  0x71   : > { %2496 = vmatpush3.bf16.msra.mxu1 %v2694_v25  ;;  %v495_v25 = vrot.slane %v2190_v58, 1 }
  0x72   : > { %2497 = vmatprep.subr.bf16.mxu1 %v2697_v28 }
  0x73   : > { %2476 = vmatpush3.bf16.msra.mxu0 %v2696_v27  ;;  %v496_v26 = vsel %vm395_vm1, %v494_v24, %v495_v25 }
  0x74   : > { %2477 = vmatprep.subr.bf16.mxu0 %v2699_v30 }
  0x75   : > { %2498 = vmatpush3.bf16.msra.mxu1 %v2698_v29 }
  0x76   : > { %2499 = vmatprep.subr.bf16.mxu1 %v2701_v32 }
  0x77   : > { %2478 = vmatpush3.bf16.msra.mxu0 %v2700_v31 }
  0x78   : > { %2479 = vmatprep.subr.bf16.mxu0 %v2703_v34 }
  0x79   : > { %2500 = vmatpush3.bf16.msra.mxu1 %v2702_v33  ;;  %v2192_v33 = vld [vmem:[%s3376_s4] ss:$0 sm:$0xff] }
  0x7a   : > { %2501 = vmatprep.subr.bf16.mxu1 %v2705_v36 }
  0x7b   : > { %2480 = vmatpush3.bf16.msra.mxu0 %v2704_v35 }
  0x7c   : > { %2481 = vmatprep.subr.bf16.mxu0 %v2707_v38 }
  0x7d   : > { %2502 = vmatpush3.bf16.msra.mxu1 %v2706_v37 }
  0x7e   : > { %2503 = vmatprep.subr.bf16.mxu1 %v2709_v40 }
  0x7f   : > { %2482 = vmatpush3.bf16.msra.mxu0 %v2708_v39 }
  0x80   : > { %2483 = vmatprep.subr.bf16.mxu0 %v2711_v42 }
  0x81   : > { %2504 = vmatpush3.bf16.msra.mxu1 %v2710_v41 }
  0x82   : > { %2505 = vmatprep.subr.bf16.mxu1 %v2713_v44 }
  0x83   : > { %2484 = vmatpush3.bf16.msra.mxu0 %v2712_v43 }
  0x84   : > { %2485 = vmatprep.subr.bf16.mxu0 %v2715_v46 }
  0x85   : > { %2506 = vmatpush3.bf16.msra.mxu1 %v2714_v45 }
  0x86   : > { %2507 = vmatprep.subr.bf16.mxu1 %v2717_v48 }
  0x87   : > { %2486 = vmatpush3.bf16.msra.mxu0 %v2716_v47 }
  0x88   : > { %2515 = vmatprep.subr.bf16.mxu0 %v2722_v52 }
  0x89   : > { %2508 = vmatpush3.bf16.msra.mxu1 %v2720_v50 }
  0x8a   : > { %1940 = vmatmul.mubr.bf16.vlgmr.msra.gmra.mrb[12].mxu0 %v3290_v51 }
  0x8b   : > { %2516 = vmatpush3.bf16.msra.mxu0 %v2724_v56  ;;  %2021 = vmatprep.mubr.bf16.mxu0 %v499_v12 }
  0x8c   : > { %2517 = vmatprep.subr.bf16.mxu0 %v2726_v62  ;;  %1981 = vmatmul.mubr.bf16.vlgmr.msra.gmra.mrb[12].mxu1 %v479_v11 }
  0x8f   : > { %2518 = vmatpush3.bf16.msra.mxu0 %v2727_v3 }
  0x90   : > { %2519 = vmatprep.subr.bf16.mxu0 %v2728_v8 }
  0x93   : > { %2520 = vmatpush3.bf16.msra.mxu0 %v2729_v13 }
  0x94   : > { %2521 = vmatprep.subr.bf16.mxu0 %v2730_v14 }
  0x97   : > { %2522 = vmatpush3.bf16.msra.mxu0 %v2731_v15 }
  0x98   : > { %2523 = vmatprep.subr.bf16.mxu0 %v2732_v16 }
  0x9b   : > { %2524 = vmatpush3.bf16.msra.mxu0 %v2733_v17 }
  0x9c   : > { %2525 = vmatprep.subr.bf16.mxu0 %v2734_v18 }
  0x9f   : > { %2526 = vmatpush3.bf16.msra.mxu0 %v2735_v19 }
  0xa0   : > { %2527 = vmatprep.subr.bf16.mxu0 %v2736_v20 }
  0xa3   : > { %2528 = vmatpush3.bf16.msra.mxu0 %v2737_v21 }
  0xa4   : > { %2529 = vmatprep.subr.bf16.mxu0 %v2738_v22 }
  0xa7   : > { %2530 = vmatpush3.bf16.msra.mxu0 %v2739_v23 }
  0xaa   : > { %2022 = vmatmul.mubr.bf16.vlgmr.msra.gmra.mrb[16].mxu0 %v496_v26 }
  0xfd   : > { %v2355_v27 = vpop.f32.mrb[0].mxu0 }
  0xfe   : > { %v2356_v28 = vpop.f32.mrb[1].mxu0 }
  0xff   : > { %v2357_v29 = vadd.f32 %v2356_v28, %v2355_v27  ;;  %v2358_v30 = vpop.f32.mrb[2].mxu0  ;;  %v2377_v35 = vpop.f32.mrb[0].mxu1 }
 0x100   : > { %v2359_v31 = vpop.f32.mrb[3].mxu0  ;;  %v2378_v36 = vpop.f32.mrb[1].mxu1 }
 0x101   : > { %v2360_v32 = vadd.f32 %v2359_v31, %v2358_v30  ;;  %v1696_v34 = vadd.f32 %v2357_v29, %v2192_v33  ;;  %v2379_v38 = vadd.f32 %v2378_v36, %v2377_v35  ;;  %v2380_v39 = vpop.f32.mrb[2].mxu1 }
 0x102   : > { %v2381_v40 = vpop.f32.mrb[3].mxu1 }
 0x103   : > { %v1699_v37 = vadd.f32 %v2360_v32, %v2192_v33  ;;  %v1737_v41 = vadd.f32 %v2379_v38, %v1696_v34  ;;  %v2382_v42 = vadd.f32 %v2381_v40, %v2380_v39 }
 0x105   : > { %v1740_v43 = vadd.f32 %v2382_v42, %v1699_v37 }
 0x11d   : > { %v2399_v44 = vpop.f32.mrb[4].mxu0 }
 0x11e   : > { %v2400_v45 = vpop.f32.mrb[5].mxu0 }
 0x11f   : > { %v2401_v46 = vadd.f32 %v2400_v45, %v2399_v44  ;;  %v2402_v47 = vpop.f32.mrb[6].mxu0  ;;  %v2421_v51 = vpop.f32.mrb[4].mxu1 }
 0x120   : > { %v2403_v48 = vpop.f32.mrb[7].mxu0  ;;  %v2422_v53 = vpop.f32.mrb[5].mxu1 }
 0x121   : > { %v1778_v49 = vadd.f32 %v2401_v46, %v1737_v41  ;;  %v2404_v50 = vadd.f32 %v2403_v48, %v2402_v47  ;;  %v2423_v54 = vadd.f32 %v2422_v53, %v2421_v51  ;;  %v2424_v55 = vpop.f32.mrb[6].mxu1 }
 0x122   : > { %v2425_v56 = vpop.f32.mrb[7].mxu1 }
 0x123   : > { %v1781_v52 = vadd.f32 %v2404_v50, %v1740_v43  ;;  %v1819_v57 = vadd.f32 %v2423_v54, %v1778_v49  ;;  %v2426_v58 = vadd.f32 %v2425_v56, %v2424_v55 }
 0x125   : > { %v1822_v59 = vadd.f32 %v2426_v58, %v1781_v52 }
 0x13d   : > { %v2443_v60 = vpop.f32.mrb[8].mxu0 }
 0x13e   : > { %v2444_v62 = vpop.f32.mrb[9].mxu0 }
 0x13f   : > { %v2465_v61 = vpop.f32.mrb[8].mxu1  ;;  %v2445_v0 = vadd.f32 %v2444_v62, %v2443_v60  ;;  %v2446_v1 = vpop.f32.mrb[10].mxu0 }
 0x140   : > { %v2466_v63 = vpop.f32.mrb[9].mxu1  ;;  %v2447_v4 = vpop.f32.mrb[11].mxu0 }
 0x141   : > { %v2467_v2 = vadd.f32 %v2466_v63, %v2465_v61  ;;  %v2468_v3 = vpop.f32.mrb[10].mxu1  ;;  %v1860_v6 = vadd.f32 %v2445_v0, %v1819_v57  ;;  %v2448_v7 = vadd.f32 %v2447_v4, %v2446_v1 }
 0x142   : > { %v2469_v5 = vpop.f32.mrb[11].mxu1 }
 0x143   : > { %v2470_v8 = vadd.f32 %v2469_v5, %v2468_v3  ;;  %v1863_v9 = vadd.f32 %v2448_v7, %v1822_v59  ;;  %v1901_v10 = vadd.f32 %v2467_v2, %v1860_v6 }
 0x145   : > { %v1904_v11 = vadd.f32 %v2470_v8, %v1863_v9 }
 0x15d   : > { %v2487_v12 = vpop.f32.mrb[12].mxu0 }
 0x15e   : > { %v2488_v13 = vpop.f32.mrb[13].mxu0 }
 0x15f   : > { %v2489_v14 = vadd.f32 %v2488_v13, %v2487_v12  ;;  %v2490_v15 = vpop.f32.mrb[14].mxu0  ;;  %v2509_v19 = vpop.f32.mrb[12].mxu1 }
 0x160   : > { %v2491_v16 = vpop.f32.mrb[15].mxu0  ;;  %v2510_v21 = vpop.f32.mrb[13].mxu1 }
 0x161   : > { %v1942_v17 = vadd.f32 %v2489_v14, %v1901_v10  ;;  %v2492_v18 = vadd.f32 %v2491_v16, %v2490_v15  ;;  %v2511_v22 = vadd.f32 %v2510_v21, %v2509_v19  ;;  %v2512_v23 = vpop.f32.mrb[14].mxu1 }
 0x162   : > { %v2513_v24 = vpop.f32.mrb[15].mxu1 }
 0x163   : > { %v1945_v20 = vadd.f32 %v2492_v18, %v1904_v11  ;;  %v1983_v25 = vadd.f32 %v2511_v22, %v1942_v17  ;;  %v2514_v26 = vadd.f32 %v2513_v24, %v2512_v23 }
 0x165   : > { %v1986_v27 = vadd.f32 %v2514_v26, %v1945_v20 }
 0x17d   : > { %v2531_v28 = vpop.f32.mrb[16].mxu0 }
 0x17e   : > { %v2532_v29 = vpop.f32.mrb[17].mxu0 }
 0x17f   : > { %v2533_v30 = vadd.f32 %v2532_v29, %v2531_v28  ;;  %v2534_v31 = vpop.f32.mrb[18].mxu0 }
 0x180   : > { %v2535_v32 = vpop.f32.mrb[19].mxu0 }
 0x181   : > { %v2024_v33 = vadd.f32 %v2533_v30, %v1983_v25  ;;  %v2536_v34 = vadd.f32 %v2535_v32, %v2534_v31 }
 0x183   : > { %2030 = vst [vmem:[%s342_s14] sm:$0xff] %v2024_v33  ;;  %v2027_v35 = vadd.f32 %v2536_v34, %v1986_v27 }
 0x185   : > { %2031 = vst [vmem:[%s342_s14 + $0x8] sm:$0xff] %v2027_v35 }
 0x186 PF: > { %s15_s22 = sadd.s32 1, %s2778_s22   ;;  %s3378_s18 = smov %s2770_s20 }
 0x187   : > { %p12_p10 = scmp.ge.s32.totalorder %s15_s22, 34   ;;  %s3379_s19 = smov %s2774_s21 }
 0x188   : > { %s3380_s20 = smov %s3383_s23  ;;  %s3381_s21 = smov %s3387_s24 }
 0x189   :  { %14 = sbr.rel (!%p12_p10) target bundleno = 3 (0x3), region = 76 }

// kernel: _lambda_.43
= control target key start
LH: loop header
LB: loop body
LE: loop exit
PB: predicated region body
PF: predicated region fallthrough
CT: control target
= control target key end

     0   :  { %s1895_s18 = smov 0   ;;  %s1897_s19 = smov 0   ;;  %s2245_s0 = inlined_call_operand.vmem [shape: bf16[2,34,34,128], index: 0, kind: input, shape index: {}, may-alias: {0,1,2}]   ;;  %s2246_s1 = inlined_call_operand.vmem [shape: bf16[2,34,34,128], index: 1, kind: input, shape index: {}, may-alias: {0,1,2}]   ;;  %s2247_s2 = inlined_call_operand.vmem [shape: bf16[2,34,34,128], index: 2, kind: input, shape index: {}, may-alias: {0,1,2}]   ;;  %s2248_s3 = inlined_call_operand.vmem [shape: bf16[1152,64], index: 3, kind: input, shape index: {}]   ;;  %s2249_s4 = inlined_call_operand.vmem [shape: f32[1,64], index: 4, kind: input, shape index: {}]   ;;  %s2250_s5 = inlined_call_operand.vmem [shape: f32[2,32,32,64], index: 5, kind: output, shape index: {}]  }
   0x1   :  { %s1899_s20 = smov 0   ;;  %s1901_s21 = smov 0  }
   0x2   :  { %s1903_s22 = smov 0  }
   0x3 LB: > { %s24_s23 = sadd.s32 1, %s1855_s20  ;;  %s27_s24 = sadd.s32 1, %s1859_s21  ;;  %s1863_s22 = sphi %s1903_s22, %s15_s22   ;;  %s1859_s21 = sphi %s1901_s21, %s2254_s21   ;;  %s1855_s20 = sphi %s1899_s20, %s2253_s20   ;;  %s1851_s19 = sphi %s1897_s19, %s2252_s19   ;;  %s1847_s18 = sphi %s1895_s18, %s2251_s18  }
   0x4   : > { %p25_p0 = scmp.ge.s32.totalorder %s24_s23, 32  ;;  %p1467_p1 = scmp.ge.s32.totalorder %s1863_s22, 1 }
   0x5   : > { %p247_p2 = scmp.lt.s32.totalorder %s1863_s22, 65 }
   0x6   : > { %s2256_s23 = smov (%p25_p0, %s24_s23), 0  ;;  %s2258_s24 = smov (!%p25_p0, %s27_s24), %s1859_s21 }
   0x7   : > { %p248_p3 = pnand %p1467_p1, %p247_p2  ;;  %p29_p4 = scmp.ge.s32.totalorder %s2258_s24, 2 }
   0x8   : > { %v1744_v0 = vld [vmem:[%s2248_s3 + $0x40] sm:$0xff] (!%p248_p3)   ;;  %v1748_v4 = vld [vmem:[%s2248_s3 + $0x48] sm:$0xff] (!%p248_p3)   ;;  %v1752_v8 = vld [vmem:[%s2248_s3 + $0x50] sm:$0xff] (!%p248_p3)   ;;  %p303_p5 = scmp.lt.s32.totalorder (!%p248_p3), %s1851_s19, 1  ;;  %p305_p6 = scmp.lt.s32.totalorder (!%p248_p3), %s1847_s18, 33  ;;  %vm397_vm1 = vcmask (!%p248_p3), 1046528  }
   0x9   : > { %s2260_s24 = smov (%p29_p4, %s2258_s24), 0  ;;  %251 = sbr.rel (%p248_p3) target bundleno = 324 (0x144), region = 40 }
   0xa   : > { %v1745_v1 = vld [vmem:[%s2248_s3] sm:$0xff] (!%p248_p3)   ;;  %1558 = vmatprep.subr.bf16.mxu0 (!%p248_p3), %v1744_v0  ;;  %v1749_v5 = vld [vmem:[%s2248_s3 + $0x8] sm:$0xff] (!%p248_p3)   ;;  %v1753_v9 = vld [vmem:[%s2248_s3 + $0x10] sm:$0xff] (!%p248_p3)   ;;  %s312_s8 = sadd.s32 (!%p248_p3), 1, %s1847_s18  ;;  %vm374_vm0 = vsmask.f32 (!%p248_p3), 7424 }
   0xb   : > { %v1746_v2 = vld [vmem:[%s2248_s3 + $0xc0] sm:$0xff] (!%p248_p3)   ;;  %1559 = vmatpush3.bf16.msra.mxu0 (!%p248_p3), %v1745_v1  ;;  %v1750_v6 = vld [vmem:[%s2248_s3 + $0xc8] sm:$0xff] (!%p248_p3)   ;;  %v1754_v10 = vld [vmem:[%s2248_s3 + $0xd0] sm:$0xff] (!%p248_p3)   ;;  %p315_p7 = scmp.lt.s32.totalorder (!%p248_p3), %s312_s8, 33  ;;  %p336_p9 = scmp.lt.s32.totalorder (!%p248_p3), %s1847_s18, 31  ;;  %vm1321_vm2 = vcmask (!%p248_p3), 523264  }
   0xc   : > { %v1747_v3 = vld [vmem:[%s2248_s3 + $0x80] sm:$0xff] (!%p248_p3)   ;;  %1586 = vmatprep.subr.bf16.mxu1 (!%p248_p3), %v1746_v2  ;;  %1560 = vmatprep.subr.bf16.mxu0 (!%p248_p3), %v1748_v4  ;;  %v1751_v7 = vld [vmem:[%s2248_s3 + $0x88] sm:$0xff] (!%p248_p3)   ;;  %v1755_v11 = vld [vmem:[%s2248_s3 + $0x90] sm:$0xff] (!%p248_p3)  }
   0xd   : > { %1587 = vmatpush3.bf16.msra.mxu1 (!%p248_p3), %v1747_v3  ;;  %v1756_v12 = vld [vmem:[%s2248_s3 + $0x58] sm:$0xff] (!%p248_p3)   ;;  %v1760_v16 = vld [vmem:[%s2248_s3 + $0x60] sm:$0xff] (!%p248_p3)   ;;  %v1764_v20 = vld [vmem:[%s2248_s3 + $0x68] sm:$0xff] (!%p248_p3)  }
   0xe   : > { %1588 = vmatprep.subr.bf16.mxu1 (!%p248_p3), %v1750_v6  ;;  %v1757_v13 = vld [vmem:[%s2248_s3 + $0x18] sm:$0xff] (!%p248_p3)   ;;  %v1761_v17 = vld [vmem:[%s2248_s3 + $0x20] sm:$0xff] (!%p248_p3)   ;;  %v1765_v21 = vld [vmem:[%s2248_s3 + $0x28] sm:$0xff] (!%p248_p3)  }
   0xf   : > { %1561 = vmatpush3.bf16.msra.mxu0 (!%p248_p3), %v1749_v5  ;;  %v1758_v14 = vld [vmem:[%s2248_s3 + $0xd8] sm:$0xff] (!%p248_p3)   ;;  %v1762_v18 = vld [vmem:[%s2248_s3 + $0xe0] sm:$0xff] (!%p248_p3)   ;;  %v1766_v22 = vld [vmem:[%s2248_s3 + $0xe8] sm:$0xff] (!%p248_p3)  }
  0x10   : > { %1562 = vmatprep.subr.bf16.mxu0 %v1752_v8  ;;  %s2262_s19 = smov (!%p303_p5, %s1851_s19), 1  ;;  %v1759_v15 = vld [vmem:[%s2248_s3 + $0x98] sm:$0xff]   ;;  %v1763_v19 = vld [vmem:[%s2248_s3 + $0xa0] sm:$0xff]   ;;  %s2264_s8 = smov (!%p315_p7, %s312_s8), 33  ;;  %v1767_v23 = vld [vmem:[%s2248_s3 + $0xa8] sm:$0xff]  }
  0x11   : > { %1589 = vmatpush3.bf16.msra.mxu1 %v1751_v7  ;;  %s306_s13 = scalar_select %p305_p6, %s1847_s18, 33  ;;  %v1768_v24 = vld [vmem:[%s2248_s3 + $0x70] sm:$0xff]   ;;  %v1772_v28 = vld [vmem:[%s2248_s3 + $0x78] sm:$0xff]   ;;  %v1778_v37 = vld [vmem:[%s2248_s3 + $0x140] sm:$0xff]  }
  0x12   : > { %1590 = vmatprep.subr.bf16.mxu1 %v1754_v10  ;;  %s1991_s27 = smul.u32 170, %s2262_s19  ;;  %v1769_v25 = vld [vmem:[%s2248_s3 + $0x30] sm:$0xff]   ;;  %v1773_v29 = vld [vmem:[%s2248_s3 + $0x38] sm:$0xff]   ;;  %v1780_v41 = vld [vmem:[%s2248_s3 + $0x100] sm:$0xff]   ;;  %s1472_s9 = sshll.u32 %s2262_s19, 7 }
  0x13   : > { %1563 = vmatpush3.bf16.msra.mxu0 %v1753_v9  ;;  %s1700_s30 = smul.u32 5, %s306_s13  ;;  %v1770_v26 = vld [vmem:[%s2248_s3 + $0xf0] sm:$0xff]   ;;  %v1774_v30 = vld [vmem:[%s2248_s3 + $0xf8] sm:$0xff]   ;;  %v1781_v45 = vld [vmem:[%s2248_s3 + $0x1c0] sm:$0xff]  }
  0x14   : > { %1564 = vmatprep.subr.bf16.mxu0 %v1756_v12  ;;  %s1702_s25 = smul.u32 5, %s2264_s8  ;;  %v1771_v27 = vld [vmem:[%s2248_s3 + $0xb0] sm:$0xff]   ;;  %v1777_v33 = vld [vmem:[%s2248_s3 + $0xb8] sm:$0xff]   ;;  %v1782_v47 = vld [vmem:[%s2248_s3 + $0x180] sm:$0xff]  }
  0x15   : > { %1591 = vmatpush3.bf16.msra.mxu1 %v1755_v11  ;;  %s309_s17 = sadd.s32 %s1991_s27, %s1700_s30  ;;  %v1783_v49 = vld [vmem:[%s2248_s3 + $0x148] sm:$0xff]   ;;  %v1787_v53 = vld [vmem:[%s2248_s3 + $0x150] sm:$0xff]   ;;  %v1791_v57 = vld [vmem:[%s2248_s3 + $0x158] sm:$0xff]  }
  0x16   : > { %1592 = vmatprep.subr.bf16.mxu1 %v1758_v14  ;;  %s1468_s10 = sshll.u32 %s309_s17, 2  ;;  %s319_s8 = sadd.s32 %s1702_s25, %s1991_s27  ;;  %v1784_v50 = vld [vmem:[%s2248_s3 + $0x108] sm:$0xff]   ;;  %v1788_v54 = vld [vmem:[%s2248_s3 + $0x110] sm:$0xff]   ;;  %v1792_v58 = vld [vmem:[%s2248_s3 + $0x118] sm:$0xff]  }
  0x17   : > { %1565 = vmatpush3.bf16.msra.mxu0 %v1757_v13  ;;  %s2034_s17 = scalar_lea.vmem %s2245_s0, %s1468_s10  ;;  %s1469_s29 = sshll.u32 %s319_s8, 2  ;;  %v1785_v51 = vld [vmem:[%s2248_s3 + $0x1c8] sm:$0xff]   ;;  %v1789_v55 = vld [vmem:[%s2248_s3 + $0x1d0] sm:$0xff]   ;;  %v1793_v59 = vld [vmem:[%s2248_s3 + $0x1d8] sm:$0xff]  }
  0x18   : > { %1566 = vmatprep.subr.bf16.mxu0 %v1760_v16  ;;  %v1775_v31 = vld [vmem:[%s2034_s17] sm:$0xff]   ;;  %v2041_v32 = vld [vmem:[%s2034_s17 + $0x8] sm:$0xff]   ;;  %s2049_s11 = scalar_lea.vmem %s2246_s1, %s1469_s29  ;;  %s323_s29 = sadd.s32 2, %s1847_s18  ;;  %v1790_v56 = vld [vmem:[%s2248_s3 + $0x190] sm:$0xff]  }
  0x19   : > { %1593 = vmatpush3.bf16.msra.mxu1 %v1759_v15  ;;  %v376_v34 = vshrl.u32 %v1775_v31, 16  ;;  %v378_v35 = vshll.u32 %v1775_v31, 16  ;;  %v383_v36 = vshll.u32 %v2041_v32, 16  ;;  %v2058_v40 = vld [vmem:[%s2049_s11] sm:$0xff]   ;;  %v398_v42 = vrot.slane %v1775_v31, 1  ;;  %v1786_v52 = vld [vmem:[%s2248_s3 + $0x188] sm:$0xff]  }
  0x1a   : > { %1594 = vmatprep.subr.bf16.mxu1 %v1762_v18  ;;  %v399_v43 = vrot.slane %v2041_v32, 1  ;;  %1157 = vmatprep.mubr.bf16.mxu1 %v2058_v40  ;;  %p326_p8 = scmp.lt.s32.totalorder %s323_s29, 33  ;;  %v1794_v60 = vld [vmem:[%s2248_s3 + $0x198] sm:$0xff]   ;;  %v1795_v61 = vld [vmem:[%s2248_s3 + $0x160] sm:$0xff]   ;;  %v423_v62 = vshll.u32 %v2058_v40, 16  ;;  %v387_v0 = vshrl.u32 %v2041_v32, 16 }
  0x1b   : > { %1567 = vmatpush3.bf16.msra.mxu0 %v1761_v17  ;;  %v380_v38 = vrot.slane %v378_v35, 1  ;;  %v2055_v39 = vrot.slane %v383_v36, 1  ;;  %v1796_v63 = vld [vmem:[%s2248_s3 + $0x120] sm:$0xff]   ;;  %v442_v2 = vrot.slane %v2058_v40, 1  ;;  %v421_v4 = vshrl.u32 %v2058_v40, 16  ;;  %v1799_v5 = vld [vmem:[%s2248_s3 + $0x168] sm:$0xff]  }
  0x1c   : > { %1568 = vmatprep.subr.bf16.mxu0 %v1764_v20  ;;  %v400_v46 = vsel %vm397_vm1, %v398_v42, %v399_v43  ;;  %s2266_s29 = smov (!%p326_p8, %s323_s29), 33  ;;  %v1797_v1 = vld [vmem:[%s2248_s3 + $0x1e0] sm:$0xff]   ;;  %v425_v6 = vrot.slane %v423_v62, 1  ;;  %v1800_v7 = vld [vmem:[%s2034_s17 + $0x10] ss:$0 sps:$4 sm:$0x11]  }
  0x1d   : > { %1595 = vmatpush3.bf16.msra.mxu1 %v1763_v19  ;;  %v381_v44 = vor.u32 %v380_v38, %v376_v34  ;;  %s1703_s13 = smul.u32 5, %s2266_s29  ;;  %v1798_v3 = vld [vmem:[%s2248_s3 + $0x1a0] sm:$0xff]   ;;  %v1801_v8 = vld [vmem:[%s2248_s3 + $0x128] sm:$0xff]   ;;  %v389_v9 = vor.u32 %v387_v0, %v2055_v39  ;;  %v391_v10 = vshll.u32 %v1800_v7, 16  ;;  %v401_v13 = vrot.slane %v1800_v7, 1  ;;  %v1805_v17 = vld [vmem:[%s2248_s3 + $0x170] sm:$0xff]  }
  0x1e   : > { %1596 = vmatprep.subr.bf16.mxu1 %v1766_v22  ;;  %v1802_v11 = vld [vmem:[%s2248_s3 + $0x1e8] sm:$0xff]   ;;  %v1806_v20 = vld [vmem:[%s2248_s3 + $0x130] sm:$0xff]   ;;  %v1821_v62 = vld [vmem:[%s2248_s3 + $0x220] sm:$0xff]   ;;  %s2268_s18 = smov (!%p336_p9, %s1847_s18), 31 }
  0x1f   : > { %1569 = vmatpush3.bf16.msra.mxu0 %v1765_v21  ;;  %v386_v48 = vsel %vm374_vm0, %v381_v44, %v2055_v39  ;;  %v2144_v12 = vld [vmem:[%s2049_s11 + $0x8] sm:$0xff]   ;;  %v393_v14 = vrot.slane %v391_v10, 1  ;;  %v402_v16 = vsel %vm397_vm1, %v399_v43, %v401_v13  ;;  %s330_s25 = sadd.s32 %s1703_s13, %s1991_s27  ;;  %v1807_v22 = vld [vmem:[%s2248_s3 + $0x1f0] sm:$0xff]   ;;  %s1471_s7 = sshll.u32 %s2268_s18, 2 }
  0x20   : > { %1570 = vmatprep.subr.bf16.mxu0 %v1768_v24  ;;  %1108 = vmatprep.mubr.bf16.mxu0 %v386_v48  ;;  %v1804_v15 = vld [vmem:[%s2248_s3 + $0x1a8] sm:$0xff]   ;;  %v443_v18 = vrot.slane %v2144_v12, 1  ;;  %v428_v21 = vshll.u32 %v2144_v12, 16  ;;  %v1808_v24 = vld [vmem:[%s2248_s3 + $0x1b0] sm:$0xff]   ;;  %s1470_s13 = sshll.u32 %s330_s25, 2  ;;  %v432_v35 = vshrl.u32 %v2144_v12, 16  ;;  %s340_s10 = sadd.s32 %s1472_s9, %s1471_s7 }
  0x21   : > { %1597 = vmatpush3.bf16.msra.mxu1 %v1767_v23  ;;  %v394_v19 = vsel %vm374_vm0, %v389_v9, %v393_v14  ;;  %s332_s28 = scalar_lea.vmem %s2247_s2, %s1470_s13  ;;  %v1816_v38 = vld [vmem:[%s2248_s3 + $0x208] sm:$0xff]   ;;  %v1817_v40 = vld [vmem:[%s2049_s11 + $0x10] ss:$0 sps:$4 sm:$0x11]   ;;  %v1483_v9 = vld [vmem:[%s2249_s4] ss:$0 sm:$0xff] }
  0x22   : > { %1598 = vmatprep.subr.bf16.mxu1 %v1770_v26  ;;  %v444_v23 = vsel %vm397_vm1, %v442_v2, %v443_v18  ;;  %v1810_v26 = vld [vmem:[%s2248_s3 + $0x138] sm:$0xff]   ;;  %v1815_v34 = vld [vmem:[%s332_s28 + $0x8] sm:$0xff]   ;;  %v1819_v48 = vld [vmem:[%s332_s28 + $0x10] ss:$0 sps:$4 sm:$0x11]   ;;  %s1473_s27 = sshll.u32 %s340_s10, 3 }
  0x23   : > { %1571 = vmatpush3.bf16.msra.mxu0 %v1769_v25  ;;  %v1809_v25 = vld [vmem:[%s2248_s3 + $0x178] sm:$0xff]   ;;  %v472_v39 = vshll.u32 %v1815_v34, 16  ;;  %v476_v43 = vshrl.u32 %v1815_v34, 16  ;;  %v1823_v0 = vld [vmem:[%s2248_s3 + $0x230] sm:$0xff]   ;;  %v489_v2 = vrot.slane %v1819_v48, 1  ;;  %s342_s11 = scalar_lea.vmem %s2250_s5, %s1473_s27 }
  0x24   : > { %1572 = vmatprep.subr.bf16.mxu0 %v1772_v28  ;;  %v430_v28 = vrot.slane %v428_v21, 1 }
  0x25   : > { %1599 = vmatpush3.bf16.msra.mxu1 %v1771_v27  ;;  %v426_v27 = vor.u32 %v425_v6, %v421_v4  ;;  %v474_v44 = vrot.slane %v472_v39, 1 }
  0x26   : > { %1600 = vmatprep.subr.bf16.mxu1 %v1774_v30  ;;  %v1812_v30 = vld [vmem:[%s2248_s3 + $0x1b8] sm:$0xff]  }
  0x27   : > { %1573 = vmatpush3.bf16.msra.mxu0 %v1773_v29  ;;  %v1811_v29 = vld [vmem:[%s2248_s3 + $0x1f8] sm:$0xff]  }
  0x28   : > { %1614 = vmatprep.subr.bf16.mxu0 %v1778_v37 }
  0x29   : > { %1601 = vmatpush3.bf16.msra.mxu1 %v1777_v33  ;;  %v1814_v33 = vld [vmem:[%s332_s28] sm:$0xff]  }
  0x2a   : > { %1642 = vmatprep.subr.bf16.mxu1 %v1781_v45  ;;  %1109 = vmatmul.mubr.bf16.vlgmr.msra.gmra.mrb[0].mxu0 %v1775_v31  ;;  %v1813_v31 = vld [vmem:[%s2248_s3 + $0x200] sm:$0xff]   ;;  %v465_v36 = vshrl.u32 %v1814_v33, 16  ;;  %v467_v37 = vshll.u32 %v1814_v33, 16  ;;  %v445_v45 = vrot.slane %v1817_v40, 1 }
  0x2b   : > { %1615 = vmatpush3.bf16.msra.mxu0 %v1780_v41  ;;  %1116 = vmatprep.mubr.bf16.mxu0 %v394_v19  ;;  %v1818_v41 = vld [vmem:[%s2248_s3 + $0x210] sm:$0xff]  }
  0x2c   : > { %1158 = vmatmul.mubr.bf16.vlgmr.msra.gmra.mrb[0].mxu1 %v400_v46  ;;  %1616 = vmatprep.subr.bf16.mxu0 %v1783_v49  ;;  %v469_v42 = vrot.slane %v467_v37, 1  ;;  %v434_v46 = vor.u32 %v432_v35, %v430_v28 }
  0x2d   : > { %1643 = vmatpush3.bf16.msra.mxu1 %v1782_v47  ;;  %1165 = vmatprep.mubr.bf16.mxu1 %v2144_v12  ;;  %v436_v47 = vshll.u32 %v1817_v40, 16 }
  0x2e   : > { %1644 = vmatprep.subr.bf16.mxu1 %v1785_v51  ;;  %v470_v49 = vor.u32 %v469_v42, %v465_v36  ;;  %v446_v51 = vsel %vm397_vm1, %v443_v18, %v445_v45 }
  0x2f   : > { %1617 = vmatpush3.bf16.msra.mxu0 %v1784_v50  ;;  %v486_v50 = vrot.slane %v1814_v33, 1 }
  0x30   : > { %1618 = vmatprep.subr.bf16.mxu0 %v1787_v53  ;;  %v478_v53 = vor.u32 %v476_v43, %v474_v44 }
  0x31   : > { %1645 = vmatpush3.bf16.msra.mxu1 %v1786_v52  ;;  %v438_v52 = vrot.slane %v436_v47, 1 }
  0x32   : > { %1646 = vmatprep.subr.bf16.mxu1 %v1789_v55  ;;  %1117 = vmatmul.mubr.bf16.gmra.mrb[4].mxu0 %v2041_v32  ;;  %v431_v32 = vsel %vm374_vm0, %v426_v27, %v430_v28  ;;  %v475_v55 = vsel %vm374_vm0, %v470_v49, %v474_v44 }
  0x33   : > { %1619 = vmatpush3.bf16.msra.mxu0 %v1788_v54  ;;  %1206 = vmatprep.mubr.bf16.mxu0 %v444_v23  ;;  %v480_v54 = vshll.u32 %v1819_v48, 16 }
  0x34   : > { %1620 = vmatprep.subr.bf16.mxu0 %v1791_v57  ;;  %1166 = vmatmul.mubr.bf16.gmra.mrb[4].mxu1 %v402_v16  ;;  %v439_v57 = vsel %vm374_vm0, %v434_v46, %v438_v52 }
  0x35   : > { %1647 = vmatpush3.bf16.msra.mxu1 %v1790_v56  ;;  %v487_v56 = vrot.slane %v1815_v34, 1  ;;  %1255 = vmatprep.mubr.bf16.mxu1 %v475_v55 }
  0x36   : > { %1648 = vmatprep.subr.bf16.mxu1 %v1793_v59  ;;  %v1820_v59 = vld [vmem:[%s2248_s3 + $0x218] sm:$0xff]  }
  0x37   : > { %1621 = vmatpush3.bf16.msra.mxu0 %v1792_v58  ;;  %v482_v58 = vrot.slane %v480_v54, 1 }
  0x38   : > { %1622 = vmatprep.subr.bf16.mxu0 %v1795_v61 }
  0x39   : > { %1649 = vmatpush3.bf16.msra.mxu1 %v1794_v60  ;;  %v488_v60 = vsel %vm397_vm1, %v486_v50, %v487_v56  ;;  %v483_v61 = vsel %vm374_vm0, %v478_v53, %v482_v58 }
  0x3a   : > { %1650 = vmatprep.subr.bf16.mxu1 %v1797_v1  ;;  %v1824_v1 = vld [vmem:[%s2248_s3 + $0x238] sm:$0xff]  }
  0x3b   : > { %1623 = vmatpush3.bf16.msra.mxu0 %v1796_v63  ;;  %v1822_v63 = vld [vmem:[%s2248_s3 + $0x228] sm:$0xff]  }
  0x3c   : > { %1624 = vmatprep.subr.bf16.mxu0 %v1799_v5 }
  0x3d   : > { %1651 = vmatpush3.bf16.msra.mxu1 %v1798_v3  ;;  %v490_v3 = vsel %vm397_vm1, %v487_v56, %v489_v2 }
  0x3e   : > { %1652 = vmatprep.subr.bf16.mxu1 %v1802_v11 }
  0x3f   : > { %1625 = vmatpush3.bf16.msra.mxu0 %v1801_v8 }
  0x40   : > { %1626 = vmatprep.subr.bf16.mxu0 %v1805_v17 }
  0x41   : > { %1653 = vmatpush3.bf16.msra.mxu1 %v1804_v15 }
  0x42   : > { %1654 = vmatprep.subr.bf16.mxu1 %v1807_v22 }
  0x43   : > { %1627 = vmatpush3.bf16.msra.mxu0 %v1806_v20 }
  0x44   : > { %1628 = vmatprep.subr.bf16.mxu0 %v1809_v25 }
  0x45   : > { %1655 = vmatpush3.bf16.msra.mxu1 %v1808_v24 }
  0x46   : > { %1656 = vmatprep.subr.bf16.mxu1 %v1811_v29 }
  0x47   : > { %1629 = vmatpush3.bf16.msra.mxu0 %v1810_v26 }
  0x48   : > { %1680 = vmatprep.subr.bf16.mxu0 %v1813_v31 }
  0x49   : > { %1657 = vmatpush3.bf16.msra.mxu1 %v1812_v30 }
  0x4a   : > { %1207 = vmatmul.mubr.bf16.vlgmr.msra.gmra.mrb[8].mxu0 %v431_v32 }
  0x4b   : > { %1681 = vmatpush3.bf16.msra.mxu0 %v1813_v31  ;;  %1214 = vmatprep.mubr.bf16.mxu0 %v446_v51 }
  0x4c   : > { %1682 = vmatprep.subr.bf16.mxu0 %v1816_v38  ;;  %1256 = vmatmul.mubr.bf16.vlgmr.msra.gmra.mrb[8].mxu1 %v1814_v33 }
  0x4d   : > { %1263 = vmatprep.mubr.bf16.mxu1 %v483_v61 }
  0x4f   : > { %1683 = vmatpush3.bf16.msra.mxu0 %v1816_v38 }
  0x50   : > { %1684 = vmatprep.subr.bf16.mxu0 %v1818_v41 }
  0x52   : > { %1215 = vmatmul.mubr.bf16.gmra.mrb[12].mxu0 %v439_v57 }
  0x53   : > { %1685 = vmatpush3.bf16.msra.mxu0 %v1818_v41  ;;  %1696 = vmatprep.mubr.bf16.mxu0 %v488_v60 }
  0x54   : > { %1686 = vmatprep.subr.bf16.mxu0 %v1820_v59  ;;  %1264 = vmatmul.mubr.bf16.gmra.mrb[12].mxu1 %v1815_v34 }
  0x57   : > { %1687 = vmatpush3.bf16.msra.mxu0 %v1820_v59 }
  0x58   : > { %1688 = vmatprep.subr.bf16.mxu0 %v1821_v62 }
  0x5b   : > { %1689 = vmatpush3.bf16.msra.mxu0 %v1821_v62 }
  0x5c   : > { %1690 = vmatprep.subr.bf16.mxu0 %v1822_v63 }
  0x5f   : > { %1691 = vmatpush3.bf16.msra.mxu0 %v1822_v63 }
  0x60   : > { %1692 = vmatprep.subr.bf16.mxu0 %v1823_v0 }
  0x63   : > { %1693 = vmatpush3.bf16.msra.mxu0 %v1823_v0 }
  0x64   : > { %1694 = vmatprep.subr.bf16.mxu0 %v1824_v1 }
  0x67   : > { %1695 = vmatpush3.bf16.msra.mxu0 %v1824_v1 }
  0x6a   : > { %1697 = vmatmul.mubr.bf16.vlgmr.msra.gmra.mrb[16].mxu0 %v490_v3 }
  0xfd   : > { %v1574_v6 = vpop.f32.mrb[0].mxu0 }
  0xfe   : > { %v1575_v10 = vpop.f32.mrb[1].mxu0 }
  0xff   : > { %v1602_v4 = vpop.f32.mrb[0].mxu1  ;;  %v1576_v12 = vadd.f32 %v1575_v10, %v1574_v6  ;;  %v1577_v13 = vpop.f32.mrb[2].mxu0 }
 0x100   : > { %v1603_v5 = vpop.f32.mrb[1].mxu1  ;;  %v1578_v15 = vpop.f32.mrb[3].mxu0 }
 0x101   : > { %v1604_v7 = vadd.f32 %v1603_v5, %v1602_v4  ;;  %v1605_v8 = vpop.f32.mrb[2].mxu1  ;;  %v1111_v16 = vadd.f32 %v1576_v12, %v1483_v9  ;;  %v1579_v17 = vadd.f32 %v1578_v15, %v1577_v13 }
 0x102   : > { %v1606_v11 = vpop.f32.mrb[3].mxu1 }
 0x103   : > { %v1607_v14 = vadd.f32 %v1606_v11, %v1605_v8  ;;  %v1114_v18 = vadd.f32 %v1579_v17, %v1483_v9  ;;  %v1160_v19 = vadd.f32 %v1604_v7, %v1111_v16 }
 0x105   : > { %v1163_v20 = vadd.f32 %v1607_v14, %v1114_v18  ;;  %v1580_v22 = vpop.f32.mrb[4].mxu0 }
 0x106   : > { %v1581_v24 = vpop.f32.mrb[5].mxu0 }
 0x107   : > { %v1608_v21 = vpop.f32.mrb[4].mxu1  ;;  %v1582_v27 = vadd.f32 %v1581_v24, %v1580_v22  ;;  %v1583_v28 = vpop.f32.mrb[6].mxu0 }
 0x108   : > { %v1609_v23 = vpop.f32.mrb[5].mxu1  ;;  %v1584_v30 = vpop.f32.mrb[7].mxu0 }
 0x109   : > { %v1610_v25 = vadd.f32 %v1609_v23, %v1608_v21  ;;  %v1611_v26 = vpop.f32.mrb[6].mxu1  ;;  %v1119_v32 = vadd.f32 %v1582_v27, %v1483_v9  ;;  %v1585_v33 = vadd.f32 %v1584_v30, %v1583_v28 }
 0x10a   : > { %v1612_v29 = vpop.f32.mrb[7].mxu1 }
 0x10b   : > { %v1613_v31 = vadd.f32 %v1612_v29, %v1611_v26  ;;  %v1122_v34 = vadd.f32 %v1585_v33, %v1483_v9  ;;  %v1168_v35 = vadd.f32 %v1610_v25, %v1119_v32 }
 0x10d   : > { %v1171_v36 = vadd.f32 %v1613_v31, %v1122_v34 }
 0x11d   : > { %v1630_v37 = vpop.f32.mrb[8].mxu0 }
 0x11e   : > { %v1631_v38 = vpop.f32.mrb[9].mxu0 }
 0x11f   : > { %v1632_v39 = vadd.f32 %v1631_v38, %v1630_v37  ;;  %v1633_v40 = vpop.f32.mrb[10].mxu0  ;;  %v1658_v45 = vpop.f32.mrb[8].mxu1 }
 0x120   : > { %v1634_v41 = vpop.f32.mrb[11].mxu0  ;;  %v1659_v46 = vpop.f32.mrb[9].mxu1 }
 0x121   : > { %v1209_v42 = vadd.f32 %v1632_v39, %v1160_v19  ;;  %v1635_v43 = vadd.f32 %v1634_v41, %v1633_v40  ;;  %v1660_v48 = vadd.f32 %v1659_v46, %v1658_v45  ;;  %v1661_v49 = vpop.f32.mrb[10].mxu1 }
 0x122   : > { %v1662_v51 = vpop.f32.mrb[11].mxu1 }
 0x123   : > { %v1212_v44 = vadd.f32 %v1635_v43, %v1163_v20  ;;  %v1663_v54 = vadd.f32 %v1662_v51, %v1661_v49  ;;  %v1258_v56 = vadd.f32 %v1660_v48, %v1209_v42 }
 0x125   : > { %v1636_v47 = vpop.f32.mrb[12].mxu0  ;;  %v1261_v59 = vadd.f32 %v1663_v54, %v1212_v44 }
 0x126   : > { %v1637_v50 = vpop.f32.mrb[13].mxu0 }
 0x127   : > { %v1638_v52 = vadd.f32 %v1637_v50, %v1636_v47  ;;  %v1639_v53 = vpop.f32.mrb[14].mxu0  ;;  %v1664_v61 = vpop.f32.mrb[12].mxu1 }
 0x128   : > { %v1640_v55 = vpop.f32.mrb[15].mxu0  ;;  %v1665_v62 = vpop.f32.mrb[13].mxu1 }
 0x129   : > { %v1217_v57 = vadd.f32 %v1638_v52, %v1168_v35  ;;  %v1641_v58 = vadd.f32 %v1640_v55, %v1639_v53  ;;  %v1666_v63 = vadd.f32 %v1665_v62, %v1664_v61  ;;  %v1667_v0 = vpop.f32.mrb[14].mxu1 }
 0x12a   : > { %v1668_v1 = vpop.f32.mrb[15].mxu1 }
 0x12b   : > { %v1220_v60 = vadd.f32 %v1641_v58, %v1171_v36  ;;  %v1669_v2 = vadd.f32 %v1668_v1, %v1667_v0  ;;  %v1266_v3 = vadd.f32 %v1666_v63, %v1217_v57 }
 0x12d   : > { %v1269_v4 = vadd.f32 %v1669_v2, %v1220_v60 }
 0x13d   : > { %v1698_v5 = vpop.f32.mrb[16].mxu0 }
 0x13e   : > { %v1315_v6 = vadd.f32 %v1698_v5, %v1266_v3  ;;  %v1306_v7 = vpop.f32.mrb[17].mxu0 }
 0x13f   : > { %v1307_v8 = vadd.f32 %v1306_v7, %v1258_v56  ;;  %v1699_v9 = vpop.f32.mrb[18].mxu0 }
 0x140   : > { %1324 = vst.msk [vmem:[%s342_s11 + $0x10] sm:$0xff] %vm1321_vm2, %v1315_v6  ;;  %v1318_v10 = vadd.f32 %v1699_v9, %v1269_v4  ;;  %v1309_v11 = vpop.f32.mrb[19].mxu0 }
 0x141   : > { %1322 = vst.msk [vmem:[%s342_s11] sm:$0xff] %vm1321_vm2, %v1307_v8  ;;  %v1310_v12 = vadd.f32 %v1309_v11, %v1261_v59 }
 0x142   : > { %1325 = vst.msk [vmem:[%s342_s11 + $0x18] sm:$0xff] %vm1321_vm2, %v1318_v10 }
 0x143   : > { %1323 = vst.msk [vmem:[%s342_s11 + $0x8] sm:$0xff] %vm1321_vm2, %v1310_v12 }
 0x144 PF: > { %s15_s22 = sadd.s32 1, %s1863_s22   ;;  %s2251_s18 = smov %s1855_s20 }
 0x145   : > { %p12_p10 = scmp.ge.s32.totalorder %s15_s22, 66   ;;  %s2252_s19 = smov %s1859_s21 }
 0x146   : > { %s2253_s20 = smov %s2256_s23  ;;  %s2254_s21 = smov %s2260_s24 }
 0x147   :  { %14 = sbr.rel (!%p12_p10) target bundleno = 3 (0x3), region = 76 }

// kernel: _lambda_.44
= control target key start
LH: loop header
LB: loop body
LE: loop exit
PB: predicated region body
PF: predicated region fallthrough
CT: control target
= control target key end

     0   :  { %s1878_s12 = smov 0   ;;  %s5361_s0 = inlined_call_operand.vmem [shape: f32[2,32,32,64], index: 0, kind: input, shape index: {}]   ;;  %s5362_s1 = inlined_call_operand.vmem [shape: f32[1,1,64], index: 1, kind: input, shape index: {}]   ;;  %s5363_s2 = inlined_call_operand.vmem [shape: f32[1,1,64], index: 2, kind: input, shape index: {}]   ;;  %s5364_s3 = inlined_call_operand.vmem [shape: f32[2,32,32,64], index: 3, kind: output, shape index: {}]  }
   0x1 LB: > { %s1812_s13 = sadd.s32 4294967295, %s1856_s12   ;;  %p1816_p0 = scmp.ge.s32.totalorder %s1856_s12, 1  ;;  %s1856_s12 = sphi %s1878_s12, %s13_s12  }
   0x2   : > { %p137_p1 = scmp.lt.s32.totalorder %s1856_s12, 3 }
   0x4   : > { %p138_p2 = pnand %p1816_p0, %p137_p1 }
   0x6   : > { %141 = sbr.rel (%p138_p2) target bundleno = 1241 (0x4d9), region = 32 }
   0xd   : > { %p161_p3 = scmp.lt.s32.totalorder %s1812_s13, 1  ;;  %vm299_vm0 = vcmask 523264  }
   0xf   : > { %s6282_s13 = smov (!%p161_p3, %s1812_s13), 1 }
  0x10   : > { %s1825_s14 = sshll.u32 %s6282_s13, 10 }
  0x11   : > { %s1894_s17 = scalar_lea.vmem %s5361_s0, %s1825_s14  ;;  %s4956_s30 = scalar_lea.vmem %s5364_s3, %s1825_s14 }
  0x12   : > { %v1897_v0 = vld [vmem:[%s1894_s17] sm:$0xff]  ;;  %v1900_v1 = vld [vmem:[%s1894_s17 + $0x8] sm:$0xff]  ;;  %v1903_v2 = vld [vmem:[%s1894_s17 + $0x10] sm:$0xff] }
  0x13   : > { %v1906_v3 = vld [vmem:[%s1894_s17 + $0x18] sm:$0xff]  ;;  %v300_v4 = vsel %vm299_vm0, %v1897_v0, 0.0  ;;  %v301_v5 = vsel %vm299_vm0, %v1900_v1, 0.0  ;;  %v303_v6 = vsel %vm299_vm0, %v1903_v2, 0.0  ;;  %v1915_v7 = vld [vmem:[%s1894_s17 + $0x20] sm:$0xff]  ;;  %v1920_v10 = vld [vmem:[%s1894_s17 + $0x28] sm:$0xff] }
  0x14   : > { %v302_v8 = vadd.f32 %v301_v5, %v300_v4  ;;  %v305_v9 = vsel %vm299_vm0, %v1906_v3, 0.0  ;;  %v307_v12 = vsel %vm299_vm0, %v1915_v7, 0.0  ;;  %v1925_v13 = vld [vmem:[%s1894_s17 + $0x30] sm:$0xff]  ;;  %v309_v15 = vsel %vm299_vm0, %v1920_v10, 0.0  ;;  %v1930_v16 = vld [vmem:[%s1894_s17 + $0x38] sm:$0xff]  ;;  %v1935_v19 = vld [vmem:[%s1894_s17 + $0x40] sm:$0xff] }
  0x15   : > { %v311_v18 = vsel %vm299_vm0, %v1925_v13, 0.0  ;;  %v313_v21 = vsel %vm299_vm0, %v1930_v16, 0.0  ;;  %v1940_v22 = vld [vmem:[%s1894_s17 + $0x48] sm:$0xff]  ;;  %v315_v24 = vsel %vm299_vm0, %v1935_v19, 0.0  ;;  %v1945_v25 = vld [vmem:[%s1894_s17 + $0x50] sm:$0xff]  ;;  %v1950_v28 = vld [vmem:[%s1894_s17 + $0x58] sm:$0xff] }
  0x16   : > { %v304_v11 = vadd.f32 %v303_v6, %v302_v8  ;;  %v317_v27 = vsel %vm299_vm0, %v1940_v22, 0.0  ;;  %v319_v30 = vsel %vm299_vm0, %v1945_v25, 0.0  ;;  %v1955_v31 = vld [vmem:[%s1894_s17 + $0x60] sm:$0xff]  ;;  %v321_v33 = vsel %vm299_vm0, %v1950_v28, 0.0  ;;  %v1960_v34 = vld [vmem:[%s1894_s17 + $0x68] sm:$0xff]  ;;  %v1965_v37 = vld [vmem:[%s1894_s17 + $0x70] sm:$0xff] }
  0x17   : > { %v323_v36 = vsel %vm299_vm0, %v1955_v31, 0.0  ;;  %v325_v39 = vsel %vm299_vm0, %v1960_v34, 0.0  ;;  %v1970_v40 = vld [vmem:[%s1894_s17 + $0x78] sm:$0xff]  ;;  %v327_v42 = vsel %vm299_vm0, %v1965_v37, 0.0  ;;  %v1975_v43 = vld [vmem:[%s1894_s17 + $0x80] sm:$0xff]  ;;  %v1980_v46 = vld [vmem:[%s1894_s17 + $0x88] sm:$0xff] }
  0x18   : > { %v306_v14 = vadd.f32 %v305_v9, %v304_v11  ;;  %v329_v45 = vsel %vm299_vm0, %v1970_v40, 0.0  ;;  %v331_v48 = vsel %vm299_vm0, %v1975_v43, 0.0  ;;  %v1985_v49 = vld [vmem:[%s1894_s17 + $0x90] sm:$0xff]  ;;  %v333_v51 = vsel %vm299_vm0, %v1980_v46, 0.0  ;;  %v1990_v52 = vld [vmem:[%s1894_s17 + $0x98] sm:$0xff]  ;;  %v1995_v55 = vld [vmem:[%s1894_s17 + $0xa0] sm:$0xff] }
  0x19   : > { %v335_v54 = vsel %vm299_vm0, %v1985_v49, 0.0  ;;  %v337_v57 = vsel %vm299_vm0, %v1990_v52, 0.0  ;;  %v2000_v58 = vld [vmem:[%s1894_s17 + $0xa8] sm:$0xff]  ;;  %v339_v60 = vsel %vm299_vm0, %v1995_v55, 0.0  ;;  %v2005_v61 = vld [vmem:[%s1894_s17 + $0xb0] sm:$0xff]  ;;  %v2010_v4 = vld [vmem:[%s1894_s17 + $0xb8] sm:$0xff] }
  0x1a   : > { %v308_v17 = vadd.f32 %v307_v12, %v306_v14  ;;  %v341_v63 = vsel %vm299_vm0, %v2000_v58, 0.0  ;;  %v343_v6 = vsel %vm299_vm0, %v2005_v61, 0.0  ;;  %v2015_v8 = vld [vmem:[%s1894_s17 + $0xc0] sm:$0xff]  ;;  %v345_v11 = vsel %vm299_vm0, %v2010_v4, 0.0  ;;  %v2020_v12 = vld [vmem:[%s1894_s17 + $0xc8] sm:$0xff] }
  0x1c   : > { %v310_v20 = vadd.f32 %v309_v15, %v308_v17  ;;  %v347_v15 = vsel %vm299_vm0, %v2015_v8, 0.0  ;;  %v2025_v17 = vld [vmem:[%s1894_s17 + $0xd0] sm:$0xff] }
  0x1e   : > { %v312_v23 = vadd.f32 %v311_v18, %v310_v20  ;;  %v349_v20 = vsel %vm299_vm0, %v2020_v12, 0.0 }
  0x20   : > { %v314_v26 = vadd.f32 %v313_v21, %v312_v23  ;;  %v2030_v21 = vld [vmem:[%s1894_s17 + $0xd8] sm:$0xff] }
  0x22   : > { %v316_v29 = vadd.f32 %v315_v24, %v314_v26  ;;  %v351_v24 = vsel %vm299_vm0, %v2025_v17, 0.0  ;;  %v2035_v26 = vld [vmem:[%s1894_s17 + $0xe0] sm:$0xff] }
  0x24   : > { %v318_v32 = vadd.f32 %v317_v27, %v316_v29  ;;  %v353_v29 = vsel %vm299_vm0, %v2030_v21, 0.0 }
  0x26   : > { %v320_v35 = vadd.f32 %v319_v30, %v318_v32  ;;  %v2040_v30 = vld [vmem:[%s1894_s17 + $0xe8] sm:$0xff] }
  0x28   : > { %v322_v38 = vadd.f32 %v321_v33, %v320_v35  ;;  %v355_v33 = vsel %vm299_vm0, %v2035_v26, 0.0  ;;  %v2045_v35 = vld [vmem:[%s1894_s17 + $0xf0] sm:$0xff] }
  0x2a   : > { %v324_v41 = vadd.f32 %v323_v36, %v322_v38  ;;  %v357_v38 = vsel %vm299_vm0, %v2040_v30, 0.0 }
  0x2c   : > { %v326_v44 = vadd.f32 %v325_v39, %v324_v41  ;;  %v2050_v39 = vld [vmem:[%s1894_s17 + $0xf8] sm:$0xff] }
  0x2e   : > { %v328_v47 = vadd.f32 %v327_v42, %v326_v44  ;;  %v359_v42 = vsel %vm299_vm0, %v2045_v35, 0.0  ;;  %v2055_v44 = vld [vmem:[%s1894_s17 + $0x100] sm:$0xff] }
  0x30   : > { %v330_v50 = vadd.f32 %v329_v45, %v328_v47  ;;  %v361_v47 = vsel %vm299_vm0, %v2050_v39, 0.0 }
  0x32   : > { %v332_v53 = vadd.f32 %v331_v48, %v330_v50  ;;  %v2060_v48 = vld [vmem:[%s1894_s17 + $0x108] sm:$0xff] }
  0x34   : > { %v334_v56 = vadd.f32 %v333_v51, %v332_v53  ;;  %v363_v51 = vsel %vm299_vm0, %v2055_v44, 0.0  ;;  %v2065_v53 = vld [vmem:[%s1894_s17 + $0x110] sm:$0xff] }
  0x36   : > { %v336_v59 = vadd.f32 %v335_v54, %v334_v56  ;;  %v365_v56 = vsel %vm299_vm0, %v2060_v48, 0.0 }
  0x38   : > { %v338_v62 = vadd.f32 %v337_v57, %v336_v59  ;;  %v2070_v57 = vld [vmem:[%s1894_s17 + $0x118] sm:$0xff] }
  0x3a   : > { %v340_v5 = vadd.f32 %v339_v60, %v338_v62  ;;  %v367_v60 = vsel %vm299_vm0, %v2065_v53, 0.0  ;;  %v2075_v62 = vld [vmem:[%s1894_s17 + $0x120] sm:$0xff] }
  0x3c   : > { %v342_v9 = vadd.f32 %v341_v63, %v340_v5  ;;  %v369_v5 = vsel %vm299_vm0, %v2070_v57, 0.0 }
  0x3e   : > { %v344_v14 = vadd.f32 %v343_v6, %v342_v9  ;;  %v2080_v6 = vld [vmem:[%s1894_s17 + $0x128] sm:$0xff] }
  0x40   : > { %v346_v18 = vadd.f32 %v345_v11, %v344_v14  ;;  %v371_v11 = vsel %vm299_vm0, %v2075_v62, 0.0  ;;  %v2085_v14 = vld [vmem:[%s1894_s17 + $0x130] sm:$0xff] }
  0x42   : > { %v348_v23 = vadd.f32 %v347_v15, %v346_v18  ;;  %v373_v18 = vsel %vm299_vm0, %v2080_v6, 0.0 }
  0x44   : > { %v350_v27 = vadd.f32 %v349_v20, %v348_v23  ;;  %v2090_v20 = vld [vmem:[%s1894_s17 + $0x138] sm:$0xff] }
  0x46   : > { %v352_v32 = vadd.f32 %v351_v24, %v350_v27  ;;  %v375_v24 = vsel %vm299_vm0, %v2085_v14, 0.0  ;;  %v2095_v27 = vld [vmem:[%s1894_s17 + $0x140] sm:$0xff] }
  0x48   : > { %v354_v36 = vadd.f32 %v353_v29, %v352_v32  ;;  %v377_v32 = vsel %vm299_vm0, %v2090_v20, 0.0 }
  0x4a   : > { %v356_v41 = vadd.f32 %v355_v33, %v354_v36  ;;  %v2100_v33 = vld [vmem:[%s1894_s17 + $0x148] sm:$0xff] }
  0x4c   : > { %v358_v45 = vadd.f32 %v357_v38, %v356_v41  ;;  %v379_v38 = vsel %vm299_vm0, %v2095_v27, 0.0  ;;  %v2105_v41 = vld [vmem:[%s1894_s17 + $0x150] sm:$0xff] }
  0x4e   : > { %v360_v50 = vadd.f32 %v359_v42, %v358_v45  ;;  %v381_v45 = vsel %vm299_vm0, %v2100_v33, 0.0 }
  0x50   : > { %v362_v54 = vadd.f32 %v361_v47, %v360_v50  ;;  %v2110_v47 = vld [vmem:[%s1894_s17 + $0x158] sm:$0xff] }
  0x51   : > { %5527 = vst [vmem:[#allocation2_spill] sm:$0xff] %v2110_v47 }
  0x52   : > { %v364_v59 = vadd.f32 %v363_v51, %v362_v54  ;;  %v383_v51 = vsel %vm299_vm0, %v2105_v41, 0.0  ;;  %v2115_v54 = vld [vmem:[%s1894_s17 + $0x160] sm:$0xff] }
  0x53   : > { %5528 = vst [vmem:[#allocation3_spill] sm:$0xff] %v2115_v54 }
  0x54   : > { %v366_v63 = vadd.f32 %v365_v56, %v364_v59  ;;  %v385_v59 = vsel %vm299_vm0, %v2110_v47, 0.0 }
  0x56   : > { %v368_v9 = vadd.f32 %v367_v60, %v366_v63  ;;  %v2120_v60 = vld [vmem:[%s1894_s17 + $0x168] sm:$0xff] }
  0x57   : > { %5529 = vst [vmem:[#allocation4_spill] sm:$0xff] %v2120_v60 }
  0x58   : > { %v370_v15 = vadd.f32 %v369_v5, %v368_v9  ;;  %v387_v5 = vsel %vm299_vm0, %v2115_v54, 0.0  ;;  %v2125_v9 = vld [vmem:[%s1894_s17 + $0x170] sm:$0xff] }
  0x59   : > { %5530 = vst [vmem:[#allocation5_spill] sm:$0xff] %v2125_v9 }
  0x5a   : > { %v372_v23 = vadd.f32 %v371_v11, %v370_v15  ;;  %v389_v15 = vsel %vm299_vm0, %v2120_v60, 0.0 }
  0x5c   : > { %v374_v29 = vadd.f32 %v373_v18, %v372_v23  ;;  %v2130_v18 = vld [vmem:[%s1894_s17 + $0x178] sm:$0xff] }
  0x5d   : > { %5531 = vst [vmem:[#allocation6_spill] sm:$0xff] %v2130_v18 }
  0x5e   : > { %v376_v36 = vadd.f32 %v375_v24, %v374_v29  ;;  %v391_v24 = vsel %vm299_vm0, %v2125_v9, 0.0  ;;  %v2135_v29 = vld [vmem:[%s1894_s17 + $0x180] sm:$0xff] }
  0x5f   : > { %5532 = vst [vmem:[#allocation7_spill] sm:$0xff] %v2135_v29 }
  0x60   : > { %v378_v42 = vadd.f32 %v377_v32, %v376_v36  ;;  %v393_v36 = vsel %vm299_vm0, %v2130_v18, 0.0  ;;  %v297_v18 = vld [vmem:[%s1894_s17 + $0x3f0] sm:$0xff] }
  0x62   : > { %v380_v50 = vadd.f32 %v379_v38, %v378_v42  ;;  %v2140_v38 = vld [vmem:[%s1894_s17 + $0x188] sm:$0xff] }
  0x63   : > { %5533 = vst [vmem:[#allocation8_spill] sm:$0xff] %v2140_v38 }
  0x64   : > { %v382_v56 = vadd.f32 %v381_v45, %v380_v50  ;;  %v395_v45 = vsel %vm299_vm0, %v2135_v29, 0.0  ;;  %v2145_v50 = vld [vmem:[%s1894_s17 + $0x190] sm:$0xff] }
  0x65   : > { %5534 = vst [vmem:[#allocation9_spill] sm:$0xff] %v2145_v50 }
  0x66   : > { %v384_v63 = vadd.f32 %v383_v51, %v382_v56  ;;  %v397_v56 = vsel %vm299_vm0, %v2140_v38, 0.0 }
  0x68   : > { %v386_v11 = vadd.f32 %v385_v59, %v384_v63  ;;  %v2150_v59 = vld [vmem:[%s1894_s17 + $0x198] sm:$0xff] }
  0x69   : > { %5535 = vst [vmem:[#allocation10_spill] sm:$0xff] %v2150_v59 }
  0x6a   : > { %v388_v23 = vadd.f32 %v387_v5, %v386_v11  ;;  %v399_v5 = vsel %vm299_vm0, %v2145_v50, 0.0  ;;  %v2155_v11 = vld [vmem:[%s1894_s17 + $0x1a0] sm:$0xff]  ;;  %v2170_v50 = vld [vmem:[%s1894_s17 + $0x1b8] sm:$0xff] }
  0x6b   : > { %5536 = vst [vmem:[#allocation11_spill] sm:$0xff] %v2155_v11  ;;  %5539 = vst [vmem:[#allocation14_spill] sm:$0xff] %v2170_v50 }
  0x6c   : > { %v390_v32 = vadd.f32 %v389_v15, %v388_v23  ;;  %v401_v23 = vsel %vm299_vm0, %v2150_v59, 0.0  ;;  %v2175_v59 = vld [vmem:[%s1894_s17 + $0x1c0] sm:$0xff] }
  0x6d   : > { %5540 = vst [vmem:[#allocation15_spill] sm:$0xff] %v2175_v59 }
  0x6e   : > { %v392_v42 = vadd.f32 %v391_v24, %v390_v32  ;;  %v2160_v24 = vld [vmem:[%s1894_s17 + $0x1a8] sm:$0xff] }
  0x6f   : > { %5537 = vst [vmem:[#allocation12_spill] sm:$0xff] %v2160_v24 }
  0x70   : > { %v394_v51 = vadd.f32 %v393_v36, %v392_v42  ;;  %v403_v36 = vsel %vm299_vm0, %v2155_v11, 0.0  ;;  %v2165_v42 = vld [vmem:[%s1894_s17 + $0x1b0] sm:$0xff]  ;;  %v2180_v11 = vld [vmem:[%s1894_s17 + $0x1c8] sm:$0xff] }
  0x71   : > { %5538 = vst [vmem:[#allocation13_spill] sm:$0xff] %v2165_v42  ;;  %5541 = vst [vmem:[#allocation16_spill] sm:$0xff] %v2180_v11 }
  0x72   : > { %v396_v63 = vadd.f32 %v395_v45, %v394_v51  ;;  %v405_v51 = vsel %vm299_vm0, %v2160_v24, 0.0  ;;  %v2185_v24 = vld [vmem:[%s1894_s17 + $0x1d0] sm:$0xff] }
  0x73   : > { %5542 = vst [vmem:[#allocation17_spill] sm:$0xff] %v2185_v24 }
  0x74   : > { %v398_v15 = vadd.f32 %v397_v56, %v396_v63  ;;  %v407_v63 = vsel %vm299_vm0, %v2165_v42, 0.0  ;;  %v2190_v42 = vld [vmem:[%s1894_s17 + $0x1d8] sm:$0xff] }
  0x75   : > { %5543 = vst [vmem:[#allocation18_spill] sm:$0xff] %v2190_v42 }
  0x76   : > { %v400_v32 = vadd.f32 %v399_v5, %v398_v15  ;;  %v409_v15 = vsel %vm299_vm0, %v2170_v50, 0.0  ;;  %v2195_v50 = vld [vmem:[%s1894_s17 + $0x1e0] sm:$0xff] }
  0x77   : > { %5544 = vst [vmem:[#allocation19_spill] sm:$0xff] %v2195_v50 }
  0x78   : > { %v402_v45 = vadd.f32 %v401_v23, %v400_v32  ;;  %v411_v32 = vsel %vm299_vm0, %v2175_v59, 0.0  ;;  %v2200_v59 = vld [vmem:[%s1894_s17 + $0x1e8] sm:$0xff] }
  0x79   : > { %5545 = vst [vmem:[#allocation20_spill] sm:$0xff] %v2200_v59 }
  0x7a   : > { %v404_v56 = vadd.f32 %v403_v36, %v402_v45  ;;  %v413_v45 = vsel %vm299_vm0, %v2180_v11, 0.0  ;;  %v2205_v11 = vld [vmem:[%s1894_s17 + $0x1f0] sm:$0xff] }
  0x7b   : > { %5546 = vst [vmem:[#allocation21_spill] sm:$0xff] %v2205_v11 }
  0x7c   : > { %v406_v5 = vadd.f32 %v405_v51, %v404_v56  ;;  %v415_v56 = vsel %vm299_vm0, %v2185_v24, 0.0  ;;  %v2210_v24 = vld [vmem:[%s1894_s17 + $0x1f8] sm:$0xff] }
  0x7d   : > { %5547 = vst [vmem:[#allocation22_spill] sm:$0xff] %v2210_v24 }
  0x7e   : > { %v408_v23 = vadd.f32 %v407_v63, %v406_v5  ;;  %v417_v5 = vsel %vm299_vm0, %v2190_v42, 0.0  ;;  %v2215_v42 = vld [vmem:[%s1894_s17 + $0x200] sm:$0xff] }
  0x7f   : > { %5548 = vst [vmem:[#allocation23_spill] sm:$0xff] %v2215_v42 }
  0x80   : > { %v410_v36 = vadd.f32 %v409_v15, %v408_v23  ;;  %v419_v23 = vsel %vm299_vm0, %v2195_v50, 0.0  ;;  %v2220_v50 = vld [vmem:[%s1894_s17 + $0x208] sm:$0xff] }
  0x81   : > { %5549 = vst [vmem:[#allocation24_spill] sm:$0xff] %v2220_v50 }
  0x82   : > { %v412_v51 = vadd.f32 %v411_v32, %v410_v36  ;;  %v421_v36 = vsel %vm299_vm0, %v2200_v59, 0.0  ;;  %v2225_v59 = vld [vmem:[%s1894_s17 + $0x210] sm:$0xff] }
  0x83   : > { %5550 = vst [vmem:[#allocation25_spill] sm:$0xff] %v2225_v59 }
  0x84   : > { %v414_v63 = vadd.f32 %v413_v45, %v412_v51  ;;  %v423_v51 = vsel %vm299_vm0, %v2205_v11, 0.0  ;;  %v2230_v11 = vld [vmem:[%s1894_s17 + $0x218] sm:$0xff] }
  0x85   : > { %5551 = vst [vmem:[#allocation26_spill] sm:$0xff] %v2230_v11 }
  0x86   : > { %v416_v15 = vadd.f32 %v415_v56, %v414_v63  ;;  %v425_v63 = vsel %vm299_vm0, %v2210_v24, 0.0  ;;  %v2235_v24 = vld [vmem:[%s1894_s17 + $0x220] sm:$0xff] }
  0x87   : > { %5552 = vst [vmem:[#allocation27_spill] sm:$0xff] %v2235_v24 }
  0x88   : > { %v418_v32 = vadd.f32 %v417_v5, %v416_v15  ;;  %v427_v15 = vsel %vm299_vm0, %v2215_v42, 0.0  ;;  %v2240_v42 = vld [vmem:[%s1894_s17 + $0x228] sm:$0xff] }
  0x89   : > { %5553 = vst [vmem:[#allocation28_spill] sm:$0xff] %v2240_v42 }
  0x8a   : > { %v420_v45 = vadd.f32 %v419_v23, %v418_v32  ;;  %v429_v32 = vsel %vm299_vm0, %v2220_v50, 0.0  ;;  %v2245_v50 = vld [vmem:[%s1894_s17 + $0x230] sm:$0xff] }
  0x8b   : > { %5554 = vst [vmem:[#allocation29_spill] sm:$0xff] %v2245_v50 }
  0x8c   : > { %v422_v56 = vadd.f32 %v421_v36, %v420_v45  ;;  %v431_v45 = vsel %vm299_vm0, %v2225_v59, 0.0  ;;  %v2250_v59 = vld [vmem:[%s1894_s17 + $0x238] sm:$0xff] }
  0x8d   : > { %5555 = vst [vmem:[#allocation30_spill] sm:$0xff] %v2250_v59 }
  0x8e   : > { %v424_v5 = vadd.f32 %v423_v51, %v422_v56  ;;  %v433_v56 = vsel %vm299_vm0, %v2230_v11, 0.0  ;;  %v2255_v11 = vld [vmem:[%s1894_s17 + $0x240] sm:$0xff] }
  0x8f   : > { %5556 = vst [vmem:[#allocation31_spill] sm:$0xff] %v2255_v11 }
  0x90   : > { %v426_v23 = vadd.f32 %v425_v63, %v424_v5  ;;  %v435_v5 = vsel %vm299_vm0, %v2235_v24, 0.0  ;;  %v2260_v24 = vld [vmem:[%s1894_s17 + $0x248] sm:$0xff] }
  0x91   : > { %5557 = vst [vmem:[#allocation32_spill] sm:$0xff] %v2260_v24 }
  0x92   : > { %v428_v36 = vadd.f32 %v427_v15, %v426_v23  ;;  %v437_v23 = vsel %vm299_vm0, %v2240_v42, 0.0  ;;  %v2265_v42 = vld [vmem:[%s1894_s17 + $0x250] sm:$0xff] }
  0x93   : > { %5558 = vst [vmem:[#allocation33_spill] sm:$0xff] %v2265_v42 }
  0x94   : > { %v430_v51 = vadd.f32 %v429_v32, %v428_v36  ;;  %v439_v36 = vsel %vm299_vm0, %v2245_v50, 0.0  ;;  %v2270_v50 = vld [vmem:[%s1894_s17 + $0x258] sm:$0xff] }
  0x95   : > { %5559 = vst [vmem:[#allocation34_spill] sm:$0xff] %v2270_v50 }
  0x96   : > { %v432_v63 = vadd.f32 %v431_v45, %v430_v51  ;;  %v441_v51 = vsel %vm299_vm0, %v2250_v59, 0.0  ;;  %v2275_v59 = vld [vmem:[%s1894_s17 + $0x260] sm:$0xff] }
  0x97   : > { %5560 = vst [vmem:[#allocation35_spill] sm:$0xff] %v2275_v59 }
  0x98   : > { %v434_v15 = vadd.f32 %v433_v56, %v432_v63  ;;  %v443_v63 = vsel %vm299_vm0, %v2255_v11, 0.0  ;;  %v2280_v11 = vld [vmem:[%s1894_s17 + $0x268] sm:$0xff] }
  0x99   : > { %5561 = vst [vmem:[#allocation36_spill] sm:$0xff] %v2280_v11 }
  0x9a   : > { %v436_v32 = vadd.f32 %v435_v5, %v434_v15  ;;  %v445_v15 = vsel %vm299_vm0, %v2260_v24, 0.0  ;;  %v2285_v24 = vld [vmem:[%s1894_s17 + $0x270] sm:$0xff] }
  0x9b   : > { %5562 = vst [vmem:[#allocation37_spill] sm:$0xff] %v2285_v24 }
  0x9c   : > { %v438_v45 = vadd.f32 %v437_v23, %v436_v32  ;;  %v447_v32 = vsel %vm299_vm0, %v2265_v42, 0.0  ;;  %v2290_v42 = vld [vmem:[%s1894_s17 + $0x278] sm:$0xff] }
  0x9d   : > { %5563 = vst [vmem:[#allocation38_spill] sm:$0xff] %v2290_v42 }
  0x9e   : > { %v440_v56 = vadd.f32 %v439_v36, %v438_v45  ;;  %v449_v45 = vsel %vm299_vm0, %v2270_v50, 0.0  ;;  %v2295_v50 = vld [vmem:[%s1894_s17 + $0x280] sm:$0xff] }
  0x9f   : > { %5564 = vst [vmem:[#allocation39_spill] sm:$0xff] %v2295_v50 }
  0xa0   : > { %v442_v5 = vadd.f32 %v441_v51, %v440_v56  ;;  %v451_v56 = vsel %vm299_vm0, %v2275_v59, 0.0  ;;  %v2300_v59 = vld [vmem:[%s1894_s17 + $0x288] sm:$0xff] }
  0xa1   : > { %5565 = vst [vmem:[#allocation40_spill] sm:$0xff] %v2300_v59 }
  0xa2   : > { %v444_v23 = vadd.f32 %v443_v63, %v442_v5  ;;  %v453_v5 = vsel %vm299_vm0, %v2280_v11, 0.0  ;;  %v2305_v11 = vld [vmem:[%s1894_s17 + $0x290] sm:$0xff] }
  0xa3   : > { %5566 = vst [vmem:[#allocation41_spill] sm:$0xff] %v2305_v11 }
  0xa4   : > { %v446_v36 = vadd.f32 %v445_v15, %v444_v23  ;;  %v455_v23 = vsel %vm299_vm0, %v2285_v24, 0.0  ;;  %v2310_v24 = vld [vmem:[%s1894_s17 + $0x298] sm:$0xff] }
  0xa5   : > { %5567 = vst [vmem:[#allocation42_spill] sm:$0xff] %v2310_v24 }
  0xa6   : > { %v448_v51 = vadd.f32 %v447_v32, %v446_v36  ;;  %v457_v36 = vsel %vm299_vm0, %v2290_v42, 0.0  ;;  %v2315_v42 = vld [vmem:[%s1894_s17 + $0x2a0] sm:$0xff] }
  0xa7   : > { %5568 = vst [vmem:[#allocation43_spill] sm:$0xff] %v2315_v42 }
  0xa8   : > { %v450_v63 = vadd.f32 %v449_v45, %v448_v51  ;;  %v459_v51 = vsel %vm299_vm0, %v2295_v50, 0.0  ;;  %v2320_v50 = vld [vmem:[%s1894_s17 + $0x2a8] sm:$0xff] }
  0xa9   : > { %5569 = vst [vmem:[#allocation44_spill] sm:$0xff] %v2320_v50 }
  0xaa   : > { %v452_v15 = vadd.f32 %v451_v56, %v450_v63  ;;  %v461_v63 = vsel %vm299_vm0, %v2300_v59, 0.0  ;;  %v2325_v59 = vld [vmem:[%s1894_s17 + $0x2b0] sm:$0xff] }
  0xab   : > { %5570 = vst [vmem:[#allocation45_spill] sm:$0xff] %v2325_v59 }
  0xac   : > { %v454_v32 = vadd.f32 %v453_v5, %v452_v15  ;;  %v463_v15 = vsel %vm299_vm0, %v2305_v11, 0.0  ;;  %v2330_v11 = vld [vmem:[%s1894_s17 + $0x2b8] sm:$0xff] }
  0xad   : > { %5571 = vst [vmem:[#allocation46_spill] sm:$0xff] %v2330_v11 }
  0xae   : > { %v456_v45 = vadd.f32 %v455_v23, %v454_v32  ;;  %v465_v32 = vsel %vm299_vm0, %v2310_v24, 0.0  ;;  %v2335_v24 = vld [vmem:[%s1894_s17 + $0x2c0] sm:$0xff] }
  0xaf   : > { %5572 = vst [vmem:[#allocation47_spill] sm:$0xff] %v2335_v24 }
  0xb0   : > { %v458_v56 = vadd.f32 %v457_v36, %v456_v45  ;;  %v467_v45 = vsel %vm299_vm0, %v2315_v42, 0.0  ;;  %v2340_v42 = vld [vmem:[%s1894_s17 + $0x2c8] sm:$0xff] }
  0xb1   : > { %5573 = vst [vmem:[#allocation48_spill] sm:$0xff] %v2340_v42 }
  0xb2   : > { %v460_v5 = vadd.f32 %v459_v51, %v458_v56  ;;  %v469_v56 = vsel %vm299_vm0, %v2320_v50, 0.0  ;;  %v2345_v50 = vld [vmem:[%s1894_s17 + $0x2d0] sm:$0xff] }
  0xb3   : > { %5574 = vst [vmem:[#allocation49_spill] sm:$0xff] %v2345_v50 }
  0xb4   : > { %v462_v23 = vadd.f32 %v461_v63, %v460_v5  ;;  %v471_v5 = vsel %vm299_vm0, %v2325_v59, 0.0  ;;  %v2350_v59 = vld [vmem:[%s1894_s17 + $0x2d8] sm:$0xff] }
  0xb5   : > { %5575 = vst [vmem:[#allocation50_spill] sm:$0xff] %v2350_v59 }
  0xb6   : > { %v464_v36 = vadd.f32 %v463_v15, %v462_v23  ;;  %v473_v23 = vsel %vm299_vm0, %v2330_v11, 0.0  ;;  %v2355_v11 = vld [vmem:[%s1894_s17 + $0x2e0] sm:$0xff] }
  0xb7   : > { %5576 = vst [vmem:[#allocation51_spill] sm:$0xff] %v2355_v11 }
  0xb8   : > { %v466_v51 = vadd.f32 %v465_v32, %v464_v36  ;;  %v475_v36 = vsel %vm299_vm0, %v2335_v24, 0.0  ;;  %v2360_v24 = vld [vmem:[%s1894_s17 + $0x2e8] sm:$0xff] }
  0xb9   : > { %5577 = vst [vmem:[#allocation52_spill] sm:$0xff] %v2360_v24 }
  0xba   : > { %v468_v63 = vadd.f32 %v467_v45, %v466_v51  ;;  %v477_v51 = vsel %vm299_vm0, %v2340_v42, 0.0  ;;  %v2365_v42 = vld [vmem:[%s1894_s17 + $0x2f0] sm:$0xff] }
  0xbb   : > { %5578 = vst [vmem:[#allocation53_spill] sm:$0xff] %v2365_v42 }
  0xbc   : > { %v470_v15 = vadd.f32 %v469_v56, %v468_v63  ;;  %v479_v63 = vsel %vm299_vm0, %v2345_v50, 0.0  ;;  %v2370_v50 = vld [vmem:[%s1894_s17 + $0x2f8] sm:$0xff] }
  0xbd   : > { %5579 = vst [vmem:[#allocation54_spill] sm:$0xff] %v2370_v50 }
  0xbe   : > { %v472_v32 = vadd.f32 %v471_v5, %v470_v15  ;;  %v481_v15 = vsel %vm299_vm0, %v2350_v59, 0.0  ;;  %v2375_v59 = vld [vmem:[%s1894_s17 + $0x300] sm:$0xff] }
  0xbf   : > { %5580 = vst [vmem:[#allocation55_spill] sm:$0xff] %v2375_v59 }
  0xc0   : > { %v474_v45 = vadd.f32 %v473_v23, %v472_v32  ;;  %v483_v32 = vsel %vm299_vm0, %v2355_v11, 0.0  ;;  %v2380_v11 = vld [vmem:[%s1894_s17 + $0x308] sm:$0xff] }
  0xc1   : > { %5581 = vst [vmem:[#allocation56_spill] sm:$0xff] %v2380_v11 }
  0xc2   : > { %v476_v56 = vadd.f32 %v475_v36, %v474_v45  ;;  %v485_v45 = vsel %vm299_vm0, %v2360_v24, 0.0  ;;  %v2385_v24 = vld [vmem:[%s1894_s17 + $0x310] sm:$0xff] }
  0xc3   : > { %5582 = vst [vmem:[#allocation57_spill] sm:$0xff] %v2385_v24 }
  0xc4   : > { %v478_v5 = vadd.f32 %v477_v51, %v476_v56  ;;  %v487_v56 = vsel %vm299_vm0, %v2365_v42, 0.0  ;;  %v2390_v42 = vld [vmem:[%s1894_s17 + $0x318] sm:$0xff] }
  0xc5   : > { %5583 = vst [vmem:[#allocation58_spill] sm:$0xff] %v2390_v42 }
  0xc6   : > { %v480_v23 = vadd.f32 %v479_v63, %v478_v5  ;;  %v489_v5 = vsel %vm299_vm0, %v2370_v50, 0.0  ;;  %v2395_v50 = vld [vmem:[%s1894_s17 + $0x320] sm:$0xff] }
  0xc7   : > { %5584 = vst [vmem:[#allocation59_spill] sm:$0xff] %v2395_v50 }
  0xc8   : > { %v482_v36 = vadd.f32 %v481_v15, %v480_v23  ;;  %v491_v23 = vsel %vm299_vm0, %v2375_v59, 0.0  ;;  %v2400_v59 = vld [vmem:[%s1894_s17 + $0x328] sm:$0xff] }
  0xc9   : > { %5585 = vst [vmem:[#allocation60_spill] sm:$0xff] %v2400_v59 }
  0xca   : > { %v484_v51 = vadd.f32 %v483_v32, %v482_v36  ;;  %v493_v36 = vsel %vm299_vm0, %v2380_v11, 0.0  ;;  %v2405_v11 = vld [vmem:[%s1894_s17 + $0x330] sm:$0xff] }
  0xcb   : > { %5586 = vst [vmem:[#allocation61_spill] sm:$0xff] %v2405_v11 }
  0xcc   : > { %v486_v63 = vadd.f32 %v485_v45, %v484_v51  ;;  %v495_v51 = vsel %vm299_vm0, %v2385_v24, 0.0  ;;  %v2410_v24 = vld [vmem:[%s1894_s17 + $0x338] sm:$0xff] }
  0xcd   : > { %5587 = vst [vmem:[#allocation62_spill] sm:$0xff] %v2410_v24 }
  0xce   : > { %v488_v15 = vadd.f32 %v487_v56, %v486_v63  ;;  %v497_v63 = vsel %vm299_vm0, %v2390_v42, 0.0  ;;  %v2415_v42 = vld [vmem:[%s1894_s17 + $0x340] sm:$0xff] }
  0xcf   : > { %5588 = vst [vmem:[#allocation63_spill] sm:$0xff] %v2415_v42 }
  0xd0   : > { %v490_v32 = vadd.f32 %v489_v5, %v488_v15  ;;  %v499_v15 = vsel %vm299_vm0, %v2395_v50, 0.0  ;;  %v2420_v50 = vld [vmem:[%s1894_s17 + $0x348] sm:$0xff] }
  0xd1   : > { %5589 = vst [vmem:[#allocation64_spill] sm:$0xff] %v2420_v50 }
  0xd2   : > { %v492_v45 = vadd.f32 %v491_v23, %v490_v32  ;;  %v501_v32 = vsel %vm299_vm0, %v2400_v59, 0.0  ;;  %v2425_v59 = vld [vmem:[%s1894_s17 + $0x350] sm:$0xff] }
  0xd3   : > { %5590 = vst [vmem:[#allocation65_spill] sm:$0xff] %v2425_v59 }
  0xd4   : > { %v494_v56 = vadd.f32 %v493_v36, %v492_v45  ;;  %v503_v45 = vsel %vm299_vm0, %v2405_v11, 0.0  ;;  %v2430_v11 = vld [vmem:[%s1894_s17 + $0x358] sm:$0xff] }
  0xd5   : > { %5591 = vst [vmem:[#allocation66_spill] sm:$0xff] %v2430_v11 }
  0xd6   : > { %v496_v5 = vadd.f32 %v495_v51, %v494_v56  ;;  %v505_v56 = vsel %vm299_vm0, %v2410_v24, 0.0  ;;  %v2435_v24 = vld [vmem:[%s1894_s17 + $0x360] sm:$0xff] }
  0xd7   : > { %5592 = vst [vmem:[#allocation67_spill] sm:$0xff] %v2435_v24 }
  0xd8   : > { %v498_v23 = vadd.f32 %v497_v63, %v496_v5  ;;  %v507_v5 = vsel %vm299_vm0, %v2415_v42, 0.0  ;;  %v2440_v42 = vld [vmem:[%s1894_s17 + $0x368] sm:$0xff] }
  0xd9   : > { %5593 = vst [vmem:[#allocation68_spill] sm:$0xff] %v2440_v42 }
  0xda   : > { %v500_v36 = vadd.f32 %v499_v15, %v498_v23  ;;  %v509_v23 = vsel %vm299_vm0, %v2420_v50, 0.0  ;;  %v2445_v50 = vld [vmem:[%s1894_s17 + $0x370] sm:$0xff] }
  0xdb   : > { %5594 = vst [vmem:[#allocation69_spill] sm:$0xff] %v2445_v50 }
  0xdc   : > { %v502_v51 = vadd.f32 %v501_v32, %v500_v36  ;;  %v511_v36 = vsel %vm299_vm0, %v2425_v59, 0.0  ;;  %v2450_v59 = vld [vmem:[%s1894_s17 + $0x378] sm:$0xff] }
  0xdd   : > { %5595 = vst [vmem:[#allocation70_spill] sm:$0xff] %v2450_v59 }
  0xde   : > { %v504_v63 = vadd.f32 %v503_v45, %v502_v51  ;;  %v513_v51 = vsel %vm299_vm0, %v2430_v11, 0.0  ;;  %v2455_v11 = vld [vmem:[%s1894_s17 + $0x380] sm:$0xff] }
  0xdf   : > { %5596 = vst [vmem:[#allocation71_spill] sm:$0xff] %v2455_v11 }
  0xe0   : > { %v506_v15 = vadd.f32 %v505_v56, %v504_v63  ;;  %v515_v63 = vsel %vm299_vm0, %v2435_v24, 0.0  ;;  %v2460_v24 = vld [vmem:[%s1894_s17 + $0x388] sm:$0xff] }
  0xe1   : > { %5597 = vst [vmem:[#allocation72_spill] sm:$0xff] %v2460_v24 }
  0xe2   : > { %v508_v32 = vadd.f32 %v507_v5, %v506_v15  ;;  %v517_v15 = vsel %vm299_vm0, %v2440_v42, 0.0  ;;  %v2465_v42 = vld [vmem:[%s1894_s17 + $0x390] sm:$0xff] }
  0xe3   : > { %5598 = vst [vmem:[#allocation73_spill] sm:$0xff] %v2465_v42 }
  0xe4   : > { %v510_v45 = vadd.f32 %v509_v23, %v508_v32  ;;  %v519_v32 = vsel %vm299_vm0, %v2445_v50, 0.0  ;;  %v2470_v50 = vld [vmem:[%s1894_s17 + $0x398] sm:$0xff] }
  0xe5   : > { %5599 = vst [vmem:[#allocation74_spill] sm:$0xff] %v2470_v50 }
  0xe6   : > { %v512_v56 = vadd.f32 %v511_v36, %v510_v45  ;;  %v521_v45 = vsel %vm299_vm0, %v2450_v59, 0.0  ;;  %v2475_v59 = vld [vmem:[%s1894_s17 + $0x3a0] sm:$0xff] }
  0xe7   : > { %5600 = vst [vmem:[#allocation75_spill] sm:$0xff] %v2475_v59 }
  0xe8   : > { %v514_v5 = vadd.f32 %v513_v51, %v512_v56  ;;  %v523_v56 = vsel %vm299_vm0, %v2455_v11, 0.0  ;;  %v2480_v11 = vld [vmem:[%s1894_s17 + $0x3a8] sm:$0xff] }
  0xe9   : > { %5601 = vst [vmem:[#allocation76_spill] sm:$0xff] %v2480_v11 }
  0xea   : > { %v516_v23 = vadd.f32 %v515_v63, %v514_v5  ;;  %v525_v5 = vsel %vm299_vm0, %v2460_v24, 0.0  ;;  %v2485_v24 = vld [vmem:[%s1894_s17 + $0x3b0] sm:$0xff] }
  0xeb   : > { %5602 = vst [vmem:[#allocation77_spill] sm:$0xff] %v2485_v24 }
  0xec   : > { %v518_v36 = vadd.f32 %v517_v15, %v516_v23  ;;  %v527_v23 = vsel %vm299_vm0, %v2465_v42, 0.0  ;;  %v2490_v42 = vld [vmem:[%s1894_s17 + $0x3b8] sm:$0xff] }
  0xed   : > { %5603 = vst [vmem:[#allocation78_spill] sm:$0xff] %v2490_v42 }
  0xee   : > { %v520_v51 = vadd.f32 %v519_v32, %v518_v36  ;;  %v529_v36 = vsel %vm299_vm0, %v2470_v50, 0.0  ;;  %v2495_v50 = vld [vmem:[%s1894_s17 + $0x3c0] sm:$0xff] }
  0xef   : > { %5604 = vst [vmem:[#allocation79_spill] sm:$0xff] %v2495_v50 }
  0xf0   : > { %v522_v63 = vadd.f32 %v521_v45, %v520_v51  ;;  %v531_v51 = vsel %vm299_vm0, %v2475_v59, 0.0  ;;  %v2500_v59 = vld [vmem:[%s1894_s17 + $0x3c8] sm:$0xff] }
  0xf1   : > { %5605 = vst [vmem:[#allocation80_spill] sm:$0xff] %v2500_v59 }
  0xf2   : > { %v524_v15 = vadd.f32 %v523_v56, %v522_v63  ;;  %v533_v63 = vsel %vm299_vm0, %v2480_v11, 0.0  ;;  %v2505_v11 = vld [vmem:[%s1894_s17 + $0x3d0] sm:$0xff] }
  0xf3   : > { %5606 = vst [vmem:[#allocation81_spill] sm:$0xff] %v2505_v11 }
  0xf4   : > { %v526_v32 = vadd.f32 %v525_v5, %v524_v15  ;;  %v535_v15 = vsel %vm299_vm0, %v2485_v24, 0.0  ;;  %v294_v24 = vld [vmem:[%s1894_s17 + $0x3d8] sm:$0xff] }
  0xf5   : > { %v545_v29 = vsel %vm299_vm0, %v294_v24, 0.0 }
  0xf6   : > { %v528_v45 = vadd.f32 %v527_v23, %v526_v32  ;;  %v537_v32 = vsel %vm299_vm0, %v2490_v42, 0.0 }
  0xf8   : > { %v530_v56 = vadd.f32 %v529_v36, %v528_v45  ;;  %v539_v45 = vsel %vm299_vm0, %v2495_v50, 0.0 }
  0xfa   : > { %v532_v5 = vadd.f32 %v531_v51, %v530_v56  ;;  %v541_v56 = vsel %vm299_vm0, %v2500_v59, 0.0  ;;  %v551_v59 = vsel %vm299_vm0, %v297_v18, 0.0 }
  0xfc   : > { %v534_v23 = vadd.f32 %v533_v63, %v532_v5  ;;  %v543_v63 = vsel %vm299_vm0, %v2505_v11, 0.0  ;;  %v295_v5 = vld [vmem:[%s1894_s17 + $0x3e0] sm:$0xff] }
  0xfd   : > { %v547_v50 = vsel %vm299_vm0, %v295_v5, 0.0 }
  0xfe   : > { %v536_v36 = vadd.f32 %v535_v15, %v534_v23  ;;  %v296_v15 = vld [vmem:[%s1894_s17 + $0x3e8] sm:$0xff] }
 0x100   : > { %v538_v51 = vadd.f32 %v537_v32, %v536_v36  ;;  %v549_v32 = vsel %vm299_vm0, %v296_v15, 0.0  ;;  %v298_v36 = vld [vmem:[%s1894_s17 + $0x3f8] sm:$0xff] }
 0x102   : > { %v540_v38 = vadd.f32 %v539_v45, %v538_v51  ;;  %v553_v51 = vsel %vm299_vm0, %v298_v36, 0.0 }
 0x104   : > { %v542_v42 = vadd.f32 %v541_v56, %v540_v38 }
 0x106   : > { %v544_v23 = vadd.f32 %v543_v63, %v542_v42 }
 0x108   : > { %v546_v9 = vadd.f32 %v545_v29, %v544_v23 }
 0x10a   : > { %v548_v60 = vadd.f32 %v547_v50, %v546_v9 }
 0x10c   : > { %v550_v45 = vadd.f32 %v549_v32, %v548_v60 }
 0x10e   : > { %v552_v11 = vadd.f32 %v551_v59, %v550_v45 }
 0x110   : > { %v554_v54 = vadd.f32 %v553_v51, %v552_v11 }
 0x112   : > { %555 = vadd.xlane.f32.xlu0 %v554_v54 }
 0x19f   : > { %v556_v38 = vpop.xlane.xlu0 %555 }
 0x1a0   : > { %v557_v24 = vrot.slane %v556_v38, 4 }
 0x1a2   : > { %v558_v56 = vadd.f32 %v557_v24, %v556_v38 }
 0x1a4   : > { %v559_v42 = vrot.slane %v558_v56, 2 }
 0x1a6   : > { %v560_v63 = vadd.f32 %v559_v42, %v558_v56 }
 0x1a8   : > { %v561_v5 = vrot.slane %v560_v63, 1 }
 0x1aa   : > { %v562_v47 = vadd.f32 %v561_v5, %v560_v63 }
 0x1ac   : > { %1827 = vpush %v562_v47 }
 0x1dd   : > { %s1828_s18 = spop %1827 }
 0x1de   : > { %s566_s19 = smul.f32 1.5258789e-05, %s1828_s18 }
 0x1e0   : > { %v2521_v29 = vstv %s566_s19 }
 0x1e1   : > { %v2525_v60 = vsub.f32 %v1897_v0, %v2521_v29  ;;  %v2529_v9 = vsub.f32 %v1900_v1, %v2521_v29  ;;  %v2533_v54 = vsub.f32 %v1903_v2, %v2521_v29  ;;  %v2537_v18 = vsub.f32 %v1906_v3, %v2521_v29 }
 0x1e2   : > { %v2545_v0 = vsub.f32 %v1915_v7, %v2521_v29  ;;  %v2551_v2 = vsub.f32 %v1920_v10, %v2521_v29  ;;  %v2559_v23 = vsub.f32 %v1925_v13, %v2521_v29  ;;  %v2566_v10 = vsub.f32 %v1930_v16, %v2521_v29 }
 0x1e3   : > { %v696_v47 = vmul.f32 %v2525_v60, %v2525_v60  ;;  %v697_v50 = vmul.f32 %v2529_v9, %v2529_v9  ;;  %v698_v1 = vmul.f32 %v2533_v54, %v2533_v54  ;;  %v699_v3 = vmul.f32 %v2537_v18, %v2537_v18 }
 0x1e4   : > { %v700_v7 = vmul.f32 %v2545_v0, %v2545_v0  ;;  %v701_v45 = vmul.f32 %v2551_v2, %v2551_v2  ;;  %v2573_v13 = vsub.f32 %v1935_v19, %v2521_v29  ;;  %v702_v24 = vmul.f32 %v2559_v23, %v2559_v23 }
 0x1e5   : > { %v824_v59 = vsel %vm299_vm0, %v696_v47, 0.0  ;;  %v825_v11 = vsel %vm299_vm0, %v697_v50, 0.0  ;;  %v827_v32 = vsel %vm299_vm0, %v698_v1, 0.0  ;;  %v829_v51 = vsel %vm299_vm0, %v699_v3, 0.0 }
 0x1e6   : > { %v826_v15 = vadd.f32 %v825_v11, %v824_v59  ;;  %v831_v56 = vsel %vm299_vm0, %v700_v7, 0.0  ;;  %v2580_v16 = vsub.f32 %v1940_v22, %v2521_v29  ;;  %v703_v63 = vmul.f32 %v2566_v10, %v2566_v10 }
 0x1e7   : > { %v833_v5 = vsel %vm299_vm0, %v701_v45, 0.0  ;;  %v2587_v19 = vsub.f32 %v1945_v25, %v2521_v29  ;;  %v704_v50 = vmul.f32 %v2573_v13, %v2573_v13  ;;  %v835_v1 = vsel %vm299_vm0, %v702_v24, 0.0 }
 0x1e8   : > { %v828_v36 = vadd.f32 %v827_v32, %v826_v15  ;;  %v2594_v22 = vsub.f32 %v1950_v28, %v2521_v29  ;;  %v705_v59 = vmul.f32 %v2580_v16, %v2580_v16  ;;  %v837_v11 = vsel %vm299_vm0, %v703_v63, 0.0 }
 0x1e9   : > { %v2601_v25 = vsub.f32 %v1955_v31, %v2521_v29  ;;  %v706_v7 = vmul.f32 %v2587_v19, %v2587_v19  ;;  %v839_v32 = vsel %vm299_vm0, %v704_v50, 0.0  ;;  %v2608_v28 = vsub.f32 %v1960_v34, %v2521_v29 }
 0x1ea   : > { %v830_v38 = vadd.f32 %v829_v51, %v828_v36  ;;  %v707_v45 = vmul.f32 %v2594_v22, %v2594_v22  ;;  %v841_v51 = vsel %vm299_vm0, %v705_v59, 0.0  ;;  %v2615_v31 = vsub.f32 %v1965_v37, %v2521_v29 }
 0x1eb   : > { %v708_v24 = vmul.f32 %v2601_v25, %v2601_v25  ;;  %v2622_v34 = vsub.f32 %v1970_v40, %v2521_v29  ;;  %v709_v63 = vmul.f32 %v2608_v28, %v2608_v28  ;;  %v2629_v37 = vsub.f32 %v1975_v43, %v2521_v29 }
 0x1ec   : > { %v832_v42 = vadd.f32 %v831_v56, %v830_v38  ;;  %v843_v56 = vsel %vm299_vm0, %v706_v7, 0.0  ;;  %v710_v50 = vmul.f32 %v2615_v31, %v2615_v31  ;;  %v2636_v40 = vsub.f32 %v1980_v46, %v2521_v29 }
 0x1ed   : > { %v711_v59 = vmul.f32 %v2622_v34, %v2622_v34  ;;  %v2643_v43 = vsub.f32 %v1985_v49, %v2521_v29  ;;  %v712_v7 = vmul.f32 %v2629_v37, %v2629_v37  ;;  %v2650_v46 = vsub.f32 %v1990_v52, %v2521_v29 }
 0x1ee   : > { %v834_v47 = vadd.f32 %v833_v5, %v832_v42  ;;  %v845_v5 = vsel %vm299_vm0, %v707_v45, 0.0  ;;  %v713_v45 = vmul.f32 %v2636_v40, %v2636_v40  ;;  %v2657_v49 = vsub.f32 %v1995_v55, %v2521_v29 }
 0x1ef   : > { %v2664_v52 = vsub.f32 %v2000_v58, %v2521_v29  ;;  %v2671_v55 = vsub.f32 %v2005_v61, %v2521_v29  ;;  %v2678_v58 = vsub.f32 %v2010_v4, %v2521_v29  ;;  %v2685_v61 = vsub.f32 %v2015_v8, %v2521_v29 }
 0x1f0   : > { %v836_v3 = vadd.f32 %v835_v1, %v834_v47  ;;  %v847_v1 = vsel %vm299_vm0, %v708_v24, 0.0  ;;  %v714_v24 = vmul.f32 %v2643_v43, %v2643_v43  ;;  %v2692_v4 = vsub.f32 %v2020_v12, %v2521_v29 }
 0x1f1   : > { %v2699_v8 = vsub.f32 %v2025_v17, %v2521_v29  ;;  %v2706_v12 = vsub.f32 %v2030_v21, %v2521_v29  ;;  %v2713_v17 = vsub.f32 %v2035_v26, %v2521_v29  ;;  %v2720_v21 = vsub.f32 %v2040_v30, %v2521_v29 }
 0x1f2   : > { %v838_v15 = vadd.f32 %v837_v11, %v836_v3  ;;  %v849_v11 = vsel %vm299_vm0, %v709_v63, 0.0  ;;  %v715_v63 = vmul.f32 %v2650_v46, %v2650_v46  ;;  %v2727_v26 = vsub.f32 %v2045_v35, %v2521_v29 }
 0x1f3   : > { %v2734_v30 = vsub.f32 %v2050_v39, %v2521_v29  ;;  %v2741_v35 = vsub.f32 %v2055_v44, %v2521_v29  ;;  %v2748_v39 = vsub.f32 %v2060_v48, %v2521_v29  ;;  %v2755_v44 = vsub.f32 %v2065_v53, %v2521_v29 }
 0x1f4   : > { %v840_v36 = vadd.f32 %v839_v32, %v838_v15  ;;  %v851_v32 = vsel %vm299_vm0, %v710_v50, 0.0  ;;  %v716_v50 = vmul.f32 %v2657_v49, %v2657_v49  ;;  %v2762_v48 = vsub.f32 %v2070_v57, %v2521_v29 }
 0x1f5   : > { %v2769_v53 = vsub.f32 %v2075_v62, %v2521_v29  ;;  %v2776_v57 = vsub.f32 %v2080_v6, %v2521_v29  ;;  %v2783_v62 = vsub.f32 %v2085_v14, %v2521_v29  ;;  %v2790_v6 = vsub.f32 %v2090_v20, %v2521_v29 }
 0x1f6   : > { %v842_v38 = vadd.f32 %v841_v51, %v840_v36  ;;  %v853_v51 = vsel %vm299_vm0, %v711_v59, 0.0  ;;  %v717_v59 = vmul.f32 %v2664_v52, %v2664_v52  ;;  %v2797_v14 = vsub.f32 %v2095_v27, %v2521_v29 }
 0x1f7   : > { %v2804_v20 = vsub.f32 %v2100_v33, %v2521_v29  ;;  %v2811_v27 = vsub.f32 %v2105_v41, %v2521_v29 }
 0x1f8   : > { %v844_v42 = vadd.f32 %v843_v56, %v842_v38  ;;  %v855_v56 = vsel %vm299_vm0, %v712_v7, 0.0  ;;  %v718_v7 = vmul.f32 %v2671_v55, %v2671_v55 }
 0x1fa   : > { %v846_v47 = vadd.f32 %v845_v5, %v844_v42  ;;  %v857_v5 = vsel %vm299_vm0, %v713_v45, 0.0  ;;  %v719_v45 = vmul.f32 %v2678_v58, %v2678_v58 }
 0x1fc   : > { %v848_v3 = vadd.f32 %v847_v1, %v846_v47  ;;  %v859_v1 = vsel %vm299_vm0, %v714_v24, 0.0  ;;  %v720_v24 = vmul.f32 %v2685_v61, %v2685_v61 }
 0x1fe   : > { %v850_v15 = vadd.f32 %v849_v11, %v848_v3  ;;  %v861_v11 = vsel %vm299_vm0, %v715_v63, 0.0  ;;  %v721_v63 = vmul.f32 %v2692_v4, %v2692_v4 }
 0x200   : > { %v852_v36 = vadd.f32 %v851_v32, %v850_v15  ;;  %v863_v32 = vsel %vm299_vm0, %v716_v50, 0.0  ;;  %v722_v50 = vmul.f32 %v2699_v8, %v2699_v8 }
 0x202   : > { %v854_v38 = vadd.f32 %v853_v51, %v852_v36  ;;  %v865_v51 = vsel %vm299_vm0, %v717_v59, 0.0  ;;  %v723_v59 = vmul.f32 %v2706_v12, %v2706_v12 }
 0x204   : > { %v856_v42 = vadd.f32 %v855_v56, %v854_v38  ;;  %v867_v56 = vsel %vm299_vm0, %v718_v7, 0.0  ;;  %v724_v7 = vmul.f32 %v2713_v17, %v2713_v17 }
 0x206   : > { %v858_v47 = vadd.f32 %v857_v5, %v856_v42  ;;  %v869_v5 = vsel %vm299_vm0, %v719_v45, 0.0  ;;  %v725_v45 = vmul.f32 %v2720_v21, %v2720_v21 }
 0x208   : > { %v860_v3 = vadd.f32 %v859_v1, %v858_v47  ;;  %v871_v1 = vsel %vm299_vm0, %v720_v24, 0.0  ;;  %v726_v24 = vmul.f32 %v2727_v26, %v2727_v26 }
 0x20a   : > { %v862_v15 = vadd.f32 %v861_v11, %v860_v3  ;;  %v873_v11 = vsel %vm299_vm0, %v721_v63, 0.0  ;;  %v727_v63 = vmul.f32 %v2734_v30, %v2734_v30 }
 0x20c   : > { %v864_v36 = vadd.f32 %v863_v32, %v862_v15  ;;  %v875_v32 = vsel %vm299_vm0, %v722_v50, 0.0  ;;  %v728_v50 = vmul.f32 %v2741_v35, %v2741_v35 }
 0x20e   : > { %v866_v38 = vadd.f32 %v865_v51, %v864_v36  ;;  %v877_v51 = vsel %vm299_vm0, %v723_v59, 0.0  ;;  %v729_v59 = vmul.f32 %v2748_v39, %v2748_v39 }
 0x210   : > { %v868_v42 = vadd.f32 %v867_v56, %v866_v38  ;;  %v879_v56 = vsel %vm299_vm0, %v724_v7, 0.0  ;;  %v730_v7 = vmul.f32 %v2755_v44, %v2755_v44 }
 0x212   : > { %v870_v47 = vadd.f32 %v869_v5, %v868_v42  ;;  %v881_v5 = vsel %vm299_vm0, %v725_v45, 0.0  ;;  %v731_v45 = vmul.f32 %v2762_v48, %v2762_v48 }
 0x214   : > { %v872_v3 = vadd.f32 %v871_v1, %v870_v47  ;;  %v883_v1 = vsel %vm299_vm0, %v726_v24, 0.0  ;;  %v732_v24 = vmul.f32 %v2769_v53, %v2769_v53 }
 0x216   : > { %v874_v15 = vadd.f32 %v873_v11, %v872_v3  ;;  %v885_v11 = vsel %vm299_vm0, %v727_v63, 0.0  ;;  %v733_v63 = vmul.f32 %v2776_v57, %v2776_v57 }
 0x218   : > { %v876_v36 = vadd.f32 %v875_v32, %v874_v15  ;;  %v887_v32 = vsel %vm299_vm0, %v728_v50, 0.0  ;;  %v734_v50 = vmul.f32 %v2783_v62, %v2783_v62 }
 0x21a   : > { %v878_v38 = vadd.f32 %v877_v51, %v876_v36  ;;  %v889_v51 = vsel %vm299_vm0, %v729_v59, 0.0  ;;  %v735_v59 = vmul.f32 %v2790_v6, %v2790_v6 }
 0x21c   : > { %v880_v42 = vadd.f32 %v879_v56, %v878_v38  ;;  %v891_v56 = vsel %vm299_vm0, %v730_v7, 0.0  ;;  %v736_v7 = vmul.f32 %v2797_v14, %v2797_v14 }
 0x21e   : > { %v882_v47 = vadd.f32 %v881_v5, %v880_v42  ;;  %v893_v5 = vsel %vm299_vm0, %v731_v45, 0.0  ;;  %v5607_v45 = vld [vmem:[#allocation2_spill] sm:$0xff] }
 0x21f   : > { %v2818_v33 = vsub.f32 %v5607_v45, %v2521_v29  ;;  %v5613_v45 = vld [vmem:[#allocation6_spill] sm:$0xff] }
 0x220   : > { %v884_v3 = vadd.f32 %v883_v1, %v882_v47  ;;  %v895_v1 = vsel %vm299_vm0, %v732_v24, 0.0 }
 0x222   : > { %v886_v15 = vadd.f32 %v885_v11, %v884_v3  ;;  %v897_v11 = vsel %vm299_vm0, %v733_v63, 0.0  ;;  %v903_v63 = vsel %vm299_vm0, %v736_v7, 0.0 }
 0x224   : > { %v888_v36 = vadd.f32 %v887_v32, %v886_v15  ;;  %v899_v32 = vsel %vm299_vm0, %v734_v50, 0.0 }
 0x226   : > { %v890_v38 = vadd.f32 %v889_v51, %v888_v36  ;;  %v737_v51 = vmul.f32 %v2804_v20, %v2804_v20 }
 0x228   : > { %v892_v42 = vadd.f32 %v891_v56, %v890_v38  ;;  %v901_v38 = vsel %vm299_vm0, %v735_v59, 0.0  ;;  %v5608_v56 = vld [vmem:[#allocation3_spill] sm:$0xff] }
 0x229   : > { %v2825_v41 = vsub.f32 %v5608_v56, %v2521_v29 }
 0x22a   : > { %v894_v47 = vadd.f32 %v893_v5, %v892_v42  ;;  %v738_v42 = vmul.f32 %v2811_v27, %v2811_v27 }
 0x22c   : > { %v896_v3 = vadd.f32 %v895_v1, %v894_v47  ;;  %v5609_v47 = vld [vmem:[#allocation4_spill] sm:$0xff]  ;;  %v739_v1 = vmul.f32 %v2818_v33, %v2818_v33  ;;  %v907_v7 = vsel %vm299_vm0, %v738_v42, 0.0 }
 0x22d   : > { %v2832_v50 = vsub.f32 %v5609_v47, %v2521_v29 }
 0x22e   : > { %v898_v15 = vadd.f32 %v897_v11, %v896_v3  ;;  %v905_v3 = vsel %vm299_vm0, %v737_v51, 0.0  ;;  %v5611_v11 = vld [vmem:[#allocation5_spill] sm:$0xff]  ;;  %v909_v51 = vsel %vm299_vm0, %v739_v1, 0.0 }
 0x22f   : > { %5610 = vst [vmem:[#allocation2_spill] sm:$0xff] %v2832_v50 }
 0x230   : > { %v900_v36 = vadd.f32 %v899_v32, %v898_v15  ;;  %v2839_v15 = vsub.f32 %v5611_v11, %v2521_v29  ;;  %v740_v32 = vmul.f32 %v2825_v41, %v2825_v41 }
 0x232   : > { %v902_v24 = vadd.f32 %v901_v38, %v900_v36  ;;  %5612 = vst [vmem:[#allocation3_spill] sm:$0xff] %v2839_v15  ;;  %v2846_v38 = vsub.f32 %v5613_v45, %v2521_v29  ;;  %v742_v47 = vmul.f32 %v2839_v15, %v2839_v15  ;;  %v911_v42 = vsel %vm299_vm0, %v740_v32, 0.0  ;;  %v5619_v45 = vld [vmem:[#allocation9_spill] sm:$0xff] }
 0x234   : > { %v904_v5 = vadd.f32 %v903_v63, %v902_v24  ;;  %5614 = vst [vmem:[#allocation4_spill] sm:$0xff] %v2846_v38  ;;  %v741_v24 = vmul.f32 %v2832_v50, %v2832_v50  ;;  %v5615_v63 = vld [vmem:[#allocation7_spill] sm:$0xff]  ;;  %v915_v32 = vsel %vm299_vm0, %v742_v47, 0.0 }
 0x236   : > { %v906_v59 = vadd.f32 %v905_v3, %v904_v5  ;;  %v2853_v5 = vsub.f32 %v5615_v63, %v2521_v29  ;;  %v913_v1 = vsel %vm299_vm0, %v741_v24, 0.0 }
 0x238   : > { %v908_v36 = vadd.f32 %v907_v7, %v906_v59  ;;  %5616 = vst [vmem:[#allocation5_spill] sm:$0xff] %v2853_v5  ;;  %v5617_v59 = vld [vmem:[#allocation8_spill] sm:$0xff]  ;;  %v743_v7 = vmul.f32 %v2846_v38, %v2846_v38  ;;  %v744_v63 = vmul.f32 %v2853_v5, %v2853_v5 }
 0x239   : > { %v2860_v11 = vsub.f32 %v5617_v59, %v2521_v29 }
 0x23a   : > { %v910_v56 = vadd.f32 %v909_v51, %v908_v36  ;;  %v2867_v51 = vsub.f32 %v5619_v45, %v2521_v29  ;;  %v917_v24 = vsel %vm299_vm0, %v743_v7, 0.0  ;;  %v919_v47 = vsel %vm299_vm0, %v744_v63, 0.0 }
 0x23b   : > { %5618 = vst [vmem:[#allocation6_spill] sm:$0xff] %v2860_v11  ;;  %v745_v38 = vmul.f32 %v2860_v11, %v2860_v11 }
 0x23c   : > { %v912_v3 = vadd.f32 %v911_v42, %v910_v56  ;;  %5620 = vst [vmem:[#allocation7_spill] sm:$0xff] %v2867_v51  ;;  %v5621_v42 = vld [vmem:[#allocation10_spill] sm:$0xff]  ;;  %v746_v5 = vmul.f32 %v2867_v51, %v2867_v51 }
 0x23d   : > { %v2874_v59 = vsub.f32 %v5621_v42, %v2521_v29  ;;  %v921_v7 = vsel %vm299_vm0, %v745_v38, 0.0 }
 0x23e   : > { %v914_v36 = vadd.f32 %v913_v1, %v912_v3  ;;  %v5623_v1 = vld [vmem:[#allocation11_spill] sm:$0xff]  ;;  %v923_v63 = vsel %vm299_vm0, %v746_v5, 0.0 }
 0x23f   : > { %5622 = vst [vmem:[#allocation8_spill] sm:$0xff] %v2874_v59  ;;  %v2881_v45 = vsub.f32 %v5623_v1, %v2521_v29  ;;  %v747_v11 = vmul.f32 %v2874_v59, %v2874_v59 }
 0x240   : > { %v916_v56 = vadd.f32 %v915_v32, %v914_v36  ;;  %v5625_v32 = vld [vmem:[#allocation12_spill] sm:$0xff] }
 0x241   : > { %5624 = vst [vmem:[#allocation9_spill] sm:$0xff] %v2881_v45  ;;  %v2888_v42 = vsub.f32 %v5625_v32, %v2521_v29  ;;  %v748_v51 = vmul.f32 %v2881_v45, %v2881_v45  ;;  %v925_v38 = vsel %vm299_vm0, %v747_v11, 0.0 }
 0x242   : > { %v918_v3 = vadd.f32 %v917_v24, %v916_v56  ;;  %v5627_v24 = vld [vmem:[#allocation13_spill] sm:$0xff] }
 0x243   : > { %5626 = vst [vmem:[#allocation10_spill] sm:$0xff] %v2888_v42  ;;  %v2895_v1 = vsub.f32 %v5627_v24, %v2521_v29  ;;  %v749_v59 = vmul.f32 %v2888_v42, %v2888_v42  ;;  %v927_v5 = vsel %vm299_vm0, %v748_v51, 0.0 }
 0x244   : > { %v920_v36 = vadd.f32 %v919_v47, %v918_v3  ;;  %v5629_v47 = vld [vmem:[#allocation14_spill] sm:$0xff] }
 0x245   : > { %5628 = vst [vmem:[#allocation11_spill] sm:$0xff] %v2895_v1  ;;  %v2902_v32 = vsub.f32 %v5629_v47, %v2521_v29  ;;  %v750_v45 = vmul.f32 %v2895_v1, %v2895_v1  ;;  %v929_v11 = vsel %vm299_vm0, %v749_v59, 0.0 }
 0x246   : > { %v922_v56 = vadd.f32 %v921_v7, %v920_v36  ;;  %v5631_v7 = vld [vmem:[#allocation15_spill] sm:$0xff] }
 0x247   : > { %5630 = vst [vmem:[#allocation12_spill] sm:$0xff] %v2902_v32  ;;  %v2909_v24 = vsub.f32 %v5631_v7, %v2521_v29  ;;  %v751_v42 = vmul.f32 %v2902_v32, %v2902_v32  ;;  %v931_v51 = vsel %vm299_vm0, %v750_v45, 0.0 }
 0x248   : > { %v924_v3 = vadd.f32 %v923_v63, %v922_v56  ;;  %v5633_v63 = vld [vmem:[#allocation16_spill] sm:$0xff] }
 0x249   : > { %5632 = vst [vmem:[#allocation13_spill] sm:$0xff] %v2909_v24  ;;  %v2916_v47 = vsub.f32 %v5633_v63, %v2521_v29  ;;  %v752_v1 = vmul.f32 %v2909_v24, %v2909_v24  ;;  %v933_v59 = vsel %vm299_vm0, %v751_v42, 0.0 }
 0x24a   : > { %v926_v36 = vadd.f32 %v925_v38, %v924_v3  ;;  %v5635_v38 = vld [vmem:[#allocation17_spill] sm:$0xff] }
 0x24b   : > { %5634 = vst [vmem:[#allocation14_spill] sm:$0xff] %v2916_v47  ;;  %v2923_v7 = vsub.f32 %v5635_v38, %v2521_v29  ;;  %v753_v32 = vmul.f32 %v2916_v47, %v2916_v47  ;;  %v935_v45 = vsel %vm299_vm0, %v752_v1, 0.0 }
 0x24c   : > { %v928_v56 = vadd.f32 %v927_v5, %v926_v36  ;;  %v5637_v5 = vld [vmem:[#allocation18_spill] sm:$0xff] }
 0x24d   : > { %5636 = vst [vmem:[#allocation15_spill] sm:$0xff] %v2923_v7  ;;  %v2930_v63 = vsub.f32 %v5637_v5, %v2521_v29  ;;  %v754_v24 = vmul.f32 %v2923_v7, %v2923_v7  ;;  %v937_v42 = vsel %vm299_vm0, %v753_v32, 0.0 }
 0x24e   : > { %v930_v3 = vadd.f32 %v929_v11, %v928_v56  ;;  %v5639_v11 = vld [vmem:[#allocation19_spill] sm:$0xff] }
 0x24f   : > { %5638 = vst [vmem:[#allocation16_spill] sm:$0xff] %v2930_v63  ;;  %v2937_v38 = vsub.f32 %v5639_v11, %v2521_v29  ;;  %v755_v47 = vmul.f32 %v2930_v63, %v2930_v63  ;;  %v939_v1 = vsel %vm299_vm0, %v754_v24, 0.0 }
 0x250   : > { %v932_v36 = vadd.f32 %v931_v51, %v930_v3  ;;  %v5641_v51 = vld [vmem:[#allocation20_spill] sm:$0xff] }
 0x251   : > { %5640 = vst [vmem:[#allocation17_spill] sm:$0xff] %v2937_v38  ;;  %v2944_v5 = vsub.f32 %v5641_v51, %v2521_v29  ;;  %v756_v7 = vmul.f32 %v2937_v38, %v2937_v38  ;;  %v941_v32 = vsel %vm299_vm0, %v755_v47, 0.0 }
 0x252   : > { %v934_v56 = vadd.f32 %v933_v59, %v932_v36  ;;  %v5643_v59 = vld [vmem:[#allocation21_spill] sm:$0xff] }
 0x253   : > { %5642 = vst [vmem:[#allocation18_spill] sm:$0xff] %v2944_v5  ;;  %v2951_v11 = vsub.f32 %v5643_v59, %v2521_v29  ;;  %v757_v63 = vmul.f32 %v2944_v5, %v2944_v5  ;;  %v943_v24 = vsel %vm299_vm0, %v756_v7, 0.0 }
 0x254   : > { %v936_v3 = vadd.f32 %v935_v45, %v934_v56  ;;  %v5645_v45 = vld [vmem:[#allocation22_spill] sm:$0xff] }
 0x255   : > { %5644 = vst [vmem:[#allocation19_spill] sm:$0xff] %v2951_v11  ;;  %v2958_v51 = vsub.f32 %v5645_v45, %v2521_v29  ;;  %v758_v38 = vmul.f32 %v2951_v11, %v2951_v11  ;;  %v945_v47 = vsel %vm299_vm0, %v757_v63, 0.0 }
 0x256   : > { %v938_v36 = vadd.f32 %v937_v42, %v936_v3  ;;  %v5647_v42 = vld [vmem:[#allocation23_spill] sm:$0xff] }
 0x257   : > { %5646 = vst [vmem:[#allocation20_spill] sm:$0xff] %v2958_v51  ;;  %v2965_v59 = vsub.f32 %v5647_v42, %v2521_v29  ;;  %v759_v5 = vmul.f32 %v2958_v51, %v2958_v51  ;;  %v947_v7 = vsel %vm299_vm0, %v758_v38, 0.0 }
 0x258   : > { %v940_v56 = vadd.f32 %v939_v1, %v938_v36  ;;  %v5649_v1 = vld [vmem:[#allocation24_spill] sm:$0xff] }
 0x259   : > { %5648 = vst [vmem:[#allocation21_spill] sm:$0xff] %v2965_v59  ;;  %v2972_v45 = vsub.f32 %v5649_v1, %v2521_v29  ;;  %v760_v11 = vmul.f32 %v2965_v59, %v2965_v59  ;;  %v949_v63 = vsel %vm299_vm0, %v759_v5, 0.0 }
 0x25a   : > { %v942_v3 = vadd.f32 %v941_v32, %v940_v56  ;;  %v5651_v32 = vld [vmem:[#allocation25_spill] sm:$0xff] }
 0x25b   : > { %5650 = vst [vmem:[#allocation22_spill] sm:$0xff] %v2972_v45  ;;  %v2979_v42 = vsub.f32 %v5651_v32, %v2521_v29  ;;  %v761_v51 = vmul.f32 %v2972_v45, %v2972_v45  ;;  %v951_v38 = vsel %vm299_vm0, %v760_v11, 0.0 }
 0x25c   : > { %v944_v36 = vadd.f32 %v943_v24, %v942_v3  ;;  %v5653_v24 = vld [vmem:[#allocation26_spill] sm:$0xff] }
 0x25d   : > { %5652 = vst [vmem:[#allocation23_spill] sm:$0xff] %v2979_v42  ;;  %v2986_v1 = vsub.f32 %v5653_v24, %v2521_v29  ;;  %v762_v59 = vmul.f32 %v2979_v42, %v2979_v42  ;;  %v953_v5 = vsel %vm299_vm0, %v761_v51, 0.0 }
 0x25e   : > { %v946_v56 = vadd.f32 %v945_v47, %v944_v36  ;;  %v5655_v47 = vld [vmem:[#allocation27_spill] sm:$0xff] }
 0x25f   : > { %5654 = vst [vmem:[#allocation24_spill] sm:$0xff] %v2986_v1  ;;  %v2993_v32 = vsub.f32 %v5655_v47, %v2521_v29  ;;  %v763_v45 = vmul.f32 %v2986_v1, %v2986_v1  ;;  %v955_v11 = vsel %vm299_vm0, %v762_v59, 0.0 }
 0x260   : > { %v948_v3 = vadd.f32 %v947_v7, %v946_v56  ;;  %v5657_v7 = vld [vmem:[#allocation28_spill] sm:$0xff] }
 0x261   : > { %5656 = vst [vmem:[#allocation25_spill] sm:$0xff] %v2993_v32  ;;  %v3000_v24 = vsub.f32 %v5657_v7, %v2521_v29  ;;  %v764_v42 = vmul.f32 %v2993_v32, %v2993_v32  ;;  %v957_v51 = vsel %vm299_vm0, %v763_v45, 0.0 }
 0x262   : > { %v950_v36 = vadd.f32 %v949_v63, %v948_v3  ;;  %v5659_v63 = vld [vmem:[#allocation29_spill] sm:$0xff] }
 0x263   : > { %5658 = vst [vmem:[#allocation26_spill] sm:$0xff] %v3000_v24  ;;  %v3007_v47 = vsub.f32 %v5659_v63, %v2521_v29  ;;  %v765_v1 = vmul.f32 %v3000_v24, %v3000_v24  ;;  %v959_v59 = vsel %vm299_vm0, %v764_v42, 0.0 }
 0x264   : > { %v952_v56 = vadd.f32 %v951_v38, %v950_v36  ;;  %v5661_v38 = vld [vmem:[#allocation30_spill] sm:$0xff] }
 0x265   : > { %5660 = vst [vmem:[#allocation27_spill] sm:$0xff] %v3007_v47  ;;  %v3014_v7 = vsub.f32 %v5661_v38, %v2521_v29  ;;  %v766_v32 = vmul.f32 %v3007_v47, %v3007_v47  ;;  %v961_v45 = vsel %vm299_vm0, %v765_v1, 0.0 }
 0x266   : > { %v954_v3 = vadd.f32 %v953_v5, %v952_v56  ;;  %v5663_v5 = vld [vmem:[#allocation31_spill] sm:$0xff] }
 0x267   : > { %5662 = vst [vmem:[#allocation28_spill] sm:$0xff] %v3014_v7  ;;  %v3021_v63 = vsub.f32 %v5663_v5, %v2521_v29  ;;  %v767_v24 = vmul.f32 %v3014_v7, %v3014_v7  ;;  %v963_v42 = vsel %vm299_vm0, %v766_v32, 0.0 }
 0x268   : > { %v956_v36 = vadd.f32 %v955_v11, %v954_v3  ;;  %v5665_v11 = vld [vmem:[#allocation32_spill] sm:$0xff] }
 0x269   : > { %5664 = vst [vmem:[#allocation29_spill] sm:$0xff] %v3021_v63  ;;  %v3028_v38 = vsub.f32 %v5665_v11, %v2521_v29  ;;  %v768_v47 = vmul.f32 %v3021_v63, %v3021_v63  ;;  %v965_v1 = vsel %vm299_vm0, %v767_v24, 0.0 }
 0x26a   : > { %v958_v56 = vadd.f32 %v957_v51, %v956_v36  ;;  %v5667_v51 = vld [vmem:[#allocation33_spill] sm:$0xff] }
 0x26b   : > { %5666 = vst [vmem:[#allocation30_spill] sm:$0xff] %v3028_v38  ;;  %v3035_v5 = vsub.f32 %v5667_v51, %v2521_v29  ;;  %v769_v7 = vmul.f32 %v3028_v38, %v3028_v38  ;;  %v967_v32 = vsel %vm299_vm0, %v768_v47, 0.0 }
 0x26c   : > { %v960_v3 = vadd.f32 %v959_v59, %v958_v56  ;;  %v5669_v59 = vld [vmem:[#allocation34_spill] sm:$0xff] }
 0x26d   : > { %5668 = vst [vmem:[#allocation31_spill] sm:$0xff] %v3035_v5  ;;  %v3042_v11 = vsub.f32 %v5669_v59, %v2521_v29  ;;  %v770_v63 = vmul.f32 %v3035_v5, %v3035_v5  ;;  %v969_v24 = vsel %vm299_vm0, %v769_v7, 0.0 }
 0x26e   : > { %v962_v36 = vadd.f32 %v961_v45, %v960_v3  ;;  %v5671_v45 = vld [vmem:[#allocation35_spill] sm:$0xff] }
 0x26f   : > { %5670 = vst [vmem:[#allocation32_spill] sm:$0xff] %v3042_v11  ;;  %v3049_v51 = vsub.f32 %v5671_v45, %v2521_v29  ;;  %v771_v38 = vmul.f32 %v3042_v11, %v3042_v11  ;;  %v971_v47 = vsel %vm299_vm0, %v770_v63, 0.0 }
 0x270   : > { %v964_v56 = vadd.f32 %v963_v42, %v962_v36  ;;  %v5673_v42 = vld [vmem:[#allocation36_spill] sm:$0xff] }
 0x271   : > { %5672 = vst [vmem:[#allocation33_spill] sm:$0xff] %v3049_v51  ;;  %v3056_v59 = vsub.f32 %v5673_v42, %v2521_v29  ;;  %v772_v5 = vmul.f32 %v3049_v51, %v3049_v51  ;;  %v973_v7 = vsel %vm299_vm0, %v771_v38, 0.0 }
 0x272   : > { %v966_v3 = vadd.f32 %v965_v1, %v964_v56  ;;  %v5675_v1 = vld [vmem:[#allocation37_spill] sm:$0xff] }
 0x273   : > { %5674 = vst [vmem:[#allocation34_spill] sm:$0xff] %v3056_v59  ;;  %v3063_v45 = vsub.f32 %v5675_v1, %v2521_v29  ;;  %v773_v11 = vmul.f32 %v3056_v59, %v3056_v59  ;;  %v975_v63 = vsel %vm299_vm0, %v772_v5, 0.0 }
 0x274   : > { %v968_v36 = vadd.f32 %v967_v32, %v966_v3  ;;  %v5677_v32 = vld [vmem:[#allocation38_spill] sm:$0xff] }
 0x275   : > { %5676 = vst [vmem:[#allocation35_spill] sm:$0xff] %v3063_v45  ;;  %v3070_v42 = vsub.f32 %v5677_v32, %v2521_v29  ;;  %v774_v51 = vmul.f32 %v3063_v45, %v3063_v45  ;;  %v977_v38 = vsel %vm299_vm0, %v773_v11, 0.0 }
 0x276   : > { %v970_v56 = vadd.f32 %v969_v24, %v968_v36  ;;  %v5679_v24 = vld [vmem:[#allocation39_spill] sm:$0xff] }
 0x277   : > { %5678 = vst [vmem:[#allocation36_spill] sm:$0xff] %v3070_v42  ;;  %v3077_v1 = vsub.f32 %v5679_v24, %v2521_v29  ;;  %v775_v59 = vmul.f32 %v3070_v42, %v3070_v42  ;;  %v979_v5 = vsel %vm299_vm0, %v774_v51, 0.0 }
 0x278   : > { %v972_v3 = vadd.f32 %v971_v47, %v970_v56  ;;  %v5681_v47 = vld [vmem:[#allocation40_spill] sm:$0xff] }
 0x279   : > { %5680 = vst [vmem:[#allocation37_spill] sm:$0xff] %v3077_v1  ;;  %v3084_v32 = vsub.f32 %v5681_v47, %v2521_v29  ;;  %v776_v45 = vmul.f32 %v3077_v1, %v3077_v1  ;;  %v981_v11 = vsel %vm299_vm0, %v775_v59, 0.0 }
 0x27a   : > { %v974_v36 = vadd.f32 %v973_v7, %v972_v3  ;;  %v5683_v7 = vld [vmem:[#allocation41_spill] sm:$0xff] }
 0x27b   : > { %5682 = vst [vmem:[#allocation38_spill] sm:$0xff] %v3084_v32  ;;  %v3091_v24 = vsub.f32 %v5683_v7, %v2521_v29  ;;  %v777_v42 = vmul.f32 %v3084_v32, %v3084_v32  ;;  %v983_v51 = vsel %vm299_vm0, %v776_v45, 0.0 }
 0x27c   : > { %v976_v56 = vadd.f32 %v975_v63, %v974_v36  ;;  %v5685_v63 = vld [vmem:[#allocation42_spill] sm:$0xff] }
 0x27d   : > { %5684 = vst [vmem:[#allocation39_spill] sm:$0xff] %v3091_v24  ;;  %v3098_v47 = vsub.f32 %v5685_v63, %v2521_v29  ;;  %v778_v1 = vmul.f32 %v3091_v24, %v3091_v24  ;;  %v985_v59 = vsel %vm299_vm0, %v777_v42, 0.0 }
 0x27e   : > { %v978_v3 = vadd.f32 %v977_v38, %v976_v56  ;;  %v5687_v38 = vld [vmem:[#allocation43_spill] sm:$0xff] }
 0x27f   : > { %5686 = vst [vmem:[#allocation40_spill] sm:$0xff] %v3098_v47  ;;  %v3105_v7 = vsub.f32 %v5687_v38, %v2521_v29  ;;  %v779_v32 = vmul.f32 %v3098_v47, %v3098_v47  ;;  %v987_v45 = vsel %vm299_vm0, %v778_v1, 0.0 }
 0x280   : > { %v980_v36 = vadd.f32 %v979_v5, %v978_v3  ;;  %v5689_v5 = vld [vmem:[#allocation44_spill] sm:$0xff] }
 0x281   : > { %5688 = vst [vmem:[#allocation41_spill] sm:$0xff] %v3105_v7  ;;  %v3112_v63 = vsub.f32 %v5689_v5, %v2521_v29  ;;  %v780_v24 = vmul.f32 %v3105_v7, %v3105_v7  ;;  %v989_v42 = vsel %vm299_vm0, %v779_v32, 0.0 }
 0x282   : > { %v982_v56 = vadd.f32 %v981_v11, %v980_v36  ;;  %v5691_v11 = vld [vmem:[#allocation45_spill] sm:$0xff] }
 0x283   : > { %5690 = vst [vmem:[#allocation42_spill] sm:$0xff] %v3112_v63  ;;  %v3119_v38 = vsub.f32 %v5691_v11, %v2521_v29  ;;  %v781_v47 = vmul.f32 %v3112_v63, %v3112_v63  ;;  %v991_v1 = vsel %vm299_vm0, %v780_v24, 0.0 }
 0x284   : > { %v984_v3 = vadd.f32 %v983_v51, %v982_v56  ;;  %v5693_v51 = vld [vmem:[#allocation46_spill] sm:$0xff] }
 0x285   : > { %5692 = vst [vmem:[#allocation43_spill] sm:$0xff] %v3119_v38  ;;  %v3126_v5 = vsub.f32 %v5693_v51, %v2521_v29  ;;  %v782_v7 = vmul.f32 %v3119_v38, %v3119_v38  ;;  %v993_v32 = vsel %vm299_vm0, %v781_v47, 0.0 }
 0x286   : > { %v986_v36 = vadd.f32 %v985_v59, %v984_v3  ;;  %v5695_v59 = vld [vmem:[#allocation47_spill] sm:$0xff] }
 0x287   : > { %5694 = vst [vmem:[#allocation44_spill] sm:$0xff] %v3126_v5  ;;  %v3133_v11 = vsub.f32 %v5695_v59, %v2521_v29  ;;  %v783_v63 = vmul.f32 %v3126_v5, %v3126_v5  ;;  %v995_v24 = vsel %vm299_vm0, %v782_v7, 0.0 }
 0x288   : > { %v988_v56 = vadd.f32 %v987_v45, %v986_v36  ;;  %v5697_v45 = vld [vmem:[#allocation48_spill] sm:$0xff] }
 0x289   : > { %5696 = vst [vmem:[#allocation45_spill] sm:$0xff] %v3133_v11  ;;  %v3140_v51 = vsub.f32 %v5697_v45, %v2521_v29  ;;  %v784_v38 = vmul.f32 %v3133_v11, %v3133_v11  ;;  %v997_v47 = vsel %vm299_vm0, %v783_v63, 0.0 }
 0x28a   : > { %v990_v3 = vadd.f32 %v989_v42, %v988_v56  ;;  %v5699_v42 = vld [vmem:[#allocation49_spill] sm:$0xff] }
 0x28b   : > { %5698 = vst [vmem:[#allocation46_spill] sm:$0xff] %v3140_v51  ;;  %v3147_v59 = vsub.f32 %v5699_v42, %v2521_v29  ;;  %v785_v5 = vmul.f32 %v3140_v51, %v3140_v51  ;;  %v999_v7 = vsel %vm299_vm0, %v784_v38, 0.0 }
 0x28c   : > { %v992_v36 = vadd.f32 %v991_v1, %v990_v3  ;;  %v5701_v1 = vld [vmem:[#allocation50_spill] sm:$0xff] }
 0x28d   : > { %5700 = vst [vmem:[#allocation47_spill] sm:$0xff] %v3147_v59  ;;  %v3154_v45 = vsub.f32 %v5701_v1, %v2521_v29  ;;  %v786_v11 = vmul.f32 %v3147_v59, %v3147_v59  ;;  %v1001_v63 = vsel %vm299_vm0, %v785_v5, 0.0 }
 0x28e   : > { %v994_v56 = vadd.f32 %v993_v32, %v992_v36  ;;  %v5703_v32 = vld [vmem:[#allocation51_spill] sm:$0xff] }
 0x28f   : > { %5702 = vst [vmem:[#allocation48_spill] sm:$0xff] %v3154_v45  ;;  %v3161_v42 = vsub.f32 %v5703_v32, %v2521_v29  ;;  %v787_v51 = vmul.f32 %v3154_v45, %v3154_v45  ;;  %v1003_v38 = vsel %vm299_vm0, %v786_v11, 0.0 }
 0x290   : > { %v996_v3 = vadd.f32 %v995_v24, %v994_v56  ;;  %v5705_v24 = vld [vmem:[#allocation52_spill] sm:$0xff] }
 0x291   : > { %5704 = vst [vmem:[#allocation49_spill] sm:$0xff] %v3161_v42  ;;  %v3168_v1 = vsub.f32 %v5705_v24, %v2521_v29  ;;  %v788_v59 = vmul.f32 %v3161_v42, %v3161_v42  ;;  %v1005_v5 = vsel %vm299_vm0, %v787_v51, 0.0 }
 0x292   : > { %v998_v36 = vadd.f32 %v997_v47, %v996_v3  ;;  %v5707_v47 = vld [vmem:[#allocation53_spill] sm:$0xff] }
 0x293   : > { %5706 = vst [vmem:[#allocation50_spill] sm:$0xff] %v3168_v1  ;;  %v3175_v32 = vsub.f32 %v5707_v47, %v2521_v29  ;;  %v789_v45 = vmul.f32 %v3168_v1, %v3168_v1  ;;  %v1007_v11 = vsel %vm299_vm0, %v788_v59, 0.0 }
 0x294   : > { %v1000_v56 = vadd.f32 %v999_v7, %v998_v36  ;;  %v5709_v7 = vld [vmem:[#allocation54_spill] sm:$0xff] }
 0x295   : > { %5708 = vst [vmem:[#allocation51_spill] sm:$0xff] %v3175_v32  ;;  %v3182_v24 = vsub.f32 %v5709_v7, %v2521_v29  ;;  %v790_v42 = vmul.f32 %v3175_v32, %v3175_v32  ;;  %v1009_v51 = vsel %vm299_vm0, %v789_v45, 0.0 }
 0x296   : > { %v1002_v3 = vadd.f32 %v1001_v63, %v1000_v56  ;;  %v5711_v63 = vld [vmem:[#allocation55_spill] sm:$0xff] }
 0x297   : > { %5710 = vst [vmem:[#allocation52_spill] sm:$0xff] %v3182_v24  ;;  %v3189_v47 = vsub.f32 %v5711_v63, %v2521_v29  ;;  %v791_v1 = vmul.f32 %v3182_v24, %v3182_v24  ;;  %v1011_v59 = vsel %vm299_vm0, %v790_v42, 0.0 }
 0x298   : > { %v1004_v36 = vadd.f32 %v1003_v38, %v1002_v3  ;;  %v5713_v38 = vld [vmem:[#allocation56_spill] sm:$0xff] }
 0x299   : > { %5712 = vst [vmem:[#allocation53_spill] sm:$0xff] %v3189_v47  ;;  %v3196_v7 = vsub.f32 %v5713_v38, %v2521_v29  ;;  %v792_v32 = vmul.f32 %v3189_v47, %v3189_v47  ;;  %v1013_v45 = vsel %vm299_vm0, %v791_v1, 0.0 }
 0x29a   : > { %v1006_v56 = vadd.f32 %v1005_v5, %v1004_v36  ;;  %v5715_v5 = vld [vmem:[#allocation57_spill] sm:$0xff] }
 0x29b   : > { %5714 = vst [vmem:[#allocation54_spill] sm:$0xff] %v3196_v7  ;;  %v3203_v63 = vsub.f32 %v5715_v5, %v2521_v29  ;;  %v793_v24 = vmul.f32 %v3196_v7, %v3196_v7  ;;  %v1015_v42 = vsel %vm299_vm0, %v792_v32, 0.0 }
 0x29c   : > { %v1008_v3 = vadd.f32 %v1007_v11, %v1006_v56  ;;  %v5717_v11 = vld [vmem:[#allocation58_spill] sm:$0xff] }
 0x29d   : > { %5716 = vst [vmem:[#allocation55_spill] sm:$0xff] %v3203_v63  ;;  %v3210_v38 = vsub.f32 %v5717_v11, %v2521_v29  ;;  %v794_v47 = vmul.f32 %v3203_v63, %v3203_v63  ;;  %v1017_v1 = vsel %vm299_vm0, %v793_v24, 0.0 }
 0x29e   : > { %v1010_v36 = vadd.f32 %v1009_v51, %v1008_v3  ;;  %v5719_v51 = vld [vmem:[#allocation59_spill] sm:$0xff] }
 0x29f   : > { %5718 = vst [vmem:[#allocation56_spill] sm:$0xff] %v3210_v38  ;;  %v3217_v5 = vsub.f32 %v5719_v51, %v2521_v29  ;;  %v795_v7 = vmul.f32 %v3210_v38, %v3210_v38  ;;  %v1019_v32 = vsel %vm299_vm0, %v794_v47, 0.0 }
 0x2a0   : > { %v1012_v56 = vadd.f32 %v1011_v59, %v1010_v36  ;;  %v5721_v59 = vld [vmem:[#allocation60_spill] sm:$0xff] }
 0x2a1   : > { %5720 = vst [vmem:[#allocation57_spill] sm:$0xff] %v3217_v5  ;;  %v3224_v11 = vsub.f32 %v5721_v59, %v2521_v29  ;;  %v796_v63 = vmul.f32 %v3217_v5, %v3217_v5  ;;  %v1021_v24 = vsel %vm299_vm0, %v795_v7, 0.0 }
 0x2a2   : > { %v1014_v3 = vadd.f32 %v1013_v45, %v1012_v56  ;;  %v5723_v45 = vld [vmem:[#allocation61_spill] sm:$0xff] }
 0x2a3   : > { %5722 = vst [vmem:[#allocation58_spill] sm:$0xff] %v3224_v11  ;;  %v3231_v51 = vsub.f32 %v5723_v45, %v2521_v29  ;;  %v797_v38 = vmul.f32 %v3224_v11, %v3224_v11  ;;  %v1023_v47 = vsel %vm299_vm0, %v796_v63, 0.0 }
 0x2a4   : > { %v1016_v36 = vadd.f32 %v1015_v42, %v1014_v3  ;;  %v5725_v42 = vld [vmem:[#allocation62_spill] sm:$0xff] }
 0x2a5   : > { %5724 = vst [vmem:[#allocation59_spill] sm:$0xff] %v3231_v51  ;;  %v3238_v59 = vsub.f32 %v5725_v42, %v2521_v29  ;;  %v798_v5 = vmul.f32 %v3231_v51, %v3231_v51  ;;  %v1025_v7 = vsel %vm299_vm0, %v797_v38, 0.0 }
 0x2a6   : > { %v1018_v56 = vadd.f32 %v1017_v1, %v1016_v36  ;;  %v5727_v1 = vld [vmem:[#allocation63_spill] sm:$0xff] }
 0x2a7   : > { %5726 = vst [vmem:[#allocation60_spill] sm:$0xff] %v3238_v59  ;;  %v3245_v45 = vsub.f32 %v5727_v1, %v2521_v29  ;;  %v799_v11 = vmul.f32 %v3238_v59, %v3238_v59  ;;  %v1027_v63 = vsel %vm299_vm0, %v798_v5, 0.0 }
 0x2a8   : > { %v1020_v3 = vadd.f32 %v1019_v32, %v1018_v56  ;;  %v5729_v32 = vld [vmem:[#allocation64_spill] sm:$0xff] }
 0x2a9   : > { %5728 = vst [vmem:[#allocation61_spill] sm:$0xff] %v3245_v45  ;;  %v3252_v42 = vsub.f32 %v5729_v32, %v2521_v29  ;;  %v800_v51 = vmul.f32 %v3245_v45, %v3245_v45  ;;  %v1029_v38 = vsel %vm299_vm0, %v799_v11, 0.0 }
 0x2aa   : > { %v1022_v36 = vadd.f32 %v1021_v24, %v1020_v3  ;;  %v5731_v24 = vld [vmem:[#allocation65_spill] sm:$0xff] }
 0x2ab   : > { %5730 = vst [vmem:[#allocation62_spill] sm:$0xff] %v3252_v42  ;;  %v3259_v1 = vsub.f32 %v5731_v24, %v2521_v29  ;;  %v801_v59 = vmul.f32 %v3252_v42, %v3252_v42  ;;  %v1031_v5 = vsel %vm299_vm0, %v800_v51, 0.0 }
 0x2ac   : > { %v1024_v56 = vadd.f32 %v1023_v47, %v1022_v36  ;;  %v5733_v47 = vld [vmem:[#allocation66_spill] sm:$0xff] }
 0x2ad   : > { %5732 = vst [vmem:[#allocation63_spill] sm:$0xff] %v3259_v1  ;;  %v3266_v32 = vsub.f32 %v5733_v47, %v2521_v29  ;;  %v802_v45 = vmul.f32 %v3259_v1, %v3259_v1  ;;  %v1033_v11 = vsel %vm299_vm0, %v801_v59, 0.0 }
 0x2ae   : > { %v1026_v3 = vadd.f32 %v1025_v7, %v1024_v56  ;;  %v5735_v7 = vld [vmem:[#allocation67_spill] sm:$0xff] }
 0x2af   : > { %5734 = vst [vmem:[#allocation64_spill] sm:$0xff] %v3266_v32  ;;  %v3273_v24 = vsub.f32 %v5735_v7, %v2521_v29  ;;  %v803_v42 = vmul.f32 %v3266_v32, %v3266_v32  ;;  %v1035_v51 = vsel %vm299_vm0, %v802_v45, 0.0 }
 0x2b0   : > { %v1028_v36 = vadd.f32 %v1027_v63, %v1026_v3  ;;  %v5737_v63 = vld [vmem:[#allocation68_spill] sm:$0xff] }
 0x2b1   : > { %5736 = vst [vmem:[#allocation65_spill] sm:$0xff] %v3273_v24  ;;  %v3280_v47 = vsub.f32 %v5737_v63, %v2521_v29  ;;  %v804_v1 = vmul.f32 %v3273_v24, %v3273_v24  ;;  %v1037_v59 = vsel %vm299_vm0, %v803_v42, 0.0 }
 0x2b2   : > { %v1030_v56 = vadd.f32 %v1029_v38, %v1028_v36  ;;  %v5739_v38 = vld [vmem:[#allocation69_spill] sm:$0xff] }
 0x2b3   : > { %5738 = vst [vmem:[#allocation66_spill] sm:$0xff] %v3280_v47  ;;  %v3287_v7 = vsub.f32 %v5739_v38, %v2521_v29  ;;  %v805_v32 = vmul.f32 %v3280_v47, %v3280_v47  ;;  %v1039_v45 = vsel %vm299_vm0, %v804_v1, 0.0 }
 0x2b4   : > { %v1032_v3 = vadd.f32 %v1031_v5, %v1030_v56  ;;  %v5741_v5 = vld [vmem:[#allocation70_spill] sm:$0xff] }
 0x2b5   : > { %5740 = vst [vmem:[#allocation67_spill] sm:$0xff] %v3287_v7  ;;  %v3294_v63 = vsub.f32 %v5741_v5, %v2521_v29  ;;  %v806_v24 = vmul.f32 %v3287_v7, %v3287_v7  ;;  %v1041_v42 = vsel %vm299_vm0, %v805_v32, 0.0 }
 0x2b6   : > { %v1034_v36 = vadd.f32 %v1033_v11, %v1032_v3  ;;  %v5743_v11 = vld [vmem:[#allocation71_spill] sm:$0xff] }
 0x2b7   : > { %5742 = vst [vmem:[#allocation68_spill] sm:$0xff] %v3294_v63  ;;  %v3301_v38 = vsub.f32 %v5743_v11, %v2521_v29  ;;  %v807_v47 = vmul.f32 %v3294_v63, %v3294_v63  ;;  %v1043_v1 = vsel %vm299_vm0, %v806_v24, 0.0 }
 0x2b8   : > { %v1036_v56 = vadd.f32 %v1035_v51, %v1034_v36  ;;  %v5745_v51 = vld [vmem:[#allocation72_spill] sm:$0xff] }
 0x2b9   : > { %5744 = vst [vmem:[#allocation69_spill] sm:$0xff] %v3301_v38  ;;  %v3308_v5 = vsub.f32 %v5745_v51, %v2521_v29  ;;  %v808_v7 = vmul.f32 %v3301_v38, %v3301_v38  ;;  %v1045_v32 = vsel %vm299_vm0, %v807_v47, 0.0 }
 0x2ba   : > { %v1038_v3 = vadd.f32 %v1037_v59, %v1036_v56  ;;  %v5747_v59 = vld [vmem:[#allocation73_spill] sm:$0xff] }
 0x2bb   : > { %5746 = vst [vmem:[#allocation70_spill] sm:$0xff] %v3308_v5  ;;  %v3315_v11 = vsub.f32 %v5747_v59, %v2521_v29  ;;  %v809_v63 = vmul.f32 %v3308_v5, %v3308_v5  ;;  %v1047_v24 = vsel %vm299_vm0, %v808_v7, 0.0 }
 0x2bc   : > { %v1040_v36 = vadd.f32 %v1039_v45, %v1038_v3  ;;  %v5749_v45 = vld [vmem:[#allocation74_spill] sm:$0xff] }
 0x2bd   : > { %5748 = vst [vmem:[#allocation71_spill] sm:$0xff] %v3315_v11  ;;  %v3322_v51 = vsub.f32 %v5749_v45, %v2521_v29  ;;  %v810_v38 = vmul.f32 %v3315_v11, %v3315_v11  ;;  %v1049_v47 = vsel %vm299_vm0, %v809_v63, 0.0 }
 0x2be   : > { %v1042_v56 = vadd.f32 %v1041_v42, %v1040_v36  ;;  %v5751_v42 = vld [vmem:[#allocation75_spill] sm:$0xff] }
 0x2bf   : > { %5750 = vst [vmem:[#allocation72_spill] sm:$0xff] %v3322_v51  ;;  %v3329_v59 = vsub.f32 %v5751_v42, %v2521_v29  ;;  %v811_v5 = vmul.f32 %v3322_v51, %v3322_v51  ;;  %v1051_v7 = vsel %vm299_vm0, %v810_v38, 0.0 }
 0x2c0   : > { %v1044_v3 = vadd.f32 %v1043_v1, %v1042_v56  ;;  %v5753_v1 = vld [vmem:[#allocation76_spill] sm:$0xff] }
 0x2c1   : > { %5752 = vst [vmem:[#allocation73_spill] sm:$0xff] %v3329_v59  ;;  %v3336_v45 = vsub.f32 %v5753_v1, %v2521_v29  ;;  %v812_v11 = vmul.f32 %v3329_v59, %v3329_v59  ;;  %v1053_v63 = vsel %vm299_vm0, %v811_v5, 0.0 }
 0x2c2   : > { %v1046_v36 = vadd.f32 %v1045_v32, %v1044_v3  ;;  %v5755_v32 = vld [vmem:[#allocation77_spill] sm:$0xff] }
 0x2c3   : > { %5754 = vst [vmem:[#allocation74_spill] sm:$0xff] %v3336_v45  ;;  %v3343_v42 = vsub.f32 %v5755_v32, %v2521_v29  ;;  %v813_v51 = vmul.f32 %v3336_v45, %v3336_v45  ;;  %v1055_v38 = vsel %vm299_vm0, %v812_v11, 0.0 }
 0x2c4   : > { %v1048_v56 = vadd.f32 %v1047_v24, %v1046_v36  ;;  %v5757_v24 = vld [vmem:[#allocation78_spill] sm:$0xff] }
 0x2c5   : > { %5756 = vst [vmem:[#allocation75_spill] sm:$0xff] %v3343_v42  ;;  %v3350_v1 = vsub.f32 %v5757_v24, %v2521_v29  ;;  %v814_v59 = vmul.f32 %v3343_v42, %v3343_v42  ;;  %v1057_v5 = vsel %vm299_vm0, %v813_v51, 0.0 }
 0x2c6   : > { %v1050_v3 = vadd.f32 %v1049_v47, %v1048_v56  ;;  %v5759_v47 = vld [vmem:[#allocation79_spill] sm:$0xff] }
 0x2c7   : > { %5758 = vst [vmem:[#allocation76_spill] sm:$0xff] %v3350_v1  ;;  %v3357_v32 = vsub.f32 %v5759_v47, %v2521_v29  ;;  %v815_v45 = vmul.f32 %v3350_v1, %v3350_v1  ;;  %v1059_v11 = vsel %vm299_vm0, %v814_v59, 0.0 }
 0x2c8   : > { %v1052_v36 = vadd.f32 %v1051_v7, %v1050_v3  ;;  %v5761_v7 = vld [vmem:[#allocation80_spill] sm:$0xff] }
 0x2c9   : > { %5760 = vst [vmem:[#allocation77_spill] sm:$0xff] %v3357_v32  ;;  %v3364_v24 = vsub.f32 %v5761_v7, %v2521_v29  ;;  %v816_v42 = vmul.f32 %v3357_v32, %v3357_v32  ;;  %v1847_v32 = vld [vmem:[%s1894_s17 + $0x3e8] sm:$0xff] }
 0x2ca   : > { %v1054_v56 = vadd.f32 %v1053_v63, %v1052_v36  ;;  %v5763_v63 = vld [vmem:[#allocation81_spill] sm:$0xff] }
 0x2cb   : > { %5762 = vst [vmem:[#allocation78_spill] sm:$0xff] %v3364_v24  ;;  %v3371_v47 = vsub.f32 %v5763_v63, %v2521_v29  ;;  %v817_v51 = vmul.f32 %v3364_v24, %v3364_v24  ;;  %v1846_v63 = vld [vmem:[%s1894_s17 + $0x3e0] sm:$0xff] }
 0x2cc   : > { %v1056_v3 = vadd.f32 %v1055_v38, %v1054_v56  ;;  %v1845_v38 = vld [vmem:[%s1894_s17 + $0x3d8] sm:$0xff]  ;;  %v3385_v1 = vsub.f32 %v1846_v63, %v2521_v29 }
 0x2cd   : > { %5764 = vst [vmem:[#allocation79_spill] sm:$0xff] %v3371_v47  ;;  %v3378_v7 = vsub.f32 %v1845_v38, %v2521_v29  ;;  %v818_v59 = vmul.f32 %v3371_v47, %v3371_v47  ;;  %v3392_v38 = vsub.f32 %v1847_v32, %v2521_v29 }
 0x2ce   : > { %v1058_v36 = vadd.f32 %v1057_v5, %v1056_v3  ;;  %v1061_v3 = vsel %vm299_vm0, %v815_v45, 0.0  ;;  %5766 = vst [vmem:[#allocation81_spill] sm:$0xff] %v3385_v1  ;;  %v1065_v45 = vsel %vm299_vm0, %v817_v51, 0.0  ;;  %v820_v47 = vmul.f32 %v3385_v1, %v3385_v1 }
 0x2cf   : > { %5765 = vst [vmem:[#allocation80_spill] sm:$0xff] %v3378_v7  ;;  %5767 = vst [vmem:[#allocation82_spill] sm:$0xff] %v3392_v38  ;;  %v819_v24 = vmul.f32 %v3378_v7, %v3378_v7  ;;  %v821_v7 = vmul.f32 %v3392_v38, %v3392_v38 }
 0x2d0   : > { %v1060_v56 = vadd.f32 %v1059_v11, %v1058_v36  ;;  %v1063_v36 = vsel %vm299_vm0, %v816_v42, 0.0  ;;  %v1067_v42 = vsel %vm299_vm0, %v818_v59, 0.0 }
 0x2d1   : > { %v1069_v51 = vsel %vm299_vm0, %v819_v24, 0.0 }
 0x2d2   : > { %v1062_v5 = vadd.f32 %v1061_v3, %v1060_v56  ;;  %v1848_v3 = vld [vmem:[%s1894_s17 + $0x3f0] sm:$0xff] }
 0x2d3   : > { %v3399_v63 = vsub.f32 %v1848_v3, %v2521_v29  ;;  %v1071_v3 = vsel %vm299_vm0, %v820_v47, 0.0 }
 0x2d4   : > { %v1064_v11 = vadd.f32 %v1063_v36, %v1062_v5  ;;  %v1849_v36 = vld [vmem:[%s1894_s17 + $0x3f8] sm:$0xff] }
 0x2d5   : > { %5768 = vst [vmem:[#allocation83_spill] sm:$0xff] %v3399_v63  ;;  %v3406_v32 = vsub.f32 %v1849_v36, %v2521_v29 }
 0x2d6   : > { %v1066_v56 = vadd.f32 %v1065_v45, %v1064_v11  ;;  %v822_v45 = vmul.f32 %v3399_v63, %v3399_v63 }
 0x2d7   : > { %v823_v59 = vmul.f32 %v3406_v32, %v3406_v32 }
 0x2d8   : > { %v1068_v5 = vadd.f32 %v1067_v42, %v1066_v56  ;;  %v1073_v56 = vsel %vm299_vm0, %v821_v7, 0.0  ;;  %v1075_v29 = vsel %vm299_vm0, %v822_v45, 0.0 }
 0x2d9   : > { %v1077_v38 = vsel %vm299_vm0, %v823_v59, 0.0 }
 0x2da   : > { %v1070_v11 = vadd.f32 %v1069_v51, %v1068_v5 }
 0x2dc   : > { %v1072_v15 = vadd.f32 %v1071_v3, %v1070_v11 }
 0x2de   : > { %v1074_v42 = vadd.f32 %v1073_v56, %v1072_v15 }
 0x2e0   : > { %v1076_v36 = vadd.f32 %v1075_v29, %v1074_v42 }
 0x2e2   : > { %v1078_v1 = vadd.f32 %v1077_v38, %v1076_v36 }
 0x2e4   : > { %1079 = vadd.xlane.f32.xlu0 %v1078_v1 }
 0x371   : > { %v1080_v24 = vpop.xlane.xlu0 %1079 }
 0x372   : > { %v1081_v5 = vrot.slane %v1080_v24, 4 }
 0x374   : > { %v1082_v51 = vadd.f32 %v1081_v5, %v1080_v24  ;;  %v5769_v24 = vld [vmem:[#allocation2_spill] sm:$0xff]  ;;  %v5770_v5 = vld [vmem:[#allocation3_spill] sm:$0xff] }
 0x376   : > { %v1083_v63 = vrot.slane %v1082_v51, 2 }
 0x378   : > { %v1084_v50 = vadd.f32 %v1083_v63, %v1082_v51  ;;  %v5771_v51 = vld [vmem:[#allocation4_spill] sm:$0xff] }
 0x37a   : > { %v1085_v47 = vrot.slane %v1084_v50, 1 }
 0x37c   : > { %v1086_v11 = vadd.f32 %v1085_v47, %v1084_v50  ;;  %v5772_v47 = vld [vmem:[#allocation5_spill] sm:$0xff] }
 0x37e   : > { %1829 = vpush %v1086_v11  ;;  %v5773_v11 = vld [vmem:[#allocation6_spill] sm:$0xff] }
 0x3af   : > { %s1830_s20 = spop %1829 }
 0x3b0   : > { %s1090_s21 = smul.f32 1.5259022e-05, %s1830_s20 }
 0x3b2   : > { %v1091_v3 = vstv %s1090_s21 }
 0x3b3   : > { %1841 = vrsqrt.f32 %v1091_v3  ;;  %vm1094_vm1 = vcmp.eq.f32.partialorder %v1091_v3, inf  ;;  %v1097_v45 = vand.u32 2147483648, %v1091_v3  ;;  %vm1096_vm2 = vcmp.eq.f32.partialorder %v1091_v3, 0.0 }
 0x3bd   : > { %v1842_v15 = vpop.eup %1841 }
 0x3be   : > { %v1093_v7 = vmul.f32 %v1842_v15, %v1091_v3 }
 0x3c0   : > { %v1095_v56 = vsel %vm1094_vm1, %v1091_v3, %v1093_v7  ;;  %v5774_v3 = vld [vmem:[#allocation7_spill] sm:$0xff]  ;;  %v5776_v7 = vld [vmem:[#allocation8_spill] sm:$0xff] }
 0x3c1   : > { %v1098_v38 = vsel %vm1096_vm2, %v1097_v45, %v1095_v56  ;;  %v5778_v56 = vld [vmem:[#allocation9_spill] sm:$0xff] }
 0x3c2   : > { %1831 = vpush %v1098_v38 }
 0x3f3   : > { %s1832_s22 = spop %1831 }
 0x3f4   : > { %s1100_s23 = sadd.f32 1e-05, %s1832_s22 }
 0x3f6   : > { %v1101_v1 = vstv %s1100_s23 }
 0x3f7   : > { %1843 = vrcp.f32 %v1101_v1  ;;  %v5780_v1 = vld [vmem:[#allocation10_spill] sm:$0xff] }
 0x401   : > { %v3419_v63 = vpop.eup %1843 }
 0x402   : > { %v3423_v50 = vmul.f32 %v3419_v63, %v2525_v60  ;;  %v3427_v59 = vmul.f32 %v3419_v63, %v2529_v9  ;;  %v3431_v42 = vmul.f32 %v3419_v63, %v2533_v54  ;;  %v3435_v29 = vmul.f32 %v3419_v63, %v2537_v18 }
 0x403   : > { %v3439_v36 = vmul.f32 %v3419_v63, %v2545_v0  ;;  %v3443_v60 = vmul.f32 %v3419_v63, %v2551_v2  ;;  %v3447_v9 = vmul.f32 %v3419_v63, %v2559_v23  ;;  %v3451_v54 = vmul.f32 %v3419_v63, %v2566_v10 }
 0x404   : > { %v3455_v18 = vmul.f32 %v3419_v63, %v2573_v13  ;;  %v3459_v0 = vmul.f32 %v3419_v63, %v2580_v16  ;;  %v3463_v2 = vmul.f32 %v3419_v63, %v2587_v19  ;;  %v3467_v23 = vmul.f32 %v3419_v63, %v2594_v22 }
 0x405   : > { %v3471_v10 = vmul.f32 %v3419_v63, %v2601_v25  ;;  %v3475_v13 = vmul.f32 %v3419_v63, %v2608_v28  ;;  %v3479_v16 = vmul.f32 %v3419_v63, %v2615_v31  ;;  %v3483_v19 = vmul.f32 %v3419_v63, %v2622_v34 }
 0x406   : > { %v3487_v22 = vmul.f32 %v3419_v63, %v2629_v37  ;;  %v3491_v25 = vmul.f32 %v3419_v63, %v2636_v40  ;;  %v3495_v28 = vmul.f32 %v3419_v63, %v2643_v43  ;;  %v3499_v31 = vmul.f32 %v3419_v63, %v2650_v46 }
 0x407   : > { %v3503_v34 = vmul.f32 %v3419_v63, %v2657_v49  ;;  %v3507_v37 = vmul.f32 %v3419_v63, %v2664_v52  ;;  %v3511_v40 = vmul.f32 %v3419_v63, %v2671_v55  ;;  %v3515_v43 = vmul.f32 %v3419_v63, %v2678_v58 }
 0x408   : > { %v3519_v46 = vmul.f32 %v3419_v63, %v2685_v61  ;;  %v3523_v49 = vmul.f32 %v3419_v63, %v2692_v4  ;;  %v3527_v52 = vmul.f32 %v3419_v63, %v2699_v8  ;;  %v3531_v55 = vmul.f32 %v3419_v63, %v2706_v12 }
 0x409   : > { %v3535_v58 = vmul.f32 %v3419_v63, %v2713_v17  ;;  %v3539_v61 = vmul.f32 %v3419_v63, %v2720_v21  ;;  %v3543_v4 = vmul.f32 %v3419_v63, %v2727_v26  ;;  %v3547_v8 = vmul.f32 %v3419_v63, %v2734_v30 }
 0x40a   : > { %v3551_v12 = vmul.f32 %v3419_v63, %v2741_v35  ;;  %v3555_v17 = vmul.f32 %v3419_v63, %v2748_v39  ;;  %v3559_v21 = vmul.f32 %v3419_v63, %v2755_v44  ;;  %v3563_v26 = vmul.f32 %v3419_v63, %v2762_v48 }
 0x40b   : > { %v3567_v30 = vmul.f32 %v3419_v63, %v2769_v53  ;;  %v3571_v35 = vmul.f32 %v3419_v63, %v2776_v57  ;;  %v3575_v39 = vmul.f32 %v3419_v63, %v2783_v62  ;;  %v3579_v44 = vmul.f32 %v3419_v63, %v2790_v6 }
 0x40c   : > { %v3583_v48 = vmul.f32 %v3419_v63, %v2797_v14  ;;  %v3587_v53 = vmul.f32 %v3419_v63, %v2804_v20  ;;  %v3591_v57 = vmul.f32 %v3419_v63, %v2811_v27  ;;  %v3595_v62 = vmul.f32 %v3419_v63, %v2818_v33 }
 0x40d   : > { %v3599_v6 = vmul.f32 %v3419_v63, %v2825_v41  ;;  %v3603_v14 = vmul.f32 %v3419_v63, %v5769_v24  ;;  %v3607_v20 = vmul.f32 %v3419_v63, %v5770_v5  ;;  %v3611_v27 = vmul.f32 %v3419_v63, %v5771_v51  ;;  %v5782_v5 = vld [vmem:[#allocation11_spill] sm:$0xff] }
 0x40e   : > { %v3615_v33 = vmul.f32 %v3419_v63, %v5772_v47  ;;  %v3619_v41 = vmul.f32 %v3419_v63, %v5773_v11  ;;  %v3623_v15 = vmul.f32 %v3419_v63, %v5774_v3  ;;  %v3627_v45 = vmul.f32 %v3419_v63, %v5776_v7  ;;  %v5784_v47 = vld [vmem:[#allocation12_spill] sm:$0xff]  ;;  %v5786_v3 = vld [vmem:[#allocation13_spill] sm:$0xff] }
 0x40f   : > { %v3631_v38 = vmul.f32 %v3419_v63, %v5778_v56  ;;  %v3635_v24 = vmul.f32 %v3419_v63, %v5780_v1  ;;  %v3639_v51 = vmul.f32 %v3419_v63, %v5782_v5  ;;  %v3643_v11 = vmul.f32 %v3419_v63, %v5784_v47 }
 0x410   : > { %5775 = vst [vmem:[#allocation2_spill] sm:$0xff] %v3623_v15  ;;  %5777 = vst [vmem:[#allocation3_spill] sm:$0xff] %v3627_v45  ;;  %v3647_v7 = vmul.f32 %v3419_v63, %v5786_v3  ;;  %v5788_v45 = vld [vmem:[#allocation14_spill] sm:$0xff] }
 0x411   : > { %5779 = vst [vmem:[#allocation4_spill] sm:$0xff] %v3631_v38  ;;  %5781 = vst [vmem:[#allocation5_spill] sm:$0xff] %v3635_v24  ;;  %v3651_v56 = vmul.f32 %v3419_v63, %v5788_v45  ;;  %v5790_v38 = vld [vmem:[#allocation15_spill] sm:$0xff]  ;;  %v5792_v24 = vld [vmem:[#allocation16_spill] sm:$0xff] }
 0x412   : > { %5783 = vst [vmem:[#allocation6_spill] sm:$0xff] %v3639_v51  ;;  %5785 = vst [vmem:[#allocation7_spill] sm:$0xff] %v3643_v11  ;;  %v3655_v1 = vmul.f32 %v3419_v63, %v5790_v38  ;;  %v3659_v5 = vmul.f32 %v3419_v63, %v5792_v24  ;;  %v5794_v51 = vld [vmem:[#allocation17_spill] sm:$0xff]  ;;  %v5796_v11 = vld [vmem:[#allocation18_spill] sm:$0xff] }
 0x413   : > { %5787 = vst [vmem:[#allocation8_spill] sm:$0xff] %v3647_v7  ;;  %5789 = vst [vmem:[#allocation9_spill] sm:$0xff] %v3651_v56  ;;  %v3663_v47 = vmul.f32 %v3419_v63, %v5794_v51  ;;  %v3667_v3 = vmul.f32 %v3419_v63, %v5796_v11  ;;  %v5798_v7 = vld [vmem:[#allocation19_spill] sm:$0xff]  ;;  %v5800_v56 = vld [vmem:[#allocation20_spill] sm:$0xff] }
 0x414   : > { %5791 = vst [vmem:[#allocation10_spill] sm:$0xff] %v3655_v1  ;;  %5793 = vst [vmem:[#allocation11_spill] sm:$0xff] %v3659_v5  ;;  %v3671_v45 = vmul.f32 %v3419_v63, %v5798_v7  ;;  %v3675_v38 = vmul.f32 %v3419_v63, %v5800_v56  ;;  %v5802_v1 = vld [vmem:[#allocation21_spill] sm:$0xff]  ;;  %v5804_v5 = vld [vmem:[#allocation22_spill] sm:$0xff] }
 0x415   : > { %5795 = vst [vmem:[#allocation12_spill] sm:$0xff] %v3663_v47  ;;  %5797 = vst [vmem:[#allocation13_spill] sm:$0xff] %v3667_v3  ;;  %v3679_v24 = vmul.f32 %v3419_v63, %v5802_v1  ;;  %v3683_v51 = vmul.f32 %v3419_v63, %v5804_v5  ;;  %v5806_v47 = vld [vmem:[#allocation23_spill] sm:$0xff]  ;;  %v5808_v3 = vld [vmem:[#allocation24_spill] sm:$0xff] }
 0x416   : > { %5799 = vst [vmem:[#allocation14_spill] sm:$0xff] %v3671_v45  ;;  %5801 = vst [vmem:[#allocation15_spill] sm:$0xff] %v3675_v38  ;;  %v3687_v11 = vmul.f32 %v3419_v63, %v5806_v47  ;;  %v3691_v7 = vmul.f32 %v3419_v63, %v5808_v3  ;;  %v5810_v45 = vld [vmem:[#allocation25_spill] sm:$0xff]  ;;  %v5812_v38 = vld [vmem:[#allocation26_spill] sm:$0xff] }
 0x417   : > { %5803 = vst [vmem:[#allocation16_spill] sm:$0xff] %v3679_v24  ;;  %5805 = vst [vmem:[#allocation17_spill] sm:$0xff] %v3683_v51  ;;  %v3695_v56 = vmul.f32 %v3419_v63, %v5810_v45  ;;  %v3699_v1 = vmul.f32 %v3419_v63, %v5812_v38  ;;  %v5814_v24 = vld [vmem:[#allocation27_spill] sm:$0xff]  ;;  %v5816_v51 = vld [vmem:[#allocation28_spill] sm:$0xff] }
 0x418   : > { %5807 = vst [vmem:[#allocation18_spill] sm:$0xff] %v3687_v11  ;;  %5809 = vst [vmem:[#allocation19_spill] sm:$0xff] %v3691_v7  ;;  %v3703_v5 = vmul.f32 %v3419_v63, %v5814_v24  ;;  %v3707_v47 = vmul.f32 %v3419_v63, %v5816_v51  ;;  %v5818_v11 = vld [vmem:[#allocation29_spill] sm:$0xff]  ;;  %v5820_v7 = vld [vmem:[#allocation30_spill] sm:$0xff] }
 0x419   : > { %5811 = vst [vmem:[#allocation20_spill] sm:$0xff] %v3695_v56  ;;  %5813 = vst [vmem:[#allocation21_spill] sm:$0xff] %v3699_v1  ;;  %v3711_v3 = vmul.f32 %v3419_v63, %v5818_v11  ;;  %v3715_v45 = vmul.f32 %v3419_v63, %v5820_v7  ;;  %v5822_v56 = vld [vmem:[#allocation31_spill] sm:$0xff]  ;;  %v5824_v1 = vld [vmem:[#allocation32_spill] sm:$0xff] }
 0x41a   : > { %5815 = vst [vmem:[#allocation22_spill] sm:$0xff] %v3703_v5  ;;  %5817 = vst [vmem:[#allocation23_spill] sm:$0xff] %v3707_v47  ;;  %v3719_v38 = vmul.f32 %v3419_v63, %v5822_v56  ;;  %v3723_v24 = vmul.f32 %v3419_v63, %v5824_v1  ;;  %v5826_v5 = vld [vmem:[#allocation33_spill] sm:$0xff]  ;;  %v5828_v47 = vld [vmem:[#allocation34_spill] sm:$0xff] }
 0x41b   : > { %5819 = vst [vmem:[#allocation24_spill] sm:$0xff] %v3711_v3  ;;  %5821 = vst [vmem:[#allocation25_spill] sm:$0xff] %v3715_v45  ;;  %v3727_v51 = vmul.f32 %v3419_v63, %v5826_v5  ;;  %v3731_v11 = vmul.f32 %v3419_v63, %v5828_v47  ;;  %v5830_v3 = vld [vmem:[#allocation35_spill] sm:$0xff]  ;;  %v5832_v45 = vld [vmem:[#allocation36_spill] sm:$0xff] }
 0x41c   : > { %5823 = vst [vmem:[#allocation26_spill] sm:$0xff] %v3719_v38  ;;  %5825 = vst [vmem:[#allocation27_spill] sm:$0xff] %v3723_v24  ;;  %v3735_v7 = vmul.f32 %v3419_v63, %v5830_v3  ;;  %v3739_v56 = vmul.f32 %v3419_v63, %v5832_v45  ;;  %v5834_v38 = vld [vmem:[#allocation37_spill] sm:$0xff]  ;;  %v5836_v24 = vld [vmem:[#allocation38_spill] sm:$0xff] }
 0x41d   : > { %5827 = vst [vmem:[#allocation28_spill] sm:$0xff] %v3727_v51  ;;  %5829 = vst [vmem:[#allocation29_spill] sm:$0xff] %v3731_v11  ;;  %v3743_v1 = vmul.f32 %v3419_v63, %v5834_v38  ;;  %v3747_v5 = vmul.f32 %v3419_v63, %v5836_v24  ;;  %v5838_v51 = vld [vmem:[#allocation39_spill] sm:$0xff]  ;;  %v5840_v11 = vld [vmem:[#allocation40_spill] sm:$0xff] }
 0x41e   : > { %5831 = vst [vmem:[#allocation30_spill] sm:$0xff] %v3735_v7  ;;  %5833 = vst [vmem:[#allocation31_spill] sm:$0xff] %v3739_v56  ;;  %v3751_v47 = vmul.f32 %v3419_v63, %v5838_v51  ;;  %v3755_v3 = vmul.f32 %v3419_v63, %v5840_v11  ;;  %v5842_v7 = vld [vmem:[#allocation41_spill] sm:$0xff]  ;;  %v5844_v56 = vld [vmem:[#allocation42_spill] sm:$0xff] }
 0x41f   : > { %5835 = vst [vmem:[#allocation32_spill] sm:$0xff] %v3743_v1  ;;  %5837 = vst [vmem:[#allocation33_spill] sm:$0xff] %v3747_v5  ;;  %v3759_v45 = vmul.f32 %v3419_v63, %v5842_v7  ;;  %v3763_v38 = vmul.f32 %v3419_v63, %v5844_v56  ;;  %v5846_v1 = vld [vmem:[#allocation43_spill] sm:$0xff]  ;;  %v5848_v5 = vld [vmem:[#allocation44_spill] sm:$0xff] }
 0x420   : > { %5839 = vst [vmem:[#allocation34_spill] sm:$0xff] %v3751_v47  ;;  %5841 = vst [vmem:[#allocation35_spill] sm:$0xff] %v3755_v3  ;;  %v3767_v24 = vmul.f32 %v3419_v63, %v5846_v1  ;;  %v3771_v51 = vmul.f32 %v3419_v63, %v5848_v5  ;;  %v5850_v47 = vld [vmem:[#allocation45_spill] sm:$0xff]  ;;  %v5852_v3 = vld [vmem:[#allocation46_spill] sm:$0xff] }
 0x421   : > { %5843 = vst [vmem:[#allocation36_spill] sm:$0xff] %v3759_v45  ;;  %5845 = vst [vmem:[#allocation37_spill] sm:$0xff] %v3763_v38  ;;  %v3775_v11 = vmul.f32 %v3419_v63, %v5850_v47  ;;  %v3779_v7 = vmul.f32 %v3419_v63, %v5852_v3  ;;  %v5854_v45 = vld [vmem:[#allocation47_spill] sm:$0xff]  ;;  %v5856_v38 = vld [vmem:[#allocation48_spill] sm:$0xff] }
 0x422   : > { %5847 = vst [vmem:[#allocation38_spill] sm:$0xff] %v3767_v24  ;;  %5849 = vst [vmem:[#allocation39_spill] sm:$0xff] %v3771_v51  ;;  %v3783_v56 = vmul.f32 %v3419_v63, %v5854_v45  ;;  %v3787_v1 = vmul.f32 %v3419_v63, %v5856_v38  ;;  %v5858_v24 = vld [vmem:[#allocation49_spill] sm:$0xff]  ;;  %v5860_v51 = vld [vmem:[#allocation50_spill] sm:$0xff] }
 0x423   : > { %5851 = vst [vmem:[#allocation40_spill] sm:$0xff] %v3775_v11  ;;  %5853 = vst [vmem:[#allocation41_spill] sm:$0xff] %v3779_v7  ;;  %v3791_v5 = vmul.f32 %v3419_v63, %v5858_v24  ;;  %v3795_v47 = vmul.f32 %v3419_v63, %v5860_v51  ;;  %v5862_v11 = vld [vmem:[#allocation51_spill] sm:$0xff]  ;;  %v5864_v7 = vld [vmem:[#allocation52_spill] sm:$0xff] }
 0x424   : > { %5855 = vst [vmem:[#allocation42_spill] sm:$0xff] %v3783_v56  ;;  %5857 = vst [vmem:[#allocation43_spill] sm:$0xff] %v3787_v1  ;;  %v3799_v3 = vmul.f32 %v3419_v63, %v5862_v11  ;;  %v3803_v45 = vmul.f32 %v3419_v63, %v5864_v7  ;;  %v5866_v56 = vld [vmem:[#allocation53_spill] sm:$0xff]  ;;  %v5868_v1 = vld [vmem:[#allocation54_spill] sm:$0xff] }
 0x425   : > { %5859 = vst [vmem:[#allocation44_spill] sm:$0xff] %v3791_v5  ;;  %5861 = vst [vmem:[#allocation45_spill] sm:$0xff] %v3795_v47  ;;  %v3807_v38 = vmul.f32 %v3419_v63, %v5866_v56  ;;  %v3811_v24 = vmul.f32 %v3419_v63, %v5868_v1  ;;  %v5870_v5 = vld [vmem:[#allocation55_spill] sm:$0xff]  ;;  %v5872_v47 = vld [vmem:[#allocation56_spill] sm:$0xff] }
 0x426   : > { %5863 = vst [vmem:[#allocation46_spill] sm:$0xff] %v3799_v3  ;;  %5865 = vst [vmem:[#allocation47_spill] sm:$0xff] %v3803_v45  ;;  %v3815_v51 = vmul.f32 %v3419_v63, %v5870_v5  ;;  %v3819_v11 = vmul.f32 %v3419_v63, %v5872_v47  ;;  %v5874_v3 = vld [vmem:[#allocation57_spill] sm:$0xff]  ;;  %v5876_v45 = vld [vmem:[#allocation58_spill] sm:$0xff] }
 0x427   : > { %5867 = vst [vmem:[#allocation48_spill] sm:$0xff] %v3807_v38  ;;  %5869 = vst [vmem:[#allocation49_spill] sm:$0xff] %v3811_v24  ;;  %v3823_v7 = vmul.f32 %v3419_v63, %v5874_v3  ;;  %v3827_v56 = vmul.f32 %v3419_v63, %v5876_v45  ;;  %v5878_v38 = vld [vmem:[#allocation59_spill] sm:$0xff]  ;;  %v5880_v24 = vld [vmem:[#allocation60_spill] sm:$0xff] }
 0x428   : > { %5871 = vst [vmem:[#allocation50_spill] sm:$0xff] %v3815_v51  ;;  %5873 = vst [vmem:[#allocation51_spill] sm:$0xff] %v3819_v11  ;;  %v3831_v1 = vmul.f32 %v3419_v63, %v5878_v38  ;;  %v3835_v5 = vmul.f32 %v3419_v63, %v5880_v24  ;;  %v5882_v51 = vld [vmem:[#allocation61_spill] sm:$0xff]  ;;  %v5884_v11 = vld [vmem:[#allocation62_spill] sm:$0xff] }
 0x429   : > { %5875 = vst [vmem:[#allocation52_spill] sm:$0xff] %v3823_v7  ;;  %5877 = vst [vmem:[#allocation53_spill] sm:$0xff] %v3827_v56  ;;  %v3839_v47 = vmul.f32 %v3419_v63, %v5882_v51  ;;  %v3843_v3 = vmul.f32 %v3419_v63, %v5884_v11  ;;  %v5886_v7 = vld [vmem:[#allocation63_spill] sm:$0xff]  ;;  %v5888_v56 = vld [vmem:[#allocation64_spill] sm:$0xff] }
 0x42a   : > { %5879 = vst [vmem:[#allocation54_spill] sm:$0xff] %v3831_v1  ;;  %5881 = vst [vmem:[#allocation55_spill] sm:$0xff] %v3835_v5  ;;  %v3847_v45 = vmul.f32 %v3419_v63, %v5886_v7  ;;  %v3851_v38 = vmul.f32 %v3419_v63, %v5888_v56  ;;  %v5890_v1 = vld [vmem:[#allocation65_spill] sm:$0xff]  ;;  %v5892_v5 = vld [vmem:[#allocation66_spill] sm:$0xff] }
 0x42b   : > { %5883 = vst [vmem:[#allocation56_spill] sm:$0xff] %v3839_v47  ;;  %5885 = vst [vmem:[#allocation57_spill] sm:$0xff] %v3843_v3  ;;  %v3855_v24 = vmul.f32 %v3419_v63, %v5890_v1  ;;  %v3859_v51 = vmul.f32 %v3419_v63, %v5892_v5  ;;  %v5894_v47 = vld [vmem:[#allocation67_spill] sm:$0xff]  ;;  %v5896_v3 = vld [vmem:[#allocation68_spill] sm:$0xff] }
 0x42c   : > { %5887 = vst [vmem:[#allocation58_spill] sm:$0xff] %v3847_v45  ;;  %5889 = vst [vmem:[#allocation59_spill] sm:$0xff] %v3851_v38  ;;  %v3863_v11 = vmul.f32 %v3419_v63, %v5894_v47  ;;  %v3867_v7 = vmul.f32 %v3419_v63, %v5896_v3  ;;  %v5898_v45 = vld [vmem:[#allocation69_spill] sm:$0xff]  ;;  %v5900_v38 = vld [vmem:[#allocation70_spill] sm:$0xff] }
 0x42d   : > { %5891 = vst [vmem:[#allocation60_spill] sm:$0xff] %v3855_v24  ;;  %5893 = vst [vmem:[#allocation61_spill] sm:$0xff] %v3859_v51  ;;  %v3871_v56 = vmul.f32 %v3419_v63, %v5898_v45  ;;  %v3875_v1 = vmul.f32 %v3419_v63, %v5900_v38  ;;  %v5902_v24 = vld [vmem:[#allocation71_spill] sm:$0xff]  ;;  %v5904_v51 = vld [vmem:[#allocation72_spill] sm:$0xff] }
 0x42e   : > { %5895 = vst [vmem:[#allocation62_spill] sm:$0xff] %v3863_v11  ;;  %5897 = vst [vmem:[#allocation63_spill] sm:$0xff] %v3867_v7  ;;  %v3879_v5 = vmul.f32 %v3419_v63, %v5902_v24  ;;  %v3883_v47 = vmul.f32 %v3419_v63, %v5904_v51  ;;  %v5906_v11 = vld [vmem:[#allocation73_spill] sm:$0xff]  ;;  %v5908_v7 = vld [vmem:[#allocation74_spill] sm:$0xff] }
 0x42f   : > { %5899 = vst [vmem:[#allocation64_spill] sm:$0xff] %v3871_v56  ;;  %5901 = vst [vmem:[#allocation65_spill] sm:$0xff] %v3875_v1  ;;  %v3887_v3 = vmul.f32 %v3419_v63, %v5906_v11  ;;  %v3891_v45 = vmul.f32 %v3419_v63, %v5908_v7  ;;  %v5910_v56 = vld [vmem:[#allocation75_spill] sm:$0xff]  ;;  %v5912_v1 = vld [vmem:[#allocation76_spill] sm:$0xff] }
 0x430   : > { %5903 = vst [vmem:[#allocation66_spill] sm:$0xff] %v3879_v5  ;;  %5905 = vst [vmem:[#allocation67_spill] sm:$0xff] %v3883_v47  ;;  %v3895_v38 = vmul.f32 %v3419_v63, %v5910_v56  ;;  %v3899_v24 = vmul.f32 %v3419_v63, %v5912_v1  ;;  %v3904_v51 = vld [vmem:[%s5362_s1] ss:$0 sm:$0xff]  ;;  %v5914_v47 = vld [vmem:[#allocation77_spill] sm:$0xff] }
 0x431   : > { %5907 = vst [vmem:[#allocation68_spill] sm:$0xff] %v3887_v3  ;;  %5909 = vst [vmem:[#allocation69_spill] sm:$0xff] %v3891_v45  ;;  %v3908_v11 = vmul.f32 %v3419_v63, %v5914_v47  ;;  %v5916_v3 = vld [vmem:[#allocation78_spill] sm:$0xff]  ;;  %v5917_v45 = vld [vmem:[#allocation79_spill] sm:$0xff] }
 0x432   : > { %5911 = vst [vmem:[#allocation70_spill] sm:$0xff] %v3895_v38  ;;  %5913 = vst [vmem:[#allocation71_spill] sm:$0xff] %v3899_v24  ;;  %v3912_v7 = vmul.f32 %v3419_v63, %v5916_v3  ;;  %v3916_v56 = vmul.f32 %v3419_v63, %v5917_v45  ;;  %v5918_v38 = vld [vmem:[#allocation80_spill] sm:$0xff]  ;;  %v5919_v24 = vld [vmem:[#allocation81_spill] sm:$0xff]  ;;  %v3936_v45 = vmul.f32 %v3419_v63, %v3406_v32 }
 0x433   : > { %5915 = vst [vmem:[#allocation72_spill] sm:$0xff] %v3908_v11  ;;  %v3920_v1 = vmul.f32 %v3419_v63, %v5918_v38  ;;  %v3924_v5 = vmul.f32 %v3419_v63, %v5919_v24  ;;  %v5920_v15 = vld [vmem:[#allocation82_spill] sm:$0xff]  ;;  %v5921_v11 = vld [vmem:[#allocation83_spill] sm:$0xff]  ;;  %v3940_v38 = vmul.f32 %v3904_v51, %v3423_v50  ;;  %v3944_v24 = vmul.f32 %v3904_v51, %v3427_v59 }
 0x434   : > { %v3928_v47 = vmul.f32 %v3419_v63, %v5920_v15  ;;  %v3932_v3 = vmul.f32 %v3419_v63, %v5921_v11  ;;  %v3948_v15 = vmul.f32 %v3904_v51, %v3431_v42  ;;  %v3952_v11 = vmul.f32 %v3904_v51, %v3435_v29 }
 0x435   : > { %v3956_v32 = vmul.f32 %v3904_v51, %v3439_v36  ;;  %v3960_v63 = vmul.f32 %v3904_v51, %v3443_v60  ;;  %v3964_v50 = vmul.f32 %v3904_v51, %v3447_v9  ;;  %v3968_v59 = vmul.f32 %v3904_v51, %v3451_v54 }
 0x436   : > { %v3972_v42 = vmul.f32 %v3904_v51, %v3455_v18  ;;  %v3976_v29 = vmul.f32 %v3904_v51, %v3459_v0  ;;  %v3980_v36 = vmul.f32 %v3904_v51, %v3463_v2  ;;  %v3984_v60 = vmul.f32 %v3904_v51, %v3467_v23 }
 0x437   : > { %v3988_v9 = vmul.f32 %v3904_v51, %v3471_v10  ;;  %v3992_v54 = vmul.f32 %v3904_v51, %v3475_v13  ;;  %v3996_v18 = vmul.f32 %v3904_v51, %v3479_v16  ;;  %v4000_v0 = vmul.f32 %v3904_v51, %v3483_v19 }
 0x438   : > { %v4004_v2 = vmul.f32 %v3904_v51, %v3487_v22  ;;  %v4008_v23 = vmul.f32 %v3904_v51, %v3491_v25  ;;  %v4012_v10 = vmul.f32 %v3904_v51, %v3495_v28  ;;  %v4016_v13 = vmul.f32 %v3904_v51, %v3499_v31 }
 0x439   : > { %v4020_v16 = vmul.f32 %v3904_v51, %v3503_v34  ;;  %v4024_v19 = vmul.f32 %v3904_v51, %v3507_v37  ;;  %v4028_v22 = vmul.f32 %v3904_v51, %v3511_v40  ;;  %v4032_v25 = vmul.f32 %v3904_v51, %v3515_v43 }
 0x43a   : > { %v4036_v28 = vmul.f32 %v3904_v51, %v3519_v46  ;;  %v4040_v31 = vmul.f32 %v3904_v51, %v3523_v49  ;;  %v4044_v34 = vmul.f32 %v3904_v51, %v3527_v52  ;;  %v4048_v37 = vmul.f32 %v3904_v51, %v3531_v55 }
 0x43b   : > { %v4052_v40 = vmul.f32 %v3904_v51, %v3535_v58  ;;  %v4056_v43 = vmul.f32 %v3904_v51, %v3539_v61  ;;  %v4060_v46 = vmul.f32 %v3904_v51, %v3543_v4  ;;  %v4064_v49 = vmul.f32 %v3904_v51, %v3547_v8 }
 0x43c   : > { %v4068_v52 = vmul.f32 %v3904_v51, %v3551_v12  ;;  %v4072_v55 = vmul.f32 %v3904_v51, %v3555_v17  ;;  %v4076_v58 = vmul.f32 %v3904_v51, %v3559_v21  ;;  %v4080_v61 = vmul.f32 %v3904_v51, %v3563_v26 }
 0x43d   : > { %v4084_v4 = vmul.f32 %v3904_v51, %v3567_v30  ;;  %v4088_v8 = vmul.f32 %v3904_v51, %v3571_v35  ;;  %v4092_v12 = vmul.f32 %v3904_v51, %v3575_v39  ;;  %v4096_v17 = vmul.f32 %v3904_v51, %v3579_v44 }
 0x43e   : > { %v4100_v21 = vmul.f32 %v3904_v51, %v3583_v48  ;;  %v4104_v26 = vmul.f32 %v3904_v51, %v3587_v53  ;;  %v4108_v30 = vmul.f32 %v3904_v51, %v3591_v57  ;;  %v4112_v35 = vmul.f32 %v3904_v51, %v3595_v62 }
 0x43f   : > { %v4116_v39 = vmul.f32 %v3904_v51, %v3599_v6  ;;  %v4120_v44 = vmul.f32 %v3904_v51, %v3603_v14  ;;  %v4124_v48 = vmul.f32 %v3904_v51, %v3607_v20  ;;  %v4128_v53 = vmul.f32 %v3904_v51, %v3611_v27  ;;  %v5927_v6 = vld [vmem:[#allocation2_spill] sm:$0xff] }
 0x440   : > { %v4132_v57 = vmul.f32 %v3904_v51, %v3615_v33  ;;  %v4136_v62 = vmul.f32 %v3904_v51, %v3619_v41  ;;  %v4140_v14 = vmul.f32 %v3904_v51, %v5927_v6 }
 0x441   : > { %5922 = vst [vmem:[#allocation73_spill] sm:$0xff] %v4120_v44  ;;  %5923 = vst [vmem:[#allocation74_spill] sm:$0xff] %v4124_v48  ;;  %v5929_v44 = vld [vmem:[#allocation3_spill] sm:$0xff]  ;;  %v5931_v48 = vld [vmem:[#allocation4_spill] sm:$0xff] }
 0x442   : > { %5924 = vst [vmem:[#allocation75_spill] sm:$0xff] %v4128_v53  ;;  %5925 = vst [vmem:[#allocation76_spill] sm:$0xff] %v4132_v57  ;;  %v4144_v20 = vmul.f32 %v3904_v51, %v5929_v44  ;;  %v4148_v27 = vmul.f32 %v3904_v51, %v5931_v48  ;;  %v5933_v53 = vld [vmem:[#allocation5_spill] sm:$0xff]  ;;  %v5935_v57 = vld [vmem:[#allocation6_spill] sm:$0xff] }
 0x443   : > { %5926 = vst [vmem:[#allocation77_spill] sm:$0xff] %v4136_v62  ;;  %5928 = vst [vmem:[#allocation78_spill] sm:$0xff] %v4140_v14  ;;  %v4152_v33 = vmul.f32 %v3904_v51, %v5933_v53  ;;  %v4156_v41 = vmul.f32 %v3904_v51, %v5935_v57  ;;  %v5937_v62 = vld [vmem:[#allocation7_spill] sm:$0xff]  ;;  %v5939_v14 = vld [vmem:[#allocation8_spill] sm:$0xff] }
 0x444   : > { %5930 = vst [vmem:[#allocation79_spill] sm:$0xff] %v4144_v20  ;;  %5932 = vst [vmem:[#allocation80_spill] sm:$0xff] %v4148_v27  ;;  %v4160_v6 = vmul.f32 %v3904_v51, %v5937_v62  ;;  %v4164_v44 = vmul.f32 %v3904_v51, %v5939_v14  ;;  %v5941_v20 = vld [vmem:[#allocation9_spill] sm:$0xff]  ;;  %v5943_v27 = vld [vmem:[#allocation10_spill] sm:$0xff] }
 0x445   : > { %5934 = vst [vmem:[#allocation81_spill] sm:$0xff] %v4152_v33  ;;  %5936 = vst [vmem:[#allocation82_spill] sm:$0xff] %v4156_v41  ;;  %v4168_v48 = vmul.f32 %v3904_v51, %v5941_v20  ;;  %v4172_v53 = vmul.f32 %v3904_v51, %v5943_v27  ;;  %v5945_v33 = vld [vmem:[#allocation11_spill] sm:$0xff]  ;;  %v5947_v41 = vld [vmem:[#allocation12_spill] sm:$0xff] }
 0x446   : > { %5938 = vst [vmem:[#allocation83_spill] sm:$0xff] %v4160_v6  ;;  %5940 = vst [vmem:[#allocation2_spill] sm:$0xff] %v4164_v44  ;;  %v4176_v57 = vmul.f32 %v3904_v51, %v5945_v33  ;;  %v4180_v62 = vmul.f32 %v3904_v51, %v5947_v41  ;;  %v5949_v6 = vld [vmem:[#allocation13_spill] sm:$0xff]  ;;  %v5951_v44 = vld [vmem:[#allocation14_spill] sm:$0xff] }
 0x447   : > { %5942 = vst [vmem:[#allocation3_spill] sm:$0xff] %v4168_v48  ;;  %5944 = vst [vmem:[#allocation4_spill] sm:$0xff] %v4172_v53  ;;  %v4184_v14 = vmul.f32 %v3904_v51, %v5949_v6  ;;  %v4188_v20 = vmul.f32 %v3904_v51, %v5951_v44  ;;  %v5953_v48 = vld [vmem:[#allocation15_spill] sm:$0xff]  ;;  %v5955_v53 = vld [vmem:[#allocation16_spill] sm:$0xff] }
 0x448   : > { %5946 = vst [vmem:[#allocation5_spill] sm:$0xff] %v4176_v57  ;;  %5948 = vst [vmem:[#allocation6_spill] sm:$0xff] %v4180_v62  ;;  %v4192_v27 = vmul.f32 %v3904_v51, %v5953_v48  ;;  %v4196_v33 = vmul.f32 %v3904_v51, %v5955_v53  ;;  %v5957_v57 = vld [vmem:[#allocation17_spill] sm:$0xff]  ;;  %v5959_v62 = vld [vmem:[#allocation18_spill] sm:$0xff] }
 0x449   : > { %5950 = vst [vmem:[#allocation7_spill] sm:$0xff] %v4184_v14  ;;  %5952 = vst [vmem:[#allocation8_spill] sm:$0xff] %v4188_v20  ;;  %v4200_v41 = vmul.f32 %v3904_v51, %v5957_v57  ;;  %v4204_v6 = vmul.f32 %v3904_v51, %v5959_v62  ;;  %v5961_v14 = vld [vmem:[#allocation19_spill] sm:$0xff]  ;;  %v5963_v20 = vld [vmem:[#allocation20_spill] sm:$0xff] }
 0x44a   : > { %5954 = vst [vmem:[#allocation9_spill] sm:$0xff] %v4192_v27  ;;  %5956 = vst [vmem:[#allocation10_spill] sm:$0xff] %v4196_v33  ;;  %v4208_v44 = vmul.f32 %v3904_v51, %v5961_v14  ;;  %v4212_v48 = vmul.f32 %v3904_v51, %v5963_v20  ;;  %v5965_v27 = vld [vmem:[#allocation21_spill] sm:$0xff]  ;;  %v5967_v33 = vld [vmem:[#allocation22_spill] sm:$0xff] }
 0x44b   : > { %5958 = vst [vmem:[#allocation11_spill] sm:$0xff] %v4200_v41  ;;  %5960 = vst [vmem:[#allocation12_spill] sm:$0xff] %v4204_v6  ;;  %v4216_v53 = vmul.f32 %v3904_v51, %v5965_v27  ;;  %v4220_v57 = vmul.f32 %v3904_v51, %v5967_v33  ;;  %v5969_v41 = vld [vmem:[#allocation23_spill] sm:$0xff]  ;;  %v5971_v6 = vld [vmem:[#allocation24_spill] sm:$0xff] }
 0x44c   : > { %5962 = vst [vmem:[#allocation13_spill] sm:$0xff] %v4208_v44  ;;  %5964 = vst [vmem:[#allocation14_spill] sm:$0xff] %v4212_v48  ;;  %v4224_v62 = vmul.f32 %v3904_v51, %v5969_v41  ;;  %v4228_v14 = vmul.f32 %v3904_v51, %v5971_v6  ;;  %v5973_v44 = vld [vmem:[#allocation25_spill] sm:$0xff]  ;;  %v5975_v48 = vld [vmem:[#allocation26_spill] sm:$0xff] }
 0x44d   : > { %5966 = vst [vmem:[#allocation15_spill] sm:$0xff] %v4216_v53  ;;  %5968 = vst [vmem:[#allocation16_spill] sm:$0xff] %v4220_v57  ;;  %v4232_v20 = vmul.f32 %v3904_v51, %v5973_v44  ;;  %v4236_v27 = vmul.f32 %v3904_v51, %v5975_v48  ;;  %v5977_v53 = vld [vmem:[#allocation27_spill] sm:$0xff]  ;;  %v5979_v57 = vld [vmem:[#allocation28_spill] sm:$0xff] }
 0x44e   : > { %5970 = vst [vmem:[#allocation17_spill] sm:$0xff] %v4224_v62  ;;  %5972 = vst [vmem:[#allocation18_spill] sm:$0xff] %v4228_v14  ;;  %v4240_v33 = vmul.f32 %v3904_v51, %v5977_v53  ;;  %v4244_v41 = vmul.f32 %v3904_v51, %v5979_v57  ;;  %v5981_v62 = vld [vmem:[#allocation29_spill] sm:$0xff]  ;;  %v5983_v14 = vld [vmem:[#allocation30_spill] sm:$0xff] }
 0x44f   : > { %5974 = vst [vmem:[#allocation19_spill] sm:$0xff] %v4232_v20  ;;  %5976 = vst [vmem:[#allocation20_spill] sm:$0xff] %v4236_v27  ;;  %v4248_v6 = vmul.f32 %v3904_v51, %v5981_v62  ;;  %v4252_v44 = vmul.f32 %v3904_v51, %v5983_v14  ;;  %v5985_v20 = vld [vmem:[#allocation31_spill] sm:$0xff]  ;;  %v5987_v27 = vld [vmem:[#allocation32_spill] sm:$0xff] }
 0x450   : > { %5978 = vst [vmem:[#allocation21_spill] sm:$0xff] %v4240_v33  ;;  %5980 = vst [vmem:[#allocation22_spill] sm:$0xff] %v4244_v41  ;;  %v4256_v48 = vmul.f32 %v3904_v51, %v5985_v20  ;;  %v4260_v53 = vmul.f32 %v3904_v51, %v5987_v27  ;;  %v5989_v33 = vld [vmem:[#allocation33_spill] sm:$0xff]  ;;  %v5991_v41 = vld [vmem:[#allocation34_spill] sm:$0xff] }
 0x451   : > { %5982 = vst [vmem:[#allocation23_spill] sm:$0xff] %v4248_v6  ;;  %5984 = vst [vmem:[#allocation24_spill] sm:$0xff] %v4252_v44  ;;  %v4264_v57 = vmul.f32 %v3904_v51, %v5989_v33  ;;  %v4268_v62 = vmul.f32 %v3904_v51, %v5991_v41  ;;  %v5993_v6 = vld [vmem:[#allocation35_spill] sm:$0xff]  ;;  %v5995_v44 = vld [vmem:[#allocation36_spill] sm:$0xff] }
 0x452   : > { %5986 = vst [vmem:[#allocation25_spill] sm:$0xff] %v4256_v48  ;;  %5988 = vst [vmem:[#allocation26_spill] sm:$0xff] %v4260_v53  ;;  %v4272_v14 = vmul.f32 %v3904_v51, %v5993_v6  ;;  %v4276_v20 = vmul.f32 %v3904_v51, %v5995_v44  ;;  %v5997_v48 = vld [vmem:[#allocation37_spill] sm:$0xff]  ;;  %v5999_v53 = vld [vmem:[#allocation38_spill] sm:$0xff] }
 0x453   : > { %5990 = vst [vmem:[#allocation27_spill] sm:$0xff] %v4264_v57  ;;  %5992 = vst [vmem:[#allocation28_spill] sm:$0xff] %v4268_v62  ;;  %v4280_v27 = vmul.f32 %v3904_v51, %v5997_v48  ;;  %v4284_v33 = vmul.f32 %v3904_v51, %v5999_v53  ;;  %v6001_v57 = vld [vmem:[#allocation39_spill] sm:$0xff]  ;;  %v6003_v62 = vld [vmem:[#allocation40_spill] sm:$0xff] }
 0x454   : > { %5994 = vst [vmem:[#allocation29_spill] sm:$0xff] %v4272_v14  ;;  %5996 = vst [vmem:[#allocation30_spill] sm:$0xff] %v4276_v20  ;;  %v4288_v41 = vmul.f32 %v3904_v51, %v6001_v57  ;;  %v4292_v6 = vmul.f32 %v3904_v51, %v6003_v62  ;;  %v6005_v14 = vld [vmem:[#allocation41_spill] sm:$0xff]  ;;  %v6007_v20 = vld [vmem:[#allocation42_spill] sm:$0xff] }
 0x455   : > { %5998 = vst [vmem:[#allocation31_spill] sm:$0xff] %v4280_v27  ;;  %6000 = vst [vmem:[#allocation32_spill] sm:$0xff] %v4284_v33  ;;  %v4296_v44 = vmul.f32 %v3904_v51, %v6005_v14  ;;  %v4300_v48 = vmul.f32 %v3904_v51, %v6007_v20  ;;  %v6009_v27 = vld [vmem:[#allocation43_spill] sm:$0xff]  ;;  %v6011_v33 = vld [vmem:[#allocation44_spill] sm:$0xff] }
 0x456   : > { %6002 = vst [vmem:[#allocation33_spill] sm:$0xff] %v4288_v41  ;;  %6004 = vst [vmem:[#allocation34_spill] sm:$0xff] %v4292_v6  ;;  %v4304_v53 = vmul.f32 %v3904_v51, %v6009_v27  ;;  %v4308_v57 = vmul.f32 %v3904_v51, %v6011_v33  ;;  %v6013_v41 = vld [vmem:[#allocation45_spill] sm:$0xff]  ;;  %v6015_v6 = vld [vmem:[#allocation46_spill] sm:$0xff] }
 0x457   : > { %6006 = vst [vmem:[#allocation35_spill] sm:$0xff] %v4296_v44  ;;  %6008 = vst [vmem:[#allocation36_spill] sm:$0xff] %v4300_v48  ;;  %v4312_v62 = vmul.f32 %v3904_v51, %v6013_v41  ;;  %v4316_v14 = vmul.f32 %v3904_v51, %v6015_v6  ;;  %v6017_v44 = vld [vmem:[#allocation47_spill] sm:$0xff]  ;;  %v6019_v48 = vld [vmem:[#allocation48_spill] sm:$0xff] }
 0x458   : > { %6010 = vst [vmem:[#allocation37_spill] sm:$0xff] %v4304_v53  ;;  %6012 = vst [vmem:[#allocation38_spill] sm:$0xff] %v4308_v57  ;;  %v4320_v20 = vmul.f32 %v3904_v51, %v6017_v44  ;;  %v4324_v27 = vmul.f32 %v3904_v51, %v6019_v48  ;;  %v6021_v53 = vld [vmem:[#allocation49_spill] sm:$0xff]  ;;  %v6023_v57 = vld [vmem:[#allocation50_spill] sm:$0xff] }
 0x459   : > { %6014 = vst [vmem:[#allocation39_spill] sm:$0xff] %v4312_v62  ;;  %6016 = vst [vmem:[#allocation40_spill] sm:$0xff] %v4316_v14  ;;  %v4328_v33 = vmul.f32 %v3904_v51, %v6021_v53  ;;  %v4332_v41 = vmul.f32 %v3904_v51, %v6023_v57  ;;  %v6025_v62 = vld [vmem:[#allocation51_spill] sm:$0xff]  ;;  %v6027_v14 = vld [vmem:[#allocation52_spill] sm:$0xff] }
 0x45a   : > { %6018 = vst [vmem:[#allocation41_spill] sm:$0xff] %v4320_v20  ;;  %6020 = vst [vmem:[#allocation42_spill] sm:$0xff] %v4324_v27  ;;  %v4336_v6 = vmul.f32 %v3904_v51, %v6025_v62  ;;  %v4340_v44 = vmul.f32 %v3904_v51, %v6027_v14  ;;  %v6029_v20 = vld [vmem:[#allocation53_spill] sm:$0xff]  ;;  %v6031_v27 = vld [vmem:[#allocation54_spill] sm:$0xff] }
 0x45b   : > { %6022 = vst [vmem:[#allocation43_spill] sm:$0xff] %v4328_v33  ;;  %6024 = vst [vmem:[#allocation44_spill] sm:$0xff] %v4332_v41  ;;  %v4344_v48 = vmul.f32 %v3904_v51, %v6029_v20  ;;  %v4348_v53 = vmul.f32 %v3904_v51, %v6031_v27  ;;  %v6033_v33 = vld [vmem:[#allocation55_spill] sm:$0xff]  ;;  %v6035_v41 = vld [vmem:[#allocation56_spill] sm:$0xff] }
 0x45c   : > { %6026 = vst [vmem:[#allocation45_spill] sm:$0xff] %v4336_v6  ;;  %6028 = vst [vmem:[#allocation46_spill] sm:$0xff] %v4340_v44  ;;  %v4352_v57 = vmul.f32 %v3904_v51, %v6033_v33  ;;  %v4356_v62 = vmul.f32 %v3904_v51, %v6035_v41  ;;  %v6037_v6 = vld [vmem:[#allocation57_spill] sm:$0xff]  ;;  %v6039_v44 = vld [vmem:[#allocation58_spill] sm:$0xff] }
 0x45d   : > { %6030 = vst [vmem:[#allocation47_spill] sm:$0xff] %v4344_v48  ;;  %6032 = vst [vmem:[#allocation48_spill] sm:$0xff] %v4348_v53  ;;  %v4360_v14 = vmul.f32 %v3904_v51, %v6037_v6  ;;  %v4364_v20 = vmul.f32 %v3904_v51, %v6039_v44  ;;  %v6041_v48 = vld [vmem:[#allocation59_spill] sm:$0xff]  ;;  %v6043_v53 = vld [vmem:[#allocation60_spill] sm:$0xff] }
 0x45e   : > { %6034 = vst [vmem:[#allocation49_spill] sm:$0xff] %v4352_v57  ;;  %6036 = vst [vmem:[#allocation50_spill] sm:$0xff] %v4356_v62  ;;  %v4368_v27 = vmul.f32 %v3904_v51, %v6041_v48  ;;  %v4372_v33 = vmul.f32 %v3904_v51, %v6043_v53  ;;  %v6045_v57 = vld [vmem:[#allocation61_spill] sm:$0xff]  ;;  %v6047_v62 = vld [vmem:[#allocation62_spill] sm:$0xff] }
 0x45f   : > { %6038 = vst [vmem:[#allocation51_spill] sm:$0xff] %v4360_v14  ;;  %6040 = vst [vmem:[#allocation52_spill] sm:$0xff] %v4364_v20  ;;  %v4376_v41 = vmul.f32 %v3904_v51, %v6045_v57  ;;  %v4380_v6 = vmul.f32 %v3904_v51, %v6047_v62  ;;  %v6049_v14 = vld [vmem:[#allocation63_spill] sm:$0xff]  ;;  %v6051_v20 = vld [vmem:[#allocation64_spill] sm:$0xff] }
 0x460   : > { %6042 = vst [vmem:[#allocation53_spill] sm:$0xff] %v4368_v27  ;;  %6044 = vst [vmem:[#allocation54_spill] sm:$0xff] %v4372_v33  ;;  %v4384_v44 = vmul.f32 %v3904_v51, %v6049_v14  ;;  %v4388_v48 = vmul.f32 %v3904_v51, %v6051_v20  ;;  %v6053_v27 = vld [vmem:[#allocation65_spill] sm:$0xff]  ;;  %v6055_v33 = vld [vmem:[#allocation66_spill] sm:$0xff] }
 0x461   : > { %6046 = vst [vmem:[#allocation55_spill] sm:$0xff] %v4376_v41  ;;  %6048 = vst [vmem:[#allocation56_spill] sm:$0xff] %v4380_v6  ;;  %v4392_v53 = vmul.f32 %v3904_v51, %v6053_v27  ;;  %v4396_v57 = vmul.f32 %v3904_v51, %v6055_v33  ;;  %v6056_v41 = vld [vmem:[#allocation67_spill] sm:$0xff]  ;;  %v6058_v6 = vld [vmem:[#allocation68_spill] sm:$0xff] }
 0x462   : > { %6050 = vst [vmem:[#allocation57_spill] sm:$0xff] %v4384_v44  ;;  %6052 = vst [vmem:[#allocation58_spill] sm:$0xff] %v4388_v48  ;;  %v4400_v62 = vmul.f32 %v3904_v51, %v6056_v41  ;;  %v4404_v14 = vmul.f32 %v3904_v51, %v6058_v6  ;;  %v6059_v44 = vld [vmem:[#allocation69_spill] sm:$0xff]  ;;  %v6060_v48 = vld [vmem:[#allocation70_spill] sm:$0xff] }
 0x463   : > { %6054 = vst [vmem:[#allocation59_spill] sm:$0xff] %v4392_v53  ;;  %v4408_v20 = vmul.f32 %v3904_v51, %v6059_v44  ;;  %v4412_v27 = vmul.f32 %v3904_v51, %v6060_v48  ;;  %v6061_v53 = vld [vmem:[#allocation71_spill] sm:$0xff]  ;;  %v4421_v41 = vld [vmem:[%s5363_s2] ss:$0 sm:$0xff]  ;;  %v4429_v44 = vmul.f32 %v3904_v51, %v3912_v7  ;;  %v4433_v48 = vmul.f32 %v3904_v51, %v3916_v56 }
 0x464   : > { %6057 = vst [vmem:[#allocation60_spill] sm:$0xff] %v4400_v62  ;;  %v4416_v33 = vmul.f32 %v3904_v51, %v6061_v53  ;;  %v6063_v62 = vld [vmem:[#allocation72_spill] sm:$0xff]  ;;  %v4437_v53 = vmul.f32 %v3904_v51, %v3920_v1  ;;  %v4449_v7 = vmul.f32 %v3904_v51, %v3932_v3  ;;  %v4453_v56 = vmul.f32 %v3904_v51, %v3936_v45 }
 0x465   : > { %v4425_v6 = vmul.f32 %v3904_v51, %v6063_v62  ;;  %v4445_v62 = vmul.f32 %v3904_v51, %v3928_v47  ;;  %v4457_v1 = vadd.f32 %v4421_v41, %v3940_v38  ;;  %v4465_v47 = vadd.f32 %v4421_v41, %v3948_v15 }
 0x466   : > { %6062 = vst [vmem:[#allocation61_spill] sm:$0xff] %v4416_v33  ;;  %v4441_v33 = vmul.f32 %v3904_v51, %v3924_v5  ;;  %v4461_v5 = vadd.f32 %v4421_v41, %v3944_v24  ;;  %v4469_v3 = vadd.f32 %v4421_v41, %v3952_v11  ;;  %v4473_v51 = vadd.f32 %v4421_v41, %v3956_v32 }
 0x467   : > { %v4477_v45 = vadd.f32 %v4421_v41, %v3960_v63  ;;  %v4481_v38 = vadd.f32 %v4421_v41, %v3964_v50  ;;  %v4485_v24 = vadd.f32 %v4421_v41, %v3968_v59  ;;  %v4489_v15 = vadd.f32 %v4421_v41, %v3972_v42 }
 0x468   : > { %v4493_v11 = vadd.f32 %v4421_v41, %v3976_v29  ;;  %v4497_v32 = vadd.f32 %v4421_v41, %v3980_v36  ;;  %v4501_v63 = vadd.f32 %v4421_v41, %v3984_v60  ;;  %v4505_v50 = vadd.f32 %v4421_v41, %v3988_v9 }
 0x469   : > { %v4509_v59 = vadd.f32 %v4421_v41, %v3992_v54  ;;  %v4513_v42 = vadd.f32 %v4421_v41, %v3996_v18  ;;  %v4517_v29 = vadd.f32 %v4421_v41, %v4000_v0  ;;  %v4521_v36 = vadd.f32 %v4421_v41, %v4004_v2 }
 0x46a   : > { %v4525_v60 = vadd.f32 %v4421_v41, %v4008_v23  ;;  %v4529_v9 = vadd.f32 %v4421_v41, %v4012_v10  ;;  %v4533_v54 = vadd.f32 %v4421_v41, %v4016_v13  ;;  %v4537_v18 = vadd.f32 %v4421_v41, %v4020_v16 }
 0x46b   : > { %v4541_v0 = vadd.f32 %v4421_v41, %v4024_v19  ;;  %v4545_v2 = vadd.f32 %v4421_v41, %v4028_v22  ;;  %v4549_v23 = vadd.f32 %v4421_v41, %v4032_v25  ;;  %v4553_v10 = vadd.f32 %v4421_v41, %v4036_v28 }
 0x46c   : > { %v4557_v13 = vadd.f32 %v4421_v41, %v4040_v31  ;;  %v4561_v16 = vadd.f32 %v4421_v41, %v4044_v34  ;;  %v4565_v19 = vadd.f32 %v4421_v41, %v4048_v37  ;;  %v4569_v22 = vadd.f32 %v4421_v41, %v4052_v40 }
 0x46d   : > { %v4573_v25 = vadd.f32 %v4421_v41, %v4056_v43  ;;  %v4577_v28 = vadd.f32 %v4421_v41, %v4060_v46  ;;  %v4581_v31 = vadd.f32 %v4421_v41, %v4064_v49  ;;  %v4585_v34 = vadd.f32 %v4421_v41, %v4068_v52 }
 0x46e   : > { %v4589_v37 = vadd.f32 %v4421_v41, %v4072_v55  ;;  %v4593_v40 = vadd.f32 %v4421_v41, %v4076_v58  ;;  %v4597_v43 = vadd.f32 %v4421_v41, %v4080_v61  ;;  %v4601_v46 = vadd.f32 %v4421_v41, %v4084_v4 }
 0x46f   : > { %v4605_v49 = vadd.f32 %v4421_v41, %v4088_v8  ;;  %v4609_v52 = vadd.f32 %v4421_v41, %v4092_v12  ;;  %v4613_v55 = vadd.f32 %v4421_v41, %v4096_v17  ;;  %v4617_v58 = vadd.f32 %v4421_v41, %v4100_v21  ;;  %v6069_v17 = vld [vmem:[#allocation73_spill] sm:$0xff] }
 0x470   : > { %v4621_v61 = vadd.f32 %v4421_v41, %v4104_v26  ;;  %v4625_v4 = vadd.f32 %v4421_v41, %v4108_v30  ;;  %v4629_v8 = vadd.f32 %v4421_v41, %v4112_v35  ;;  %v4633_v12 = vadd.f32 %v4421_v41, %v4116_v39 }
 0x471   : > { %6064 = vst [vmem:[#allocation62_spill] sm:$0xff] %v4617_v58  ;;  %v4637_v21 = vadd.f32 %v4421_v41, %v6069_v17  ;;  %v6071_v58 = vld [vmem:[#allocation74_spill] sm:$0xff] }
 0x472   : > { %6065 = vst [vmem:[#allocation63_spill] sm:$0xff] %v4621_v61  ;;  %6066 = vst [vmem:[#allocation64_spill] sm:$0xff] %v4625_v4  ;;  %v4641_v26 = vadd.f32 %v4421_v41, %v6071_v58  ;;  %v6073_v61 = vld [vmem:[#allocation75_spill] sm:$0xff]  ;;  %v6075_v4 = vld [vmem:[#allocation76_spill] sm:$0xff] }
 0x473   : > { %6067 = vst [vmem:[#allocation65_spill] sm:$0xff] %v4629_v8  ;;  %6068 = vst [vmem:[#allocation66_spill] sm:$0xff] %v4633_v12  ;;  %v4645_v30 = vadd.f32 %v4421_v41, %v6073_v61  ;;  %v4649_v35 = vadd.f32 %v4421_v41, %v6075_v4  ;;  %v6077_v8 = vld [vmem:[#allocation77_spill] sm:$0xff]  ;;  %v6079_v12 = vld [vmem:[#allocation78_spill] sm:$0xff] }
 0x474   : > { %6070 = vst [vmem:[#allocation67_spill] sm:$0xff] %v4637_v21  ;;  %6072 = vst [vmem:[#allocation68_spill] sm:$0xff] %v4641_v26  ;;  %v4653_v39 = vadd.f32 %v4421_v41, %v6077_v8  ;;  %v4657_v17 = vadd.f32 %v4421_v41, %v6079_v12  ;;  %v6081_v21 = vld [vmem:[#allocation79_spill] sm:$0xff]  ;;  %v6083_v26 = vld [vmem:[#allocation80_spill] sm:$0xff] }
 0x475   : > { %6074 = vst [vmem:[#allocation69_spill] sm:$0xff] %v4645_v30  ;;  %6076 = vst [vmem:[#allocation70_spill] sm:$0xff] %v4649_v35  ;;  %v4661_v58 = vadd.f32 %v4421_v41, %v6081_v21  ;;  %v4665_v61 = vadd.f32 %v4421_v41, %v6083_v26  ;;  %v6085_v30 = vld [vmem:[#allocation81_spill] sm:$0xff]  ;;  %v6087_v35 = vld [vmem:[#allocation82_spill] sm:$0xff] }
 0x476   : > { %6078 = vst [vmem:[#allocation71_spill] sm:$0xff] %v4653_v39  ;;  %6080 = vst [vmem:[#allocation72_spill] sm:$0xff] %v4657_v17  ;;  %v4669_v4 = vadd.f32 %v4421_v41, %v6085_v30  ;;  %v4673_v8 = vadd.f32 %v4421_v41, %v6087_v35  ;;  %v6089_v39 = vld [vmem:[#allocation83_spill] sm:$0xff]  ;;  %v6091_v17 = vld [vmem:[#allocation2_spill] sm:$0xff] }
 0x477   : > { %6082 = vst [vmem:[#allocation73_spill] sm:$0xff] %v4661_v58  ;;  %6084 = vst [vmem:[#allocation74_spill] sm:$0xff] %v4665_v61  ;;  %v4677_v12 = vadd.f32 %v4421_v41, %v6089_v39  ;;  %v4681_v21 = vadd.f32 %v4421_v41, %v6091_v17  ;;  %v6093_v58 = vld [vmem:[#allocation3_spill] sm:$0xff]  ;;  %v6095_v61 = vld [vmem:[#allocation4_spill] sm:$0xff] }
 0x478   : > { %6086 = vst [vmem:[#allocation75_spill] sm:$0xff] %v4669_v4  ;;  %6088 = vst [vmem:[#allocation76_spill] sm:$0xff] %v4673_v8  ;;  %v4685_v26 = vadd.f32 %v4421_v41, %v6093_v58  ;;  %v4689_v30 = vadd.f32 %v4421_v41, %v6095_v61  ;;  %v6097_v4 = vld [vmem:[#allocation5_spill] sm:$0xff]  ;;  %v6099_v8 = vld [vmem:[#allocation6_spill] sm:$0xff] }
 0x479   : > { %6090 = vst [vmem:[#allocation77_spill] sm:$0xff] %v4677_v12  ;;  %6092 = vst [vmem:[#allocation78_spill] sm:$0xff] %v4681_v21  ;;  %v4693_v35 = vadd.f32 %v4421_v41, %v6097_v4  ;;  %v4697_v39 = vadd.f32 %v4421_v41, %v6099_v8  ;;  %v6101_v12 = vld [vmem:[#allocation7_spill] sm:$0xff]  ;;  %v6103_v21 = vld [vmem:[#allocation8_spill] sm:$0xff] }
 0x47a   : > { %6094 = vst [vmem:[#allocation79_spill] sm:$0xff] %v4685_v26  ;;  %6096 = vst [vmem:[#allocation80_spill] sm:$0xff] %v4689_v30  ;;  %v4701_v17 = vadd.f32 %v4421_v41, %v6101_v12  ;;  %v4705_v58 = vadd.f32 %v4421_v41, %v6103_v21  ;;  %v6105_v26 = vld [vmem:[#allocation9_spill] sm:$0xff]  ;;  %v6107_v30 = vld [vmem:[#allocation10_spill] sm:$0xff] }
 0x47b   : > { %6098 = vst [vmem:[#allocation81_spill] sm:$0xff] %v4693_v35  ;;  %6100 = vst [vmem:[#allocation82_spill] sm:$0xff] %v4697_v39  ;;  %v4709_v61 = vadd.f32 %v4421_v41, %v6105_v26  ;;  %v4713_v4 = vadd.f32 %v4421_v41, %v6107_v30  ;;  %v6109_v35 = vld [vmem:[#allocation11_spill] sm:$0xff]  ;;  %v6111_v39 = vld [vmem:[#allocation12_spill] sm:$0xff] }
 0x47c   : > { %6102 = vst [vmem:[#allocation83_spill] sm:$0xff] %v4701_v17  ;;  %6104 = vst [vmem:[#allocation2_spill] sm:$0xff] %v4705_v58  ;;  %v4717_v8 = vadd.f32 %v4421_v41, %v6109_v35  ;;  %v4721_v12 = vadd.f32 %v4421_v41, %v6111_v39  ;;  %v6113_v17 = vld [vmem:[#allocation13_spill] sm:$0xff]  ;;  %v6115_v58 = vld [vmem:[#allocation14_spill] sm:$0xff] }
 0x47d   : > { %6106 = vst [vmem:[#allocation3_spill] sm:$0xff] %v4709_v61  ;;  %6108 = vst [vmem:[#allocation4_spill] sm:$0xff] %v4713_v4  ;;  %v4725_v21 = vadd.f32 %v4421_v41, %v6113_v17  ;;  %v4729_v26 = vadd.f32 %v4421_v41, %v6115_v58  ;;  %v6117_v61 = vld [vmem:[#allocation15_spill] sm:$0xff]  ;;  %v6119_v4 = vld [vmem:[#allocation16_spill] sm:$0xff] }
 0x47e   : > { %6110 = vst [vmem:[#allocation5_spill] sm:$0xff] %v4717_v8  ;;  %6112 = vst [vmem:[#allocation6_spill] sm:$0xff] %v4721_v12  ;;  %v4733_v30 = vadd.f32 %v4421_v41, %v6117_v61  ;;  %v4737_v35 = vadd.f32 %v4421_v41, %v6119_v4  ;;  %v6121_v8 = vld [vmem:[#allocation17_spill] sm:$0xff]  ;;  %v6123_v12 = vld [vmem:[#allocation18_spill] sm:$0xff] }
 0x47f   : > { %6114 = vst [vmem:[#allocation7_spill] sm:$0xff] %v4725_v21  ;;  %6116 = vst [vmem:[#allocation8_spill] sm:$0xff] %v4729_v26  ;;  %v4741_v39 = vadd.f32 %v4421_v41, %v6121_v8  ;;  %v4745_v17 = vadd.f32 %v4421_v41, %v6123_v12  ;;  %v6125_v21 = vld [vmem:[#allocation19_spill] sm:$0xff]  ;;  %v6127_v26 = vld [vmem:[#allocation20_spill] sm:$0xff] }
 0x480   : > { %6118 = vst [vmem:[#allocation9_spill] sm:$0xff] %v4733_v30  ;;  %6120 = vst [vmem:[#allocation10_spill] sm:$0xff] %v4737_v35  ;;  %v4749_v58 = vadd.f32 %v4421_v41, %v6125_v21  ;;  %v4753_v61 = vadd.f32 %v4421_v41, %v6127_v26  ;;  %v6129_v30 = vld [vmem:[#allocation21_spill] sm:$0xff]  ;;  %v6131_v35 = vld [vmem:[#allocation22_spill] sm:$0xff] }
 0x481   : > { %6122 = vst [vmem:[#allocation11_spill] sm:$0xff] %v4741_v39  ;;  %6124 = vst [vmem:[#allocation12_spill] sm:$0xff] %v4745_v17  ;;  %v4757_v4 = vadd.f32 %v4421_v41, %v6129_v30  ;;  %v4761_v8 = vadd.f32 %v4421_v41, %v6131_v35  ;;  %v6133_v39 = vld [vmem:[#allocation23_spill] sm:$0xff]  ;;  %v6135_v17 = vld [vmem:[#allocation24_spill] sm:$0xff] }
 0x482   : > { %6126 = vst [vmem:[#allocation13_spill] sm:$0xff] %v4749_v58  ;;  %6128 = vst [vmem:[#allocation14_spill] sm:$0xff] %v4753_v61  ;;  %v4765_v12 = vadd.f32 %v4421_v41, %v6133_v39  ;;  %v4769_v21 = vadd.f32 %v4421_v41, %v6135_v17  ;;  %v6137_v58 = vld [vmem:[#allocation25_spill] sm:$0xff]  ;;  %v6139_v61 = vld [vmem:[#allocation26_spill] sm:$0xff] }
 0x483   : > { %6130 = vst [vmem:[#allocation15_spill] sm:$0xff] %v4757_v4  ;;  %6132 = vst [vmem:[#allocation16_spill] sm:$0xff] %v4761_v8  ;;  %v4773_v26 = vadd.f32 %v4421_v41, %v6137_v58  ;;  %v4777_v30 = vadd.f32 %v4421_v41, %v6139_v61  ;;  %v6141_v4 = vld [vmem:[#allocation27_spill] sm:$0xff]  ;;  %v6143_v8 = vld [vmem:[#allocation28_spill] sm:$0xff] }
 0x484   : > { %6134 = vst [vmem:[#allocation17_spill] sm:$0xff] %v4765_v12  ;;  %6136 = vst [vmem:[#allocation18_spill] sm:$0xff] %v4769_v21  ;;  %v4781_v35 = vadd.f32 %v4421_v41, %v6141_v4  ;;  %v4785_v39 = vadd.f32 %v4421_v41, %v6143_v8  ;;  %v6145_v12 = vld [vmem:[#allocation29_spill] sm:$0xff]  ;;  %v6147_v21 = vld [vmem:[#allocation30_spill] sm:$0xff] }
 0x485   : > { %6138 = vst [vmem:[#allocation19_spill] sm:$0xff] %v4773_v26  ;;  %6140 = vst [vmem:[#allocation20_spill] sm:$0xff] %v4777_v30  ;;  %v4789_v17 = vadd.f32 %v4421_v41, %v6145_v12  ;;  %v4793_v58 = vadd.f32 %v4421_v41, %v6147_v21  ;;  %v6149_v26 = vld [vmem:[#allocation31_spill] sm:$0xff]  ;;  %v6151_v30 = vld [vmem:[#allocation32_spill] sm:$0xff] }
 0x486   : > { %6142 = vst [vmem:[#allocation21_spill] sm:$0xff] %v4781_v35  ;;  %6144 = vst [vmem:[#allocation22_spill] sm:$0xff] %v4785_v39  ;;  %v4797_v61 = vadd.f32 %v4421_v41, %v6149_v26  ;;  %v4801_v4 = vadd.f32 %v4421_v41, %v6151_v30  ;;  %v6153_v35 = vld [vmem:[#allocation33_spill] sm:$0xff]  ;;  %v6155_v39 = vld [vmem:[#allocation34_spill] sm:$0xff] }
 0x487   : > { %6146 = vst [vmem:[#allocation23_spill] sm:$0xff] %v4789_v17  ;;  %6148 = vst [vmem:[#allocation24_spill] sm:$0xff] %v4793_v58  ;;  %v4805_v8 = vadd.f32 %v4421_v41, %v6153_v35  ;;  %v4809_v12 = vadd.f32 %v4421_v41, %v6155_v39  ;;  %v6157_v17 = vld [vmem:[#allocation35_spill] sm:$0xff]  ;;  %v6159_v58 = vld [vmem:[#allocation36_spill] sm:$0xff] }
 0x488   : > { %6150 = vst [vmem:[#allocation25_spill] sm:$0xff] %v4797_v61  ;;  %6152 = vst [vmem:[#allocation26_spill] sm:$0xff] %v4801_v4  ;;  %v4813_v21 = vadd.f32 %v4421_v41, %v6157_v17  ;;  %v4817_v26 = vadd.f32 %v4421_v41, %v6159_v58  ;;  %v6161_v61 = vld [vmem:[#allocation37_spill] sm:$0xff]  ;;  %v6163_v4 = vld [vmem:[#allocation38_spill] sm:$0xff] }
 0x489   : > { %6154 = vst [vmem:[#allocation27_spill] sm:$0xff] %v4805_v8  ;;  %6156 = vst [vmem:[#allocation28_spill] sm:$0xff] %v4809_v12  ;;  %v4821_v30 = vadd.f32 %v4421_v41, %v6161_v61  ;;  %v4825_v35 = vadd.f32 %v4421_v41, %v6163_v4  ;;  %v6165_v8 = vld [vmem:[#allocation39_spill] sm:$0xff]  ;;  %v6167_v12 = vld [vmem:[#allocation40_spill] sm:$0xff] }
 0x48a   : > { %6158 = vst [vmem:[#allocation29_spill] sm:$0xff] %v4813_v21  ;;  %6160 = vst [vmem:[#allocation30_spill] sm:$0xff] %v4817_v26  ;;  %v4829_v39 = vadd.f32 %v4421_v41, %v6165_v8  ;;  %v4833_v17 = vadd.f32 %v4421_v41, %v6167_v12  ;;  %v6169_v21 = vld [vmem:[#allocation41_spill] sm:$0xff]  ;;  %v6171_v26 = vld [vmem:[#allocation42_spill] sm:$0xff] }
 0x48b   : > { %6162 = vst [vmem:[#allocation31_spill] sm:$0xff] %v4821_v30  ;;  %6164 = vst [vmem:[#allocation32_spill] sm:$0xff] %v4825_v35  ;;  %v4837_v58 = vadd.f32 %v4421_v41, %v6169_v21  ;;  %v4841_v61 = vadd.f32 %v4421_v41, %v6171_v26  ;;  %v6173_v30 = vld [vmem:[#allocation43_spill] sm:$0xff]  ;;  %v6175_v35 = vld [vmem:[#allocation44_spill] sm:$0xff] }
 0x48c   : > { %6166 = vst [vmem:[#allocation33_spill] sm:$0xff] %v4829_v39  ;;  %6168 = vst [vmem:[#allocation34_spill] sm:$0xff] %v4833_v17  ;;  %v4845_v4 = vadd.f32 %v4421_v41, %v6173_v30  ;;  %v4849_v8 = vadd.f32 %v4421_v41, %v6175_v35  ;;  %v6177_v39 = vld [vmem:[#allocation45_spill] sm:$0xff]  ;;  %v6179_v17 = vld [vmem:[#allocation46_spill] sm:$0xff] }
 0x48d   : > { %6170 = vst [vmem:[#allocation35_spill] sm:$0xff] %v4837_v58  ;;  %6172 = vst [vmem:[#allocation36_spill] sm:$0xff] %v4841_v61  ;;  %v4853_v12 = vadd.f32 %v4421_v41, %v6177_v39  ;;  %v4857_v21 = vadd.f32 %v4421_v41, %v6179_v17  ;;  %v6181_v58 = vld [vmem:[#allocation47_spill] sm:$0xff]  ;;  %v6183_v61 = vld [vmem:[#allocation48_spill] sm:$0xff] }
 0x48e   : > { %6174 = vst [vmem:[#allocation37_spill] sm:$0xff] %v4845_v4  ;;  %6176 = vst [vmem:[#allocation38_spill] sm:$0xff] %v4849_v8  ;;  %v4861_v26 = vadd.f32 %v4421_v41, %v6181_v58  ;;  %v4865_v30 = vadd.f32 %v4421_v41, %v6183_v61  ;;  %v6185_v4 = vld [vmem:[#allocation49_spill] sm:$0xff]  ;;  %v6187_v8 = vld [vmem:[#allocation50_spill] sm:$0xff] }
 0x48f   : > { %6178 = vst [vmem:[#allocation39_spill] sm:$0xff] %v4853_v12  ;;  %6180 = vst [vmem:[#allocation40_spill] sm:$0xff] %v4857_v21  ;;  %v4869_v35 = vadd.f32 %v4421_v41, %v6185_v4  ;;  %v4873_v39 = vadd.f32 %v4421_v41, %v6187_v8  ;;  %v6189_v12 = vld [vmem:[#allocation51_spill] sm:$0xff]  ;;  %v6191_v21 = vld [vmem:[#allocation52_spill] sm:$0xff] }
 0x490   : > { %6182 = vst [vmem:[#allocation41_spill] sm:$0xff] %v4861_v26  ;;  %6184 = vst [vmem:[#allocation42_spill] sm:$0xff] %v4865_v30  ;;  %v4877_v17 = vadd.f32 %v4421_v41, %v6189_v12  ;;  %v4881_v58 = vadd.f32 %v4421_v41, %v6191_v21  ;;  %v6193_v26 = vld [vmem:[#allocation53_spill] sm:$0xff]  ;;  %v6195_v30 = vld [vmem:[#allocation54_spill] sm:$0xff] }
 0x491   : > { %6186 = vst [vmem:[#allocation43_spill] sm:$0xff] %v4869_v35  ;;  %6188 = vst [vmem:[#allocation44_spill] sm:$0xff] %v4873_v39  ;;  %v4885_v61 = vadd.f32 %v4421_v41, %v6193_v26  ;;  %v4889_v4 = vadd.f32 %v4421_v41, %v6195_v30  ;;  %v6196_v35 = vld [vmem:[#allocation55_spill] sm:$0xff]  ;;  %v6198_v39 = vld [vmem:[#allocation56_spill] sm:$0xff] }
 0x492   : > { %6190 = vst [vmem:[#allocation45_spill] sm:$0xff] %v4877_v17  ;;  %6192 = vst [vmem:[#allocation46_spill] sm:$0xff] %v4881_v58  ;;  %v4893_v8 = vadd.f32 %v4421_v41, %v6196_v35  ;;  %v4897_v12 = vadd.f32 %v4421_v41, %v6198_v39  ;;  %v6199_v17 = vld [vmem:[#allocation57_spill] sm:$0xff]  ;;  %v6200_v58 = vld [vmem:[#allocation58_spill] sm:$0xff]  ;;  %v4913_v35 = vadd.f32 %v4421_v41, %v4396_v57 }
 0x493   : > { %6194 = vst [vmem:[#allocation47_spill] sm:$0xff] %v4885_v61  ;;  %v4901_v21 = vadd.f32 %v4421_v41, %v6199_v17  ;;  %v4905_v26 = vadd.f32 %v4421_v41, %v6200_v58  ;;  %v6201_v61 = vld [vmem:[#allocation59_spill] sm:$0xff]  ;;  %v4921_v17 = vadd.f32 %v4421_v41, %v4404_v14  ;;  %v4925_v58 = vadd.f32 %v4421_v41, %v4408_v20 }
 0x494   : > { %6197 = vst [vmem:[#allocation48_spill] sm:$0xff] %v4893_v8  ;;  %v4909_v30 = vadd.f32 %v4421_v41, %v6201_v61  ;;  %v6203_v8 = vld [vmem:[#allocation60_spill] sm:$0xff]  ;;  %v4929_v61 = vadd.f32 %v4421_v41, %v4412_v27  ;;  %v4941_v14 = vadd.f32 %v4421_v41, %v4429_v44  ;;  %v4945_v20 = vadd.f32 %v4421_v41, %v4433_v48 }
 0x495   : > { %v4917_v39 = vadd.f32 %v4421_v41, %v6203_v8  ;;  %v4937_v8 = vadd.f32 %v4421_v41, %v4425_v6  ;;  %v4949_v27 = vadd.f32 %v4421_v41, %v4437_v53  ;;  %v4960_v6 = vadd.f32 %v4421_v41, %v4441_v33 }
 0x496   : > { %6202 = vst [vmem:[#allocation49_spill] sm:$0xff] %v4909_v30  ;;  %v6204_v30 = vld [vmem:[#allocation61_spill] sm:$0xff]  ;;  %v4964_v44 = vadd.f32 %v4421_v41, %v4445_v62  ;;  %v4968_v48 = vadd.f32 %v4421_v41, %v4449_v7  ;;  %v4972_v53 = vadd.f32 %v4421_v41, %v4453_v56  ;;  %v1502_v33 = vmax.f32 %v4461_v5, 0.0 }
 0x497   : > { %v4933_v57 = vadd.f32 %v4421_v41, %v6204_v30  ;;  %6205 = vst [vmem:[#allocation50_spill] sm:$0xff] %v4960_v6  ;;  %v1501_v30 = vmax.f32 %v4457_v1, 0.0  ;;  %v1503_v6 = vmax.f32 %v4465_v47, 0.0  ;;  %v1504_v62 = vmax.f32 %v4469_v3, 0.0 }
 0x498   : > { %6206 = vst [vmem:[#allocation51_spill] sm:$0xff] %v4964_v44  ;;  %6207 = vst [vmem:[#allocation52_spill] sm:$0xff] %v4968_v48  ;;  %v1505_v44 = vmax.f32 %v4473_v51, 0.0  ;;  %v1506_v7 = vmax.f32 %v4477_v45, 0.0  ;;  %v1507_v48 = vmax.f32 %v4481_v38, 0.0  ;;  %v1508_v41 = vmax.f32 %v4485_v24, 0.0 }
 0x499   : > { %v1509_v56 = vmax.f32 %v4489_v15, 0.0  ;;  %v1510_v1 = vmax.f32 %v4493_v11, 0.0  ;;  %v1511_v5 = vmax.f32 %v4497_v32, 0.0  ;;  %v1512_v47 = vmax.f32 %v4501_v63, 0.0  ;;  %1629 = vst.msk [vmem:[%s4956_s30] sm:$0xff] %vm299_vm0, %v1501_v30  ;;  %1630 = vst.msk [vmem:[%s4956_s30 + $0x8] sm:$0xff] %vm299_vm0, %v1502_v33 }
 0x49a   : > { %1631 = vst.msk [vmem:[%s4956_s30 + $0x10] sm:$0xff] %vm299_vm0, %v1503_v6  ;;  %1632 = vst.msk [vmem:[%s4956_s30 + $0x18] sm:$0xff] %vm299_vm0, %v1504_v62  ;;  %v1513_v3 = vmax.f32 %v4505_v50, 0.0  ;;  %v1514_v51 = vmax.f32 %v4509_v59, 0.0  ;;  %v1515_v45 = vmax.f32 %v4513_v42, 0.0  ;;  %v1516_v38 = vmax.f32 %v4517_v29, 0.0 }
 0x49b   : > { %1633 = vst.msk [vmem:[%s4956_s30 + $0x20] sm:$0xff] %vm299_vm0, %v1505_v44  ;;  %1634 = vst.msk [vmem:[%s4956_s30 + $0x28] sm:$0xff] %vm299_vm0, %v1506_v7  ;;  %v1517_v24 = vmax.f32 %v4521_v36, 0.0  ;;  %v1518_v15 = vmax.f32 %v4525_v60, 0.0  ;;  %v1519_v11 = vmax.f32 %v4529_v9, 0.0  ;;  %v1520_v32 = vmax.f32 %v4533_v54, 0.0 }
 0x49c   : > { %1635 = vst.msk [vmem:[%s4956_s30 + $0x30] sm:$0xff] %vm299_vm0, %v1507_v48  ;;  %1636 = vst.msk [vmem:[%s4956_s30 + $0x38] sm:$0xff] %vm299_vm0, %v1508_v41  ;;  %v1521_v63 = vmax.f32 %v4537_v18, 0.0  ;;  %v1522_v50 = vmax.f32 %v4541_v0, 0.0  ;;  %v1523_v59 = vmax.f32 %v4545_v2, 0.0  ;;  %v1524_v42 = vmax.f32 %v4549_v23, 0.0 }
 0x49d   : > { %1637 = vst.msk [vmem:[%s4956_s30 + $0x40] sm:$0xff] %vm299_vm0, %v1509_v56  ;;  %1638 = vst.msk [vmem:[%s4956_s30 + $0x48] sm:$0xff] %vm299_vm0, %v1510_v1  ;;  %v1525_v29 = vmax.f32 %v4553_v10, 0.0  ;;  %v1526_v36 = vmax.f32 %v4557_v13, 0.0  ;;  %v1527_v60 = vmax.f32 %v4561_v16, 0.0  ;;  %v1528_v9 = vmax.f32 %v4565_v19, 0.0 }
 0x49e   : > { %1639 = vst.msk [vmem:[%s4956_s30 + $0x50] sm:$0xff] %vm299_vm0, %v1511_v5  ;;  %1640 = vst.msk [vmem:[%s4956_s30 + $0x58] sm:$0xff] %vm299_vm0, %v1512_v47  ;;  %v1529_v54 = vmax.f32 %v4569_v22, 0.0  ;;  %v1530_v18 = vmax.f32 %v4573_v25, 0.0  ;;  %v1531_v0 = vmax.f32 %v4577_v28, 0.0  ;;  %v1532_v2 = vmax.f32 %v4581_v31, 0.0 }
 0x49f   : > { %1641 = vst.msk [vmem:[%s4956_s30 + $0x60] sm:$0xff] %vm299_vm0, %v1513_v3  ;;  %1642 = vst.msk [vmem:[%s4956_s30 + $0x68] sm:$0xff] %vm299_vm0, %v1514_v51  ;;  %v1533_v23 = vmax.f32 %v4585_v34, 0.0  ;;  %v1534_v10 = vmax.f32 %v4589_v37, 0.0  ;;  %v1535_v13 = vmax.f32 %v4593_v40, 0.0  ;;  %v1536_v16 = vmax.f32 %v4597_v43, 0.0 }
 0x4a0   : > { %1643 = vst.msk [vmem:[%s4956_s30 + $0x70] sm:$0xff] %vm299_vm0, %v1515_v45  ;;  %1644 = vst.msk [vmem:[%s4956_s30 + $0x78] sm:$0xff] %vm299_vm0, %v1516_v38  ;;  %v1537_v19 = vmax.f32 %v4601_v46, 0.0  ;;  %v1538_v22 = vmax.f32 %v4605_v49, 0.0  ;;  %v1539_v25 = vmax.f32 %v4609_v52, 0.0  ;;  %v1540_v28 = vmax.f32 %v4613_v55, 0.0 }
 0x4a1   : > { %1645 = vst.msk [vmem:[%s4956_s30 + $0x80] sm:$0xff] %vm299_vm0, %v1517_v24  ;;  %1646 = vst.msk [vmem:[%s4956_s30 + $0x88] sm:$0xff] %vm299_vm0, %v1518_v15  ;;  %v6208_v31 = vld [vmem:[#allocation62_spill] sm:$0xff]  ;;  %v6209_v37 = vld [vmem:[#allocation63_spill] sm:$0xff] }
 0x4a2   : > { %1647 = vst.msk [vmem:[%s4956_s30 + $0x90] sm:$0xff] %vm299_vm0, %v1519_v11  ;;  %1648 = vst.msk [vmem:[%s4956_s30 + $0x98] sm:$0xff] %vm299_vm0, %v1520_v32  ;;  %v1541_v34 = vmax.f32 %v6208_v31, 0.0  ;;  %v1542_v40 = vmax.f32 %v6209_v37, 0.0  ;;  %v6210_v43 = vld [vmem:[#allocation64_spill] sm:$0xff]  ;;  %v6211_v49 = vld [vmem:[#allocation65_spill] sm:$0xff] }
 0x4a3   : > { %1649 = vst.msk [vmem:[%s4956_s30 + $0xa0] sm:$0xff] %vm299_vm0, %v1521_v63  ;;  %1650 = vst.msk [vmem:[%s4956_s30 + $0xa8] sm:$0xff] %vm299_vm0, %v1522_v50  ;;  %v1543_v46 = vmax.f32 %v6210_v43, 0.0  ;;  %v1544_v52 = vmax.f32 %v6211_v49, 0.0  ;;  %v6212_v55 = vld [vmem:[#allocation66_spill] sm:$0xff]  ;;  %v6213_v44 = vld [vmem:[#allocation67_spill] sm:$0xff] }
 0x4a4   : > { %1651 = vst.msk [vmem:[%s4956_s30 + $0xb0] sm:$0xff] %vm299_vm0, %v1523_v59  ;;  %1652 = vst.msk [vmem:[%s4956_s30 + $0xb8] sm:$0xff] %vm299_vm0, %v1524_v42  ;;  %v1545_v6 = vmax.f32 %v6212_v55, 0.0  ;;  %v1546_v48 = vmax.f32 %v6213_v44, 0.0  ;;  %v6214_v30 = vld [vmem:[#allocation68_spill] sm:$0xff]  ;;  %v6215_v62 = vld [vmem:[#allocation69_spill] sm:$0xff] }
 0x4a5   : > { %1653 = vst.msk [vmem:[%s4956_s30 + $0xc0] sm:$0xff] %vm299_vm0, %v1525_v29  ;;  %1654 = vst.msk [vmem:[%s4956_s30 + $0xc8] sm:$0xff] %vm299_vm0, %v1526_v36  ;;  %v1547_v33 = vmax.f32 %v6214_v30, 0.0  ;;  %v1548_v7 = vmax.f32 %v6215_v62, 0.0  ;;  %v6216_v41 = vld [vmem:[#allocation70_spill] sm:$0xff]  ;;  %v6217_v1 = vld [vmem:[#allocation71_spill] sm:$0xff] }
 0x4a6   : > { %1655 = vst.msk [vmem:[%s4956_s30 + $0xd0] sm:$0xff] %vm299_vm0, %v1527_v60  ;;  %1656 = vst.msk [vmem:[%s4956_s30 + $0xd8] sm:$0xff] %vm299_vm0, %v1528_v9  ;;  %v1549_v56 = vmax.f32 %v6216_v41, 0.0  ;;  %v1550_v5 = vmax.f32 %v6217_v1, 0.0  ;;  %v6218_v47 = vld [vmem:[#allocation72_spill] sm:$0xff]  ;;  %v6219_v51 = vld [vmem:[#allocation73_spill] sm:$0xff] }
 0x4a7   : > { %1657 = vst.msk [vmem:[%s4956_s30 + $0xe0] sm:$0xff] %vm299_vm0, %v1529_v54  ;;  %1658 = vst.msk [vmem:[%s4956_s30 + $0xe8] sm:$0xff] %vm299_vm0, %v1530_v18  ;;  %v1551_v3 = vmax.f32 %v6218_v47, 0.0  ;;  %v1552_v45 = vmax.f32 %v6219_v51, 0.0  ;;  %v6220_v38 = vld [vmem:[#allocation74_spill] sm:$0xff]  ;;  %v6221_v15 = vld [vmem:[#allocation75_spill] sm:$0xff] }
 0x4a8   : > { %1659 = vst.msk [vmem:[%s4956_s30 + $0xf0] sm:$0xff] %vm299_vm0, %v1531_v0  ;;  %1660 = vst.msk [vmem:[%s4956_s30 + $0xf8] sm:$0xff] %vm299_vm0, %v1532_v2  ;;  %v1553_v24 = vmax.f32 %v6220_v38, 0.0  ;;  %v1554_v11 = vmax.f32 %v6221_v15, 0.0  ;;  %v6222_v32 = vld [vmem:[#allocation76_spill] sm:$0xff]  ;;  %v6223_v50 = vld [vmem:[#allocation77_spill] sm:$0xff] }
 0x4a9   : > { %1661 = vst.msk [vmem:[%s4956_s30 + $0x100] sm:$0xff] %vm299_vm0, %v1533_v23  ;;  %1662 = vst.msk [vmem:[%s4956_s30 + $0x108] sm:$0xff] %vm299_vm0, %v1534_v10  ;;  %v1555_v63 = vmax.f32 %v6222_v32, 0.0  ;;  %v1556_v59 = vmax.f32 %v6223_v50, 0.0  ;;  %v6224_v42 = vld [vmem:[#allocation78_spill] sm:$0xff]  ;;  %v6225_v36 = vld [vmem:[#allocation79_spill] sm:$0xff] }
 0x4aa   : > { %1663 = vst.msk [vmem:[%s4956_s30 + $0x110] sm:$0xff] %vm299_vm0, %v1535_v13  ;;  %1664 = vst.msk [vmem:[%s4956_s30 + $0x118] sm:$0xff] %vm299_vm0, %v1536_v16  ;;  %v1557_v29 = vmax.f32 %v6224_v42, 0.0  ;;  %v1558_v60 = vmax.f32 %v6225_v36, 0.0  ;;  %v6226_v9 = vld [vmem:[#allocation80_spill] sm:$0xff]  ;;  %v6227_v18 = vld [vmem:[#allocation81_spill] sm:$0xff] }
 0x4ab   : > { %1665 = vst.msk [vmem:[%s4956_s30 + $0x120] sm:$0xff] %vm299_vm0, %v1537_v19  ;;  %1666 = vst.msk [vmem:[%s4956_s30 + $0x128] sm:$0xff] %vm299_vm0, %v1538_v22  ;;  %v1559_v54 = vmax.f32 %v6226_v9, 0.0  ;;  %v1560_v0 = vmax.f32 %v6227_v18, 0.0  ;;  %v6228_v2 = vld [vmem:[#allocation82_spill] sm:$0xff]  ;;  %v6229_v10 = vld [vmem:[#allocation83_spill] sm:$0xff] }
 0x4ac   : > { %1667 = vst.msk [vmem:[%s4956_s30 + $0x130] sm:$0xff] %vm299_vm0, %v1539_v25  ;;  %1668 = vst.msk [vmem:[%s4956_s30 + $0x138] sm:$0xff] %vm299_vm0, %v1540_v28  ;;  %v1561_v23 = vmax.f32 %v6228_v2, 0.0  ;;  %v1562_v13 = vmax.f32 %v6229_v10, 0.0  ;;  %v6230_v16 = vld [vmem:[#allocation2_spill] sm:$0xff]  ;;  %v6231_v22 = vld [vmem:[#allocation3_spill] sm:$0xff] }
 0x4ad   : > { %1669 = vst.msk [vmem:[%s4956_s30 + $0x140] sm:$0xff] %vm299_vm0, %v1541_v34  ;;  %1670 = vst.msk [vmem:[%s4956_s30 + $0x148] sm:$0xff] %vm299_vm0, %v1542_v40  ;;  %v1563_v19 = vmax.f32 %v6230_v16, 0.0  ;;  %v1564_v25 = vmax.f32 %v6231_v22, 0.0  ;;  %v6232_v28 = vld [vmem:[#allocation4_spill] sm:$0xff]  ;;  %v6233_v34 = vld [vmem:[#allocation5_spill] sm:$0xff] }
 0x4ae   : > { %1671 = vst.msk [vmem:[%s4956_s30 + $0x150] sm:$0xff] %vm299_vm0, %v1543_v46  ;;  %1672 = vst.msk [vmem:[%s4956_s30 + $0x158] sm:$0xff] %vm299_vm0, %v1544_v52  ;;  %v1565_v31 = vmax.f32 %v6232_v28, 0.0  ;;  %v1566_v37 = vmax.f32 %v6233_v34, 0.0  ;;  %v6234_v40 = vld [vmem:[#allocation6_spill] sm:$0xff]  ;;  %v6235_v46 = vld [vmem:[#allocation7_spill] sm:$0xff] }
 0x4af   : > { %1673 = vst.msk [vmem:[%s4956_s30 + $0x160] sm:$0xff] %vm299_vm0, %v1545_v6  ;;  %1674 = vst.msk [vmem:[%s4956_s30 + $0x168] sm:$0xff] %vm299_vm0, %v1546_v48  ;;  %v1567_v43 = vmax.f32 %v6234_v40, 0.0  ;;  %v1568_v49 = vmax.f32 %v6235_v46, 0.0  ;;  %v6236_v52 = vld [vmem:[#allocation8_spill] sm:$0xff]  ;;  %v6237_v6 = vld [vmem:[#allocation9_spill] sm:$0xff] }
 0x4b0   : > { %1675 = vst.msk [vmem:[%s4956_s30 + $0x170] sm:$0xff] %vm299_vm0, %v1547_v33  ;;  %1676 = vst.msk [vmem:[%s4956_s30 + $0x178] sm:$0xff] %vm299_vm0, %v1548_v7  ;;  %v1569_v55 = vmax.f32 %v6236_v52, 0.0  ;;  %v1570_v44 = vmax.f32 %v6237_v6, 0.0  ;;  %v6238_v48 = vld [vmem:[#allocation10_spill] sm:$0xff]  ;;  %v6239_v33 = vld [vmem:[#allocation11_spill] sm:$0xff] }
 0x4b1   : > { %1677 = vst.msk [vmem:[%s4956_s30 + $0x180] sm:$0xff] %vm299_vm0, %v1549_v56  ;;  %1678 = vst.msk [vmem:[%s4956_s30 + $0x188] sm:$0xff] %vm299_vm0, %v1550_v5  ;;  %v1571_v30 = vmax.f32 %v6238_v48, 0.0  ;;  %v1572_v62 = vmax.f32 %v6239_v33, 0.0  ;;  %v6240_v7 = vld [vmem:[#allocation12_spill] sm:$0xff]  ;;  %v6241_v56 = vld [vmem:[#allocation13_spill] sm:$0xff] }
 0x4b2   : > { %1679 = vst.msk [vmem:[%s4956_s30 + $0x190] sm:$0xff] %vm299_vm0, %v1551_v3  ;;  %1680 = vst.msk [vmem:[%s4956_s30 + $0x198] sm:$0xff] %vm299_vm0, %v1552_v45  ;;  %v1573_v41 = vmax.f32 %v6240_v7, 0.0  ;;  %v1574_v1 = vmax.f32 %v6241_v56, 0.0  ;;  %v6242_v5 = vld [vmem:[#allocation14_spill] sm:$0xff]  ;;  %v6243_v3 = vld [vmem:[#allocation15_spill] sm:$0xff] }
 0x4b3   : > { %1681 = vst.msk [vmem:[%s4956_s30 + $0x1a0] sm:$0xff] %vm299_vm0, %v1553_v24  ;;  %1682 = vst.msk [vmem:[%s4956_s30 + $0x1a8] sm:$0xff] %vm299_vm0, %v1554_v11  ;;  %v1575_v47 = vmax.f32 %v6242_v5, 0.0  ;;  %v1576_v51 = vmax.f32 %v6243_v3, 0.0  ;;  %v6244_v45 = vld [vmem:[#allocation16_spill] sm:$0xff]  ;;  %v6245_v24 = vld [vmem:[#allocation17_spill] sm:$0xff] }
 0x4b4   : > { %1683 = vst.msk [vmem:[%s4956_s30 + $0x1b0] sm:$0xff] %vm299_vm0, %v1555_v63  ;;  %1684 = vst.msk [vmem:[%s4956_s30 + $0x1b8] sm:$0xff] %vm299_vm0, %v1556_v59  ;;  %v1577_v38 = vmax.f32 %v6244_v45, 0.0  ;;  %v1578_v15 = vmax.f32 %v6245_v24, 0.0  ;;  %v6246_v11 = vld [vmem:[#allocation18_spill] sm:$0xff]  ;;  %v6247_v63 = vld [vmem:[#allocation19_spill] sm:$0xff] }
 0x4b5   : > { %1685 = vst.msk [vmem:[%s4956_s30 + $0x1c0] sm:$0xff] %vm299_vm0, %v1557_v29  ;;  %1686 = vst.msk [vmem:[%s4956_s30 + $0x1c8] sm:$0xff] %vm299_vm0, %v1558_v60  ;;  %v1579_v32 = vmax.f32 %v6246_v11, 0.0  ;;  %v1580_v50 = vmax.f32 %v6247_v63, 0.0  ;;  %v6248_v59 = vld [vmem:[#allocation20_spill] sm:$0xff]  ;;  %v6249_v29 = vld [vmem:[#allocation21_spill] sm:$0xff] }
 0x4b6   : > { %1687 = vst.msk [vmem:[%s4956_s30 + $0x1d0] sm:$0xff] %vm299_vm0, %v1559_v54  ;;  %1688 = vst.msk [vmem:[%s4956_s30 + $0x1d8] sm:$0xff] %vm299_vm0, %v1560_v0  ;;  %v1581_v42 = vmax.f32 %v6248_v59, 0.0  ;;  %v1582_v36 = vmax.f32 %v6249_v29, 0.0  ;;  %v6250_v60 = vld [vmem:[#allocation22_spill] sm:$0xff]  ;;  %v6251_v54 = vld [vmem:[#allocation23_spill] sm:$0xff] }
 0x4b7   : > { %1689 = vst.msk [vmem:[%s4956_s30 + $0x1e0] sm:$0xff] %vm299_vm0, %v1561_v23  ;;  %1690 = vst.msk [vmem:[%s4956_s30 + $0x1e8] sm:$0xff] %vm299_vm0, %v1562_v13  ;;  %v1583_v9 = vmax.f32 %v6250_v60, 0.0  ;;  %v1584_v18 = vmax.f32 %v6251_v54, 0.0  ;;  %v6252_v0 = vld [vmem:[#allocation24_spill] sm:$0xff]  ;;  %v6253_v23 = vld [vmem:[#allocation25_spill] sm:$0xff] }
 0x4b8   : > { %1691 = vst.msk [vmem:[%s4956_s30 + $0x1f0] sm:$0xff] %vm299_vm0, %v1563_v19  ;;  %1692 = vst.msk [vmem:[%s4956_s30 + $0x1f8] sm:$0xff] %vm299_vm0, %v1564_v25  ;;  %v1585_v2 = vmax.f32 %v6252_v0, 0.0  ;;  %v1586_v10 = vmax.f32 %v6253_v23, 0.0  ;;  %v6254_v13 = vld [vmem:[#allocation26_spill] sm:$0xff]  ;;  %v6255_v19 = vld [vmem:[#allocation27_spill] sm:$0xff] }
 0x4b9   : > { %1693 = vst.msk [vmem:[%s4956_s30 + $0x200] sm:$0xff] %vm299_vm0, %v1565_v31  ;;  %1694 = vst.msk [vmem:[%s4956_s30 + $0x208] sm:$0xff] %vm299_vm0, %v1566_v37  ;;  %v1587_v16 = vmax.f32 %v6254_v13, 0.0  ;;  %v1588_v22 = vmax.f32 %v6255_v19, 0.0  ;;  %v6256_v25 = vld [vmem:[#allocation28_spill] sm:$0xff]  ;;  %v6257_v31 = vld [vmem:[#allocation29_spill] sm:$0xff] }
 0x4ba   : > { %1695 = vst.msk [vmem:[%s4956_s30 + $0x210] sm:$0xff] %vm299_vm0, %v1567_v43  ;;  %1696 = vst.msk [vmem:[%s4956_s30 + $0x218] sm:$0xff] %vm299_vm0, %v1568_v49  ;;  %v1589_v28 = vmax.f32 %v6256_v25, 0.0  ;;  %v1590_v34 = vmax.f32 %v6257_v31, 0.0  ;;  %v6258_v37 = vld [vmem:[#allocation30_spill] sm:$0xff]  ;;  %v6259_v43 = vld [vmem:[#allocation31_spill] sm:$0xff] }
 0x4bb   : > { %1697 = vst.msk [vmem:[%s4956_s30 + $0x220] sm:$0xff] %vm299_vm0, %v1569_v55  ;;  %1698 = vst.msk [vmem:[%s4956_s30 + $0x228] sm:$0xff] %vm299_vm0, %v1570_v44  ;;  %v1591_v40 = vmax.f32 %v6258_v37, 0.0  ;;  %v1592_v46 = vmax.f32 %v6259_v43, 0.0  ;;  %v6260_v49 = vld [vmem:[#allocation32_spill] sm:$0xff]  ;;  %v6261_v55 = vld [vmem:[#allocation33_spill] sm:$0xff] }
 0x4bc   : > { %1699 = vst.msk [vmem:[%s4956_s30 + $0x230] sm:$0xff] %vm299_vm0, %v1571_v30  ;;  %1700 = vst.msk [vmem:[%s4956_s30 + $0x238] sm:$0xff] %vm299_vm0, %v1572_v62  ;;  %v1593_v52 = vmax.f32 %v6260_v49, 0.0  ;;  %v1594_v6 = vmax.f32 %v6261_v55, 0.0  ;;  %v6262_v44 = vld [vmem:[#allocation34_spill] sm:$0xff]  ;;  %v6263_v30 = vld [vmem:[#allocation35_spill] sm:$0xff] }
 0x4bd   : > { %1701 = vst.msk [vmem:[%s4956_s30 + $0x240] sm:$0xff] %vm299_vm0, %v1573_v41  ;;  %1702 = vst.msk [vmem:[%s4956_s30 + $0x248] sm:$0xff] %vm299_vm0, %v1574_v1  ;;  %v1595_v48 = vmax.f32 %v6262_v44, 0.0  ;;  %v1596_v33 = vmax.f32 %v6263_v30, 0.0  ;;  %v6264_v62 = vld [vmem:[#allocation36_spill] sm:$0xff]  ;;  %v6265_v41 = vld [vmem:[#allocation37_spill] sm:$0xff] }
 0x4be   : > { %1703 = vst.msk [vmem:[%s4956_s30 + $0x250] sm:$0xff] %vm299_vm0, %v1575_v47  ;;  %1704 = vst.msk [vmem:[%s4956_s30 + $0x258] sm:$0xff] %vm299_vm0, %v1576_v51  ;;  %v1597_v7 = vmax.f32 %v6264_v62, 0.0  ;;  %v1598_v56 = vmax.f32 %v6265_v41, 0.0  ;;  %v6266_v1 = vld [vmem:[#allocation38_spill] sm:$0xff]  ;;  %v6267_v47 = vld [vmem:[#allocation39_spill] sm:$0xff] }
 0x4bf   : > { %1705 = vst.msk [vmem:[%s4956_s30 + $0x260] sm:$0xff] %vm299_vm0, %v1577_v38  ;;  %1706 = vst.msk [vmem:[%s4956_s30 + $0x268] sm:$0xff] %vm299_vm0, %v1578_v15  ;;  %v1599_v5 = vmax.f32 %v6266_v1, 0.0  ;;  %v1600_v3 = vmax.f32 %v6267_v47, 0.0  ;;  %v6268_v51 = vld [vmem:[#allocation40_spill] sm:$0xff]  ;;  %v6269_v38 = vld [vmem:[#allocation41_spill] sm:$0xff] }
 0x4c0   : > { %1707 = vst.msk [vmem:[%s4956_s30 + $0x270] sm:$0xff] %vm299_vm0, %v1579_v32  ;;  %1708 = vst.msk [vmem:[%s4956_s30 + $0x278] sm:$0xff] %vm299_vm0, %v1580_v50  ;;  %v1601_v45 = vmax.f32 %v6268_v51, 0.0  ;;  %v1602_v24 = vmax.f32 %v6269_v38, 0.0  ;;  %v6270_v15 = vld [vmem:[#allocation42_spill] sm:$0xff]  ;;  %v6271_v32 = vld [vmem:[#allocation43_spill] sm:$0xff] }
 0x4c1   : > { %1709 = vst.msk [vmem:[%s4956_s30 + $0x280] sm:$0xff] %vm299_vm0, %v1581_v42  ;;  %1710 = vst.msk [vmem:[%s4956_s30 + $0x288] sm:$0xff] %vm299_vm0, %v1582_v36  ;;  %v1603_v11 = vmax.f32 %v6270_v15, 0.0  ;;  %v1604_v63 = vmax.f32 %v6271_v32, 0.0  ;;  %v6272_v50 = vld [vmem:[#allocation44_spill] sm:$0xff]  ;;  %v6273_v42 = vld [vmem:[#allocation45_spill] sm:$0xff] }
 0x4c2   : > { %1711 = vst.msk [vmem:[%s4956_s30 + $0x290] sm:$0xff] %vm299_vm0, %v1583_v9  ;;  %1712 = vst.msk [vmem:[%s4956_s30 + $0x298] sm:$0xff] %vm299_vm0, %v1584_v18  ;;  %v1605_v59 = vmax.f32 %v6272_v50, 0.0  ;;  %v1606_v29 = vmax.f32 %v6273_v42, 0.0  ;;  %v6274_v36 = vld [vmem:[#allocation46_spill] sm:$0xff]  ;;  %v6275_v9 = vld [vmem:[#allocation47_spill] sm:$0xff] }
 0x4c3   : > { %1713 = vst.msk [vmem:[%s4956_s30 + $0x2a0] sm:$0xff] %vm299_vm0, %v1585_v2  ;;  %1714 = vst.msk [vmem:[%s4956_s30 + $0x2a8] sm:$0xff] %vm299_vm0, %v1586_v10  ;;  %v1607_v60 = vmax.f32 %v6274_v36, 0.0  ;;  %v1608_v54 = vmax.f32 %v6275_v9, 0.0  ;;  %v1609_v18 = vmax.f32 %v4889_v4, 0.0  ;;  %v6276_v0 = vld [vmem:[#allocation48_spill] sm:$0xff] }
 0x4c4   : > { %1715 = vst.msk [vmem:[%s4956_s30 + $0x2b0] sm:$0xff] %vm299_vm0, %v1587_v16  ;;  %1716 = vst.msk [vmem:[%s4956_s30 + $0x2b8] sm:$0xff] %vm299_vm0, %v1588_v22  ;;  %v1610_v2 = vmax.f32 %v6276_v0, 0.0  ;;  %v1611_v23 = vmax.f32 %v4897_v12, 0.0  ;;  %v1612_v10 = vmax.f32 %v4901_v21, 0.0  ;;  %v1613_v4 = vmax.f32 %v4905_v26, 0.0 }
 0x4c5   : > { %1717 = vst.msk [vmem:[%s4956_s30 + $0x2c0] sm:$0xff] %vm299_vm0, %v1589_v28  ;;  %1718 = vst.msk [vmem:[%s4956_s30 + $0x2c8] sm:$0xff] %vm299_vm0, %v1590_v34  ;;  %v6277_v13 = vld [vmem:[#allocation49_spill] sm:$0xff]  ;;  %v1615_v12 = vmax.f32 %v4913_v35, 0.0  ;;  %v1616_v21 = vmax.f32 %v4917_v39, 0.0  ;;  %v1617_v26 = vmax.f32 %v4921_v17, 0.0 }
 0x4c6   : > { %1719 = vst.msk [vmem:[%s4956_s30 + $0x2d0] sm:$0xff] %vm299_vm0, %v1591_v40  ;;  %1720 = vst.msk [vmem:[%s4956_s30 + $0x2d8] sm:$0xff] %vm299_vm0, %v1592_v46  ;;  %v1614_v16 = vmax.f32 %v6277_v13, 0.0  ;;  %v1618_v19 = vmax.f32 %v4925_v58, 0.0  ;;  %v1619_v35 = vmax.f32 %v4929_v61, 0.0  ;;  %v1620_v39 = vmax.f32 %v4933_v57, 0.0 }
 0x4c7   : > { %1721 = vst.msk [vmem:[%s4956_s30 + $0x2e0] sm:$0xff] %vm299_vm0, %v1593_v52  ;;  %1722 = vst.msk [vmem:[%s4956_s30 + $0x2e8] sm:$0xff] %vm299_vm0, %v1594_v6  ;;  %v1621_v17 = vmax.f32 %v4937_v8, 0.0  ;;  %v1622_v58 = vmax.f32 %v4941_v14, 0.0  ;;  %v1623_v61 = vmax.f32 %v4945_v20, 0.0  ;;  %v1624_v57 = vmax.f32 %v4949_v27, 0.0 }
 0x4c8   : > { %1723 = vst.msk [vmem:[%s4956_s30 + $0x2f0] sm:$0xff] %vm299_vm0, %v1595_v48  ;;  %1724 = vst.msk [vmem:[%s4956_s30 + $0x2f8] sm:$0xff] %vm299_vm0, %v1596_v33  ;;  %v6278_v8 = vld [vmem:[#allocation50_spill] sm:$0xff]  ;;  %v6279_v22 = vld [vmem:[#allocation51_spill] sm:$0xff]  ;;  %v1628_v27 = vmax.f32 %v4972_v53, 0.0 }
 0x4c9   : > { %1725 = vst.msk [vmem:[%s4956_s30 + $0x300] sm:$0xff] %vm299_vm0, %v1597_v7  ;;  %1726 = vst.msk [vmem:[%s4956_s30 + $0x308] sm:$0xff] %vm299_vm0, %v1598_v56  ;;  %v1625_v14 = vmax.f32 %v6278_v8, 0.0  ;;  %v1626_v20 = vmax.f32 %v6279_v22, 0.0  ;;  %v6280_v25 = vld [vmem:[#allocation52_spill] sm:$0xff] }
 0x4ca   : > { %1727 = vst.msk [vmem:[%s4956_s30 + $0x310] sm:$0xff] %vm299_vm0, %v1599_v5  ;;  %1728 = vst.msk [vmem:[%s4956_s30 + $0x318] sm:$0xff] %vm299_vm0, %v1600_v3  ;;  %v1627_v28 = vmax.f32 %v6280_v25, 0.0 }
 0x4cb   : > { %1729 = vst.msk [vmem:[%s4956_s30 + $0x320] sm:$0xff] %vm299_vm0, %v1601_v45  ;;  %1730 = vst.msk [vmem:[%s4956_s30 + $0x328] sm:$0xff] %vm299_vm0, %v1602_v24 }
 0x4cc   : > { %1731 = vst.msk [vmem:[%s4956_s30 + $0x330] sm:$0xff] %vm299_vm0, %v1603_v11  ;;  %1732 = vst.msk [vmem:[%s4956_s30 + $0x338] sm:$0xff] %vm299_vm0, %v1604_v63 }
 0x4cd   : > { %1733 = vst.msk [vmem:[%s4956_s30 + $0x340] sm:$0xff] %vm299_vm0, %v1605_v59  ;;  %1734 = vst.msk [vmem:[%s4956_s30 + $0x348] sm:$0xff] %vm299_vm0, %v1606_v29 }
 0x4ce   : > { %1735 = vst.msk [vmem:[%s4956_s30 + $0x350] sm:$0xff] %vm299_vm0, %v1607_v60  ;;  %1736 = vst.msk [vmem:[%s4956_s30 + $0x358] sm:$0xff] %vm299_vm0, %v1608_v54 }
 0x4cf   : > { %1737 = vst.msk [vmem:[%s4956_s30 + $0x360] sm:$0xff] %vm299_vm0, %v1609_v18  ;;  %1738 = vst.msk [vmem:[%s4956_s30 + $0x368] sm:$0xff] %vm299_vm0, %v1610_v2 }
 0x4d0   : > { %1739 = vst.msk [vmem:[%s4956_s30 + $0x370] sm:$0xff] %vm299_vm0, %v1611_v23  ;;  %1740 = vst.msk [vmem:[%s4956_s30 + $0x378] sm:$0xff] %vm299_vm0, %v1612_v10 }
 0x4d1   : > { %1741 = vst.msk [vmem:[%s4956_s30 + $0x380] sm:$0xff] %vm299_vm0, %v1613_v4  ;;  %1742 = vst.msk [vmem:[%s4956_s30 + $0x388] sm:$0xff] %vm299_vm0, %v1614_v16 }
 0x4d2   : > { %1743 = vst.msk [vmem:[%s4956_s30 + $0x390] sm:$0xff] %vm299_vm0, %v1615_v12  ;;  %1744 = vst.msk [vmem:[%s4956_s30 + $0x398] sm:$0xff] %vm299_vm0, %v1616_v21 }
 0x4d3   : > { %1745 = vst.msk [vmem:[%s4956_s30 + $0x3a0] sm:$0xff] %vm299_vm0, %v1617_v26  ;;  %1746 = vst.msk [vmem:[%s4956_s30 + $0x3a8] sm:$0xff] %vm299_vm0, %v1618_v19 }
 0x4d4   : > { %1747 = vst.msk [vmem:[%s4956_s30 + $0x3b0] sm:$0xff] %vm299_vm0, %v1619_v35  ;;  %1748 = vst.msk [vmem:[%s4956_s30 + $0x3b8] sm:$0xff] %vm299_vm0, %v1620_v39 }
 0x4d5   : > { %1749 = vst.msk [vmem:[%s4956_s30 + $0x3c0] sm:$0xff] %vm299_vm0, %v1621_v17  ;;  %1750 = vst.msk [vmem:[%s4956_s30 + $0x3c8] sm:$0xff] %vm299_vm0, %v1622_v58 }
 0x4d6   : > { %1751 = vst.msk [vmem:[%s4956_s30 + $0x3d0] sm:$0xff] %vm299_vm0, %v1623_v61  ;;  %1752 = vst.msk [vmem:[%s4956_s30 + $0x3d8] sm:$0xff] %vm299_vm0, %v1624_v57 }
 0x4d7   : > { %1753 = vst.msk [vmem:[%s4956_s30 + $0x3e0] sm:$0xff] %vm299_vm0, %v1625_v14  ;;  %1754 = vst.msk [vmem:[%s4956_s30 + $0x3e8] sm:$0xff] %vm299_vm0, %v1626_v20 }
 0x4d8   : > { %1755 = vst.msk [vmem:[%s4956_s30 + $0x3f0] sm:$0xff] %vm299_vm0, %v1627_v28  ;;  %1756 = vst.msk [vmem:[%s4956_s30 + $0x3f8] sm:$0xff] %vm299_vm0, %v1628_v27 }
 0x4d9 PF: > { %s13_s12 = sadd.s32 1, %s1856_s12  }
 0x4da   : > { %p10_p4 = scmp.ge.s32.totalorder %s13_s12, 4  }
 0x4dc   :  { %12 = sbr.rel (!%p10_p4) target bundleno = 1 (0x1), region = 62 }

// kernel: _lambda_.45
= control target key start
LH: loop header
LB: loop body
LE: loop exit
PB: predicated region body
PF: predicated region fallthrough
CT: control target
= control target key end

     0   :  { %s4991_s30 = smov 0   ;;  %s4993_s10 = smov 0   ;;  %s6388_s0 = inlined_call_operand.vmem [shape: bf16[2,38,38,64], index: 0, kind: input, shape index: {}, may-alias: {0,1,2,3,4,5,6}]   ;;  %s6389_s1 = inlined_call_operand.vmem [shape: bf16[2,38,38,64], index: 1, kind: input, shape index: {}, may-alias: {0,1,2,3,4,5,6}]   ;;  %s6390_s2 = inlined_call_operand.vmem [shape: bf16[2,38,38,64], index: 2, kind: input, shape index: {}, may-alias: {0,1,2,3,4,5,6}]   ;;  %s6391_s3 = inlined_call_operand.vmem [shape: bf16[2,38,38,64], index: 3, kind: input, shape index: {}, may-alias: {0,1,2,3,4,5,6}]   ;;  %s6392_s4 = inlined_call_operand.vmem [shape: bf16[2,38,38,64], index: 4, kind: input, shape index: {}, may-alias: {0,1,2,3,4,5,6}]   ;;  %s6393_s5 = inlined_call_operand.vmem [shape: bf16[2,38,38,64], index: 5, kind: input, shape index: {}, may-alias: {0,1,2,3,4,5,6}]   ;;  %s6394_s6 = inlined_call_operand.vmem [shape: bf16[2,38,38,64], index: 6, kind: input, shape index: {}, may-alias: {0,1,2,3,4,5,6}]   ;;  %s6395_s7 = inlined_call_operand.vmem [shape: bf16[3136,3], index: 7, kind: input, shape index: {}]   ;;  %s6396_s8 = inlined_call_operand.vmem [shape: f32[1,3], index: 8, kind: input, shape index: {}]   ;;  %s6397_s9 = inlined_call_operand.vmem [shape: f32[2,32,32,3], index: 9, kind: output, shape index: {}]  }
   0x1   :  { %6400 = sst [smem:[#allocation3_spill]] %s6388_s0  ;;  %s4995_s11 = smov 0  }
   0x2   :  { %s4997_s12 = smov 0   ;;  %s4999_s13 = smov 0  }
   0x3 LB: > { %s28_s14 = sadd.s32 1, %s4930_s11  ;;  %s31_s15 = sadd.s32 1, %s4934_s12  ;;  %s4938_s13 = sphi %s4999_s13, %s19_s13   ;;  %s4934_s12 = sphi %s4997_s12, %s6409_s12   ;;  %s4930_s11 = sphi %s4995_s11, %s6408_s11   ;;  %s4926_s10 = sphi %s4993_s10, %s6407_s10   ;;  %s4922_s30 = sphi %s4991_s30, %s6406_s30  }
   0x4   : > { %p29_p0 = scmp.ge.s32.totalorder %s28_s14, 32  ;;  %p4020_p1 = scmp.ge.s32.totalorder %s4938_s13, 1 }
   0x5   : > { %p427_p2 = scmp.lt.s32.totalorder %s4938_s13, 65 }
   0x6   : > { %s6411_s14 = smov (%p29_p0, %s28_s14), 0  ;;  %s6413_s15 = smov (!%p29_p0, %s31_s15), %s4934_s12 }
   0x7   : > { %p428_p3 = pnand %p4020_p1, %p427_p2  ;;  %p33_p4 = scmp.ge.s32.totalorder %s6413_s15, 2 }
   0x8   : > { %p531_p5 = scmp.lt.s32.totalorder (!%p428_p3), %s4926_s10, 1  ;;  %s540_s16 = sadd.s32 (!%p428_p3), 1, %s4922_s30  ;;  %v4670_v0 = vld [vmem:[%s6395_s7 + $0xc0] sm:$0xff] (!%p428_p3)   ;;  %v4674_v3 = vld [vmem:[%s6395_s7 + $0xc8] sm:$0xff] (!%p428_p3)   ;;  %vm719_vm0 = vsmask.f32 (!%p428_p3), 5376 }
   0x9   : > { %s6415_s15 = smov (%p33_p4, %s6413_s15), 0  ;;  %431 = sbr.rel (%p428_p3) target bundleno = 560 (0x230), region = 56 }
   0xa   : > { %6401 = sst [smem:[#allocation2_spill]] %s6415_s15  ;;  %p543_p6 = scmp.lt.s32.totalorder (!%p428_p3), %s540_s16, 37  ;;  %v4671_v1 = vld [vmem:[%s6395_s7 + $0x80] sm:$0xff] (!%p428_p3)   ;;  %4281 = vmatprep.subr.bf16.mxu1 (!%p428_p3), %v4670_v0  ;;  %v4676_v5 = vld [vmem:[%s6395_s7 + $0x88] sm:$0xff] (!%p428_p3)   ;;  %vm695_vm1 = vsmask.f32 (!%p428_p3), 6400 }
   0xb   : > { %p533_p7 = scmp.lt.s32.totalorder (!%p428_p3), %s4922_s30, 37  ;;  %4282 = vmatpush3.bf16.msra.mxu1 (!%p428_p3), %v4671_v1  ;;  %v4673_v2 = vld [vmem:[%s6395_s7 + $0x40] sm:$0xff] (!%p428_p3)   ;;  %s551_s18 = sadd.s32 (!%p428_p3), 2, %s4922_s30  ;;  %v4677_v6 = vld [vmem:[%s6395_s7 + $0x48] sm:$0xff] (!%p428_p3)   ;;  %v4678_v15 = vld [vmem:[%s6395_s7 + $0xd0] sm:$0xff] (!%p428_p3)   ;;  %vm713_vm3 = vcmask (!%p428_p3), 1045504  }
   0xc   : > { %v4675_v4 = vld [vmem:[%s6395_s7] sm:$0xff] (!%p428_p3)   ;;  %4253 = vmatprep.subr.bf16.mxu0 (!%p428_p3), %v4673_v2  ;;  %4283 = vmatprep.subr.bf16.mxu1 (!%p428_p3), %v4674_v3  ;;  %s562_s15 = sadd.s32 (!%p428_p3), 3, %s4922_s30  ;;  %p554_p8 = scmp.lt.s32.totalorder (!%p428_p3), %s551_s18, 37  ;;  %vm664_vm2 = vsmask.f32 (!%p428_p3), 7424  ;;  %v4679_v30 = vld [vmem:[%s6395_s7 + $0x8] sm:$0xff] (!%p428_p3)  }
   0xd   : > { %4254 = vmatpush3.bf16.msra.mxu0 (!%p428_p3), %v4675_v4  ;;  %s6402_s0 = sld [smem:[#allocation3_spill]] (!%p428_p3)  ;;  %p565_p9 = scmp.lt.s32.totalorder (!%p428_p3), %s562_s15, 37  ;;  %v4680_v35 = vld [vmem:[%s6395_s7 + $0x90] sm:$0xff] (!%p428_p3)   ;;  %vm689_vm4 = vcmask (!%p428_p3), 1046528   ;;  %vm735_vm5 = vcmask (!%p428_p3), 1044480   ;;  %v4682_v61 = vld [vmem:[%s6395_s7 + $0xd8] sm:$0xff] (!%p428_p3)  }
   0xe   : > { %4255 = vmatprep.subr.bf16.mxu0 (!%p428_p3), %v4677_v6  ;;  %v4681_v57 = vld [vmem:[%s6395_s7 + $0x50] sm:$0xff] (!%p428_p3)   ;;  %vm969_vm6 = vcmask (!%p428_p3), 1040384   ;;  %vm982_vm7 = vsmask.f32 (!%p428_p3), 256  ;;  %vm1185_vm8 = vcmask (!%p428_p3), 1041408   ;;  %vm866_vm10 = vcmask (!%p428_p3), 523264  }
   0xf   : > { %4284 = vmatpush3.bf16.msra.mxu1 (!%p428_p3), %v4676_v5  ;;  %v4683_v1 = vld [vmem:[%s6395_s7 + $0x10] sm:$0xff] (!%p428_p3)   ;;  %vm1198_vm9 = vsmask.f32 (!%p428_p3), 1280  ;;  %p608_p13 = scmp.lt.s32.totalorder (!%p428_p3), %s4922_s30, 31  ;;  %vm3790_vm11 = vcmask (!%p428_p3), 23552  }
  0x10   : > { %s6417_s10 = smov (!%p531_p5, %s4926_s10), 1  ;;  %s6419_s16 = smov (!%p543_p6, %s540_s16), 37  ;;  %4285 = vmatprep.subr.bf16.mxu1 %v4678_v15 }
  0x11   : > { %s5033_s21 = smul.u32 190, %s6417_s10  ;;  %s6421_s18 = smov (!%p554_p8, %s551_s18), 37  ;;  %4256 = vmatpush3.bf16.msra.mxu0 %v4679_v30 }
  0x12   : > { %s4609_s22 = smul.u32 5, %s6419_s16  ;;  %s6423_s15 = smov (!%p565_p9, %s562_s15), 37  ;;  %4257 = vmatprep.subr.bf16.mxu0 %v4681_v57  ;;  %v4700_v57 = vld [vmem:[%s6395_s7 + $0xb8] sm:$0xff]  }
  0x13   : > { %s534_s27 = scalar_select %p533_p7, %s4922_s30, 37  ;;  %4286 = vmatpush3.bf16.msra.mxu1 %v4680_v35 }
  0x14   : > { %s547_s17 = sadd.s32 %s4609_s22, %s5033_s21  ;;  %s4610_s25 = smul.u32 5, %s6421_s18  ;;  %4287 = vmatprep.subr.bf16.mxu1 %v4682_v61 }
  0x15   : > { %s4022_s20 = sshll.u32 %s547_s17, 2  ;;  %s4607_s23 = smul.u32 5, %s534_s27  ;;  %4258 = vmatpush3.bf16.msra.mxu0 %v4683_v1 }
  0x16   : > { %s5054_s26 = scalar_lea.vmem %s6389_s1, %s4022_s20  ;;  %s6398_s27 = smov 64  }
  0x17   : > { %v5061_v7 = vld [vmem:[%s5054_s26] sm:$0xff]   ;;  %s537_s29 = sadd.s32 %s5033_s21, %s4607_s23  ;;  %s4611_s28 = smul.u32 5, %s6423_s15  ;;  %v5120_v48 = vld [vmem:[%s5054_s26 + $0x8] sm:$0xff]   ;;  %v4663_v60 = vld [vmem:[%s5054_s26 + $0x10] ss:$0 sps:$4 sm:$0x77]  }
  0x18   : > { %s4021_s16 = sshll.u32 %s537_s29, 2  ;;  %751 = vrot.lane.b32.xlu1 %v5061_v7, %s6398_s27  ;;  %s573_s22 = sadd.s32 4, %s4922_s30  ;;  %v778_v50 = vrot.slane %v5061_v7, 1  ;;  %v779_v51 = vrot.slane %v5120_v48, 1  ;;  %v800_v53 = vrot.slane %v5061_v7, 2  ;;  %v820_v56 = vrot.slane %v5061_v7, 3 }
  0x19   : > { %s5069_s20 = scalar_lea.vmem %s6402_s0, %s4021_s16  ;;  %s558_s29 = sadd.s32 %s4610_s25, %s5033_s21  ;;  %v801_v58 = vrot.slane %v5120_v48, 2  ;;  %v821_v0 = vrot.slane %v5120_v48, 3 }
  0x1a   : > { %v5072_v8 = vld [vmem:[%s5069_s20] sm:$0xff]   ;;  %v5075_v9 = vld [vmem:[%s5069_s20 + $0x8] sm:$0xff]   ;;  %v4659_v10 = vld [vmem:[%s5069_s20 + $0x10] ss:$0 sps:$4 sm:$0x77]   ;;  %s4023_s16 = sshll.u32 %s558_s29, 2  ;;  %s569_s18 = sadd.s32 %s4611_s28, %s5033_s21  ;;  %v780_v62 = vsel %vm689_vm4, %v778_v50, %v779_v51 }
  0x1b   : > { %v666_v11 = vshrl.u32 %v5072_v8, 16  ;;  %v668_v12 = vshll.u32 %v5072_v8, 16  ;;  %v673_v13 = vshll.u32 %v5075_v9, 16  ;;  %v677_v14 = vshrl.u32 %v5075_v9, 16  ;;  %s5094_s24 = scalar_lea.vmem %s6390_s2, %s4023_s16  ;;  %p5098_p10 = scmp.lt.s32.totalorder %s573_s22, 37  ;;  %v4695_v50 = vld [vmem:[%s6395_s7 + $0x28] sm:$0xff]  }
  0x1c   : > { %v681_v16 = vshll.u32 %v4659_v10, 16  ;;  %v703_v17 = vshrl.u32 %v4659_v10, 16  ;;  %s4024_s17 = sshll.u32 %s569_s18, 2  ;;  %v5112_v47 = vld [vmem:[%s5094_s24] sm:$0xff]   ;;  %v4662_v54 = vld [vmem:[%s5094_s24 + $0x8] sm:$0xff]   ;;  %v802_v6 = vsel %vm713_vm3, %v800_v53, %v801_v58  ;;  %v822_v10 = vsel %vm735_vm5, %v820_v56, %v821_v0  ;;  %s6404_s0 = smov 64  }
  0x1d   : > { %v720_v18 = vrot.slane %v666_v11, 2  ;;  %v721_v19 = vrot.slane %v668_v12, 3  ;;  %v723_v20 = vrot.slane %v677_v14, 2  ;;  %v724_v21 = vrot.slane %v673_v13, 3  ;;  %s5117_s19 = scalar_lea.vmem %s6391_s3, %s4024_s17  ;;  %s6425_s22 = smov (!%p5098_p10, %s573_s22), 37  ;;  %v4697_v53 = vld [vmem:[%s6395_s7 + $0x70] sm:$0xff]  }
  0x1e   : > { %v696_v22 = vrot.slane %v666_v11, 1  ;;  %v697_v23 = vrot.slane %v668_v12, 2  ;;  %v699_v24 = vrot.slane %v677_v14, 1  ;;  %v700_v25 = vrot.slane %v673_v13, 2  ;;  %s4612_s15 = smul.u32 5, %s6425_s22  ;;  %v5196_v35 = vld [vmem:[%s5117_s19] sm:$0xff]  }
  0x1f   : > { %v722_v26 = vor.u32 %v721_v19, %v720_v18  ;;  %v725_v27 = vor.u32 %v724_v21, %v723_v20  ;;  %v670_v28 = vrot.slane %v668_v12, 1  ;;  %v675_v29 = vrot.slane %v673_v13, 1  ;;  %v5141_v59 = vld [vmem:[%s5094_s24 + $0x10] ss:$0 sps:$4 sm:$0x77]  }
  0x20   : > { %v698_v31 = vor.u32 %v697_v23, %v696_v22  ;;  %v701_v32 = vor.u32 %v700_v25, %v699_v24  ;;  %v705_v33 = vrot.slane %v703_v17, 1  ;;  %v706_v34 = vrot.slane %v681_v16, 2  ;;  %s580_s29 = sadd.s32 %s4612_s15, %s5033_s21  ;;  %s584_s15 = sadd.s32 5, %s4922_s30  ;;  %v4699_v56 = vld [vmem:[%s6395_s7 + $0x30] sm:$0xff]  }
  0x21   : > { %v726_v36 = vsel %vm719_vm0, %v722_v26, %v725_v27  ;;  %v671_v37 = vor.u32 %v670_v28, %v666_v11  ;;  %v679_v38 = vor.u32 %v677_v14, %v675_v29  ;;  %v683_v39 = vrot.slane %v681_v16, 1  ;;  %s4025_s22 = sshll.u32 %s580_s29, 2  ;;  %v4685_v26 = vld [vmem:[%s6395_s7 + $0x58] sm:$0xff]   ;;  %p587_p11 = scmp.lt.s32.totalorder %s584_s15, 37 }
  0x22   : > { %731 = vrot.lane.b32.xlu1 %v726_v36, %s6398_s27  ;;  %v702_v40 = vsel %vm695_vm1, %v698_v31, %v701_v32  ;;  %v727_v41 = vrot.slane %v703_v17, 2  ;;  %v728_v42 = vrot.slane %v681_v16, 3  ;;  %v707_v45 = vor.u32 %v706_v34, %v705_v33  ;;  %s5159_s25 = scalar_lea.vmem %s6392_s4, %s4025_s22  ;;  %v4684_v16 = vld [vmem:[%s6395_s7 + $0x98] sm:$0xff]   ;;  %4259 = vmatprep.subr.bf16.mxu0 %v4685_v26  ;;  %v4688_v36 = vld [vmem:[%s6395_s7 + $0xa0] sm:$0xff]  }
  0x23   : > { %709 = vrot.lane.b32.xlu0 %v702_v40, %s6398_s27  ;;  %v684_v43 = vsel %vm664_vm2, %v679_v38, %v683_v39  ;;  %v676_v44 = vsel %vm664_vm2, %v671_v37, %v675_v29  ;;  %v845_v55 = vshll.u32 %v5112_v47, 16  ;;  %v843_v63 = vshrl.u32 %v5112_v47, 16  ;;  %4288 = vmatpush3.bf16.msra.mxu1 %v4684_v16  ;;  %v4687_v31 = vld [vmem:[%s6395_s7 + $0x18] sm:$0xff]   ;;  %v5202_v37 = vld [vmem:[%s5117_s19 + $0x8] sm:$0xff]   ;;  %v4689_v38 = vld [vmem:[%s6395_s7 + $0x60] sm:$0xff]   ;;  %s6427_s15 = smov (!%p587_p11, %s584_s15), 37 }
  0x24   : > { %v729_v46 = vor.u32 %v728_v42, %v727_v41  ;;  %v708_v52 = vsel %vm695_vm1, %v701_v32, %v707_v45  ;;  %v850_v3 = vshll.u32 %v4662_v54, 16  ;;  %v858_v4 = vshll.u32 %v5141_v59, 16  ;;  %4260 = vmatpush3.bf16.msra.mxu0 %v4687_v31  ;;  %v4690_v39 = vld [vmem:[%s6395_s7 + $0xe8] sm:$0xff]   ;;  %v4691_v41 = vld [vmem:[%s6395_s7 + $0x20] sm:$0xff]   ;;  %s4613_s17 = smul.u32 5, %s6427_s15  ;;  %v4694_v47 = vld [vmem:[%s6395_s7 + $0xf0] sm:$0xff]  }
  0x25   : > { %v847_v2 = vrot.slane %v845_v55, 1  ;;  %v927_v5 = vshrl.u32 %v5141_v59, 16  ;;  %v781_v11 = vrot.slane %v4663_v60, 1  ;;  %v803_v14 = vrot.slane %v4663_v60, 2  ;;  %4261 = vmatprep.subr.bf16.mxu0 %v4689_v38  ;;  %v4693_v45 = vld [vmem:[%s6395_s7 + $0x68] sm:$0xff]   ;;  %v5269_v61 = vld [vmem:[%s5159_s25] sm:$0xff]  }
  0x26   : > { %687 = vrot.lane.b32.xlu1 %v684_v43, %s6398_s27  ;;  %v730_v49 = vsel %vm719_vm0, %v725_v27, %v729_v46  ;;  %v852_v13 = vrot.slane %v850_v3, 1  ;;  %v854_v15 = vshrl.u32 %v4662_v54, 16  ;;  %v5171_v17 = vrot.slane %v858_v4, 1  ;;  %v4686_v27 = vld [vmem:[%s6395_s7 + $0xe0] sm:$0xff]   ;;  %v4698_v54 = vld [vmem:[%s6395_s7 + $0xf8] sm:$0xff]   ;;  %s595_s15 = sadd.s32 6, %s4922_s30 }
  0x27   : > { %685 = vrot.lane.b32.xlu0 %v676_v44, %s6398_s27  ;;  %v848_v12 = vor.u32 %v847_v2, %v843_v63  ;;  %v823_v18 = vrot.slane %v4663_v60, 3  ;;  %v941_v20 = vrot.slane %v850_v3, 2  ;;  %v944_v21 = vrot.slane %v927_v5, 1  ;;  %4289 = vmatprep.subr.bf16.mxu1 %v4686_v27  ;;  %v4692_v44 = vld [vmem:[%s6395_s7 + $0xa8] sm:$0xff]   ;;  %v4704_v59 = vld [vmem:[%s6395_s7 + $0x38] sm:$0xff]   ;;  %p598_p12 = scmp.lt.s32.totalorder %s595_s15, 37 }
  0x28   : > { %v940_v19 = vrot.slane %v854_v15, 1  ;;  %v945_v22 = vrot.slane %v858_v4, 2  ;;  %v782_v23 = vsel %vm689_vm4, %v779_v51, %v781_v11  ;;  %v937_v25 = vrot.slane %v843_v63, 1  ;;  %4290 = vmatpush3.bf16.msra.mxu1 %v4688_v36  ;;  %4262 = vmatpush3.bf16.msra.mxu0 %v4691_v41  ;;  %v5266_v60 = vld [vmem:[%s5117_s19 + $0x10] ss:$0 sps:$4 sm:$0x77]  }
  0x29   : > { %v853_v24 = vsel %vm664_vm2, %v848_v12, %v852_v13  ;;  %v824_v28 = vsel %vm735_vm5, %v821_v0, %v823_v18  ;;  %v804_v32 = vsel %vm713_vm3, %v801_v58, %v803_v14  ;;  %v856_v33 = vor.u32 %v854_v15, %v852_v13  ;;  %4291 = vmatprep.subr.bf16.mxu1 %v4690_v39  ;;  %v4703_v63 = vld [vmem:[%s6395_s7 + $0x1c0] sm:$0xff]   ;;  %v5280_v0 = vld [vmem:[%s5159_s25 + $0x10] ss:$0 sps:$4 sm:$0x77]   ;;  %v4669_v2 = vld [vmem:[%s5159_s25 + $0x8] sm:$0xff]   ;;  %s6429_s15 = smov (!%p598_p12, %s595_s15), 37 }
  0x2a   : > { %733 = vrot.lane.b32.xlu1 %v730_v49, %s6398_s27  ;;  %v942_v29 = vor.u32 %v941_v20, %v940_v19  ;;  %v5189_v30 = vor.u32 %v945_v22, %v944_v21  ;;  %v938_v34 = vrot.slane %v845_v55, 2  ;;  %v970_v46 = vrot.slane %v5196_v35, 7  ;;  %4263 = vmatprep.subr.bf16.mxu0 %v4693_v45  ;;  %s4614_s28 = smul.u32 5, %s6429_s15  ;;  %s6431_s30 = smov (!%p608_p13, %s4922_s30), 31 }
  0x2b   : > { %711 = vrot.lane.b32.xlu0 %v708_v52, %s6398_s27  ;;  %v861_v42 = vsel %vm664_vm2, %v856_v33, %v5171_v17  ;;  %v971_v49 = vrot.slane %v5202_v37, 7  ;;  %v4696_v52 = vld [vmem:[%s6395_s7 + $0xb0] sm:$0xff]   ;;  %v929_v58 = vor.u32 %v927_v5, %v5171_v17  ;;  %v1040_v1 = vrot.slane %v5196_v35, 2  ;;  %v4707_v5 = vld [vmem:[%s6395_s7 + $0x140] sm:$0xff]  }
  0x2c   : > { %v947_v40 = vsel %vm695_vm1, %v942_v29, %v5189_v30  ;;  %v939_v43 = vor.u32 %v938_v34, %v937_v25  ;;  %4292 = vmatpush3.bf16.msra.mxu1 %v4692_v44  ;;  %4264 = vmatpush3.bf16.msra.mxu0 %v4695_v50  ;;  %v1041_v3 = vrot.slane %v5202_v37, 2  ;;  %v1043_v4 = vrot.slane %v5266_v60, 2 }
  0x2d   : > { %4293 = vmatprep.subr.bf16.mxu1 %v4694_v47  ;;  %v972_v55 = vsel %vm969_vm6, %v970_v46, %v971_v49  ;;  %4265 = vmatprep.subr.bf16.mxu0 %v4697_v53  ;;  %v1019_v11 = vrot.slane %v5202_v37, 1  ;;  %v1078_v12 = vshll.u32 %v4669_v2, 16  ;;  %v1021_v13 = vrot.slane %v5266_v60, 1 }
  0x2e   : > { %783 = vrot.lane.b32.xlu1 %v780_v62, %s6398_s27  ;;  %v943_v51 = vsel %vm695_vm1, %v939_v43, %v942_v29  ;;  %v4702_v62 = vld [vmem:[%s6395_s7 + $0x78] sm:$0xff]   ;;  %v1083_v14 = vshll.u32 %v5280_v0, 16  ;;  %v1044_v15 = vsel %vm713_vm3, %v1041_v3, %v1043_v4  ;;  %v1075_v16 = vshrl.u32 %v4669_v2, 16 }
  0x2f   : > { %753 = vrot.lane.b32.xlu0 %v5120_v48, %s6398_s27  ;;  %v1068_v17 = vshrl.u32 %v5269_v61, 16  ;;  %v1094_v19 = vrot.slane %v1078_v12, 1  ;;  %v761_v22 = vshll.u32 %v5061_v7, 16  ;;  %v5313_v25 = vshll.u32 %v5120_v48, 16 }
  0x30   : > { %4294 = vmatpush3.bf16.msra.mxu1 %v4696_v52  ;;  %4266 = vmatpush3.bf16.msra.mxu0 %v4699_v56  ;;  %v1077_v20 = vrot.slane %v1075_v16, 7  ;;  %v1097_v21 = vrot.slane %v1083_v14, 1  ;;  %v1042_v26 = vsel %vm713_vm3, %v1040_v1, %v1041_v3  ;;  %v759_v27 = vshrl.u32 %v5061_v7, 16 }
  0x31   : > { %4295 = vmatprep.subr.bf16.mxu1 %v4698_v54  ;;  %4267 = vmatprep.subr.bf16.mxu0 %v4702_v62  ;;  %v768_v29 = vrot.slane %v5313_v25, 1  ;;  %v1070_v36 = vrot.slane %v1068_v17, 7  ;;  %v791_v54 = vrot.slane %v5313_v25, 2 }
  0x32   : > { %825 = vrot.lane.b32.xlu1 %v822_v10, %s6398_s27  ;;  %v1071_v10 = vshll.u32 %v5269_v61, 16  ;;  %v809_v38 = vrot.slane %v759_v27, 2  ;;  %v787_v44 = vrot.slane %v759_v27, 1  ;;  %v1085_v56 = vsel %vm982_vm7, %v1077_v20, %v1083_v14 }
  0x33   : > { %805 = vrot.lane.b32.xlu0 %v802_v6, %s6398_s27  ;;  %v1018_v6 = vrot.slane %v5196_v35, 1 }
  0x34   : > { %4296 = vmatpush3.bf16.msra.mxu1 %v4700_v57  ;;  %4268 = vmatpush3.bf16.msra.mxu0 %v4704_v59  ;;  %v1092_v18 = vrot.slane %v1071_v10, 1  ;;  %v1073_v45 = vor.u32 %v1071_v10, %v1070_v36 }
  0x35   : > { %4337 = vmatprep.subr.bf16.mxu1 %v4703_v63  ;;  %4309 = vmatprep.subr.bf16.mxu0 %v4707_v5  ;;  %v1020_v33 = vsel %vm689_vm4, %v1018_v6, %v1019_v11 }
  0x36   : > { %785 = vrot.lane.b32.xlu1 %v782_v23, %s6398_s27  ;;  %v1022_v23 = vsel %vm689_vm4, %v1019_v11, %v1021_v13  ;;  %v1093_v34 = vor.u32 %v1092_v18, %v1068_v17 }
  0x37   : > { %862 = vrot.lane.b32.xlu0 %v853_v24, %s6398_s27  ;;  %v1096_v24 = vor.u32 %v1094_v19, %v1075_v16 }
  0x38   : > { %v1095_v41 = vsel %vm664_vm2, %v1093_v34, %v1094_v19  ;;  %v736_v34 = vrot.slane %v5072_v8, 3 }
  0x39   : > { %v1098_v31 = vsel %vm664_vm2, %v1096_v24, %v1097_v21 }
  0x3a   : > { %827 = vrot.lane.b32.xlu1 %v824_v28, %s6398_s27  ;;  %v763_v28 = vrot.slane %v761_v22, 1 }
  0x3b   : > { %807 = vrot.lane.b32.xlu0 %v804_v32, %s6398_s27  ;;  %s591_s27 = sadd.s32 %s4613_s17, %s5033_s21  ;;  %v1080_v32 = vor.u32 %v1078_v12, %v1077_v20 }
  0x3c   : > { %s4026_s18 = sshll.u32 %s591_s27, 2  ;;  %s602_s27 = sadd.s32 %s4614_s28, %s5033_s21 }
  0x3d   : > { %s5256_s23 = scalar_lea.vmem %s6393_s5, %s4026_s18  ;;  %v1081_v39 = vsel %vm982_vm7, %v1070_v36, %v1080_v32  ;;  %s4027_s22 = sshll.u32 %s602_s27, 2 }
  0x3e   : > { %950 = vrot.lane.b32.xlu1 %v947_v40, %s6404_s0  ;;  %v810_v40 = vrot.slane %v761_v22, 3  ;;  %s5341_s16 = scalar_lea.vmem %s6394_s6, %s4027_s22  ;;  %s4029_s28 = sshll.u32 %s6417_s10, 7 }
  0x3f   : > { %864 = vrot.lane.b32.xlu0 %v861_v42, %s6404_s0  ;;  %v4728_v59 = vld [vmem:[%s5341_s16] sm:$0xff]   ;;  %v4733_v6 = vld [vmem:[%s5341_s16 + $0x8] sm:$0xff]  }
  0x40   : > { %v811_v43 = vor.u32 %v810_v40, %v809_v38  ;;  %v5378_v3 = vshrl.u32 %v4728_v59, 16  ;;  %v1287_v5 = vshll.u32 %v4728_v59, 16  ;;  %v5389_v12 = vshrl.u32 %v4733_v6, 16 }
  0x41   : > { %v737_v38 = vrot.slane %v5075_v9, 3  ;;  %v4722_v9 = vld [vmem:[%s6395_s7 + $0x1a0] sm:$0xff]  }
  0x42   : > { %1004 = vrot.lane.b32.xlu1 %v5202_v37, %s6404_s0  ;;  %v1286_v10 = vrot.slane %v5378_v3, 6  ;;  %v1289_v11 = vrot.slane %v1287_v5, 7  ;;  %v1332_v18 = vrot.slane %v1287_v5, 1  ;;  %v1294_v19 = vrot.slane %v5389_v12, 6 }
  0x43   : > { %948 = vrot.lane.b32.xlu0 %v943_v51, %s6404_s0  ;;  %v4701_v51 = vld [vmem:[%s5256_s23] sm:$0xff]   ;;  %v738_v8 = vsel %vm735_vm5, %v736_v34, %v737_v38  ;;  %v4718_v34 = vld [vmem:[%s6395_s7 + $0x198] sm:$0xff]  }
  0x44   : > { %v1186_v61 = vrot.slane %v4701_v51, 6  ;;  %v1221_v2 = vrot.slane %v4701_v51, 7  ;;  %v1290_v14 = vor.u32 %v1289_v11, %v1286_v10 }
  0x46   : > { %975 = vrot.lane.b32.xlu1 %v972_v55, %s6404_s0  ;;  %v1099_v55 = vshrl.u32 %v5280_v0, 16 }
  0x47   : > { %1002 = vrot.lane.b32.xlu0 %v5196_v35, %s6404_s0  ;;  %v5329_v35 = vshrl.u32 %v5120_v48, 16  ;;  %v813_v48 = vrot.slane %v5313_v25, 3  ;;  %v4750_v25 = vld [vmem:[%s6395_s7 + $0x290] sm:$0xff]  }
  0x48   : > { %v1101_v63 = vor.u32 %v1099_v55, %v1097_v21  ;;  %v4881_v55 = vld [vmem:[%s5069_s20] sm:$0xff]  }
  0x49   : > { %v812_v42 = vrot.slane %v5329_v35, 2  ;;  %v790_v50 = vrot.slane %v5329_v35, 1 }
  0x4a   : > { %930 = vrot.lane.b32.xlu1 %v929_v58, %s6404_s0 }
  0x4b   : > { %973 = vrot.lane.b32.xlu0 %v970_v46, %s6404_s0  ;;  %v5345_v46 = vld [vmem:[%s5256_s23 + $0x8] sm:$0xff]   ;;  %v5347_v47 = vor.u32 %v813_v48, %v812_v42  ;;  %v5361_v58 = vor.u32 %v791_v54, %v790_v50 }
  0x4c   : > { %v1187_v57 = vrot.slane %v5345_v46, 6  ;;  %v1222_v1 = vrot.slane %v5345_v46, 7  ;;  %v1257_v16 = vrot.slane %v5345_v46, 1 }
  0x4d   : > { %v5353_v52 = vsel %vm719_vm0, %v811_v43, %v5347_v47  ;;  %v1318_v43 = vrot.slane %v5389_v12, 7 }
  0x4e   : > { %977 = vrot.lane.b32.xlu1 %v971_v49, %s6404_s0  ;;  %v788_v49 = vrot.slane %v761_v22, 2  ;;  %v1188_v0 = vsel %vm1185_vm8, %v1186_v61, %v1187_v57  ;;  %v1333_v22 = vor.u32 %v1332_v18, %v5378_v3 }
  0x4f   : > { %952 = vrot.lane.b32.xlu0 %v5189_v30, %s6404_s0  ;;  %v764_v30 = vor.u32 %v763_v28, %v759_v27  ;;  %v4742_v27 = vld [vmem:[%s5341_s16 + $0x10] ss:$0 sps:$4 sm:$0x77]   ;;  %v1316_v28 = vrot.slane %v5378_v3, 7  ;;  %v4706_v3 = vld [vmem:[%s6395_s7 + $0x180] sm:$0xff]  }
  0x50   : > { %v789_v53 = vor.u32 %v788_v49, %v787_v44  ;;  %v1321_v48 = vshrl.u32 %v4742_v27, 16 }
  0x51   : > { %v5326_v7 = vsel %vm664_vm2, %v764_v30, %v768_v29  ;;  %v1317_v36 = vor.u32 %v1316_v28, %v1287_v5 }
  0x52   : > { %1047 = vrot.lane.b32.xlu1 %v1044_v15, %s6404_s0  ;;  %v5366_v62 = vsel %vm695_vm1, %v789_v53, %v5361_v58  ;;  %v1256_v15 = vrot.slane %v4701_v51, 1  ;;  %v1323_v54 = vrot.slane %v1321_v48, 7 }
  0x53   : > { %1006 = vrot.lane.b32.xlu0 %v5266_v60, %s6404_s0  ;;  %v1223_v60 = vsel %vm969_vm6, %v1221_v2, %v1222_v1 }
  0x54   : > { %v1258_v21 = vsel %vm689_vm4, %v1256_v15, %v1257_v16 }
  0x56   : > { %1025 = vrot.lane.b32.xlu1 %v1022_v23, %s6404_s0 }
  0x57   : > { %1045 = vrot.lane.b32.xlu0 %v1042_v26, %s6404_s0 }
  0x5a   : > { %1104 = vrot.lane.b32.xlu1 %v1098_v31, %s6404_s0 }
  0x5b   : > { %1023 = vrot.lane.b32.xlu0 %v1020_v33, %s6404_s0  ;;  %v1301_v33 = vshll.u32 %v4742_v27, 16  ;;  %v4716_v27 = vld [vmem:[%s6395_s7 + $0x1d8] sm:$0xff]  }
  0x5d   : > { %v1337_v42 = vrot.slane %v1301_v33, 1  ;;  %v1324_v59 = vor.u32 %v1323_v54, %v1301_v33 }
  0x5e   : > { %1088 = vrot.lane.b32.xlu1 %v1081_v39, %s6404_s0  ;;  %v1303_v39 = vrot.slane %v1301_v33, 7 }
  0x5f   : > { %1102 = vrot.lane.b32.xlu0 %v1095_v41, %s6404_s0  ;;  %v1325_v10 = vsel %vm982_vm7, %v1318_v43, %v1324_v59 }
  0x62   : > { %1027 = vrot.lane.b32.xlu1 %v1021_v13, %s6404_s0  ;;  %v1295_v13 = vshll.u32 %v4733_v6, 16 }
  0x63   : > { %1086 = vrot.lane.b32.xlu0 %v1073_v45, %s6404_s0 }
  0x64   : > { %v1297_v20 = vrot.slane %v1295_v13, 7  ;;  %v1334_v23 = vrot.slane %v1295_v13, 1 }
  0x66   : > { %1090 = vrot.lane.b32.xlu1 %v1085_v56, %s6404_s0  ;;  %v1298_v26 = vor.u32 %v1297_v20, %v1294_v19  ;;  %v1335_v30 = vsel %vm664_vm2, %v1333_v22, %v1334_v23  ;;  %v1336_v41 = vor.u32 %v1334_v23, %v5389_v12  ;;  %v714_v56 = vrot.slane %v4881_v55, 2  ;;  %v4709_v12 = vld [vmem:[%s6395_s7 + $0x100] sm:$0xff]   ;;  %v4711_v19 = vld [vmem:[%s6395_s7 + $0x148] sm:$0xff]   ;;  %v4714_v23 = vld [vmem:[%s6395_s7 + $0x190] sm:$0xff]  }
  0x67   : > { %1049 = vrot.lane.b32.xlu0 %v1043_v4, %s6404_s0  ;;  %v5383_v4 = vld [vmem:[%s5256_s23 + $0x10] ss:$0 sps:$4 sm:$0x77]  }
  0x68   : > { %v1224_v17 = vrot.slane %v5383_v4, 7  ;;  %v1299_v31 = vsel %vm1198_vm9, %v1290_v14, %v1298_v26  ;;  %v1259_v32 = vrot.slane %v5383_v4, 1  ;;  %v1304_v44 = vsel %vm1198_vm9, %v1298_v26, %v1303_v39 }
  0x69   : > { %v1338_v45 = vsel %vm664_vm2, %v1336_v41, %v1337_v42 }
  0x6a   : > { %1191 = vrot.lane.b32.xlu1 %v1188_v0, %s6404_s0  ;;  %v1225_v24 = vsel %vm969_vm6, %v1222_v1, %v1224_v17  ;;  %v1260_v40 = vsel %vm689_vm4, %v1257_v16, %v1259_v32  ;;  %v4712_v16 = vld [vmem:[%s6395_s7 + $0x1d0] sm:$0xff]  }
  0x6b   : > { %1106 = vrot.lane.b32.xlu0 %v1101_v63, %s6404_s0  ;;  %v690_v63 = vrot.slane %v4881_v55, 1 }
  0x6e   : > { %1244 = vrot.lane.b32.xlu1 %v5345_v46, %s6404_s0  ;;  %v1319_v46 = vor.u32 %v1318_v43, %v1295_v13  ;;  %v4710_v13 = vld [vmem:[%s6395_s7 + $0x188] sm:$0xff]  }
  0x6f   : > { %1189 = vrot.lane.b32.xlu0 %v1186_v61, %s6404_s0 }
  0x70   : > { %v1320_v53 = vsel %vm982_vm7, %v1316_v28, %v1319_v46 }
  0x72   : > { %1228 = vrot.lane.b32.xlu1 %v1223_v60, %s6404_s0  ;;  %v4708_v60 = vld [vmem:[%s6395_s7 + $0x1c8] sm:$0xff]  }
  0x73   : > { %1242 = vrot.lane.b32.xlu0 %v4701_v51, %s6404_s0  ;;  %v1339_v51 = vor.u32 %v1337_v42, %v1321_v48  ;;  %v4720_v42 = vld [vmem:[%s6395_s7 + $0x158] sm:$0xff]  }
  0x76   : > { %1246 = vrot.lane.b32.xlu1 %v5383_v4, %s6404_s0 }
  0x77   : > { %1226 = vrot.lane.b32.xlu0 %v1221_v2, %s6404_s0 }
  0x7a   : > { %1305 = vrot.lane.b32.xlu1 %v1290_v14, %s6404_s0  ;;  %v4883_v14 = vld [vmem:[%s5069_s20 + $0x10] ss:$0 sps:$4 sm:$0x77]  }
  0x7b   : > { %1193 = vrot.lane.b32.xlu0 %v1187_v57, %s6404_s0  ;;  %v5429_v57 = vld [vmem:[%s5069_s20 + $0x8] sm:$0xff]   ;;  %v693_v15 = vrot.slane %v4883_v14, 1  ;;  %v739_v22 = vrot.slane %v4883_v14, 3  ;;  %v717_v26 = vrot.slane %v4883_v14, 2  ;;  %v4737_v14 = vld [vmem:[%s6395_s7 + $0x1b8] sm:$0xff]  }
  0x7c   : > { %v715_v61 = vrot.slane %v5429_v57, 2  ;;  %v691_v0 = vrot.slane %v5429_v57, 1 }
  0x7e   : > { %1261 = vrot.lane.b32.xlu1 %v1258_v21, %s6404_s0  ;;  %v716_v1 = vsel %vm713_vm3, %v714_v56, %v715_v61  ;;  %v692_v2 = vsel %vm689_vm4, %v690_v63, %v691_v0  ;;  %v4713_v21 = vld [vmem:[%s6395_s7 + $0x108] sm:$0xff]   ;;  %v718_v39 = vsel %vm713_vm3, %v715_v61, %v717_v26  ;;  %v5522_v56 = vshrl.u32 %v5202_v37, 16  ;;  %v4738_v26 = vld [vmem:[%s6395_s7 + $0x178] sm:$0xff]  }
  0x7f   : > { %1230 = vrot.lane.b32.xlu0 %v1225_v24, %s6404_s0  ;;  %v694_v24 = vsel %vm689_vm4, %v691_v0, %v693_v15  ;;  %v4884_v0 = vld [vmem:[%s5054_s26 + $0x10] ss:$0 sps:$4 sm:$0x77]   ;;  %v4731_v37 = vld [vmem:[%s6395_s7 + $0x128] sm:$0xff]  }
  0x80   : > { %v5533_v59 = vshll.u32 %v4884_v0, 16 }
  0x82   : > { %1340 = vrot.lane.b32.xlu1 %v1335_v30, %s6404_s0  ;;  %v4715_v30 = vld [vmem:[%s6395_s7 + $0x150] sm:$0xff]  }
  0x83   : > { %1307 = vrot.lane.b32.xlu0 %v1299_v31, %s6404_s0 }
  0x86   : > { %1326 = vrot.lane.b32.xlu1 %v1317_v36, %s6404_s0  ;;  %v740_v36 = vsel %vm735_vm5, %v737_v38, %v739_v22 }
  0x87   : > { %1263 = vrot.lane.b32.xlu0 %v1260_v40, %s6404_s0  ;;  %v4721_v40 = vld [vmem:[%s6395_s7 + $0x1e0] sm:$0xff]  }
  0x8a   : > { %v752_v49 = vpop.permute.xlu1 %751  ;;  %1309 = vrot.lane.b32.xlu1 %v1304_v44, %s6404_s0 }
  0x8b   : > { %v891_v50 = vsel %vm866_vm10, %v738_v8, %v752_v49  ;;  %1342 = vrot.lane.b32.xlu0 %v1338_v45, %s6404_s0  ;;  %v4723_v8 = vld [vmem:[%s6395_s7 + $0x118] sm:$0xff]   ;;  %v4725_v45 = vld [vmem:[%s6395_s7 + $0x1e8] sm:$0xff]   ;;  %v4724_v49 = vld [vmem:[%s6395_s7 + $0x160] sm:$0xff]  }
  0x8c   : > { %3230 = vmatprep.mubr.bf16.mxu1 %v891_v50 }
  0x8e   : > { %1344 = vrot.lane.b32.xlu1 %v1339_v51, %s6404_s0  ;;  %v4726_v51 = vld [vmem:[%s6395_s7 + $0x120] sm:$0xff]  }
  0x8f   : > { %1328 = vrot.lane.b32.xlu0 %v1320_v53, %s6404_s0  ;;  %v4727_v53 = vld [vmem:[%s6395_s7 + $0x1a8] sm:$0xff]  }
  0x93   : > { %1265 = vrot.lane.b32.xlu0 %v1259_v32, %s6404_s0  ;;  %v4717_v32 = vld [vmem:[%s6395_s7 + $0x110] sm:$0xff]  }
  0x94   : > { %v732_v5 = vpop.permute.xlu1 %731 }
  0x95   : > { %v710_v4 = vpop.permute.xlu0 %709  ;;  %v883_v6 = vsel %vm866_vm10, %v716_v1, %v732_v5  ;;  %v5539_v1 = vld [vmem:[%s5094_s24] sm:$0xff]  }
  0x96   : > { %v875_v11 = vsel %vm866_vm10, %v692_v2, %v710_v4  ;;  %3231 = vmatmul.mubr.bf16.vlgmr.msra.gmra.mrb[0].mxu1 %v883_v6  ;;  %v4886_v5 = vld [vmem:[%s5117_s19] sm:$0xff]   ;;  %v4734_v4 = vld [vmem:[%s6395_s7 + $0x170] sm:$0xff]   ;;  %v993_v6 = vrot.slane %v5522_v56, 7 }
  0x97   : > { %3181 = vmatprep.mubr.bf16.mxu0 %v875_v11  ;;  %4338 = vmatpush3.bf16.msra.mxu1 %v4706_v3  ;;  %v794_v3 = vshrl.u32 %v4884_v0, 16  ;;  %v776_v0 = vrot.slane %v5533_v59, 1 }
  0x98   : > { %4339 = vmatprep.subr.bf16.mxu1 %v4708_v60  ;;  %v688_v17 = vpop.permute.xlu1 %687  ;;  %1330 = vrot.lane.b32.xlu0 %v1325_v10, %s6404_s0  ;;  %v5546_v60 = vshrl.u32 %v4886_v5, 16  ;;  %v4887_v10 = vld [vmem:[%s5117_s19 + $0x8] sm:$0xff]  }
  0x99   : > { %v686_v18 = vpop.permute.xlu0 %685  ;;  %v871_v44 = vsel %vm866_vm10, %v5429_v57, %v688_v17  ;;  %v4730_v57 = vld [vmem:[%s6395_s7 + $0x1f0] sm:$0xff]   ;;  %v5554_v11 = vshll.u32 %v4887_v10, 16  ;;  %v796_v17 = vrot.slane %v794_v3, 1  ;;  %v4752_v10 = vld [vmem:[%s6395_s7 + $0x2d8] sm:$0xff]  }
  0x9a   : > { %v868_v20 = vsel %vm866_vm10, %v4881_v55, %v686_v18  ;;  %v4729_v55 = vld [vmem:[%s6395_s7 + $0x168] sm:$0xff]   ;;  %v797_v18 = vrot.slane %v5533_v59, 2 }
  0x9b   : > { %3182 = vmatmul.mubr.bf16.vlgmr.msra.gmra.mrb[0].mxu0 %v868_v20  ;;  %4340 = vmatpush3.bf16.msra.mxu1 %v4710_v13  ;;  %v986_v20 = vrot.slane %v5546_v60, 7 }
  0x9c   : > { %4310 = vmatpush3.bf16.msra.mxu0 %v4709_v12  ;;  %4341 = vmatprep.subr.bf16.mxu1 %v4712_v16  ;;  %v734_v28 = vpop.permute.xlu1 %733  ;;  %v4735_v12 = vld [vmem:[%s6395_s7 + $0x1f8] sm:$0xff]   ;;  %v4736_v16 = vld [vmem:[%s6395_s7 + $0x130] sm:$0xff]  }
  0x9d   : > { %4311 = vmatprep.subr.bf16.mxu0 %v4711_v19  ;;  %v712_v31 = vpop.permute.xlu0 %711  ;;  %v887_v48 = vsel %vm866_vm10, %v718_v39, %v734_v28  ;;  %v4739_v19 = vld [vmem:[%s6395_s7 + $0x2c0] sm:$0xff]   ;;  %v4740_v28 = vld [vmem:[%s6395_s7 + $0x138] sm:$0xff]   ;;  %v5594_v39 = vld [vmem:[%s5094_s24 + $0x10] ss:$0 sps:$4 sm:$0x77]  }
  0x9e   : > { %v879_v33 = vsel %vm866_vm10, %v694_v24, %v712_v31  ;;  %v817_v24 = vrot.slane %v5533_v59, 3  ;;  %v798_v31 = vor.u32 %v797_v18, %v796_v17  ;;  %v4753_v17 = vld [vmem:[%s6395_s7 + $0x210] sm:$0xff]  }
  0x9f   : > { %4342 = vmatpush3.bf16.msra.mxu1 %v4714_v23  ;;  %3189 = vmatprep.mubr.bf16.mxu0 %v879_v33  ;;  %v816_v23 = vrot.slane %v794_v3, 2 }
  0xa0   : > { %4312 = vmatpush3.bf16.msra.mxu0 %v4713_v21  ;;  %4343 = vmatprep.subr.bf16.mxu1 %v4716_v27  ;;  %v5489_v41 = vpop.permute.xlu1 %783  ;;  %v996_v21 = vor.u32 %v5554_v11, %v993_v6 }
  0xa1   : > { %4313 = vmatprep.subr.bf16.mxu0 %v4715_v30  ;;  %v754_v43 = vpop.permute.xlu0 %753  ;;  %v4741_v30 = vld [vmem:[%s6395_s7 + $0x280] sm:$0xff]  }
  0xa2   : > { %v895_v38 = vsel %vm866_vm10, %v740_v36, %v754_v43  ;;  %v4744_v43 = vld [vmem:[%s6395_s7 + $0x2c8] sm:$0xff]  }
  0xa3   : > { %4344 = vmatpush3.bf16.msra.mxu1 %v4718_v34  ;;  %3238 = vmatprep.mubr.bf16.mxu1 %v895_v38  ;;  %v5590_v34 = vld [vmem:[%s5094_s24 + $0x8] sm:$0xff]  }
  0xa4   : > { %4314 = vmatpush3.bf16.msra.mxu0 %v4717_v32  ;;  %4345 = vmatprep.subr.bf16.mxu1 %v4721_v40  ;;  %v826_v46 = vpop.permute.xlu1 %825  ;;  %v5585_v32 = vshll.u32 %v4886_v5, 16  ;;  %v933_v36 = vrot.slane %v5590_v34, 1  ;;  %v935_v40 = vrot.slane %v5594_v39, 1 }
  0xa5   : > { %4315 = vmatprep.subr.bf16.mxu0 %v4720_v42  ;;  %3239 = vmatmul.mubr.bf16.gmra.mrb[4].mxu1 %v887_v48  ;;  %v806_v50 = vpop.permute.xlu0 %805  ;;  %v915_v33 = vsel %vm866_vm10, %v5353_v52, %v826_v46  ;;  %v997_v42 = vsel %vm982_vm7, %v986_v20, %v996_v21  ;;  %v932_v52 = vrot.slane %v5539_v1, 1  ;;  %v4743_v48 = vld [vmem:[%s6395_s7 + $0x240] sm:$0xff]  }
  0xa6   : > { %3190 = vmatmul.mubr.bf16.gmra.mrb[4].mxu0 %v871_v44  ;;  %v907_v54 = vsel %vm866_vm10, %v5366_v62, %v806_v50  ;;  %v4732_v62 = vld [vmem:[%s6395_s7 + $0x1b0] sm:$0xff]   ;;  %v4745_v44 = vld [vmem:[%s6395_s7 + $0x200] sm:$0xff]   ;;  %v989_v50 = vor.u32 %v5585_v32, %v986_v20 }
  0xa7   : > { %4346 = vmatpush3.bf16.msra.mxu1 %v4722_v9  ;;  %3279 = vmatprep.mubr.bf16.mxu0 %v907_v54  ;;  %v818_v9 = vor.u32 %v817_v24, %v816_v23  ;;  %v936_v54 = vsel %vm689_vm4, %v933_v36, %v935_v40  ;;  %v4756_v21 = vld [vmem:[%s6395_s7 + $0x2e0] sm:$0xff]   ;;  %v4755_v23 = vld [vmem:[%s6395_s7 + $0x258] sm:$0xff]  }
  0xa8   : > { %4316 = vmatpush3.bf16.msra.mxu0 %v4723_v8  ;;  %4347 = vmatprep.subr.bf16.mxu1 %v4725_v45  ;;  %v5527_v61 = vpop.permute.xlu1 %785  ;;  %v4746_v45 = vld [vmem:[%s6395_s7 + $0x288] sm:$0xff]  }
  0xa9   : > { %4317 = vmatprep.subr.bf16.mxu0 %v4724_v49  ;;  %v863_v63 = vpop.permute.xlu0 %862 }
  0xaa   : > { %v5543_v2 = vsel %vm866_vm10, %v5539_v1, %v863_v63  ;;  %v772_v63 = vor.u32 %v5329_v35, %v768_v29 }
  0xab   : > { %4348 = vmatpush3.bf16.msra.mxu1 %v4727_v53  ;;  %3328 = vmatprep.mubr.bf16.mxu1 %v5543_v2  ;;  %v799_v53 = vsel %vm695_vm1, %v5361_v58, %v798_v31  ;;  %v934_v58 = vsel %vm689_vm4, %v932_v52, %v933_v36  ;;  %v955_v31 = vrot.slane %v5590_v34, 2  ;;  %v957_v36 = vrot.slane %v5594_v39, 2 }
  0xac   : > { %4318 = vmatpush3.bf16.msra.mxu0 %v4726_v51  ;;  %4349 = vmatprep.subr.bf16.mxu1 %v4730_v57  ;;  %v5559_v13 = vpop.permute.xlu1 %827  ;;  %v4747_v51 = vld [vmem:[%s6395_s7 + $0x248] sm:$0xff]   ;;  %v4748_v57 = vld [vmem:[%s6395_s7 + $0x2d0] sm:$0xff]  }
  0xad   : > { %4319 = vmatprep.subr.bf16.mxu0 %v4729_v55  ;;  %v808_v15 = vpop.permute.xlu0 %807  ;;  %v899_v55 = vsel %vm866_vm10, %v5326_v7, %v5489_v41 }
  0xae   : > { %v911_v3 = vsel %vm866_vm10, %v799_v53, %v808_v15  ;;  %v4765_v53 = vld [vmem:[%s6395_s7 + $0x228] sm:$0xff]  }
  0xaf   : > { %4350 = vmatpush3.bf16.msra.mxu1 %v4732_v62  ;;  %v819_v62 = vsel %vm719_vm0, %v5347_v47, %v818_v9  ;;  %v4761_v9 = vld [vmem:[%s6395_s7 + $0x220] sm:$0xff]  }
  0xb0   : > { %4320 = vmatpush3.bf16.msra.mxu0 %v4731_v37  ;;  %4351 = vmatprep.subr.bf16.mxu1 %v4735_v12  ;;  %v951_v22 = vpop.permute.xlu1 %950  ;;  %v4749_v37 = vld [vmem:[%s6395_s7 + $0x208] sm:$0xff]   ;;  %v919_v35 = vsel %vm866_vm10, %v819_v62, %v5559_v13  ;;  %v777_v12 = vsel %vm664_vm2, %v772_v63, %v776_v0  ;;  %v4767_v62 = vld [vmem:[%s6395_s7 + $0x270] sm:$0xff]  }
  0xb1   : > { %4321 = vmatprep.subr.bf16.mxu0 %v4734_v4  ;;  %v865_v27 = vpop.permute.xlu0 %864  ;;  %v5653_v29 = vsel %vm866_vm10, %v936_v54, %v951_v22  ;;  %v903_v20 = vsel %vm866_vm10, %v777_v12, %v5527_v61  ;;  %v4758_v61 = vld [vmem:[%s6395_s7 + $0x2a0] sm:$0xff]   ;;  %v4766_v54 = vld [vmem:[%s6395_s7 + $0x2b0] sm:$0xff]  }
  0xb2   : > { %v5613_v46 = vsel %vm866_vm10, %v5590_v34, %v865_v27  ;;  %v4762_v34 = vld [vmem:[%s6395_s7 + $0x2a8] sm:$0xff]  }
  0xb3   : > { %4352 = vmatpush3.bf16.msra.mxu1 %v4737_v14  ;;  %v4751_v14 = vld [vmem:[%s6395_s7 + $0x250] sm:$0xff]  }
  0xb4   : > { %4322 = vmatpush3.bf16.msra.mxu0 %v4736_v16  ;;  %4393 = vmatprep.subr.bf16.mxu1 %v4739_v19  ;;  %v1005_v38 = vpop.permute.xlu1 %1004  ;;  %v1434_v16 = vrot.slane %v5653_v29, 1  ;;  %v4754_v19 = vld [vmem:[%s6395_s7 + $0x298] sm:$0xff]  }
  0xb5   : > { %4323 = vmatprep.subr.bf16.mxu0 %v4738_v26  ;;  %v949_v8 = vpop.permute.xlu0 %948  ;;  %v5616_v49 = vsel %vm866_vm10, %v997_v42, %v1005_v38  ;;  %v4757_v26 = vld [vmem:[%s6395_s7 + $0x218] sm:$0xff]   ;;  %v954_v42 = vrot.slane %v5539_v1, 2  ;;  %v5709_v38 = vld [vmem:[%s5117_s19 + $0x10] ss:$0 sps:$4 sm:$0x77]  }
  0xb6   : > { %3329 = vmatmul.mubr.bf16.vlgmr.msra.gmra.mrb[8].mxu1 %v915_v33  ;;  %v1440_v7 = vrot.slane %v5616_v49, 1  ;;  %v1112_v59 = vsel %vm866_vm10, %v934_v58, %v949_v8  ;;  %v5712_v52 = vshll.u32 %v5709_v38, 16  ;;  %v4764_v1 = vld [vmem:[%s6395_s7 + $0x2f0] sm:$0xff]   ;;  %v958_v8 = vsel %vm713_vm3, %v955_v31, %v957_v36  ;;  %v5811_v49 = vld [vmem:[%s5159_s25 + $0x8] sm:$0xff]   ;;  %v4784_v29 = vld [vmem:[%s6395_s7 + $0x3d8] sm:$0xff]  }
  0xb7   : > { %4394 = vmatpush3.bf16.msra.mxu1 %v4741_v30  ;;  %3336 = vmatprep.mubr.bf16.mxu1 %v5613_v46  ;;  %v1433_v18 = vrot.slane %v1112_v59, 1  ;;  %v4760_v30 = vld [vmem:[%s6395_s7 + $0x2e8] sm:$0xff]   ;;  %v1030_v58 = vrot.slane %v5585_v32, 2 }
  0xb8   : > { %4324 = vmatpush3.bf16.msra.mxu0 %v4740_v28  ;;  %4395 = vmatprep.subr.bf16.mxu1 %v4744_v43  ;;  %v5646_v5 = vpop.permute.xlu1 %975  ;;  %v4759_v28 = vld [vmem:[%s6395_s7 + $0x260] sm:$0xff]  }
  0xb9   : > { %4365 = vmatprep.subr.bf16.mxu0 %v4743_v48  ;;  %v1003_v41 = vpop.permute.xlu0 %1002  ;;  %v1435_v27 = vsel %vm689_vm4, %v1433_v18, %v1434_v16  ;;  %v5747_v63 = vsel %vm866_vm10, %v958_v8, %v5646_v5  ;;  %v4769_v5 = vld [vmem:[%s6395_s7 + $0x230] sm:$0xff]   ;;  %v4774_v18 = vld [vmem:[%s6395_s7 + $0x380] sm:$0xff]  }
  0xba   : > { %v1130_v47 = vsel %vm866_vm10, %v989_v50, %v1003_v41  ;;  %v1029_v50 = vrot.slane %v5546_v60, 1  ;;  %v1032_v41 = vrot.slane %v5522_v56, 1 }
  0xbb   : > { %3280 = vmatmul.mubr.bf16.vlgmr.msra.gmra.mrb[8].mxu0 %v899_v55  ;;  %4396 = vmatpush3.bf16.msra.mxu1 %v4746_v45  ;;  %v1439_v4 = vrot.slane %v1130_v47, 1  ;;  %v956_v45 = vsel %vm713_vm3, %v954_v42, %v955_v31  ;;  %v1001_v55 = vsel %vm982_vm7, %v993_v6, %v5712_v52  ;;  %v4768_v6 = vld [vmem:[%s6395_s7 + $0x2f8] sm:$0xff]   ;;  %v1037_v47 = vrot.slane %v5712_v52, 2  ;;  %v4778_v42 = vld [vmem:[%s6395_s7 + $0x388] sm:$0xff]  }
  0xbc   : > { %4366 = vmatpush3.bf16.msra.mxu0 %v4745_v44  ;;  %4397 = vmatprep.subr.bf16.mxu1 %v4748_v57  ;;  %v5680_v22 = vpop.permute.xlu1 %930  ;;  %v4763_v44 = vld [vmem:[%s6395_s7 + $0x268] sm:$0xff]   ;;  %v1015_v57 = vshrl.u32 %v5709_v38, 16 }
  0xbd   : > { %4367 = vmatprep.subr.bf16.mxu0 %v4747_v51  ;;  %3287 = vmatprep.mubr.bf16.mxu0 %v911_v3  ;;  %v974_v15 = vpop.permute.xlu0 %973  ;;  %v1441_v13 = vsel %vm689_vm4, %v1439_v4, %v1440_v7  ;;  %v1033_v3 = vrot.slane %v5554_v11, 2 }
  0xbe   : > { %3337 = vmatmul.mubr.bf16.gmra.mrb[12].mxu1 %v919_v35  ;;  %v1121_v0 = vsel %vm866_vm10, %v956_v45, %v974_v15  ;;  %v1036_v35 = vrot.slane %v1015_v57, 1 }
  0xbf   : > { %4398 = vmatpush3.bf16.msra.mxu1 %v4750_v25  ;;  %3426 = vmatprep.mubr.bf16.mxu1 %v1441_v13  ;;  %v4770_v25 = vld [vmem:[%s6395_s7 + $0x2b8] sm:$0xff]   ;;  %v1436_v12 = vrot.slane %v1121_v0, 1 }
  0xc0   : > { %4368 = vmatpush3.bf16.msra.mxu0 %v4749_v37  ;;  %4399 = vmatprep.subr.bf16.mxu1 %v4752_v10  ;;  %v978_v33 = vpop.permute.xlu1 %977  ;;  %v1437_v10 = vrot.slane %v5747_v63, 1  ;;  %v4771_v13 = vld [vmem:[%s6395_s7 + $0x278] sm:$0xff]   ;;  %v4782_v63 = vld [vmem:[%s6395_s7 + $0x390] sm:$0xff]  }
  0xc1   : > { %4369 = vmatprep.subr.bf16.mxu0 %v4751_v14  ;;  %v5685_v24 = vpop.permute.xlu0 %952  ;;  %v4772_v14 = vld [vmem:[%s6395_s7 + $0x3c0] sm:$0xff]  }
  0xc3   : > { %3288 = vmatmul.mubr.bf16.gmra.mrb[12].mxu0 %v903_v20  ;;  %4400 = vmatpush3.bf16.msra.mxu1 %v4754_v19  ;;  %v1438_v19 = vsel %vm689_vm4, %v1436_v12, %v1437_v10  ;;  %v1127_v20 = vsel %vm866_vm10, %v957_v36, %v978_v33  ;;  %v1430_v36 = vrot.slane %v5543_v2, 1 }
  0xc4   : > { %4370 = vmatpush3.bf16.msra.mxu0 %v4753_v17  ;;  %4401 = vmatprep.subr.bf16.mxu1 %v4756_v21  ;;  %v5720_v48 = vpop.permute.xlu1 %1047  ;;  %v4773_v17 = vld [vmem:[%s6395_s7 + $0x238] sm:$0xff]   ;;  %v4775_v21 = vld [vmem:[%s6395_s7 + $0x340] sm:$0xff]   ;;  %v1458_v2 = vrot.slane %v1127_v20, 1 }
  0xc5   : > { %4371 = vmatprep.subr.bf16.mxu0 %v4755_v23  ;;  %v1007_v43 = vpop.permute.xlu0 %1006  ;;  %3377 = vmatprep.mubr.bf16.mxu0 %v1435_v27  ;;  %v4776_v23 = vld [vmem:[%s6395_s7 + $0x3c8] sm:$0xff]   ;;  %v1118_v27 = vsel %vm866_vm10, %v935_v40, %v5685_v24  ;;  %v1431_v24 = vrot.slane %v5613_v46, 1 }
  0xc6   : > { %v1136_v37 = vsel %vm866_vm10, %v1001_v55, %v1007_v43  ;;  %v5804_v43 = vld [vmem:[%s5159_s25] sm:$0xff]   ;;  %v1459_v55 = vsel %vm689_vm4, %v1437_v10, %v1458_v2  ;;  %v4789_v10 = vld [vmem:[%s6395_s7 + $0x318] sm:$0xff]  }
  0xc7   : > { %4402 = vmatpush3.bf16.msra.mxu1 %v4758_v61  ;;  %v1460_v15 = vrot.slane %v1136_v37, 1  ;;  %v1034_v61 = vor.u32 %v1033_v3, %v1032_v41  ;;  %v4785_v41 = vld [vmem:[%s6395_s7 + $0x310] sm:$0xff]   ;;  %v4786_v37 = vld [vmem:[%s6395_s7 + $0x398] sm:$0xff]   ;;  %v4788_v3 = vld [vmem:[%s6395_s7 + $0x3e0] sm:$0xff]  }
  0xc8   : > { %4372 = vmatpush3.bf16.msra.mxu0 %v4757_v26  ;;  %4403 = vmatprep.subr.bf16.mxu1 %v4760_v30  ;;  %v5767_v4 = vpop.permute.xlu1 %1025  ;;  %v1031_v26 = vor.u32 %v1030_v58, %v1029_v50  ;;  %v5797_v30 = vor.u32 %v1037_v47, %v1036_v35  ;;  %v4780_v50 = vld [vmem:[%s6395_s7 + $0x3d0] sm:$0xff]  }
  0xc9   : > { %4373 = vmatprep.subr.bf16.mxu0 %v4759_v28  ;;  %v5728_v51 = vpop.permute.xlu0 %1045  ;;  %v1461_v28 = vsel %vm689_vm4, %v1440_v7, %v1460_v15  ;;  %v4790_v15 = vld [vmem:[%s6395_s7 + $0x3a0] sm:$0xff]  }
  0xca   : > { %v1035_v8 = vsel %vm695_vm1, %v1031_v26, %v1034_v61  ;;  %v1039_v46 = vsel %vm695_vm1, %v1034_v61, %v5797_v30  ;;  %v1010_v61 = vrot.slane %v5554_v11, 1 }
  0xcb   : > { %4404 = vmatpush3.bf16.msra.mxu1 %v4762_v34  ;;  %v1456_v34 = vrot.slane %v1118_v27, 1  ;;  %v4794_v27 = vld [vmem:[%s6395_s7 + $0x3a8] sm:$0xff]  }
  0xcc   : > { %4374 = vmatpush3.bf16.msra.mxu0 %v4761_v9  ;;  %4405 = vmatprep.subr.bf16.mxu1 %v4764_v1  ;;  %v1105_v33 = vpop.permute.xlu1 %1104  ;;  %v4777_v9 = vld [vmem:[%s6395_s7 + $0x300] sm:$0xff]   ;;  %v4779_v1 = vld [vmem:[%s6395_s7 + $0x348] sm:$0xff]  }
  0xcd   : > { %4375 = vmatprep.subr.bf16.mxu0 %v4763_v44  ;;  %v5765_v59 = vpop.permute.xlu0 %1023  ;;  %v5815_v7 = vsel %vm866_vm10, %v5811_v49, %v1105_v33  ;;  %v1457_v58 = vsel %vm689_vm4, %v1434_v16, %v1456_v34 }
  0xce   : > { %v1452_v45 = vrot.slane %v5815_v7, 1 }
  0xcf   : > { %4406 = vmatpush3.bf16.msra.mxu1 %v4766_v54  ;;  %v1432_v54 = vsel %vm689_vm4, %v1430_v36, %v1431_v24  ;;  %v4795_v36 = vld [vmem:[%s6395_s7 + $0x368] sm:$0xff]  }
  0xd0   : > { %4376 = vmatpush3.bf16.msra.mxu0 %v4765_v53  ;;  %4407 = vmatprep.subr.bf16.mxu1 %v4768_v6  ;;  %v1109_v53 = vsel %vm866_vm10, %v5594_v39, %v5680_v22  ;;  %v1148_v39 = vsel %vm866_vm10, %v1035_v8, %v5728_v51  ;;  %v5850_v22 = vsel %vm866_vm10, %v1039_v46, %v5720_v48  ;;  %v4783_v51 = vld [vmem:[%s6395_s7 + $0x350] sm:$0xff]  }
  0xd1   : > { %4377 = vmatprep.subr.bf16.mxu0 %v4767_v62  ;;  %v1103_v31 = vpop.permute.xlu0 %1102  ;;  %v4781_v62 = vld [vmem:[%s6395_s7 + $0x308] sm:$0xff]   ;;  %v1454_v0 = vrot.slane %v1109_v53, 1  ;;  %v1445_v48 = vrot.slane %v1148_v39, 1  ;;  %v1446_v6 = vrot.slane %v5850_v22, 1  ;;  %v4798_v8 = vld [vmem:[%s6395_s7 + $0x3b0] sm:$0xff]   ;;  %v1012_v46 = vor.u32 %v1010_v61, %v5522_v56 }
  0xd2   : > { %v5808_v40 = vsel %vm866_vm10, %v5804_v43, %v1103_v31  ;;  %v4894_v31 = vld [vmem:[%s5256_s23] sm:$0xff]   ;;  %v4813_v22 = vld [vmem:[%s6395_s7 + $0x408] sm:$0xff]  }
  0xd3   : > { %4408 = vmatpush3.bf16.msra.mxu1 %v4770_v25  ;;  %v1451_v44 = vrot.slane %v5808_v40, 1  ;;  %v4787_v25 = vld [vmem:[%s6395_s7 + $0x358] sm:$0xff]   ;;  %v1455_v35 = vsel %vm689_vm4, %v1431_v24, %v1454_v0  ;;  %v1447_v12 = vsel %vm689_vm4, %v1445_v48, %v1446_v6  ;;  %v5909_v33 = vshrl.u32 %v4894_v31, 16  ;;  %v4797_v24 = vld [vmem:[%s6395_s7 + $0x328] sm:$0xff]  }
  0xd4   : > { %4378 = vmatpush3.bf16.msra.mxu0 %v4769_v5  ;;  %4449 = vmatprep.subr.bf16.mxu1 %v4772_v14  ;;  %v1089_v5 = vpop.permute.xlu1 %1088  ;;  %v1008_v14 = vrot.slane %v5585_v32, 1  ;;  %v1062_v32 = vrot.slane %v5811_v49, 7 }
  0xd5   : > { %4379 = vmatprep.subr.bf16.mxu0 %v4771_v13  ;;  %v1453_v16 = vsel %vm689_vm4, %v1451_v44, %v1452_v45  ;;  %v1087_v47 = vpop.permute.xlu0 %1086  ;;  %v4792_v13 = vld [vmem:[%s6395_s7 + $0x3e8] sm:$0xff]   ;;  %v1013_v44 = vrot.slane %v5712_v52, 1  ;;  %v1232_v52 = vrot.slane %v5909_v33, 7 }
  0xd6   : > { %3427 = vmatmul.mubr.bf16.vlgmr.msra.gmra.mrb[16].mxu1 %v1438_v19  ;;  %v4793_v19 = vld [vmem:[%s6395_s7 + $0x320] sm:$0xff]  }
  0xd7   : > { %4450 = vmatpush3.bf16.msra.mxu1 %v4774_v18  ;;  %3434 = vmatprep.mubr.bf16.mxu1 %v1461_v28  ;;  %v4791_v18 = vld [vmem:[%s6395_s7 + $0x360] sm:$0xff]   ;;  %v4796_v28 = vld [vmem:[%s6395_s7 + $0x3f0] sm:$0xff]  }
  0xd8   : > { %4380 = vmatpush3.bf16.msra.mxu0 %v4773_v17  ;;  %4451 = vmatprep.subr.bf16.mxu1 %v4776_v23  ;;  %v1061_v17 = vrot.slane %v5804_v43, 7  ;;  %v4893_v23 = vld [vmem:[%s5256_s23 + $0x8] sm:$0xff]  }
  0xd9   : > { %4421 = vmatprep.subr.bf16.mxu0 %v4775_v21  ;;  %v1050_v20 = vpop.permute.xlu0 %1049  ;;  %v5896_v21 = vpop.permute.xlu1 %1027  ;;  %v5899_v26 = vshrl.u32 %v4893_v23, 16 }
  0xda   : > { %v1063_v11 = vsel %vm969_vm6, %v1061_v17, %v1062_v32 }
  0xdb   : > { %3378 = vmatmul.mubr.bf16.vlgmr.msra.gmra.mrb[16].mxu0 %v1432_v54  ;;  %4452 = vmatpush3.bf16.msra.mxu1 %v4778_v42  ;;  %v5917_v42 = vshll.u32 %v4893_v23, 16  ;;  %v1234_v34 = vrot.slane %v5899_v26, 7  ;;  %v5931_v53 = vsel %vm866_vm10, %v1063_v11, %v1089_v5  ;;  %v4799_v54 = vld [vmem:[%s6395_s7 + $0x370] sm:$0xff]   ;;  %v4809_v11 = vld [vmem:[%s6395_s7 + $0x400] sm:$0xff]  }
  0xdc   : > { %3385 = vmatprep.mubr.bf16.mxu0 %v1457_v58  ;;  %4422 = vmatpush3.bf16.msra.mxu0 %v4777_v9  ;;  %v4802_v58 = vld [vmem:[%s6395_s7 + $0x3b8] sm:$0xff]  }
  0xdd   : > { %4423 = vmatprep.subr.bf16.mxu0 %v4779_v1  ;;  %4453 = vmatprep.subr.bf16.mxu1 %v4780_v50  ;;  %v1107_v2 = vpop.permute.xlu0 %1106  ;;  %v1091_v9 = vpop.permute.xlu1 %1090  ;;  %v1009_v1 = vor.u32 %v1008_v14, %v5546_v60  ;;  %v1157_v50 = vsel %vm866_vm10, %v1061_v17, %v1087_v47  ;;  %v4800_v60 = vld [vmem:[%s6395_s7 + $0x3f8] sm:$0xff]  }
  0xde   : > { %3435 = vmatmul.mubr.bf16.gmra.mrb[20].mxu1 %v1459_v55  ;;  %v5940_v55 = vld [vmem:[%s5159_s25 + $0x10] ss:$0 sps:$4 sm:$0x77]   ;;  %v1448_v0 = vrot.slane %v1157_v50, 1  ;;  %v4803_v47 = vld [vmem:[%s6395_s7 + $0x378] sm:$0xff]  }
  0xdf   : > { %4454 = vmatpush3.bf16.msra.mxu1 %v4782_v63  ;;  %3524 = vmatprep.mubr.bf16.mxu1 %v1453_v16  ;;  %v5944_v56 = vsel %vm866_vm10, %v5940_v55, %v1107_v2  ;;  %v1235_v16 = vor.u32 %v1234_v34, %v5917_v42  ;;  %v1011_v48 = vsel %vm664_vm2, %v1009_v1, %v1010_v61  ;;  %v4812_v1 = vld [vmem:[%s6395_s7 + $0x4d0] sm:$0xff]  }
  0xe0   : > { %4424 = vmatpush3.bf16.msra.mxu0 %v4781_v62  ;;  %4455 = vmatprep.subr.bf16.mxu1 %v4784_v29  ;;  %v4801_v62 = vld [vmem:[%s6395_s7 + $0x330] sm:$0xff]   ;;  %v5957_v29 = vshll.u32 %v4894_v31, 16 }
  0xe1   : > { %4425 = vmatprep.subr.bf16.mxu0 %v4783_v51  ;;  %v5953_v63 = vpop.permute.xlu0 %1189  ;;  %v5955_v39 = vpop.permute.xlu1 %1191  ;;  %v1449_v51 = vrot.slane %v5931_v53, 1 }
  0xe2   : > { %v1233_v5 = vor.u32 %v1232_v52, %v5957_v29 }
  0xe3   : > { %3386 = vmatmul.mubr.bf16.gmra.mrb[20].mxu0 %v1455_v35  ;;  %4456 = vmatpush3.bf16.msra.mxu1 %v4786_v37  ;;  %v4804_v37 = vld [vmem:[%s6395_s7 + $0x4c0] sm:$0xff]   ;;  %v1236_v35 = vsel %vm982_vm7, %v1232_v52, %v1235_v16  ;;  %v1450_v14 = vsel %vm689_vm4, %v1448_v0, %v1449_v51  ;;  %v6060_v0 = vld [vmem:[%s5256_s23 + $0x10] ss:$0 sps:$4 sm:$0x77]  }
  0xe4   : > { %4426 = vmatpush3.bf16.msra.mxu0 %v4785_v41  ;;  %4457 = vmatprep.subr.bf16.mxu1 %v4788_v3  ;;  %v1014_v41 = vsel %vm664_vm2, %v1012_v46, %v1013_v44  ;;  %v1468_v3 = vrot.slane %v5944_v56, 1 }
  0xe5   : > { %4427 = vmatprep.subr.bf16.mxu0 %v4787_v25  ;;  %3475 = vmatprep.mubr.bf16.mxu0 %v1447_v12  ;;  %v1170_v25 = vrot.slane %v5804_v43, 1  ;;  %v5979_v12 = vsel %vm866_vm10, %v1014_v41, %v5767_v4  ;;  %v1163_v43 = vsel %vm866_vm10, %v1062_v32, %v1091_v9  ;;  %v4808_v4 = vld [vmem:[%s6395_s7 + $0x4c8] sm:$0xff]   ;;  %v1173_v32 = vrot.slane %v5940_v55, 1  ;;  %v4817_v41 = vld [vmem:[%s6395_s7 + $0x410] sm:$0xff]  }
  0xe6   : > { %v1469_v17 = vsel %vm689_vm4, %v1452_v45, %v1468_v3  ;;  %v1466_v45 = vrot.slane %v1163_v43, 1  ;;  %v4811_v9 = vld [vmem:[%s6395_s7 + $0x448] sm:$0xff]  }
  0xe7   : > { %4458 = vmatpush3.bf16.msra.mxu1 %v4790_v15  ;;  %v4806_v15 = vld [vmem:[%s6395_s7 + $0x480] sm:$0xff]  }
  0xe8   : > { %4428 = vmatpush3.bf16.msra.mxu0 %v4789_v10  ;;  %4459 = vmatprep.subr.bf16.mxu1 %v4792_v13  ;;  %v1139_v10 = vsel %vm866_vm10, %v1011_v48, %v5765_v59  ;;  %v1154_v13 = vsel %vm866_vm10, %v5797_v30, %v1050_v20  ;;  %v4805_v59 = vld [vmem:[%s6395_s7 + $0x338] sm:$0xff]   ;;  %v1245_v30 = vpop.permute.xlu1 %1244  ;;  %v4807_v20 = vld [vmem:[%s6395_s7 + $0x440] sm:$0xff]  }
  0xe9   : > { %4429 = vmatprep.subr.bf16.mxu0 %v4791_v18  ;;  %v1171_v18 = vrot.slane %v5811_v49, 1  ;;  %v6006_v61 = vsel %vm866_vm10, %v1236_v35, %v1245_v30  ;;  %v1017_v49 = vor.u32 %v1015_v57, %v1013_v44  ;;  %v1464_v31 = vrot.slane %v1154_v13, 1  ;;  %v4818_v48 = vld [vmem:[%s6395_s7 + $0x498] sm:$0xff]   ;;  %v4822_v13 = vld [vmem:[%s6395_s7 + $0x4a0] sm:$0xff]  }
  0xea   : > { %v1517_v2 = vrot.slane %v6006_v61, 2  ;;  %v1467_v44 = vsel %vm689_vm4, %v1449_v51, %v1466_v45  ;;  %v1237_v51 = vshrl.u32 %v6060_v0, 16  ;;  %v1210_v35 = vrot.slane %v5899_v26, 6 }
  0xeb   : > { %4460 = vmatpush3.bf16.msra.mxu1 %v4794_v27  ;;  %v1442_v27 = vrot.slane %v1139_v10, 1  ;;  %v1174_v38 = vsel %vm689_vm4, %v1171_v18, %v1173_v32  ;;  %v1465_v53 = vsel %vm689_vm4, %v1446_v6, %v1464_v31  ;;  %v4816_v6 = vld [vmem:[%s6395_s7 + $0x4d8] sm:$0xff]   ;;  %v1213_v10 = vrot.slane %v5917_v42, 7 }
  0xec   : > { %4430 = vmatpush3.bf16.msra.mxu0 %v4793_v19  ;;  %4461 = vmatprep.subr.bf16.mxu1 %v4796_v28  ;;  %v1243_v19 = vpop.permute.xlu0 %1242  ;;  %v1443_v28 = vrot.slane %v5979_v12, 1  ;;  %v1229_v16 = vpop.permute.xlu1 %1228  ;;  %v1507_v61 = vrot.slane %v5808_v40, 2 }
  0xed   : > { %4431 = vmatprep.subr.bf16.mxu0 %v4795_v36  ;;  %v1366_v23 = vsel %vm866_vm10, %v1233_v5, %v1243_v19  ;;  %v4810_v36 = vld [vmem:[%s6395_s7 + $0x488] sm:$0xff]   ;;  %v1202_v5 = vrot.slane %v5909_v33, 6  ;;  %v4823_v19 = vld [vmem:[%s6395_s7 + $0x460] sm:$0xff]  }
  0xee   : > { %v1516_v57 = vrot.slane %v1366_v23, 2  ;;  %v1444_v46 = vsel %vm689_vm4, %v1442_v27, %v1443_v28  ;;  %v4826_v27 = vld [vmem:[%s6395_s7 + $0x4a8] sm:$0xff]  }
  0xef   : > { %4462 = vmatpush3.bf16.msra.mxu1 %v4798_v8  ;;  %v1145_v8 = vsel %vm866_vm10, %v1017_v49, %v5896_v21  ;;  %v4828_v49 = vld [vmem:[%s6395_s7 + $0x4f0] sm:$0xff]  }
  0xf0   : > { %4432 = vmatpush3.bf16.msra.mxu0 %v4797_v24  ;;  %4463 = vmatprep.subr.bf16.mxu1 %v4800_v60  ;;  %v1172_v24 = vsel %vm689_vm4, %v1170_v25, %v1171_v18  ;;  %v6032_v50 = vpop.permute.xlu0 %1226  ;;  %v4814_v60 = vld [vmem:[%s6395_s7 + $0x490] sm:$0xff]   ;;  %v1518_v52 = vsel %vm713_vm3, %v1516_v57, %v1517_v2  ;;  %v1205_v25 = vrot.slane %v5957_v29, 7  ;;  %v4829_v57 = vld [vmem:[%s6395_s7 + $0x428] sm:$0xff]  }
  0xf1   : > { %4433 = vmatprep.subr.bf16.mxu0 %v4799_v54  ;;  %v1348_v21 = vsel %vm866_vm10, %v1172_v24, %v5953_v63  ;;  %v6044_v54 = vsel %vm866_vm10, %v1174_v38, %v5955_v39  ;;  %v4830_v38 = vld [vmem:[%s6395_s7 + $0x4b0] sm:$0xff]  }
  0xf2   : > { %v1510_v63 = vrot.slane %v1348_v21, 2  ;;  %v1511_v39 = vrot.slane %v6044_v54, 2  ;;  %v1206_v30 = vor.u32 %v1205_v25, %v1202_v5  ;;  %v4837_v5 = vld [vmem:[%s6395_s7 + $0x438] sm:$0xff]  }
  0xf3   : > { %4464 = vmatpush3.bf16.msra.mxu1 %v4802_v58  ;;  %v1462_v58 = vrot.slane %v1145_v8, 1  ;;  %v4831_v8 = vld [vmem:[%s6395_s7 + $0x470] sm:$0xff]   ;;  %v4848_v54 = vld [vmem:[%s6395_s7 + $0x5d8] sm:$0xff]  }
  0xf4   : > { %4434 = vmatpush3.bf16.msra.mxu0 %v4801_v62  ;;  %4505 = vmatprep.subr.bf16.mxu1 %v4804_v37  ;;  %v4815_v62 = vld [vmem:[%s6395_s7 + $0x450] sm:$0xff]   ;;  %v4820_v37 = vld [vmem:[%s6395_s7 + $0x4e0] sm:$0xff]   ;;  %v6072_v3 = vpop.permute.xlu0 %1193  ;;  %v1512_v43 = vsel %vm713_vm3, %v1510_v63, %v1511_v39 }
  0xf5   : > { %4435 = vmatprep.subr.bf16.mxu0 %v4803_v47  ;;  %v4819_v47 = vld [vmem:[%s6395_s7 + $0x458] sm:$0xff]   ;;  %v1463_v12 = vsel %vm689_vm4, %v1443_v28, %v1462_v58  ;;  %v4825_v28 = vld [vmem:[%s6395_s7 + $0x420] sm:$0xff]  }
  0xf6   : > { %3525 = vmatmul.mubr.bf16.vlgmr.msra.gmra.mrb[24].mxu1 %v1450_v14  ;;  %v6083_v14 = vshll.u32 %v6060_v0, 16  ;;  %v4835_v58 = vld [vmem:[%s6395_s7 + $0x478] sm:$0xff]  }
  0xf7   : > { %4506 = vmatpush3.bf16.msra.mxu1 %v4806_v15  ;;  %3532 = vmatprep.mubr.bf16.mxu1 %v1469_v17  ;;  %v1239_v15 = vrot.slane %v1237_v51, 7  ;;  %v1247_v17 = vpop.permute.xlu1 %1246 }
  0xf8   : > { %4436 = vmatpush3.bf16.msra.mxu0 %v4805_v59  ;;  %4507 = vmatprep.subr.bf16.mxu1 %v4808_v4  ;;  %v4821_v59 = vld [vmem:[%s6395_s7 + $0x418] sm:$0xff]   ;;  %v4824_v4 = vld [vmem:[%s6395_s7 + $0x4e8] sm:$0xff]   ;;  %v1231_v18 = vpop.permute.xlu0 %1230 }
  0xf9   : > { %4477 = vmatprep.subr.bf16.mxu0 %v4807_v20  ;;  %v1214_v20 = vor.u32 %v1213_v10, %v1210_v35  ;;  %v1240_v23 = vor.u32 %v1239_v15, %v6083_v14  ;;  %v4840_v35 = vld [vmem:[%s6395_s7 + $0x5c8] sm:$0xff]   ;;  %v4839_v15 = vld [vmem:[%s6395_s7 + $0x540] sm:$0xff]  }
  0xfb   : > { %3476 = vmatmul.mubr.bf16.vlgmr.msra.gmra.mrb[24].mxu0 %v1444_v46  ;;  %4508 = vmatpush3.bf16.msra.mxu1 %v4810_v36  ;;  %v6112_v45 = vpop.permute.xlu1 %1305  ;;  %v4827_v36 = vld [vmem:[%s6395_s7 + $0x468] sm:$0xff]   ;;  %v1241_v24 = vsel %vm982_vm7, %v1234_v34, %v1240_v23  ;;  %v4832_v34 = vld [vmem:[%s6395_s7 + $0x4f8] sm:$0xff]  }
  0xfc   : > { %3483 = vmatprep.mubr.bf16.mxu0 %v1465_v53  ;;  %4478 = vmatpush3.bf16.msra.mxu0 %v4809_v11  ;;  %v6114_v31 = vpop.permute.xlu0 %1307  ;;  %v1215_v11 = vsel %vm1198_vm9, %v1206_v30, %v1214_v20  ;;  %v1372_v46 = vsel %vm866_vm10, %v1241_v24, %v1247_v17  ;;  %v4842_v17 = vld [vmem:[%s6395_s7 + $0x588] sm:$0xff]   ;;  %v1531_v24 = vrot.slane %v5944_v56, 2  ;;  %v4852_v56 = vld [vmem:[%s6395_s7 + $0x5e0] sm:$0xff]  }
  0xfd   : > { %4479 = vmatprep.subr.bf16.mxu0 %v4811_v9  ;;  %4509 = vmatprep.subr.bf16.mxu1 %v4812_v1  ;;  %v1357_v9 = vsel %vm866_vm10, %v1206_v30, %v6032_v50  ;;  %v6132_v1 = vsel %vm866_vm10, %v1215_v11, %v1229_v16  ;;  %v4843_v30 = vld [vmem:[%s6395_s7 + $0x548] sm:$0xff]  }
  0xfe   : > { %3533 = vmatmul.mubr.bf16.gmra.mrb[28].mxu1 %v1467_v44  ;;  %v1219_v44 = vrot.slane %v6083_v14, 7  ;;  %v1513_v50 = vrot.slane %v1357_v9, 2  ;;  %v1514_v21 = vrot.slane %v6132_v1, 2  ;;  %v4850_v9 = vld [vmem:[%s6395_s7 + $0x598] sm:$0xff]   ;;  %v4849_v1 = vld [vmem:[%s6395_s7 + $0x510] sm:$0xff]  }
  0xff   : > { %4510 = vmatpush3.bf16.msra.mxu1 %v4814_v60  ;;  %3622 = vmatprep.mubr.bf16.mxu1 %v1518_v52  ;;  %v6142_v53 = vpop.permute.xlu1 %1261  ;;  %v4836_v52 = vld [vmem:[%s6395_s7 + $0x5c0] sm:$0xff]  }
 0x100   : > { %4480 = vmatpush3.bf16.msra.mxu0 %v4813_v22  ;;  %4511 = vmatprep.subr.bf16.mxu1 %v4816_v6  ;;  %v6144_v60 = vpop.permute.xlu0 %1263  ;;  %v4834_v22 = vld [vmem:[%s6395_s7 + $0x4b8] sm:$0xff]   ;;  %v4833_v6 = vld [vmem:[%s6395_s7 + $0x430] sm:$0xff]   ;;  %v1220_v63 = vsel %vm1198_vm9, %v1214_v20, %v1219_v44  ;;  %v1515_v16 = vsel %vm713_vm3, %v1513_v50, %v1514_v21  ;;  %v4854_v50 = vld [vmem:[%s6395_s7 + $0x5a0] sm:$0xff]  }
 0x101   : > { %4481 = vmatprep.subr.bf16.mxu0 %v4815_v62  ;;  %v1537_v62 = vrot.slane %v1372_v46, 2  ;;  %v1363_v25 = vsel %vm866_vm10, %v1220_v63, %v1231_v18  ;;  %v4841_v18 = vld [vmem:[%s6395_s7 + $0x500] sm:$0xff]   ;;  %v4844_v20 = vld [vmem:[%s6395_s7 + $0x5d0] sm:$0xff]   ;;  %v1248_v63 = vrot.slane %v5957_v29, 1  ;;  %v4859_v29 = vld [vmem:[%s6395_s7 + $0x568] sm:$0xff]  }
 0x103   : > { %3484 = vmatmul.mubr.bf16.gmra.mrb[28].mxu0 %v1463_v12  ;;  %4512 = vmatpush3.bf16.msra.mxu1 %v4818_v48  ;;  %v4838_v48 = vld [vmem:[%s6395_s7 + $0x580] sm:$0xff]   ;;  %v1538_v10 = vsel %vm713_vm3, %v1517_v2, %v1537_v62  ;;  %v6183_v12 = vld [vmem:[%s5341_s16 + $0x8] sm:$0xff]   ;;  %v1508_v2 = vrot.slane %v5815_v7, 2 }
 0x104   : > { %4482 = vmatpush3.bf16.msra.mxu0 %v4817_v41  ;;  %4513 = vmatprep.subr.bf16.mxu1 %v4820_v37  ;;  %v6165_v41 = vld [vmem:[%s5341_s16] sm:$0xff]   ;;  %v1278_v55 = vrot.slane %v6183_v12, 6  ;;  %v1312_v62 = vrot.slane %v6183_v12, 7 }
 0x105   : > { %4483 = vmatprep.subr.bf16.mxu0 %v4819_v47  ;;  %3573 = vmatprep.mubr.bf16.mxu0 %v1512_v43  ;;  %v1277_v37 = vrot.slane %v6165_v41, 6  ;;  %v1354_v47 = vsel %vm866_vm10, %v1173_v32, %v6072_v3  ;;  %v1341_v32 = vpop.permute.xlu1 %1340  ;;  %v1343_v3 = vpop.permute.xlu0 %1342  ;;  %v1509_v23 = vsel %vm713_vm3, %v1507_v61, %v1508_v2  ;;  %v1532_v46 = vsel %vm713_vm3, %v1508_v2, %v1531_v24  ;;  %v4861_v61 = vld [vmem:[%s6395_s7 + $0x528] sm:$0xff]   ;;  %v6304_v2 = vld [vmem:[%s5341_s16 + $0x10] ss:$0 sps:$4 sm:$0x77]   ;;  %s4028_s16 = sshll.u32 %s6431_s30, 2 }
 0x106   : > { %v1401_v43 = vsel %vm866_vm10, %v6165_v41, %v1341_v32  ;;  %s612_s27 = sadd.s32 %s4029_s28, %s4028_s16 }
 0x107   : > { %4514 = vmatpush3.bf16.msra.mxu1 %v4822_v13  ;;  %v6193_v13 = vsel %vm866_vm10, %v6183_v12, %v1343_v3  ;;  %v1279_v40 = vsel %vm1185_vm8, %v1277_v37, %v1278_v55  ;;  %v1528_v7 = vrot.slane %v1401_v43, 2  ;;  %v1253_v3 = vrot.slane %v6083_v14, 1  ;;  %s4030_s22 = sshll.u32 %s612_s27, 3 }
 0x108   : > { %4484 = vmatpush3.bf16.msra.mxu0 %v4821_v59  ;;  %4515 = vmatprep.subr.bf16.mxu1 %v4824_v4  ;;  %v1533_v59 = vrot.slane %v1354_v47, 2  ;;  %v1535_v4 = vrot.slane %v1363_v25, 2  ;;  %v6225_v11 = vsel %vm866_vm10, %v1279_v40, %v6114_v31  ;;  %v4847_v31 = vld [vmem:[%s6395_s7 + $0x550] sm:$0xff]   ;;  %v4857_v47 = vld [vmem:[%s6395_s7 + $0x520] sm:$0xff]   ;;  %v4866_v40 = vld [vmem:[%s6395_s7 + $0x5b8] sm:$0xff]   ;;  %s614_s24 = scalar_lea.vmem %s6397_s9, %s4030_s22 }
 0x109   : > { %4485 = vmatprep.subr.bf16.mxu0 %v4823_v19  ;;  %v1529_v19 = vrot.slane %v6193_v13, 2  ;;  %v4870_v13 = vld [vmem:[%s6395_s7 + $0x608] sm:$0xff]  }
 0x10b   : > { %4516 = vmatpush3.bf16.msra.mxu1 %v4826_v27  ;;  %v1384_v27 = vsel %vm866_vm10, %v1277_v37, %v6112_v45  ;;  %v4845_v45 = vld [vmem:[%s6395_s7 + $0x508] sm:$0xff]   ;;  %v1250_v37 = vrot.slane %v5917_v42, 1  ;;  %v1249_v42 = vor.u32 %v1248_v63, %v5909_v33  ;;  %v4864_v33 = vld [vmem:[%s6395_s7 + $0x5f8] sm:$0xff]  }
 0x10c   : > { %4486 = vmatpush3.bf16.msra.mxu0 %v4825_v28  ;;  %4517 = vmatprep.subr.bf16.mxu1 %v4828_v49  ;;  %v1534_v28 = vsel %vm713_vm3, %v1511_v39, %v1533_v59  ;;  %v1536_v49 = vsel %vm713_vm3, %v1514_v21, %v1535_v4  ;;  %v1530_v39 = vsel %vm713_vm3, %v1528_v7, %v1529_v19  ;;  %v4853_v21 = vld [vmem:[%s6395_s7 + $0x518] sm:$0xff]   ;;  %v1314_v4 = vrot.slane %v6304_v2, 7 }
 0x10d   : > { %4487 = vmatprep.subr.bf16.mxu0 %v4827_v36  ;;  %v4846_v36 = vld [vmem:[%s6395_s7 + $0x590] sm:$0xff]   ;;  %v1252_v32 = vor.u32 %v1250_v37, %v5899_v26  ;;  %v1251_v7 = vsel %vm664_vm2, %v1249_v42, %v1250_v37 }
 0x10e   : > { %v4863_v26 = vld [vmem:[%s6395_s7 + $0x570] sm:$0xff]  }
 0x10f   : > { %4518 = vmatpush3.bf16.msra.mxu1 %v4830_v38  ;;  %v1522_v38 = vrot.slane %v1384_v27, 2  ;;  %v4867_v27 = vld [vmem:[%s6395_s7 + $0x578] sm:$0xff]  }
 0x110   : > { %4488 = vmatpush3.bf16.msra.mxu0 %v4829_v57  ;;  %4519 = vmatprep.subr.bf16.mxu1 %v4832_v34  ;;  %v1523_v57 = vrot.slane %v6225_v11, 2  ;;  %v1327_v34 = vpop.permute.xlu1 %1326  ;;  %v4872_v11 = vld [vmem:[%s6395_s7 + $0x618] sm:$0xff]  }
 0x111   : > { %4489 = vmatprep.subr.bf16.mxu0 %v4831_v8  ;;  %v4851_v8 = vld [vmem:[%s6395_s7 + $0x558] sm:$0xff]  }
 0x112   : > { %v1524_v44 = vsel %vm713_vm3, %v1522_v38, %v1523_v57 }
 0x113   : > { %4520 = vmatpush3.bf16.msra.mxu1 %v4834_v22  ;;  %v4856_v22 = vld [vmem:[%s6395_s7 + $0x5e8] sm:$0xff]  }
 0x114   : > { %4490 = vmatpush3.bf16.msra.mxu0 %v4833_v6  ;;  %4561 = vmatprep.subr.bf16.mxu1 %v4836_v52  ;;  %v1311_v6 = vrot.slane %v6165_v41, 7  ;;  %v4855_v52 = vld [vmem:[%s6395_s7 + $0x560] sm:$0xff]  }
 0x115   : > { %4491 = vmatprep.subr.bf16.mxu0 %v4835_v58  ;;  %v1310_v58 = vpop.permute.xlu1 %1309 }
 0x116   : > { %3623 = vmatmul.mubr.bf16.vlgmr.msra.gmra.mrb[32].mxu1 %v1515_v16  ;;  %v4858_v16 = vld [vmem:[%s6395_s7 + $0x5a8] sm:$0xff]   ;;  %v1313_v25 = vsel %vm969_vm6, %v1311_v6, %v1312_v62 }
 0x117   : > { %4562 = vmatpush3.bf16.msra.mxu1 %v4838_v48  ;;  %3630 = vmatprep.mubr.bf16.mxu1 %v1538_v10  ;;  %v1329_v48 = vpop.permute.xlu0 %1328  ;;  %v4862_v10 = vld [vmem:[%s6395_s7 + $0x5b0] sm:$0xff]  }
 0x118   : > { %4492 = vmatpush3.bf16.msra.mxu0 %v4837_v5  ;;  %4563 = vmatprep.subr.bf16.mxu1 %v4840_v35  ;;  %v4860_v5 = vld [vmem:[%s6395_s7 + $0x5f0] sm:$0xff]   ;;  %v1396_v43 = vsel %vm866_vm10, %v1313_v25, %v1329_v48  ;;  %v4052_v48 = vld [vmem:[%s6396_s8] ss:$0 sm:$0xff] }
 0x119   : > { %4533 = vmatprep.subr.bf16.mxu0 %v4839_v15  ;;  %v1345_v35 = vpop.permute.xlu1 %1344  ;;  %v1393_v15 = vsel %vm866_vm10, %v1311_v6, %v1327_v34 }
 0x11a   : > { %v1405_v59 = vsel %vm866_vm10, %v6304_v2, %v1345_v35 }
 0x11b   : > { %3574 = vmatmul.mubr.bf16.vlgmr.msra.gmra.mrb[32].mxu0 %v1509_v23  ;;  %4564 = vmatpush3.bf16.msra.mxu1 %v4842_v17  ;;  %v1266_v14 = vpop.permute.xlu0 %1265  ;;  %v1525_v17 = vrot.slane %v1393_v15, 2  ;;  %v1545_v23 = vrot.slane %v1405_v59, 2 }
 0x11c   : > { %3581 = vmatprep.mubr.bf16.mxu0 %v1534_v28  ;;  %4534 = vmatpush3.bf16.msra.mxu0 %v4841_v18  ;;  %v1526_v18 = vrot.slane %v1396_v43, 2  ;;  %v1315_v28 = vsel %vm969_vm6, %v1312_v62, %v1314_v4 }
 0x11d   : > { %4535 = vmatprep.subr.bf16.mxu0 %v4843_v30  ;;  %4565 = vmatprep.subr.bf16.mxu1 %v4844_v20  ;;  %v1254_v30 = vsel %vm664_vm2, %v1252_v32, %v1253_v3  ;;  %v4865_v20 = vld [vmem:[%s6395_s7 + $0x530] sm:$0xff]  }
 0x11e   : > { %3631 = vmatmul.mubr.bf16.gmra.mrb[36].mxu1 %v1536_v49 }
 0x11f   : > { %4566 = vmatpush3.bf16.msra.mxu1 %v4846_v36  ;;  %3720 = vmatprep.mubr.bf16.mxu1 %v1530_v39  ;;  %v1331_v49 = vpop.permute.xlu0 %1330  ;;  %v1375_v36 = vsel %vm866_vm10, %v1251_v7, %v6142_v53  ;;  %v1390_v39 = vsel %vm866_vm10, %v1278_v55, %v1310_v58  ;;  %v1546_v53 = vsel %vm713_vm3, %v1529_v19, %v1545_v23 }
 0x120   : > { %4536 = vmatpush3.bf16.msra.mxu0 %v4845_v45  ;;  %4567 = vmatprep.subr.bf16.mxu1 %v4848_v54  ;;  %v1378_v45 = vsel %vm866_vm10, %v1254_v30, %v6144_v60  ;;  %v1527_v54 = vsel %vm713_vm3, %v1525_v17, %v1526_v18  ;;  %v1399_v24 = vsel %vm866_vm10, %v1315_v28, %v1331_v49  ;;  %v4869_v60 = vld [vmem:[%s6395_s7 + $0x600] sm:$0xff]   ;;  %v1519_v38 = vrot.slane %v1375_v36, 2 }
 0x121   : > { %4537 = vmatprep.subr.bf16.mxu0 %v4847_v31  ;;  %v4868_v31 = vld [vmem:[%s6395_s7 + $0x538] sm:$0xff]   ;;  %v1541_v55 = vrot.slane %v1390_v39, 2 }
 0x123   : > { %3582 = vmatmul.mubr.bf16.gmra.mrb[36].mxu0 %v1532_v46  ;;  %4568 = vmatpush3.bf16.msra.mxu1 %v4850_v9  ;;  %v1520_v9 = vrot.slane %v1378_v45, 2  ;;  %v1563_v46 = vrot.slane %v6165_v41, 3  ;;  %v1566_v41 = vrot.slane %v6304_v2, 3 }
 0x124   : > { %4538 = vmatpush3.bf16.msra.mxu0 %v4849_v1  ;;  %4569 = vmatprep.subr.bf16.mxu1 %v4852_v56  ;;  %v1255_v1 = vor.u32 %v1253_v3, %v1237_v51  ;;  %v1543_v56 = vrot.slane %v1399_v24, 2  ;;  %v4871_v51 = vld [vmem:[%s6395_s7 + $0x610] sm:$0xff]  }
 0x125   : > { %4539 = vmatprep.subr.bf16.mxu0 %v4851_v8  ;;  %3671 = vmatprep.mubr.bf16.mxu0 %v1524_v44  ;;  %v1521_v19 = vsel %vm713_vm3, %v1519_v38, %v1520_v9  ;;  %v1542_v8 = vsel %vm713_vm3, %v1523_v57, %v1541_v55  ;;  %v1564_v44 = vrot.slane %v6183_v12, 3 }
 0x126   : > { %v1381_v34 = vsel %vm866_vm10, %v1255_v1, %v1266_v14  ;;  %v1544_v0 = vsel %vm713_vm3, %v1526_v18, %v1543_v56 }
 0x127   : > { %4570 = vmatpush3.bf16.msra.mxu1 %v4854_v50  ;;  %v1539_v50 = vrot.slane %v1381_v34, 2  ;;  %v1565_v57 = vsel %vm735_vm5, %v1563_v46, %v1564_v44  ;;  %v1567_v12 = vsel %vm735_vm5, %v1564_v44, %v1566_v41 }
 0x128   : > { %4540 = vmatpush3.bf16.msra.mxu0 %v4853_v21  ;;  %4571 = vmatprep.subr.bf16.mxu1 %v4856_v22 }
 0x129   : > { %4541 = vmatprep.subr.bf16.mxu0 %v4855_v52  ;;  %v1540_v21 = vsel %vm713_vm3, %v1520_v9, %v1539_v50 }
 0x12b   : > { %4572 = vmatpush3.bf16.msra.mxu1 %v4858_v16 }
 0x12c   : > { %4542 = vmatpush3.bf16.msra.mxu0 %v4857_v47  ;;  %4573 = vmatprep.subr.bf16.mxu1 %v4860_v5 }
 0x12d   : > { %4543 = vmatprep.subr.bf16.mxu0 %v4859_v29 }
 0x12f   : > { %4574 = vmatpush3.bf16.msra.mxu1 %v4862_v10 }
 0x130   : > { %4544 = vmatpush3.bf16.msra.mxu0 %v4861_v61  ;;  %4575 = vmatprep.subr.bf16.mxu1 %v4864_v33 }
 0x131   : > { %4545 = vmatprep.subr.bf16.mxu0 %v4863_v26 }
 0x133   : > { %4576 = vmatpush3.bf16.msra.mxu1 %v4866_v40 }
 0x134   : > { %4546 = vmatpush3.bf16.msra.mxu0 %v4865_v20 }
 0x135   : > { %4547 = vmatprep.subr.bf16.mxu0 %v4867_v27 }
 0x136   : > { %3721 = vmatmul.mubr.bf16.vlgmr.msra.gmra.mrb[40].mxu1 %v1527_v54 }
 0x137   : > { %3728 = vmatprep.mubr.bf16.mxu1 %v1546_v53 }
 0x138   : > { %4548 = vmatpush3.bf16.msra.mxu0 %v4868_v31 }
 0x139   : > { %4595 = vmatprep.subr.bf16.mxu0 %v4869_v60 }
 0x13b   : > { %3672 = vmatmul.mubr.bf16.vlgmr.msra.gmra.mrb[40].mxu0 %v1521_v19 }
 0x13c   : > { %3679 = vmatprep.mubr.bf16.mxu0 %v1542_v8  ;;  %4596 = vmatpush3.bf16.msra.mxu0 %v4869_v60 }
 0x13d   : > { %4597 = vmatprep.subr.bf16.mxu0 %v4870_v13 }
 0x13e   : > { %3729 = vmatmul.mubr.bf16.gmra.mrb[44].mxu1 %v1544_v0 }
 0x140   : > { %4598 = vmatpush3.bf16.msra.mxu0 %v4870_v13 }
 0x141   : > { %4599 = vmatprep.subr.bf16.mxu0 %v4871_v51 }
 0x143   : > { %3680 = vmatmul.mubr.bf16.gmra.mrb[44].mxu0 %v1540_v21 }
 0x144   : > { %4600 = vmatpush3.bf16.msra.mxu0 %v4871_v51  ;;  %4603 = vmatprep.mubr.msk.bf16.mxu0 %vm866_vm10, %v1565_v57 }
 0x145   : > { %4601 = vmatprep.subr.bf16.mxu0 %v4872_v11 }
 0x148   : > { %4602 = vmatpush3.bf16.msra.mxu0 %v4872_v11 }
 0x14b   : > { %4604 = vmatmul.mubr.msk.bf16.vlgmr.msra.gmra.mrb[48].mxu0 %vm866_vm10, %v1567_v12 }
 0x169   : > { %v4297_v22 = vpop.f32.mrb[0].mxu1 }
 0x16a   : > { %v4298_v6 = vpop.f32.mrb[1].mxu1 }
 0x16b   : > { %v4299_v52 = vadd.f32 %v4298_v6, %v4297_v22  ;;  %v4300_v62 = vpop.f32.mrb[2].mxu1 }
 0x16c   : > { %v4301_v58 = vpop.f32.mrb[3].mxu1 }
 0x16d   : > { %v4302_v63 = vadd.f32 %v4301_v58, %v4300_v62 }
 0x16e   : > { %v4269_v16 = vpop.f32.mrb[0].mxu0 }
 0x16f   : > { %v4270_v37 = vpop.f32.mrb[1].mxu0 }
 0x170   : > { %v4271_v47 = vadd.f32 %v4270_v37, %v4269_v16  ;;  %v4272_v5 = vpop.f32.mrb[2].mxu0 }
 0x171   : > { %v4273_v29 = vpop.f32.mrb[3].mxu0 }
 0x172   : > { %v3184_v25 = vadd.f32 %v4271_v47, %v4052_v48  ;;  %v4274_v35 = vadd.f32 %v4273_v29, %v4272_v5 }
 0x174   : > { %v3187_v42 = vadd.f32 %v4274_v35, %v4052_v48  ;;  %v3233_v10 = vadd.f32 %v4299_v52, %v3184_v25 }
 0x176   : > { %v3236_v32 = vadd.f32 %v4302_v63, %v3187_v42 }
 0x178   : > { %v4303_v3 = vpop.f32.mrb[4].mxu1 }
 0x179   : > { %v4275_v15 = vpop.f32.mrb[4].mxu0  ;;  %v4304_v43 = vpop.f32.mrb[5].mxu1 }
 0x17a   : > { %v4276_v61 = vpop.f32.mrb[5].mxu0  ;;  %v4305_v33 = vadd.f32 %v4304_v43, %v4303_v3  ;;  %v4306_v26 = vpop.f32.mrb[6].mxu1 }
 0x17b   : > { %v4277_v14 = vadd.f32 %v4276_v61, %v4275_v15  ;;  %v4278_v2 = vpop.f32.mrb[6].mxu0  ;;  %v4307_v59 = vpop.f32.mrb[7].mxu1 }
 0x17c   : > { %v4279_v4 = vpop.f32.mrb[7].mxu0  ;;  %v4308_v17 = vadd.f32 %v4307_v59, %v4306_v26 }
 0x17d   : > { %v3192_v18 = vadd.f32 %v4277_v14, %v4052_v48  ;;  %v4280_v40 = vadd.f32 %v4279_v4, %v4278_v2 }
 0x17f   : > { %v3195_v7 = vadd.f32 %v4280_v40, %v4052_v48  ;;  %v3241_v30 = vadd.f32 %v4305_v33, %v3192_v18 }
 0x181   : > { %v3244_v20 = vadd.f32 %v4308_v17, %v3195_v7 }
 0x189   : > { %v4353_v23 = vpop.f32.mrb[8].mxu1 }
 0x18a   : > { %v4354_v27 = vpop.f32.mrb[9].mxu1 }
 0x18b   : > { %v4355_v28 = vadd.f32 %v4354_v27, %v4353_v23  ;;  %v4356_v49 = vpop.f32.mrb[10].mxu1 }
 0x18c   : > { %v4357_v36 = vpop.f32.mrb[11].mxu1 }
 0x18d   : > { %v4358_v45 = vadd.f32 %v4357_v36, %v4356_v49 }
 0x18e   : > { %v4325_v54 = vpop.f32.mrb[8].mxu0 }
 0x18f   : > { %v4326_v39 = vpop.f32.mrb[9].mxu0 }
 0x190   : > { %v4327_v31 = vadd.f32 %v4326_v39, %v4325_v54  ;;  %v4328_v24 = vpop.f32.mrb[10].mxu0 }
 0x191   : > { %v4329_v53 = vpop.f32.mrb[11].mxu0  ;;  %v4359_v60 = vpop.f32.mrb[12].mxu1 }
 0x192   : > { %v3282_v38 = vadd.f32 %v4327_v31, %v3233_v10  ;;  %v4330_v9 = vadd.f32 %v4329_v53, %v4328_v24  ;;  %v4360_v55 = vpop.f32.mrb[13].mxu1 }
 0x193   : > { %v4361_v1 = vadd.f32 %v4360_v55, %v4359_v60  ;;  %v4362_v56 = vpop.f32.mrb[14].mxu1 }
 0x194   : > { %v3285_v13 = vadd.f32 %v4330_v9, %v3236_v32  ;;  %v3331_v19 = vadd.f32 %v4355_v28, %v3282_v38  ;;  %v4363_v34 = vpop.f32.mrb[15].mxu1 }
 0x195   : > { %v4364_v8 = vadd.f32 %v4363_v34, %v4362_v56 }
 0x196   : > { %v3334_v0 = vadd.f32 %v4358_v45, %v3285_v13  ;;  %v4331_v51 = vpop.f32.mrb[12].mxu0 }
 0x197   : > { %v4332_v46 = vpop.f32.mrb[13].mxu0 }
 0x198   : > { %v4333_v44 = vadd.f32 %v4332_v46, %v4331_v51  ;;  %v4334_v50 = vpop.f32.mrb[14].mxu0 }
 0x199   : > { %v4335_v11 = vpop.f32.mrb[15].mxu0 }
 0x19a   : > { %v3290_v57 = vadd.f32 %v4333_v44, %v3241_v30  ;;  %v4336_v21 = vadd.f32 %v4335_v11, %v4334_v50 }
 0x19c   : > { %v3293_v41 = vadd.f32 %v4336_v21, %v3244_v20  ;;  %v3339_v12 = vadd.f32 %v4361_v1, %v3290_v57 }
 0x19e   : > { %v3342_v22 = vadd.f32 %v4364_v8, %v3293_v41 }
 0x1a9   : > { %v4409_v6 = vpop.f32.mrb[16].mxu1 }
 0x1aa   : > { %v4410_v52 = vpop.f32.mrb[17].mxu1 }
 0x1ab   : > { %v4411_v62 = vadd.f32 %v4410_v52, %v4409_v6  ;;  %v4412_v58 = vpop.f32.mrb[18].mxu1 }
 0x1ac   : > { %v4413_v63 = vpop.f32.mrb[19].mxu1 }
 0x1ad   : > { %v4414_v16 = vadd.f32 %v4413_v63, %v4412_v58 }
 0x1ae   : > { %v4381_v48 = vpop.f32.mrb[16].mxu0 }
 0x1af   : > { %v4382_v37 = vpop.f32.mrb[17].mxu0 }
 0x1b0   : > { %v4383_v47 = vadd.f32 %v4382_v37, %v4381_v48  ;;  %v4384_v5 = vpop.f32.mrb[18].mxu0 }
 0x1b1   : > { %v4385_v29 = vpop.f32.mrb[19].mxu0  ;;  %v4415_v25 = vpop.f32.mrb[20].mxu1 }
 0x1b2   : > { %v3380_v35 = vadd.f32 %v4383_v47, %v3331_v19  ;;  %v4386_v42 = vadd.f32 %v4385_v29, %v4384_v5  ;;  %v4416_v10 = vpop.f32.mrb[21].mxu1 }
 0x1b3   : > { %v4417_v32 = vadd.f32 %v4416_v10, %v4415_v25  ;;  %v4418_v3 = vpop.f32.mrb[22].mxu1 }
 0x1b4   : > { %v3429_v15 = vadd.f32 %v4411_v62, %v3380_v35  ;;  %v3383_v43 = vadd.f32 %v4386_v42, %v3334_v0  ;;  %v4419_v61 = vpop.f32.mrb[23].mxu1 }
 0x1b5   : > { %v4420_v33 = vadd.f32 %v4419_v61, %v4418_v3 }
 0x1b6   : > { %v3432_v26 = vadd.f32 %v4414_v16, %v3383_v43  ;;  %v4387_v14 = vpop.f32.mrb[20].mxu0 }
 0x1b7   : > { %v4388_v2 = vpop.f32.mrb[21].mxu0 }
 0x1b8   : > { %v4389_v59 = vadd.f32 %v4388_v2, %v4387_v14  ;;  %v4390_v4 = vpop.f32.mrb[22].mxu0 }
 0x1b9   : > { %v4391_v17 = vpop.f32.mrb[23].mxu0 }
 0x1ba   : > { %v3388_v18 = vadd.f32 %v4389_v59, %v3339_v12  ;;  %v4392_v40 = vadd.f32 %v4391_v17, %v4390_v4 }
 0x1bc   : > { %v3391_v7 = vadd.f32 %v4392_v40, %v3342_v22  ;;  %v3437_v30 = vadd.f32 %v4417_v32, %v3388_v18 }
 0x1be   : > { %v3440_v20 = vadd.f32 %v4420_v33, %v3391_v7 }
 0x1c9   : > { %v4465_v23 = vpop.f32.mrb[24].mxu1 }
 0x1ca   : > { %v4466_v27 = vpop.f32.mrb[25].mxu1 }
 0x1cb   : > { %v4467_v28 = vadd.f32 %v4466_v27, %v4465_v23  ;;  %v4468_v49 = vpop.f32.mrb[26].mxu1 }
 0x1cc   : > { %v4469_v36 = vpop.f32.mrb[27].mxu1 }
 0x1cd   : > { %v4470_v45 = vadd.f32 %v4469_v36, %v4468_v49 }
 0x1ce   : > { %v4437_v54 = vpop.f32.mrb[24].mxu0 }
 0x1cf   : > { %v4438_v39 = vpop.f32.mrb[25].mxu0 }
 0x1d0   : > { %v4439_v31 = vadd.f32 %v4438_v39, %v4437_v54  ;;  %v4440_v24 = vpop.f32.mrb[26].mxu0 }
 0x1d1   : > { %v4441_v53 = vpop.f32.mrb[27].mxu0  ;;  %v4471_v60 = vpop.f32.mrb[28].mxu1 }
 0x1d2   : > { %v3478_v38 = vadd.f32 %v4439_v31, %v3429_v15  ;;  %v4442_v9 = vadd.f32 %v4441_v53, %v4440_v24  ;;  %v4472_v55 = vpop.f32.mrb[29].mxu1 }
 0x1d3   : > { %v4473_v1 = vadd.f32 %v4472_v55, %v4471_v60  ;;  %v4474_v56 = vpop.f32.mrb[30].mxu1 }
 0x1d4   : > { %v3527_v13 = vadd.f32 %v4467_v28, %v3478_v38  ;;  %v3481_v19 = vadd.f32 %v4442_v9, %v3432_v26  ;;  %v4475_v34 = vpop.f32.mrb[31].mxu1 }
 0x1d5   : > { %v4476_v8 = vadd.f32 %v4475_v34, %v4474_v56 }
 0x1d6   : > { %v3530_v0 = vadd.f32 %v4470_v45, %v3481_v19  ;;  %v4443_v51 = vpop.f32.mrb[28].mxu0 }
 0x1d7   : > { %v4444_v46 = vpop.f32.mrb[29].mxu0 }
 0x1d8   : > { %v4445_v44 = vadd.f32 %v4444_v46, %v4443_v51  ;;  %v4446_v50 = vpop.f32.mrb[30].mxu0 }
 0x1d9   : > { %v4447_v11 = vpop.f32.mrb[31].mxu0 }
 0x1da   : > { %v3486_v57 = vadd.f32 %v4445_v44, %v3437_v30  ;;  %v4448_v21 = vadd.f32 %v4447_v11, %v4446_v50 }
 0x1dc   : > { %v3489_v41 = vadd.f32 %v4448_v21, %v3440_v20  ;;  %v3535_v12 = vadd.f32 %v4473_v1, %v3486_v57 }
 0x1de   : > { %v3538_v22 = vadd.f32 %v4476_v8, %v3489_v41 }
 0x1e9   : > { %v4521_v6 = vpop.f32.mrb[32].mxu1 }
 0x1ea   : > { %v4522_v52 = vpop.f32.mrb[33].mxu1 }
 0x1eb   : > { %v4523_v62 = vadd.f32 %v4522_v52, %v4521_v6  ;;  %v4524_v58 = vpop.f32.mrb[34].mxu1 }
 0x1ec   : > { %v4525_v63 = vpop.f32.mrb[35].mxu1 }
 0x1ed   : > { %v4526_v16 = vadd.f32 %v4525_v63, %v4524_v58 }
 0x1ee   : > { %v4493_v48 = vpop.f32.mrb[32].mxu0 }
 0x1ef   : > { %v4494_v37 = vpop.f32.mrb[33].mxu0 }
 0x1f0   : > { %v4495_v47 = vadd.f32 %v4494_v37, %v4493_v48  ;;  %v4496_v5 = vpop.f32.mrb[34].mxu0 }
 0x1f1   : > { %v4497_v29 = vpop.f32.mrb[35].mxu0  ;;  %v4527_v25 = vpop.f32.mrb[36].mxu1 }
 0x1f2   : > { %v3576_v35 = vadd.f32 %v4495_v47, %v3527_v13  ;;  %v4498_v42 = vadd.f32 %v4497_v29, %v4496_v5  ;;  %v4528_v10 = vpop.f32.mrb[37].mxu1 }
 0x1f3   : > { %v4529_v32 = vadd.f32 %v4528_v10, %v4527_v25  ;;  %v4530_v3 = vpop.f32.mrb[38].mxu1 }
 0x1f4   : > { %v3625_v15 = vadd.f32 %v4523_v62, %v3576_v35  ;;  %v3579_v43 = vadd.f32 %v4498_v42, %v3530_v0  ;;  %v4531_v61 = vpop.f32.mrb[39].mxu1 }
 0x1f5   : > { %v4532_v33 = vadd.f32 %v4531_v61, %v4530_v3 }
 0x1f6   : > { %v3628_v26 = vadd.f32 %v4526_v16, %v3579_v43  ;;  %v4499_v14 = vpop.f32.mrb[36].mxu0 }
 0x1f7   : > { %v4500_v2 = vpop.f32.mrb[37].mxu0 }
 0x1f8   : > { %v4501_v59 = vadd.f32 %v4500_v2, %v4499_v14  ;;  %v4502_v4 = vpop.f32.mrb[38].mxu0 }
 0x1f9   : > { %v4503_v17 = vpop.f32.mrb[39].mxu0 }
 0x1fa   : > { %v3584_v18 = vadd.f32 %v4501_v59, %v3535_v12  ;;  %v4504_v40 = vadd.f32 %v4503_v17, %v4502_v4 }
 0x1fc   : > { %v3587_v7 = vadd.f32 %v4504_v40, %v3538_v22  ;;  %v3633_v30 = vadd.f32 %v4529_v32, %v3584_v18 }
 0x1fe   : > { %v3636_v20 = vadd.f32 %v4532_v33, %v3587_v7 }
 0x209   : > { %v4577_v23 = vpop.f32.mrb[40].mxu1 }
 0x20a   : > { %v4578_v27 = vpop.f32.mrb[41].mxu1 }
 0x20b   : > { %v4579_v28 = vadd.f32 %v4578_v27, %v4577_v23  ;;  %v4580_v49 = vpop.f32.mrb[42].mxu1 }
 0x20c   : > { %v4581_v36 = vpop.f32.mrb[43].mxu1 }
 0x20d   : > { %v4582_v45 = vadd.f32 %v4581_v36, %v4580_v49 }
 0x20e   : > { %v4549_v54 = vpop.f32.mrb[40].mxu0 }
 0x20f   : > { %v4550_v39 = vpop.f32.mrb[41].mxu0 }
 0x210   : > { %v4551_v31 = vadd.f32 %v4550_v39, %v4549_v54  ;;  %v4552_v24 = vpop.f32.mrb[42].mxu0 }
 0x211   : > { %v4553_v53 = vpop.f32.mrb[43].mxu0  ;;  %v4583_v60 = vpop.f32.mrb[44].mxu1 }
 0x212   : > { %v3674_v38 = vadd.f32 %v4551_v31, %v3625_v15  ;;  %v4554_v9 = vadd.f32 %v4553_v53, %v4552_v24  ;;  %v4584_v55 = vpop.f32.mrb[45].mxu1 }
 0x213   : > { %v4585_v1 = vadd.f32 %v4584_v55, %v4583_v60  ;;  %v4586_v56 = vpop.f32.mrb[46].mxu1 }
 0x214   : > { %v3677_v13 = vadd.f32 %v4554_v9, %v3628_v26  ;;  %v4587_v19 = vpop.f32.mrb[47].mxu1  ;;  %v3723_v34 = vadd.f32 %v4579_v28, %v3674_v38 }
 0x215   : > { %v4588_v8 = vadd.f32 %v4587_v19, %v4586_v56 }
 0x216   : > { %v4555_v0 = vpop.f32.mrb[44].mxu0  ;;  %v3726_v51 = vadd.f32 %v4582_v45, %v3677_v13 }
 0x217   : > { %v4556_v46 = vpop.f32.mrb[45].mxu0 }
 0x218   : > { %v4557_v44 = vadd.f32 %v4556_v46, %v4555_v0  ;;  %v4558_v50 = vpop.f32.mrb[46].mxu0 }
 0x219   : > { %v4559_v11 = vpop.f32.mrb[47].mxu0 }
 0x21a   : > { %v3682_v57 = vadd.f32 %v4557_v44, %v3633_v30  ;;  %v4560_v21 = vadd.f32 %v4559_v11, %v4558_v50 }
 0x21c   : > { %v3685_v41 = vadd.f32 %v4560_v21, %v3636_v20  ;;  %v3731_v12 = vadd.f32 %v4585_v1, %v3682_v57 }
 0x21e   : > { %v4605_v22 = vpop.f32.mrb[48].mxu0  ;;  %v3734_v6 = vadd.f32 %v4588_v8, %v3685_v41 }
 0x21f   : > { %v3780_v52 = vadd.f32 %v4605_v22, %v3731_v12  ;;  %v3771_v62 = vpop.f32.mrb[49].mxu0 }
 0x220   : > { %v3772_v58 = vadd.f32 %v3771_v62, %v3723_v34  ;;  %v4606_v63 = vpop.f32.mrb[50].mxu0 }
 0x221   : > { %4873 = vtanh.f32 %v3780_v52  ;;  %v3783_v16 = vadd.f32 %v4606_v63, %v3734_v6  ;;  %v3774_v48 = vpop.f32.mrb[51].mxu0 }
 0x222   : > { %4875 = vtanh.f32 %v3772_v58  ;;  %v3775_v37 = vadd.f32 %v3774_v48, %v3726_v51 }
 0x223   : > { %4877 = vtanh.f32 %v3783_v16 }
 0x224   : > { %4879 = vtanh.f32 %v3775_v37 }
 0x22b   : > { %v4874_v47 = vpop.eup %4873 }
 0x22c   : > { %v4876_v5 = vpop.eup %4875  ;;  %3793 = vst.msk [vmem:[%s614_s24 + $0x10] sm:$0xff] %vm3790_vm11, %v4874_v47 }
 0x22d   : > { %v4878_v29 = vpop.eup %4877  ;;  %3791 = vst.msk [vmem:[%s614_s24] sm:$0xff] %vm3790_vm11, %v4876_v5 }
 0x22e   : > { %v4880_v25 = vpop.eup %4879  ;;  %3794 = vst.msk [vmem:[%s614_s24 + $0x18] sm:$0xff] %vm3790_vm11, %v4878_v29 }
 0x22f   : > { %3792 = vst.msk [vmem:[%s614_s24 + $0x8] sm:$0xff] %vm3790_vm11, %v4880_v25 }
 0x230 PF: > { %s19_s13 = sadd.s32 1, %s4938_s13   ;;  %s6405_s0 = sld [smem:[#allocation2_spill]] }
 0x231   : > { %p16_p0 = scmp.ge.s32.totalorder %s19_s13, 66   ;;  %s6406_s30 = smov %s4930_s11 }
 0x232   : > { %s6407_s10 = smov %s4934_s12  ;;  %s6408_s11 = smov %s6411_s14 }
 0x233   :  { %18 = sbr.rel (!%p16_p0) target bundleno = 3 (0x3), region = 104 }
 0x236   : > { %s6409_s12 = smov %s6405_s0 }

</bundles_post_ra>
